<compile_context>
chip_gen: v7x
topology: tpu7x:2x2x1
jax: 0.10.0
libtpu: 0.0.40
codegen_flags: <defaults>
</compile_context>

<pallas_src>
import functools  # noqa: F401

import jax
import jax.numpy as jnp
from jax.experimental import pallas as pl
from jax.experimental.pallas import tpu as pltpu  # noqa: F401  (TPU backend)

# ----------------------- model dimensions -----------------------
N_NODES = 16
FEAT_DIM = 64          # x feature dim (split in half for 2 modalities)
NUM_MODALITY = 2
PROJ_DIM = 32          # must equal channel1 (visualNorm/audioNorm constraint)
CH1 = 32
CH2 = 16
FINAL_DIM = 8
LAND_DIM = 16
C_DIM = 24
PERS_DIM = 8
PS_DIM = 4
REF_LAYERS = 10
INTERM_DIM = 64
NEG = -1e30


# ----------------------- the fused Pallas kernel -----------------------

def _spell_kernel(inp_ref, anorm_ref, maskneg_ref, gate_ref,
                  w_front, b_front,
                  e_wself, e_wnbr, e_b1, e_w2, e_b2, bn1_s, bn1_t,
                  wl21, b21, wr21, s3_wl, s3_bl, s3_wr,
                  dm_ref, dp_ref,
                  in_w, in_b, wk_cat, wk0, dil_b, one_w, one_b, out_w, out_b,
                  o_ref):
    """Full SPELLBYPLAYLAND forward: projections + 3 graph branches + 2 Refinement stacks."""
    dot = lambda a, b: jnp.dot(a, b, preferred_element_type=jnp.float32)
    n = inp_ref.shape[0]

    # ---- fused input projections (layer_spf/layer011/layer012 + all folded BNs) + relu ----
    xf = jnp.maximum(dot(inp_ref[...], w_front[...]) + b_front[...], 0.0)        # (N, 32)

    # ---- EdgeConv for the 3 branches at once (branch channels concatenated -> 96) ----
    # message(j->i) = relu([x_i, x_j - x_i] @ W1 + b1) @ W2 + b2
    #              = relu(x_i @ (W1a - W1b) + x_j @ W1b + b1) @ W2 + b2
    p = dot(xf, e_wself[...]) + e_b1[...]                                         # (N, 96)
    q = dot(xf, e_wnbr[...])                                                      # (N, 96)
    w2 = e_w2[...]
    b2 = e_b2[...]
    acc = jnp.full((n, 3 * CH1), NEG, jnp.float32)
    for j in range(n):                         # masked max over source nodes
        hj = jnp.maximum(p + q[j:j + 1, :], 0.0)                                  # (N, 96)
        mj = dot(hj, w2) + b2                                                     # (N, 96)
        acc = jnp.maximum(acc, mj + maskneg_ref[j])   # -1e30 where no edge j->i in branch
    # isolated nodes -> 0 (gate), then folded batch1x + relu (dropout = identity)
    h1 = jnp.maximum(acc * gate_ref[...] * bn1_s[...] + bn1_t[...], 0.0)          # (N, 96)

    # ---- per-branch: shared SAGE layer21 (bn21 folded) + relu, then SAGE layer3x, summed ----
    out8 = jnp.zeros((n, FINAL_DIM), jnp.float32)
    for b in range(3):
        a = anorm_ref[b]                                  # row-normalized adjacency (N, N)
        h1b = h1[:, b * CH1:(b + 1) * CH1]                # (N, 32)
        h2 = jnp.maximum(dot(dot(a, h1b), wl21[...]) + b21[...] + dot(h1b, wr21[...]), 0.0)
        out8 = out8 + dot(dot(a, h2), s3_wl[b]) + s3_bl[b] + dot(h2, s3_wr[b])
    xr0 = out8                                                                    # (N, 8)

    # ---- Refinement stacks (ref1, ref2); ref3 is dead code in the torch forward ----
    n_small = dm_ref.shape[0]                  # layers with dilation < N keep shifted taps

    def refinement(r, xin):
        # softmax over channels (torch dim=1 of (1, C, N) == last dim of (N, C) here)
        e = jnp.exp(xin - jnp.max(xin, axis=-1, keepdims=True))
        pr = e / jnp.sum(e, axis=-1, keepdims=True)
        f = dot(pr, in_w[r]) + in_b[r]                                            # (N, 64)
        for i in range(REF_LAYERS):
            if i < n_small:
                g = dot(f, wk_cat[r, i])                                          # (N, 192)
                h = (dot(dm_ref[i], g[:, :INTERM_DIM])                # f[t - 2^i] tap
                     + g[:, INTERM_DIM:2 * INTERM_DIM]                # center tap
                     + dot(dp_ref[i], g[:, 2 * INTERM_DIM:])          # f[t + 2^i] tap
                     + dil_b[r, i])
            else:
                # dilation 2^i >= N: both shifted taps read only zero padding
                h = dot(f, wk0[r, i - n_small]) + dil_b[r, i]
            h = jnp.maximum(h, 0.0)
            f = f + dot(h, one_w[r, i]) + one_b[r, i]                 # conv_1x1 + residual
        return dot(f, out_w[r]) + out_b[r]                                        # (N, 8)

    xr1 = refinement(0, xr0)
    xr2 = refinement(1, xr1)
    # torch stacks (xr0, xr1, xr2, xr2); xr3 = ref3(softmax(xr2)) is never used -> skipped.
    o_ref[0] = xr0
    o_ref[1] = xr1
    o_ref[2] = xr2
    o_ref[3] = xr2


# ----------------------- parameters -----------------------

def init_params(key):
    keys = iter(jax.random.split(key, 256))

    def lin(fan_in, fan_out):
        k1, k2 = jax.random.split(next(keys))
        s = 1.0 / float(fan_in) ** 0.5
        return {"w": jax.random.uniform(k1, (fan_in, fan_out), jnp.float32, -s, s),
                "b": jax.random.uniform(k2, (fan_out,), jnp.float32, -s, s)}

    def bn(c):
        k1, k2, k3, k4 = jax.random.split(next(keys), 4)
        return {"gamma": 1.0 + 0.1 * jax.random.normal(k1, (c,), jnp.float32),
                "beta": 0.1 * jax.random.normal(k2, (c,), jnp.float32),
                "mean": 0.1 * jax.random.normal(k3, (c,), jnp.float32),
                "var": jax.random.uniform(k4, (c,), jnp.float32, 0.5, 1.5)}

    def edge(c):
        l1, l2 = lin(2 * c, c), lin(c, c)
        return {"w1": l1["w"], "b1": l1["b"], "w2": l2["w"], "b2": l2["b"]}

    def sage(cin, cout):
        ll, lr = lin(cin, cout), lin(cin, cout)
        return {"wl": ll["w"], "bl": ll["b"], "wr": lr["w"]}

    def conv(cout, cin, k):
        k1, k2 = jax.random.split(next(keys))
        s = 1.0 / float(cin * k) ** 0.5
        return {"w": jax.random.uniform(k1, (cout, cin, k), jnp.float32, -s, s),
                "b": jax.random.uniform(k2, (cout,), jnp.float32, -s, s)}

    def ref(final_dim):
        return {"in": conv(INTERM_DIM, final_dim, 1),
                "layers": [{"dil": conv(INTERM_DIM, INTERM_DIM, 3),
                            "one": conv(INTERM_DIM, INTERM_DIM, 1)}
                           for _ in range(REF_LAYERS)],
                "out": conv(final_dim, INTERM_DIM, 1)}

    # TODO(synk): layer_gaze/layer_pose/layer_speakerEmb/speakerNorm/coorPred/
    # LaughClassifier/laughNorm are created in __init__ but never used in forward; omitted.
    return {
        "gender_emb": jax.random.normal(next(keys), (3, 5), jnp.float32),
        "layer_spf": lin(C_DIM, PROJ_DIM),
        "layer011": lin(FEAT_DIM // NUM_MODALITY + LAND_DIM + PROJ_DIM, CH1),
        "layer012": lin(FEAT_DIM // NUM_MODALITY + PERS_DIM + PS_DIM, CH1),
        "visualNorm": bn(PROJ_DIM), "audioNorm": bn(PROJ_DIM), "batch01": bn(CH1),
        "layer11": edge(CH1), "layer12": edge(CH1), "layer13": edge(CH1),
        "batch11": bn(CH1), "batch12": bn(CH1), "batch13": bn(CH1),
        "layer21": sage(CH1, CH2), "batch21": bn(CH2),
        "layer31": sage(CH2, FINAL_DIM), "layer32": sage(CH2, FINAL_DIM),
        "layer33": sage(CH2, FINAL_DIM),
        "ref1": ref(FINAL_DIM), "ref2": ref(FINAL_DIM), "ref3": ref(FINAL_DIM),
    }


def prepare_params(params, n=N_NODES):
    """One-time weight-layout preparation: BN folds, Linear composition, EdgeConv weight
    decomposition + branch concatenation, Conv1d tap transposes/concats, shift matrices."""
    eps = 1e-5
    row = lambda b: b.reshape(1, -1)

    def bn_fold(bn):
        s = bn["gamma"] / jnp.sqrt(bn["var"] + eps)
        return s, bn["beta"] - bn["mean"] * s

    vs, vt = bn_fold(params["visualNorm"])
    as_, at = bn_fold(params["audioNorm"])
    s01, t01 = bn_fold(params["batch01"])
    s21, t21 = bn_fold(params["batch21"])
    bn1 = [bn_fold(params[k]) for k in ("batch11", "batch12", "batch13")]

    # ---- front end: batch01(visualNorm(layer011([xv|land|spf(c)])) + audioNorm(layer012(.)))
    # folded into one matmul on the concatenated input [xv|land | xa|pers|ps | c] ----
    SV = s01 * vs                                  # per-channel scale on the visual path
    SA = s01 * as_                                 # per-channel scale on the audio path
    w011 = params["layer011"]["w"]
    b011 = params["layer011"]["b"]
    main_rows = FEAT_DIM // NUM_MODALITY + LAND_DIM
    w011m, w011s = w011[:main_rows], w011[main_rows:]
    spf_w, spf_b = params["layer_spf"]["w"], params["layer_spf"]["b"]
    w012, b012 = params["layer012"]["w"], params["layer012"]["b"]

    w_front = jnp.concatenate([w011m * SV[None, :],
                               w012 * SA[None, :],
                               spf_w @ (w011s * SV[None, :])], axis=0)       # (116, 32)
    b_front = row((b011 + spf_b @ w011s) * SV + b012 * SA + s01 * (vt + at) + t01)

    # ---- EdgeConv: 3 branches channel-concatenated; W2 block-diagonal ----
    edges = [params[k] for k in ("layer11", "layer12", "layer13")]
    e_wself = jnp.concatenate([e["w1"][:CH1] - e["w1"][CH1:] for e in edges], axis=1)
    e_wnbr = jnp.concatenate([e["w1"][CH1:] for e in edges], axis=1)
    e_b1 = jnp.concatenate([e["b1"] for e in edges]).reshape(1, -1)
    z = jnp.zeros((CH1, CH1), jnp.float32)
    e_w2 = jnp.concatenate([
        jnp.concatenate([edges[0]["w2"], z, z], axis=1),
        jnp.concatenate([z, edges[1]["w2"], z], axis=1),
        jnp.concatenate([z, z, edges[2]["w2"]], axis=1)], axis=0)            # (96, 96)
    e_b2 = jnp.concatenate([e["b2"] for e in edges]).reshape(1, -1)
    bn1_s = jnp.concatenate([s for s, _ in bn1]).reshape(1, -1)
    bn1_t = jnp.concatenate([t for _, t in bn1]).reshape(1, -1)

    # ---- layer21 SAGE with batch21 folded; per-branch layer3x stacked ----
    sage21 = params["layer21"]
    wl21 = sage21["wl"] * s21[None, :]
    wr21 = sage21["wr"] * s21[None, :]
    b21 = row(sage21["bl"] * s21 + t21)
    sage3 = [params[k] for k in ("layer31", "layer32", "layer33")]
    s3_wl = jnp.stack([s["wl"] for s in sage3])
    s3_bl = jnp.stack([row(s["bl"]) for s in sage3])
    s3_wr = jnp.stack([s["wr"] for s in sage3])

    # ---- Refinement weights (ref1, ref2 only). Conv1d taps transposed to (Cin, Cout). ----
    refs = [params["ref1"], params["ref2"]]
    tap = lambda w, k: w[:, :, k].T
    n_small = sum(1 for i in range(REF_LAYERS) if 2 ** i < n)   # layers with in-range shifts
    in_w = jnp.stack([tap(r["in"]["w"], 0) for r in refs])
    in_b = jnp.stack([row(r["in"]["b"]) for r in refs])
    wk_cat = jnp.stack([jnp.stack([
        jnp.concatenate([tap(l["dil"]["w"], 0), tap(l["dil"]["w"], 1), tap(l["dil"]["w"], 2)],
                        axis=1)
        for l in r["layers"][:n_small]]) for r in refs])                     # (2, s, 64, 192)
    wk0 = jnp.stack([jnp.stack([tap(l["dil"]["w"], 1) for l in r["layers"][n_small:]])
                     for r in refs])                                         # (2, 10-s, 64, 64)
    dil_b = jnp.stack([jnp.stack([row(l["dil"]["b"]) for l in r["layers"]]) for r in refs])
    one_w = jnp.stack([jnp.stack([tap(l["one"]["w"], 0) for l in r["layers"]]) for r in refs])
    one_b = jnp.stack([jnp.stack([row(l["one"]["b"]) for l in r["layers"]]) for r in refs])
    out_w = jnp.stack([tap(r["out"]["w"], 0) for r in refs])
    out_b = jnp.stack([row(r["out"]["b"]) for r in refs])

    # Dilation shift matrices: (Dm[i] @ f)[t] = f[t - 2^i] (zero padded), Dp = Dm^T.
    t_idx = jnp.arange(n)
    dm = jnp.stack([(t_idx[:, None] - (2 ** i) == t_idx[None, :]).astype(jnp.float32)
                    for i in range(n_small)])
    dp = jnp.transpose(dm, (0, 2, 1))

    return {
        "gender_emb": params["gender_emb"],
        "w_front": w_front, "b_front": b_front,
        "e_wself": e_wself, "e_wnbr": e_wnbr, "e_b1": e_b1, "e_w2": e_w2, "e_b2": e_b2,
        "bn1_s": bn1_s, "bn1_t": bn1_t,
        "wl21": wl21, "b21": b21, "wr21": wr21,
        "s3_wl": s3_wl, "s3_bl": s3_bl, "s3_wr": s3_wr,
        "dm": dm, "dp": dp,
        "in_w": in_w, "in_b": in_b, "wk_cat": wk_cat, "wk0": wk0, "dil_b": dil_b,
        "one_w": one_w, "one_b": one_b, "out_w": out_w, "out_b": out_b,
    }


_W_KEYS = ("w_front", "b_front",
           "e_wself", "e_wnbr", "e_b1", "e_w2", "e_b2", "bn1_s", "bn1_t",
           "wl21", "b21", "wr21", "s3_wl", "s3_bl", "s3_wr",
           "dm", "dp", "in_w", "in_b", "wk_cat", "wk0", "dil_b",
           "one_w", "one_b", "out_w", "out_b")


# ----------------------- forward -----------------------

@jax.jit
def spell_forward(prep, x, edge_index, edge_attr, gaze, gender, landmarks, c, pers, ps):
    n = x.shape[0]
    half = x.shape[1] // NUM_MODALITY

    # kept for fidelity with the reference forward; unused -> DCE'd by XLA inside the jit
    _ = jnp.nan_to_num(gaze)
    _ = prep["gender_emb"][gender[:, 0]]

    # concatenated front-end input: [x_visual_half | landmarks | x_audio_half | pers | ps | c]
    inp_all = jnp.concatenate([x[:, half:], landmarks, x[:, :half], pers, ps, c], axis=1)

    # dense per-branch adjacencies: A[b, i, j] = 1 iff edge j -> i in branch b
    src, tgt = edge_index[0], edge_index[1]

    def adj_from(sel):
        a = jnp.zeros((n, n), jnp.float32)
        return a.at[tgt, src].max(sel.astype(jnp.float32))

    adj = jnp.stack([adj_from(edge_attr <= 0),                          # forward edges
                     adj_from(edge_attr >= 0),                          # backward edges
                     adj_from(jnp.ones_like(edge_attr, dtype=bool))])   # all edges

    # SAGE mean-aggregation matrix, EdgeConv additive mask and isolated-node gate
    anorm = adj / jnp.maximum(jnp.sum(adj, axis=2, keepdims=True), 1.0)             # (3,N,N)
    adj_jib = jnp.transpose(adj, (2, 1, 0))                                          # (j,i,b)
    maskneg = jnp.where(jnp.repeat(adj_jib, CH1, axis=2) > 0.0, 0.0, NEG)            # (N,N,96)
    maskneg = maskneg.astype(jnp.float32)
    gate = jnp.repeat((jnp.sum(adj, axis=2) > 0.0).astype(jnp.float32).T, CH1, axis=1)  # (N,96)

    # torch: stack((xr0,xr1,xr2,xr2)).squeeze(1).transpose(2,1) -> (4, N, final_dim)
    out = pl.pallas_call(
        _spell_kernel,
        out_shape=jax.ShapeDtypeStruct((4, n, FINAL_DIM), jnp.float32),
    )(inp_all, anorm, maskneg, gate, *[prep[k] for k in _W_KEYS])
    return out


# ----------------------- demo -----------------------

if __name__ == "__main__":
    key = jax.random.PRNGKey(0)
    ks = jax.random.split(key, 16)
    n = N_NODES

    x = jax.random.normal(ks[0], (n, FEAT_DIM), jnp.float32)
    landmarks = jax.random.normal(ks[1], (n, LAND_DIM), jnp.float32)
    c = jax.random.normal(ks[2], (n, C_DIM), jnp.float32)
    pers = jax.random.normal(ks[3], (n, PERS_DIM), jnp.float32)
    ps = jax.random.normal(ks[4], (n, PS_DIM), jnp.float32)
    gaze = jax.random.normal(ks[5], (n, 2), jnp.float32).at[0, 0].set(jnp.nan)
    gender = jax.random.randint(ks[6], (n, 1), 0, 3)

    idx = jnp.arange(n)
    src = jnp.concatenate([idx, idx, (idx + 1) % n])
    tgt = jnp.concatenate([idx, (idx + 1) % n, idx])
    edge_index = jnp.stack([src, tgt]).astype(jnp.int32)
    edge_attr = jnp.concatenate([jnp.zeros(n, jnp.int32),
                                 -jnp.ones(n, jnp.int32),
                                 jnp.ones(n, jnp.int32)])

    params = init_params(jax.random.PRNGKey(42))
    prep = prepare_params(params)

    out = spell_forward(prep, x, edge_index, edge_attr, gaze, gender,
                        landmarks, c, pers, ps)
    out = jax.block_until_ready(out)

    assert out.shape == (4, n, FINAL_DIM), out.shape
    assert bool(jnp.isfinite(out).all())
    print("KERNEL_OK")
</pallas_src>

<mosaic_0001>
module attributes {stable_mosaic.version = 11 : i64} {
  func.func private @main(%arg0: i32) attributes {dimension_semantics = [#tpu.dimension_semantics<core_parallel>], iteration_bounds = array<i64: 2>, tpu.core_type = #tpu.core_type<sc_scalar_subcore>, window_params = []} {
    return
  }
}

module attributes {stable_mosaic.version = 11 : i64} {
  func.func private @main(%arg0: i32) attributes {dimension_semantics = [#tpu.dimension_semantics<core_parallel>], iteration_bounds = array<i64: 2>, tpu.core_type = #tpu.core_type<sc_scalar_subcore>, window_params = []} {
    return
  }
}

module attributes {stable_mosaic.version = 11 : i64} {
  func.func @_spell_kernel(%arg0: memref<16x116xf32, #tpu.memory_space<vmem>>, %arg1: memref<3x16x16xf32, #tpu.memory_space<vmem>>, %arg2: memref<16x16x96xf32, #tpu.memory_space<vmem>>, %arg3: memref<16x96xf32, #tpu.memory_space<vmem>>, %arg4: memref<116x32xf32, #tpu.memory_space<vmem>>, %arg5: memref<1x32xf32, #tpu.memory_space<vmem>>, %arg6: memref<32x96xf32, #tpu.memory_space<vmem>>, %arg7: memref<32x96xf32, #tpu.memory_space<vmem>>, %arg8: memref<1x96xf32, #tpu.memory_space<vmem>>, %arg9: memref<96x96xf32, #tpu.memory_space<vmem>>, %arg10: memref<1x96xf32, #tpu.memory_space<vmem>>, %arg11: memref<1x96xf32, #tpu.memory_space<vmem>>, %arg12: memref<1x96xf32, #tpu.memory_space<vmem>>, %arg13: memref<32x16xf32, #tpu.memory_space<vmem>>, %arg14: memref<1x16xf32, #tpu.memory_space<vmem>>, %arg15: memref<32x16xf32, #tpu.memory_space<vmem>>, %arg16: memref<3x16x8xf32, #tpu.memory_space<vmem>>, %arg17: memref<3x1x8xf32, #tpu.memory_space<vmem>>, %arg18: memref<3x16x8xf32, #tpu.memory_space<vmem>>, %arg19: memref<4x16x16xf32, #tpu.memory_space<vmem>>, %arg20: memref<4x16x16xf32, #tpu.memory_space<vmem>>, %arg21: memref<2x8x64xf32, #tpu.memory_space<vmem>>, %arg22: memref<2x1x64xf32, #tpu.memory_space<vmem>>, %arg23: memref<2x4x64x192xf32, #tpu.memory_space<vmem>>, %arg24: memref<2x6x64x64xf32, #tpu.memory_space<vmem>>, %arg25: memref<2x10x1x64xf32, #tpu.memory_space<vmem>>, %arg26: memref<2x10x64x64xf32, #tpu.memory_space<vmem>>, %arg27: memref<2x10x1x64xf32, #tpu.memory_space<vmem>>, %arg28: memref<2x64x8xf32, #tpu.memory_space<vmem>>, %arg29: memref<2x1x8xf32, #tpu.memory_space<vmem>>, %arg30: memref<4x16x8xf32, #tpu.memory_space<vmem>>) attributes {dimension_semantics = [], scalar_prefetch = 0 : i64, scratch_operands = 0 : i64, tpu.core_type = #tpu.core_type<tc>} {
    %c0 = arith.constant 0 : index
    %c0_0 = arith.constant 0 : index
    %0 = vector.load %arg0[%c0, %c0_0] : memref<16x116xf32, #tpu.memory_space<vmem>>, vector<16x116xf32>
    %c0_1 = arith.constant 0 : index
    %c0_2 = arith.constant 0 : index
    %1 = vector.load %arg4[%c0_1, %c0_2] : memref<116x32xf32, #tpu.memory_space<vmem>>, vector<116x32xf32>
    %cst = arith.constant dense<0.000000e+00> : vector<16x32xf32>
    %2 = tpu.matmul %0, %1, %cst {dimension_numbers = #tpu.dot_dimension_numbers<[1], [0], [0], [1], [0, 0, 1, 1], [], []>} : vector<16x116xf32>, vector<116x32xf32>, vector<16x32xf32> -> vector<16x32xf32>
    %c0_3 = arith.constant 0 : index
    %c0_4 = arith.constant 0 : index
    %3 = vector.load %arg5[%c0_3, %c0_4] : memref<1x32xf32, #tpu.memory_space<vmem>>, vector<1x32xf32>
    %4 = vector.broadcast %3 : vector<1x32xf32> to vector<16x32xf32>
    %5 = arith.addf %2, %4 : vector<16x32xf32>
    %cst_5 = arith.constant 0.000000e+00 : f32
    %6 = vector.broadcast %cst_5 : f32 to vector<16x32xf32>
    %7 = arith.maximumf %5, %6 : vector<16x32xf32>
    %c0_6 = arith.constant 0 : index
    %c0_7 = arith.constant 0 : index
    %8 = vector.load %arg6[%c0_6, %c0_7] : memref<32x96xf32, #tpu.memory_space<vmem>>, vector<32x96xf32>
    %cst_8 = arith.constant dense<0.000000e+00> : vector<16x96xf32>
    %9 = tpu.matmul %7, %8, %cst_8 {dimension_numbers = #tpu.dot_dimension_numbers<[1], [0], [0], [1], [0, 0, 1, 1], [], []>} : vector<16x32xf32>, vector<32x96xf32>, vector<16x96xf32> -> vector<16x96xf32>
    %c0_9 = arith.constant 0 : index
    %c0_10 = arith.constant 0 : index
    %10 = vector.load %arg8[%c0_9, %c0_10] : memref<1x96xf32, #tpu.memory_space<vmem>>, vector<1x96xf32>
    %11 = vector.broadcast %10 : vector<1x96xf32> to vector<16x96xf32>
    %12 = arith.addf %9, %11 : vector<16x96xf32>
    %c0_11 = arith.constant 0 : index
    %c0_12 = arith.constant 0 : index
    %13 = vector.load %arg7[%c0_11, %c0_12] : memref<32x96xf32, #tpu.memory_space<vmem>>, vector<32x96xf32>
    %cst_13 = arith.constant dense<0.000000e+00> : vector<16x96xf32>
    %14 = tpu.matmul %7, %13, %cst_13 {dimension_numbers = #tpu.dot_dimension_numbers<[1], [0], [0], [1], [0, 0, 1, 1], [], []>} : vector<16x32xf32>, vector<32x96xf32>, vector<16x96xf32> -> vector<16x96xf32>
    %c0_14 = arith.constant 0 : index
    %c0_15 = arith.constant 0 : index
    %15 = vector.load %arg9[%c0_14, %c0_15] : memref<96x96xf32, #tpu.memory_space<vmem>>, vector<96x96xf32>
    %c0_16 = arith.constant 0 : index
    %c0_17 = arith.constant 0 : index
    %16 = vector.load %arg10[%c0_16, %c0_17] : memref<1x96xf32, #tpu.memory_space<vmem>>, vector<1x96xf32>
    %cst_18 = arith.constant -1.000000e+30 : f32
    %17 = vector.broadcast %cst_18 : f32 to vector<16x96xf32>
    %18 = vector.extract_strided_slice %14 {offsets = [0, 0], sizes = [1, 96], strides = [1, 1]} : vector<16x96xf32> to vector<1x96xf32>
    %19 = vector.broadcast %18 : vector<1x96xf32> to vector<16x96xf32>
    %20 = arith.addf %12, %19 : vector<16x96xf32>
    %cst_19 = arith.constant 0.000000e+00 : f32
    %21 = vector.broadcast %cst_19 : f32 to vector<16x96xf32>
    %22 = arith.maximumf %20, %21 : vector<16x96xf32>
    %cst_20 = arith.constant dense<0.000000e+00> : vector<16x96xf32>
    %23 = tpu.matmul %22, %15, %cst_20 {dimension_numbers = #tpu.dot_dimension_numbers<[1], [0], [0], [1], [0, 0, 1, 1], [], []>} : vector<16x96xf32>, vector<96x96xf32>, vector<16x96xf32> -> vector<16x96xf32>
    %24 = vector.broadcast %16 : vector<1x96xf32> to vector<16x96xf32>
    %25 = arith.addf %23, %24 : vector<16x96xf32>
    %c0_21 = arith.constant 0 : index
    %c0_22 = arith.constant 0 : index
    %c0_23 = arith.constant 0 : index
    %26 = vector.load %arg2[%c0_21, %c0_22, %c0_23] : memref<16x16x96xf32, #tpu.memory_space<vmem>>, vector<1x16x96xf32>
    %27 = vector.shape_cast %26 : vector<1x16x96xf32> to vector<16x96xf32>
    %28 = arith.addf %25, %27 : vector<16x96xf32>
    %29 = arith.maximumf %17, %28 : vector<16x96xf32>
    %30 = vector.extract_strided_slice %14 {offsets = [1, 0], sizes = [1, 96], strides = [1, 1]} : vector<16x96xf32> to vector<1x96xf32>
    %31 = vector.broadcast %30 : vector<1x96xf32> to vector<16x96xf32>
    %32 = arith.addf %12, %31 : vector<16x96xf32>
    %cst_24 = arith.constant 0.000000e+00 : f32
    %33 = vector.broadcast %cst_24 : f32 to vector<16x96xf32>
    %34 = arith.maximumf %32, %33 : vector<16x96xf32>
    %cst_25 = arith.constant dense<0.000000e+00> : vector<16x96xf32>
    %35 = tpu.matmul %34, %15, %cst_25 {dimension_numbers = #tpu.dot_dimension_numbers<[1], [0], [0], [1], [0, 0, 1, 1], [], []>} : vector<16x96xf32>, vector<96x96xf32>, vector<16x96xf32> -> vector<16x96xf32>
    %36 = vector.broadcast %16 : vector<1x96xf32> to vector<16x96xf32>
    %37 = arith.addf %35, %36 : vector<16x96xf32>
    %c1 = arith.constant 1 : index
    %c0_26 = arith.constant 0 : index
    %c0_27 = arith.constant 0 : index
    %38 = vector.load %arg2[%c1, %c0_26, %c0_27] : memref<16x16x96xf32, #tpu.memory_space<vmem>>, vector<1x16x96xf32>
    %39 = vector.shape_cast %38 : vector<1x16x96xf32> to vector<16x96xf32>
    %40 = arith.addf %37, %39 : vector<16x96xf32>
    %41 = arith.maximumf %29, %40 : vector<16x96xf32>
    %42 = vector.extract_strided_slice %14 {offsets = [2, 0], sizes = [1, 96], strides = [1, 1]} : vector<16x96xf32> to vector<1x96xf32>
    %43 = vector.broadcast %42 : vector<1x96xf32> to vector<16x96xf32>
    %44 = arith.addf %12, %43 : vector<16x96xf32>
    %cst_28 = arith.constant 0.000000e+00 : f32
    %45 = vector.broadcast %cst_28 : f32 to vector<16x96xf32>
    %46 = arith.maximumf %44, %45 : vector<16x96xf32>
    %cst_29 = arith.constant dense<0.000000e+00> : vector<16x96xf32>
    %47 = tpu.matmul %46, %15, %cst_29 {dimension_numbers = #tpu.dot_dimension_numbers<[1], [0], [0], [1], [0, 0, 1, 1], [], []>} : vector<16x96xf32>, vector<96x96xf32>, vector<16x96xf32> -> vector<16x96xf32>
    %48 = vector.broadcast %16 : vector<1x96xf32> to vector<16x96xf32>
    %49 = arith.addf %47, %48 : vector<16x96xf32>
    %c2 = arith.constant 2 : index
    %c0_30 = arith.constant 0 : index
    %c0_31 = arith.constant 0 : index
    %50 = vector.load %arg2[%c2, %c0_30, %c0_31] : memref<16x16x96xf32, #tpu.memory_space<vmem>>, vector<1x16x96xf32>
    %51 = vector.shape_cast %50 : vector<1x16x96xf32> to vector<16x96xf32>
    %52 = arith.addf %49, %51 : vector<16x96xf32>
    %53 = arith.maximumf %41, %52 : vector<16x96xf32>
    %54 = vector.extract_strided_slice %14 {offsets = [3, 0], sizes = [1, 96], strides = [1, 1]} : vector<16x96xf32> to vector<1x96xf32>
    %55 = vector.broadcast %54 : vector<1x96xf32> to vector<16x96xf32>
    %56 = arith.addf %12, %55 : vector<16x96xf32>
    %cst_32 = arith.constant 0.000000e+00 : f32
    %57 = vector.broadcast %cst_32 : f32 to vector<16x96xf32>
    %58 = arith.maximumf %56, %57 : vector<16x96xf32>
    %cst_33 = arith.constant dense<0.000000e+00> : vector<16x96xf32>
    %59 = tpu.matmul %58, %15, %cst_33 {dimension_numbers = #tpu.dot_dimension_numbers<[1], [0], [0], [1], [0, 0, 1, 1], [], []>} : vector<16x96xf32>, vector<96x96xf32>, vector<16x96xf32> -> vector<16x96xf32>
    %60 = vector.broadcast %16 : vector<1x96xf32> to vector<16x96xf32>
    %61 = arith.addf %59, %60 : vector<16x96xf32>
    %c3 = arith.constant 3 : index
    %c0_34 = arith.constant 0 : index
    %c0_35 = arith.constant 0 : index
    %62 = vector.load %arg2[%c3, %c0_34, %c0_35] : memref<16x16x96xf32, #tpu.memory_space<vmem>>, vector<1x16x96xf32>
    %63 = vector.shape_cast %62 : vector<1x16x96xf32> to vector<16x96xf32>
    %64 = arith.addf %61, %63 : vector<16x96xf32>
    %65 = arith.maximumf %53, %64 : vector<16x96xf32>
    %66 = vector.extract_strided_slice %14 {offsets = [4, 0], sizes = [1, 96], strides = [1, 1]} : vector<16x96xf32> to vector<1x96xf32>
    %67 = vector.broadcast %66 : vector<1x96xf32> to vector<16x96xf32>
    %68 = arith.addf %12, %67 : vector<16x96xf32>
    %cst_36 = arith.constant 0.000000e+00 : f32
    %69 = vector.broadcast %cst_36 : f32 to vector<16x96xf32>
    %70 = arith.maximumf %68, %69 : vector<16x96xf32>
    %cst_37 = arith.constant dense<0.000000e+00> : vector<16x96xf32>
    %71 = tpu.matmul %70, %15, %cst_37 {dimension_numbers = #tpu.dot_dimension_numbers<[1], [0], [0], [1], [0, 0, 1, 1], [], []>} : vector<16x96xf32>, vector<96x96xf32>, vector<16x96xf32> -> vector<16x96xf32>
    %72 = vector.broadcast %16 : vector<1x96xf32> to vector<16x96xf32>
    %73 = arith.addf %71, %72 : vector<16x96xf32>
    %c4 = arith.constant 4 : index
    %c0_38 = arith.constant 0 : index
    %c0_39 = arith.constant 0 : index
    %74 = vector.load %arg2[%c4, %c0_38, %c0_39] : memref<16x16x96xf32, #tpu.memory_space<vmem>>, vector<1x16x96xf32>
    %75 = vector.shape_cast %74 : vector<1x16x96xf32> to vector<16x96xf32>
    %76 = arith.addf %73, %75 : vector<16x96xf32>
    %77 = arith.maximumf %65, %76 : vector<16x96xf32>
    %78 = vector.extract_strided_slice %14 {offsets = [5, 0], sizes = [1, 96], strides = [1, 1]} : vector<16x96xf32> to vector<1x96xf32>
    %79 = vector.broadcast %78 : vector<1x96xf32> to vector<16x96xf32>
    %80 = arith.addf %12, %79 : vector<16x96xf32>
    %cst_40 = arith.constant 0.000000e+00 : f32
    %81 = vector.broadcast %cst_40 : f32 to vector<16x96xf32>
    %82 = arith.maximumf %80, %81 : vector<16x96xf32>
    %cst_41 = arith.constant dense<0.000000e+00> : vector<16x96xf32>
    %83 = tpu.matmul %82, %15, %cst_41 {dimension_numbers = #tpu.dot_dimension_numbers<[1], [0], [0], [1], [0, 0, 1, 1], [], []>} : vector<16x96xf32>, vector<96x96xf32>, vector<16x96xf32> -> vector<16x96xf32>
    %84 = vector.broadcast %16 : vector<1x96xf32> to vector<16x96xf32>
    %85 = arith.addf %83, %84 : vector<16x96xf32>
    %c5 = arith.constant 5 : index
    %c0_42 = arith.constant 0 : index
    %c0_43 = arith.constant 0 : index
    %86 = vector.load %arg2[%c5, %c0_42, %c0_43] : memref<16x16x96xf32, #tpu.memory_space<vmem>>, vector<1x16x96xf32>
    %87 = vector.shape_cast %86 : vector<1x16x96xf32> to vector<16x96xf32>
    %88 = arith.addf %85, %87 : vector<16x96xf32>
    %89 = arith.maximumf %77, %88 : vector<16x96xf32>
    %90 = vector.extract_strided_slice %14 {offsets = [6, 0], sizes = [1, 96], strides = [1, 1]} : vector<16x96xf32> to vector<1x96xf32>
    %91 = vector.broadcast %90 : vector<1x96xf32> to vector<16x96xf32>
    %92 = arith.addf %12, %91 : vector<16x96xf32>
    %cst_44 = arith.constant 0.000000e+00 : f32
    %93 = vector.broadcast %cst_44 : f32 to vector<16x96xf32>
    %94 = arith.maximumf %92, %93 : vector<16x96xf32>
    %cst_45 = arith.constant dense<0.000000e+00> : vector<16x96xf32>
    %95 = tpu.matmul %94, %15, %cst_45 {dimension_numbers = #tpu.dot_dimension_numbers<[1], [0], [0], [1], [0, 0, 1, 1], [], []>} : vector<16x96xf32>, vector<96x96xf32>, vector<16x96xf32> -> vector<16x96xf32>
    %96 = vector.broadcast %16 : vector<1x96xf32> to vector<16x96xf32>
    %97 = arith.addf %95, %96 : vector<16x96xf32>
    %c6 = arith.constant 6 : index
    %c0_46 = arith.constant 0 : index
    %c0_47 = arith.constant 0 : index
    %98 = vector.load %arg2[%c6, %c0_46, %c0_47] : memref<16x16x96xf32, #tpu.memory_space<vmem>>, vector<1x16x96xf32>
    %99 = vector.shape_cast %98 : vector<1x16x96xf32> to vector<16x96xf32>
    %100 = arith.addf %97, %99 : vector<16x96xf32>
    %101 = arith.maximumf %89, %100 : vector<16x96xf32>
    %102 = vector.extract_strided_slice %14 {offsets = [7, 0], sizes = [1, 96], strides = [1, 1]} : vector<16x96xf32> to vector<1x96xf32>
    %103 = vector.broadcast %102 : vector<1x96xf32> to vector<16x96xf32>
    %104 = arith.addf %12, %103 : vector<16x96xf32>
    %cst_48 = arith.constant 0.000000e+00 : f32
    %105 = vector.broadcast %cst_48 : f32 to vector<16x96xf32>
    %106 = arith.maximumf %104, %105 : vector<16x96xf32>
    %cst_49 = arith.constant dense<0.000000e+00> : vector<16x96xf32>
    %107 = tpu.matmul %106, %15, %cst_49 {dimension_numbers = #tpu.dot_dimension_numbers<[1], [0], [0], [1], [0, 0, 1, 1], [], []>} : vector<16x96xf32>, vector<96x96xf32>, vector<16x96xf32> -> vector<16x96xf32>
    %108 = vector.broadcast %16 : vector<1x96xf32> to vector<16x96xf32>
    %109 = arith.addf %107, %108 : vector<16x96xf32>
    %c7 = arith.constant 7 : index
    %c0_50 = arith.constant 0 : index
    %c0_51 = arith.constant 0 : index
    %110 = vector.load %arg2[%c7, %c0_50, %c0_51] : memref<16x16x96xf32, #tpu.memory_space<vmem>>, vector<1x16x96xf32>
    %111 = vector.shape_cast %110 : vector<1x16x96xf32> to vector<16x96xf32>
    %112 = arith.addf %109, %111 : vector<16x96xf32>
    %113 = arith.maximumf %101, %112 : vector<16x96xf32>
    %114 = vector.extract_strided_slice %14 {offsets = [8, 0], sizes = [1, 96], strides = [1, 1]} : vector<16x96xf32> to vector<1x96xf32>
    %115 = vector.broadcast %114 : vector<1x96xf32> to vector<16x96xf32>
    %116 = arith.addf %12, %115 : vector<16x96xf32>
    %cst_52 = arith.constant 0.000000e+00 : f32
    %117 = vector.broadcast %cst_52 : f32 to vector<16x96xf32>
    %118 = arith.maximumf %116, %117 : vector<16x96xf32>
    %cst_53 = arith.constant dense<0.000000e+00> : vector<16x96xf32>
    %119 = tpu.matmul %118, %15, %cst_53 {dimension_numbers = #tpu.dot_dimension_numbers<[1], [0], [0], [1], [0, 0, 1, 1], [], []>} : vector<16x96xf32>, vector<96x96xf32>, vector<16x96xf32> -> vector<16x96xf32>
    %120 = vector.broadcast %16 : vector<1x96xf32> to vector<16x96xf32>
    %121 = arith.addf %119, %120 : vector<16x96xf32>
    %c8 = arith.constant 8 : index
    %c0_54 = arith.constant 0 : index
    %c0_55 = arith.constant 0 : index
    %122 = vector.load %arg2[%c8, %c0_54, %c0_55] : memref<16x16x96xf32, #tpu.memory_space<vmem>>, vector<1x16x96xf32>
    %123 = vector.shape_cast %122 : vector<1x16x96xf32> to vector<16x96xf32>
    %124 = arith.addf %121, %123 : vector<16x96xf32>
    %125 = arith.maximumf %113, %124 : vector<16x96xf32>
    %126 = vector.extract_strided_slice %14 {offsets = [9, 0], sizes = [1, 96], strides = [1, 1]} : vector<16x96xf32> to vector<1x96xf32>
    %127 = vector.broadcast %126 : vector<1x96xf32> to vector<16x96xf32>
    %128 = arith.addf %12, %127 : vector<16x96xf32>
    %cst_56 = arith.constant 0.000000e+00 : f32
    %129 = vector.broadcast %cst_56 : f32 to vector<16x96xf32>
    %130 = arith.maximumf %128, %129 : vector<16x96xf32>
    %cst_57 = arith.constant dense<0.000000e+00> : vector<16x96xf32>
    %131 = tpu.matmul %130, %15, %cst_57 {dimension_numbers = #tpu.dot_dimension_numbers<[1], [0], [0], [1], [0, 0, 1, 1], [], []>} : vector<16x96xf32>, vector<96x96xf32>, vector<16x96xf32> -> vector<16x96xf32>
    %132 = vector.broadcast %16 : vector<1x96xf32> to vector<16x96xf32>
    %133 = arith.addf %131, %132 : vector<16x96xf32>
    %c9 = arith.constant 9 : index
    %c0_58 = arith.constant 0 : index
    %c0_59 = arith.constant 0 : index
    %134 = vector.load %arg2[%c9, %c0_58, %c0_59] : memref<16x16x96xf32, #tpu.memory_space<vmem>>, vector<1x16x96xf32>
    %135 = vector.shape_cast %134 : vector<1x16x96xf32> to vector<16x96xf32>
    %136 = arith.addf %133, %135 : vector<16x96xf32>
    %137 = arith.maximumf %125, %136 : vector<16x96xf32>
    %138 = vector.extract_strided_slice %14 {offsets = [10, 0], sizes = [1, 96], strides = [1, 1]} : vector<16x96xf32> to vector<1x96xf32>
    %139 = vector.broadcast %138 : vector<1x96xf32> to vector<16x96xf32>
    %140 = arith.addf %12, %139 : vector<16x96xf32>
    %cst_60 = arith.constant 0.000000e+00 : f32
    %141 = vector.broadcast %cst_60 : f32 to vector<16x96xf32>
    %142 = arith.maximumf %140, %141 : vector<16x96xf32>
    %cst_61 = arith.constant dense<0.000000e+00> : vector<16x96xf32>
    %143 = tpu.matmul %142, %15, %cst_61 {dimension_numbers = #tpu.dot_dimension_numbers<[1], [0], [0], [1], [0, 0, 1, 1], [], []>} : vector<16x96xf32>, vector<96x96xf32>, vector<16x96xf32> -> vector<16x96xf32>
    %144 = vector.broadcast %16 : vector<1x96xf32> to vector<16x96xf32>
    %145 = arith.addf %143, %144 : vector<16x96xf32>
    %c10 = arith.constant 10 : index
    %c0_62 = arith.constant 0 : index
    %c0_63 = arith.constant 0 : index
    %146 = vector.load %arg2[%c10, %c0_62, %c0_63] : memref<16x16x96xf32, #tpu.memory_space<vmem>>, vector<1x16x96xf32>
    %147 = vector.shape_cast %146 : vector<1x16x96xf32> to vector<16x96xf32>
    %148 = arith.addf %145, %147 : vector<16x96xf32>
    %149 = arith.maximumf %137, %148 : vector<16x96xf32>
    %150 = vector.extract_strided_slice %14 {offsets = [11, 0], sizes = [1, 96], strides = [1, 1]} : vector<16x96xf32> to vector<1x96xf32>
    %151 = vector.broadcast %150 : vector<1x96xf32> to vector<16x96xf32>
    %152 = arith.addf %12, %151 : vector<16x96xf32>
    %cst_64 = arith.constant 0.000000e+00 : f32
    %153 = vector.broadcast %cst_64 : f32 to vector<16x96xf32>
    %154 = arith.maximumf %152, %153 : vector<16x96xf32>
    %cst_65 = arith.constant dense<0.000000e+00> : vector<16x96xf32>
    %155 = tpu.matmul %154, %15, %cst_65 {dimension_numbers = #tpu.dot_dimension_numbers<[1], [0], [0], [1], [0, 0, 1, 1], [], []>} : vector<16x96xf32>, vector<96x96xf32>, vector<16x96xf32> -> vector<16x96xf32>
    %156 = vector.broadcast %16 : vector<1x96xf32> to vector<16x96xf32>
    %157 = arith.addf %155, %156 : vector<16x96xf32>
    %c11 = arith.constant 11 : index
    %c0_66 = arith.constant 0 : index
    %c0_67 = arith.constant 0 : index
    %158 = vector.load %arg2[%c11, %c0_66, %c0_67] : memref<16x16x96xf32, #tpu.memory_space<vmem>>, vector<1x16x96xf32>
    %159 = vector.shape_cast %158 : vector<1x16x96xf32> to vector<16x96xf32>
    %160 = arith.addf %157, %159 : vector<16x96xf32>
    %161 = arith.maximumf %149, %160 : vector<16x96xf32>
    %162 = vector.extract_strided_slice %14 {offsets = [12, 0], sizes = [1, 96], strides = [1, 1]} : vector<16x96xf32> to vector<1x96xf32>
    %163 = vector.broadcast %162 : vector<1x96xf32> to vector<16x96xf32>
    %164 = arith.addf %12, %163 : vector<16x96xf32>
    %cst_68 = arith.constant 0.000000e+00 : f32
    %165 = vector.broadcast %cst_68 : f32 to vector<16x96xf32>
    %166 = arith.maximumf %164, %165 : vector<16x96xf32>
    %cst_69 = arith.constant dense<0.000000e+00> : vector<16x96xf32>
    %167 = tpu.matmul %166, %15, %cst_69 {dimension_numbers = #tpu.dot_dimension_numbers<[1], [0], [0], [1], [0, 0, 1, 1], [], []>} : vector<16x96xf32>, vector<96x96xf32>, vector<16x96xf32> -> vector<16x96xf32>
    %168 = vector.broadcast %16 : vector<1x96xf32> to vector<16x96xf32>
    %169 = arith.addf %167, %168 : vector<16x96xf32>
    %c12 = arith.constant 12 : index
    %c0_70 = arith.constant 0 : index
    %c0_71 = arith.constant 0 : index
    %170 = vector.load %arg2[%c12, %c0_70, %c0_71] : memref<16x16x96xf32, #tpu.memory_space<vmem>>, vector<1x16x96xf32>
    %171 = vector.shape_cast %170 : vector<1x16x96xf32> to vector<16x96xf32>
    %172 = arith.addf %169, %171 : vector<16x96xf32>
    %173 = arith.maximumf %161, %172 : vector<16x96xf32>
    %174 = vector.extract_strided_slice %14 {offsets = [13, 0], sizes = [1, 96], strides = [1, 1]} : vector<16x96xf32> to vector<1x96xf32>
    %175 = vector.broadcast %174 : vector<1x96xf32> to vector<16x96xf32>
    %176 = arith.addf %12, %175 : vector<16x96xf32>
    %cst_72 = arith.constant 0.000000e+00 : f32
    %177 = vector.broadcast %cst_72 : f32 to vector<16x96xf32>
    %178 = arith.maximumf %176, %177 : vector<16x96xf32>
    %cst_73 = arith.constant dense<0.000000e+00> : vector<16x96xf32>
    %179 = tpu.matmul %178, %15, %cst_73 {dimension_numbers = #tpu.dot_dimension_numbers<[1], [0], [0], [1], [0, 0, 1, 1], [], []>} : vector<16x96xf32>, vector<96x96xf32>, vector<16x96xf32> -> vector<16x96xf32>
    %180 = vector.broadcast %16 : vector<1x96xf32> to vector<16x96xf32>
    %181 = arith.addf %179, %180 : vector<16x96xf32>
    %c13 = arith.constant 13 : index
    %c0_74 = arith.constant 0 : index
    %c0_75 = arith.constant 0 : index
    %182 = vector.load %arg2[%c13, %c0_74, %c0_75] : memref<16x16x96xf32, #tpu.memory_space<vmem>>, vector<1x16x96xf32>
    %183 = vector.shape_cast %182 : vector<1x16x96xf32> to vector<16x96xf32>
    %184 = arith.addf %181, %183 : vector<16x96xf32>
    %185 = arith.maximumf %173, %184 : vector<16x96xf32>
    %186 = vector.extract_strided_slice %14 {offsets = [14, 0], sizes = [1, 96], strides = [1, 1]} : vector<16x96xf32> to vector<1x96xf32>
    %187 = vector.broadcast %186 : vector<1x96xf32> to vector<16x96xf32>
    %188 = arith.addf %12, %187 : vector<16x96xf32>
    %cst_76 = arith.constant 0.000000e+00 : f32
    %189 = vector.broadcast %cst_76 : f32 to vector<16x96xf32>
    %190 = arith.maximumf %188, %189 : vector<16x96xf32>
    %cst_77 = arith.constant dense<0.000000e+00> : vector<16x96xf32>
    %191 = tpu.matmul %190, %15, %cst_77 {dimension_numbers = #tpu.dot_dimension_numbers<[1], [0], [0], [1], [0, 0, 1, 1], [], []>} : vector<16x96xf32>, vector<96x96xf32>, vector<16x96xf32> -> vector<16x96xf32>
    %192 = vector.broadcast %16 : vector<1x96xf32> to vector<16x96xf32>
    %193 = arith.addf %191, %192 : vector<16x96xf32>
    %c14 = arith.constant 14 : index
    %c0_78 = arith.constant 0 : index
    %c0_79 = arith.constant 0 : index
    %194 = vector.load %arg2[%c14, %c0_78, %c0_79] : memref<16x16x96xf32, #tpu.memory_space<vmem>>, vector<1x16x96xf32>
    %195 = vector.shape_cast %194 : vector<1x16x96xf32> to vector<16x96xf32>
    %196 = arith.addf %193, %195 : vector<16x96xf32>
    %197 = arith.maximumf %185, %196 : vector<16x96xf32>
    %198 = vector.extract_strided_slice %14 {offsets = [15, 0], sizes = [1, 96], strides = [1, 1]} : vector<16x96xf32> to vector<1x96xf32>
    %199 = vector.broadcast %198 : vector<1x96xf32> to vector<16x96xf32>
    %200 = arith.addf %12, %199 : vector<16x96xf32>
    %cst_80 = arith.constant 0.000000e+00 : f32
    %201 = vector.broadcast %cst_80 : f32 to vector<16x96xf32>
    %202 = arith.maximumf %200, %201 : vector<16x96xf32>
    %cst_81 = arith.constant dense<0.000000e+00> : vector<16x96xf32>
    %203 = tpu.matmul %202, %15, %cst_81 {dimension_numbers = #tpu.dot_dimension_numbers<[1], [0], [0], [1], [0, 0, 1, 1], [], []>} : vector<16x96xf32>, vector<96x96xf32>, vector<16x96xf32> -> vector<16x96xf32>
    %204 = vector.broadcast %16 : vector<1x96xf32> to vector<16x96xf32>
    %205 = arith.addf %203, %204 : vector<16x96xf32>
    %c15 = arith.constant 15 : index
    %c0_82 = arith.constant 0 : index
    %c0_83 = arith.constant 0 : index
    %206 = vector.load %arg2[%c15, %c0_82, %c0_83] : memref<16x16x96xf32, #tpu.memory_space<vmem>>, vector<1x16x96xf32>
    %207 = vector.shape_cast %206 : vector<1x16x96xf32> to vector<16x96xf32>
    %208 = arith.addf %205, %207 : vector<16x96xf32>
    %209 = arith.maximumf %197, %208 : vector<16x96xf32>
    %c0_84 = arith.constant 0 : index
    %c0_85 = arith.constant 0 : index
    %210 = vector.load %arg3[%c0_84, %c0_85] : memref<16x96xf32, #tpu.memory_space<vmem>>, vector<16x96xf32>
    %211 = arith.mulf %209, %210 : vector<16x96xf32>
    %c0_86 = arith.constant 0 : index
    %c0_87 = arith.constant 0 : index
    %212 = vector.load %arg11[%c0_86, %c0_87] : memref<1x96xf32, #tpu.memory_space<vmem>>, vector<1x96xf32>
    %213 = vector.broadcast %212 : vector<1x96xf32> to vector<16x96xf32>
    %214 = arith.mulf %211, %213 : vector<16x96xf32>
    %c0_88 = arith.constant 0 : index
    %c0_89 = arith.constant 0 : index
    %215 = vector.load %arg12[%c0_88, %c0_89] : memref<1x96xf32, #tpu.memory_space<vmem>>, vector<1x96xf32>
    %216 = vector.broadcast %215 : vector<1x96xf32> to vector<16x96xf32>
    %217 = arith.addf %214, %216 : vector<16x96xf32>
    %cst_90 = arith.constant 0.000000e+00 : f32
    %218 = vector.broadcast %cst_90 : f32 to vector<16x96xf32>
    %219 = arith.maximumf %217, %218 : vector<16x96xf32>
    %cst_91 = arith.constant 0.000000e+00 : f32
    %220 = vector.broadcast %cst_91 : f32 to vector<16x8xf32>
    %c0_92 = arith.constant 0 : index
    %c0_93 = arith.constant 0 : index
    %c0_94 = arith.constant 0 : index
    %221 = vector.load %arg1[%c0_92, %c0_93, %c0_94] : memref<3x16x16xf32, #tpu.memory_space<vmem>>, vector<1x16x16xf32>
    %222 = vector.shape_cast %221 : vector<1x16x16xf32> to vector<16x16xf32>
    %223 = vector.extract_strided_slice %219 {offsets = [0, 0], sizes = [16, 32], strides = [1, 1]} : vector<16x96xf32> to vector<16x32xf32>
    %cst_95 = arith.constant dense<0.000000e+00> : vector<16x32xf32>
    %224 = tpu.matmul %222, %223, %cst_95 {dimension_numbers = #tpu.dot_dimension_numbers<[1], [0], [0], [1], [0, 0, 1, 1], [], []>} : vector<16x16xf32>, vector<16x32xf32>, vector<16x32xf32> -> vector<16x32xf32>
    %c0_96 = arith.constant 0 : index
    %c0_97 = arith.constant 0 : index
    %225 = vector.load %arg13[%c0_96, %c0_97] : memref<32x16xf32, #tpu.memory_space<vmem>>, vector<32x16xf32>
    %cst_98 = arith.constant dense<0.000000e+00> : vector<16x16xf32>
    %226 = tpu.matmul %224, %225, %cst_98 {dimension_numbers = #tpu.dot_dimension_numbers<[1], [0], [0], [1], [0, 0, 1, 1], [], []>} : vector<16x32xf32>, vector<32x16xf32>, vector<16x16xf32> -> vector<16x16xf32>
    %c0_99 = arith.constant 0 : index
    %c0_100 = arith.constant 0 : index
    %227 = vector.load %arg14[%c0_99, %c0_100] : memref<1x16xf32, #tpu.memory_space<vmem>>, vector<1x16xf32>
    %228 = vector.broadcast %227 : vector<1x16xf32> to vector<16x16xf32>
    %229 = arith.addf %226, %228 : vector<16x16xf32>
    %c0_101 = arith.constant 0 : index
    %c0_102 = arith.constant 0 : index
    %230 = vector.load %arg15[%c0_101, %c0_102] : memref<32x16xf32, #tpu.memory_space<vmem>>, vector<32x16xf32>
    %cst_103 = arith.constant dense<0.000000e+00> : vector<16x16xf32>
    %231 = tpu.matmul %223, %230, %cst_103 {dimension_numbers = #tpu.dot_dimension_numbers<[1], [0], [0], [1], [0, 0, 1, 1], [], []>} : vector<16x32xf32>, vector<32x16xf32>, vector<16x16xf32> -> vector<16x16xf32>
    %232 = arith.addf %229, %231 : vector<16x16xf32>
    %cst_104 = arith.constant 0.000000e+00 : f32
    %233 = vector.broadcast %cst_104 : f32 to vector<16x16xf32>
    %234 = arith.maximumf %232, %233 : vector<16x16xf32>
    %cst_105 = arith.constant dense<0.000000e+00> : vector<16x16xf32>
    %235 = tpu.matmul %222, %234, %cst_105 {dimension_numbers = #tpu.dot_dimension_numbers<[1], [0], [0], [1], [0, 0, 1, 1], [], []>} : vector<16x16xf32>, vector<16x16xf32>, vector<16x16xf32> -> vector<16x16xf32>
    %c0_106 = arith.constant 0 : index
    %c0_107 = arith.constant 0 : index
    %c0_108 = arith.constant 0 : index
    %236 = vector.load %arg16[%c0_106, %c0_107, %c0_108] : memref<3x16x8xf32, #tpu.memory_space<vmem>>, vector<1x16x8xf32>
    %237 = vector.shape_cast %236 : vector<1x16x8xf32> to vector<16x8xf32>
    %cst_109 = arith.constant dense<0.000000e+00> : vector<16x8xf32>
    %238 = tpu.matmul %235, %237, %cst_109 {dimension_numbers = #tpu.dot_dimension_numbers<[1], [0], [0], [1], [0, 0, 1, 1], [], []>} : vector<16x16xf32>, vector<16x8xf32>, vector<16x8xf32> -> vector<16x8xf32>
    %239 = arith.addf %220, %238 : vector<16x8xf32>
    %c0_110 = arith.constant 0 : index
    %c0_111 = arith.constant 0 : index
    %c0_112 = arith.constant 0 : index
    %240 = vector.load %arg17[%c0_110, %c0_111, %c0_112] : memref<3x1x8xf32, #tpu.memory_space<vmem>>, vector<1x1x8xf32>
    %241 = vector.shape_cast %240 : vector<1x1x8xf32> to vector<1x8xf32>
    %242 = vector.broadcast %241 : vector<1x8xf32> to vector<16x8xf32>
    %243 = arith.addf %239, %242 : vector<16x8xf32>
    %c0_113 = arith.constant 0 : index
    %c0_114 = arith.constant 0 : index
    %c0_115 = arith.constant 0 : index
    %244 = vector.load %arg18[%c0_113, %c0_114, %c0_115] : memref<3x16x8xf32, #tpu.memory_space<vmem>>, vector<1x16x8xf32>
    %245 = vector.shape_cast %244 : vector<1x16x8xf32> to vector<16x8xf32>
    %cst_116 = arith.constant dense<0.000000e+00> : vector<16x8xf32>
    %246 = tpu.matmul %234, %245, %cst_116 {dimension_numbers = #tpu.dot_dimension_numbers<[1], [0], [0], [1], [0, 0, 1, 1], [], []>} : vector<16x16xf32>, vector<16x8xf32>, vector<16x8xf32> -> vector<16x8xf32>
    %247 = arith.addf %243, %246 : vector<16x8xf32>
    %c1_117 = arith.constant 1 : index
    %c0_118 = arith.constant 0 : index
    %c0_119 = arith.constant 0 : index
    %248 = vector.load %arg1[%c1_117, %c0_118, %c0_119] : memref<3x16x16xf32, #tpu.memory_space<vmem>>, vector<1x16x16xf32>
    %249 = vector.shape_cast %248 : vector<1x16x16xf32> to vector<16x16xf32>
    %250 = vector.extract_strided_slice %219 {offsets = [0, 32], sizes = [16, 32], strides = [1, 1]} : vector<16x96xf32> to vector<16x32xf32>
    %cst_120 = arith.constant dense<0.000000e+00> : vector<16x32xf32>
    %251 = tpu.matmul %249, %250, %cst_120 {dimension_numbers = #tpu.dot_dimension_numbers<[1], [0], [0], [1], [0, 0, 1, 1], [], []>} : vector<16x16xf32>, vector<16x32xf32>, vector<16x32xf32> -> vector<16x32xf32>
    %c0_121 = arith.constant 0 : index
    %c0_122 = arith.constant 0 : index
    %252 = vector.load %arg13[%c0_121, %c0_122] : memref<32x16xf32, #tpu.memory_space<vmem>>, vector<32x16xf32>
    %cst_123 = arith.constant dense<0.000000e+00> : vector<16x16xf32>
    %253 = tpu.matmul %251, %252, %cst_123 {dimension_numbers = #tpu.dot_dimension_numbers<[1], [0], [0], [1], [0, 0, 1, 1], [], []>} : vector<16x32xf32>, vector<32x16xf32>, vector<16x16xf32> -> vector<16x16xf32>
    %c0_124 = arith.constant 0 : index
    %c0_125 = arith.constant 0 : index
    %254 = vector.load %arg14[%c0_124, %c0_125] : memref<1x16xf32, #tpu.memory_space<vmem>>, vector<1x16xf32>
    %255 = vector.broadcast %254 : vector<1x16xf32> to vector<16x16xf32>
    %256 = arith.addf %253, %255 : vector<16x16xf32>
    %c0_126 = arith.constant 0 : index
    %c0_127 = arith.constant 0 : index
    %257 = vector.load %arg15[%c0_126, %c0_127] : memref<32x16xf32, #tpu.memory_space<vmem>>, vector<32x16xf32>
    %cst_128 = arith.constant dense<0.000000e+00> : vector<16x16xf32>
    %258 = tpu.matmul %250, %257, %cst_128 {dimension_numbers = #tpu.dot_dimension_numbers<[1], [0], [0], [1], [0, 0, 1, 1], [], []>} : vector<16x32xf32>, vector<32x16xf32>, vector<16x16xf32> -> vector<16x16xf32>
    %259 = arith.addf %256, %258 : vector<16x16xf32>
    %cst_129 = arith.constant 0.000000e+00 : f32
    %260 = vector.broadcast %cst_129 : f32 to vector<16x16xf32>
    %261 = arith.maximumf %259, %260 : vector<16x16xf32>
    %cst_130 = arith.constant dense<0.000000e+00> : vector<16x16xf32>
    %262 = tpu.matmul %249, %261, %cst_130 {dimension_numbers = #tpu.dot_dimension_numbers<[1], [0], [0], [1], [0, 0, 1, 1], [], []>} : vector<16x16xf32>, vector<16x16xf32>, vector<16x16xf32> -> vector<16x16xf32>
    %c1_131 = arith.constant 1 : index
    %c0_132 = arith.constant 0 : index
    %c0_133 = arith.constant 0 : index
    %263 = vector.load %arg16[%c1_131, %c0_132, %c0_133] : memref<3x16x8xf32, #tpu.memory_space<vmem>>, vector<1x16x8xf32>
    %264 = vector.shape_cast %263 : vector<1x16x8xf32> to vector<16x8xf32>
    %cst_134 = arith.constant dense<0.000000e+00> : vector<16x8xf32>
    %265 = tpu.matmul %262, %264, %cst_134 {dimension_numbers = #tpu.dot_dimension_numbers<[1], [0], [0], [1], [0, 0, 1, 1], [], []>} : vector<16x16xf32>, vector<16x8xf32>, vector<16x8xf32> -> vector<16x8xf32>
    %266 = arith.addf %247, %265 : vector<16x8xf32>
    %c1_135 = arith.constant 1 : index
    %c0_136 = arith.constant 0 : index
    %c0_137 = arith.constant 0 : index
    %267 = vector.load %arg17[%c1_135, %c0_136, %c0_137] : memref<3x1x8xf32, #tpu.memory_space<vmem>>, vector<1x1x8xf32>
    %268 = vector.shape_cast %267 : vector<1x1x8xf32> to vector<1x8xf32>
    %269 = vector.broadcast %268 : vector<1x8xf32> to vector<16x8xf32>
    %270 = arith.addf %266, %269 : vector<16x8xf32>
    %c1_138 = arith.constant 1 : index
    %c0_139 = arith.constant 0 : index
    %c0_140 = arith.constant 0 : index
    %271 = vector.load %arg18[%c1_138, %c0_139, %c0_140] : memref<3x16x8xf32, #tpu.memory_space<vmem>>, vector<1x16x8xf32>
    %272 = vector.shape_cast %271 : vector<1x16x8xf32> to vector<16x8xf32>
    %cst_141 = arith.constant dense<0.000000e+00> : vector<16x8xf32>
    %273 = tpu.matmul %261, %272, %cst_141 {dimension_numbers = #tpu.dot_dimension_numbers<[1], [0], [0], [1], [0, 0, 1, 1], [], []>} : vector<16x16xf32>, vector<16x8xf32>, vector<16x8xf32> -> vector<16x8xf32>
    %274 = arith.addf %270, %273 : vector<16x8xf32>
    %c2_142 = arith.constant 2 : index
    %c0_143 = arith.constant 0 : index
    %c0_144 = arith.constant 0 : index
    %275 = vector.load %arg1[%c2_142, %c0_143, %c0_144] : memref<3x16x16xf32, #tpu.memory_space<vmem>>, vector<1x16x16xf32>
    %276 = vector.shape_cast %275 : vector<1x16x16xf32> to vector<16x16xf32>
    %277 = vector.extract_strided_slice %219 {offsets = [0, 64], sizes = [16, 32], strides = [1, 1]} : vector<16x96xf32> to vector<16x32xf32>
    %cst_145 = arith.constant dense<0.000000e+00> : vector<16x32xf32>
    %278 = tpu.matmul %276, %277, %cst_145 {dimension_numbers = #tpu.dot_dimension_numbers<[1], [0], [0], [1], [0, 0, 1, 1], [], []>} : vector<16x16xf32>, vector<16x32xf32>, vector<16x32xf32> -> vector<16x32xf32>
    %c0_146 = arith.constant 0 : index
    %c0_147 = arith.constant 0 : index
    %279 = vector.load %arg13[%c0_146, %c0_147] : memref<32x16xf32, #tpu.memory_space<vmem>>, vector<32x16xf32>
    %cst_148 = arith.constant dense<0.000000e+00> : vector<16x16xf32>
    %280 = tpu.matmul %278, %279, %cst_148 {dimension_numbers = #tpu.dot_dimension_numbers<[1], [0], [0], [1], [0, 0, 1, 1], [], []>} : vector<16x32xf32>, vector<32x16xf32>, vector<16x16xf32> -> vector<16x16xf32>
    %c0_149 = arith.constant 0 : index
    %c0_150 = arith.constant 0 : index
    %281 = vector.load %arg14[%c0_149, %c0_150] : memref<1x16xf32, #tpu.memory_space<vmem>>, vector<1x16xf32>
    %282 = vector.broadcast %281 : vector<1x16xf32> to vector<16x16xf32>
    %283 = arith.addf %280, %282 : vector<16x16xf32>
    %c0_151 = arith.constant 0 : index
    %c0_152 = arith.constant 0 : index
    %284 = vector.load %arg15[%c0_151, %c0_152] : memref<32x16xf32, #tpu.memory_space<vmem>>, vector<32x16xf32>
    %cst_153 = arith.constant dense<0.000000e+00> : vector<16x16xf32>
    %285 = tpu.matmul %277, %284, %cst_153 {dimension_numbers = #tpu.dot_dimension_numbers<[1], [0], [0], [1], [0, 0, 1, 1], [], []>} : vector<16x32xf32>, vector<32x16xf32>, vector<16x16xf32> -> vector<16x16xf32>
    %286 = arith.addf %283, %285 : vector<16x16xf32>
    %cst_154 = arith.constant 0.000000e+00 : f32
    %287 = vector.broadcast %cst_154 : f32 to vector<16x16xf32>
    %288 = arith.maximumf %286, %287 : vector<16x16xf32>
    %cst_155 = arith.constant dense<0.000000e+00> : vector<16x16xf32>
    %289 = tpu.matmul %276, %288, %cst_155 {dimension_numbers = #tpu.dot_dimension_numbers<[1], [0], [0], [1], [0, 0, 1, 1], [], []>} : vector<16x16xf32>, vector<16x16xf32>, vector<16x16xf32> -> vector<16x16xf32>
    %c2_156 = arith.constant 2 : index
    %c0_157 = arith.constant 0 : index
    %c0_158 = arith.constant 0 : index
    %290 = vector.load %arg16[%c2_156, %c0_157, %c0_158] : memref<3x16x8xf32, #tpu.memory_space<vmem>>, vector<1x16x8xf32>
    %291 = vector.shape_cast %290 : vector<1x16x8xf32> to vector<16x8xf32>
    %cst_159 = arith.constant dense<0.000000e+00> : vector<16x8xf32>
    %292 = tpu.matmul %289, %291, %cst_159 {dimension_numbers = #tpu.dot_dimension_numbers<[1], [0], [0], [1], [0, 0, 1, 1], [], []>} : vector<16x16xf32>, vector<16x8xf32>, vector<16x8xf32> -> vector<16x8xf32>
    %293 = arith.addf %274, %292 : vector<16x8xf32>
    %c2_160 = arith.constant 2 : index
    %c0_161 = arith.constant 0 : index
    %c0_162 = arith.constant 0 : index
    %294 = vector.load %arg17[%c2_160, %c0_161, %c0_162] : memref<3x1x8xf32, #tpu.memory_space<vmem>>, vector<1x1x8xf32>
    %295 = vector.shape_cast %294 : vector<1x1x8xf32> to vector<1x8xf32>
    %296 = vector.broadcast %295 : vector<1x8xf32> to vector<16x8xf32>
    %297 = arith.addf %293, %296 : vector<16x8xf32>
    %c2_163 = arith.constant 2 : index
    %c0_164 = arith.constant 0 : index
    %c0_165 = arith.constant 0 : index
    %298 = vector.load %arg18[%c2_163, %c0_164, %c0_165] : memref<3x16x8xf32, #tpu.memory_space<vmem>>, vector<1x16x8xf32>
    %299 = vector.shape_cast %298 : vector<1x16x8xf32> to vector<16x8xf32>
    %cst_166 = arith.constant dense<0.000000e+00> : vector<16x8xf32>
    %300 = tpu.matmul %288, %299, %cst_166 {dimension_numbers = #tpu.dot_dimension_numbers<[1], [0], [0], [1], [0, 0, 1, 1], [], []>} : vector<16x16xf32>, vector<16x8xf32>, vector<16x8xf32> -> vector<16x8xf32>
    %301 = arith.addf %297, %300 : vector<16x8xf32>
    %cst_167 = arith.constant dense<0xFF800000> : vector<16xf32>
    %302 = vector.multi_reduction <maximumf>, %301, %cst_167 [1] : vector<16x8xf32> to vector<16xf32>
    %303 = vector.shape_cast %302 : vector<16xf32> to vector<16x1xf32>
    %304 = vector.broadcast %303 : vector<16x1xf32> to vector<16x8xf32>
    %305 = arith.subf %301, %304 : vector<16x8xf32>
    %306 = math.exp %305 : vector<16x8xf32>
    %cst_168 = arith.constant dense<0.000000e+00> : vector<16xf32>
    %307 = vector.multi_reduction <add>, %306, %cst_168 [1] : vector<16x8xf32> to vector<16xf32>
    %308 = vector.shape_cast %307 : vector<16xf32> to vector<16x1xf32>
    %309 = vector.broadcast %308 : vector<16x1xf32> to vector<16x8xf32>
    %310 = arith.divf %306, %309 : vector<16x8xf32>
    %c0_169 = arith.constant 0 : index
    %c0_170 = arith.constant 0 : index
    %c0_171 = arith.constant 0 : index
    %311 = vector.load %arg21[%c0_169, %c0_170, %c0_171] : memref<2x8x64xf32, #tpu.memory_space<vmem>>, vector<1x8x64xf32>
    %312 = vector.shape_cast %311 : vector<1x8x64xf32> to vector<8x64xf32>
    %cst_172 = arith.constant dense<0.000000e+00> : vector<16x64xf32>
    %313 = tpu.matmul %310, %312, %cst_172 {dimension_numbers = #tpu.dot_dimension_numbers<[1], [0], [0], [1], [0, 0, 1, 1], [], []>} : vector<16x8xf32>, vector<8x64xf32>, vector<16x64xf32> -> vector<16x64xf32>
    %c0_173 = arith.constant 0 : index
    %c0_174 = arith.constant 0 : index
    %c0_175 = arith.constant 0 : index
    %314 = vector.load %arg22[%c0_173, %c0_174, %c0_175] : memref<2x1x64xf32, #tpu.memory_space<vmem>>, vector<1x1x64xf32>
    %315 = vector.shape_cast %314 : vector<1x1x64xf32> to vector<1x64xf32>
    %316 = vector.broadcast %315 : vector<1x64xf32> to vector<16x64xf32>
    %317 = arith.addf %313, %316 : vector<16x64xf32>
    %c0_176 = arith.constant 0 : index
    %c0_177 = arith.constant 0 : index
    %c0_178 = arith.constant 0 : index
    %c0_179 = arith.constant 0 : index
    %318 = vector.load %arg23[%c0_176, %c0_177, %c0_178, %c0_179] : memref<2x4x64x192xf32, #tpu.memory_space<vmem>>, vector<1x1x64x192xf32>
    %319 = vector.shape_cast %318 : vector<1x1x64x192xf32> to vector<64x192xf32>
    %cst_180 = arith.constant dense<0.000000e+00> : vector<16x192xf32>
    %320 = tpu.matmul %317, %319, %cst_180 {dimension_numbers = #tpu.dot_dimension_numbers<[1], [0], [0], [1], [0, 0, 1, 1], [], []>} : vector<16x64xf32>, vector<64x192xf32>, vector<16x192xf32> -> vector<16x192xf32>
    %c0_181 = arith.constant 0 : index
    %c0_182 = arith.constant 0 : index
    %c0_183 = arith.constant 0 : index
    %321 = vector.load %arg19[%c0_181, %c0_182, %c0_183] : memref<4x16x16xf32, #tpu.memory_space<vmem>>, vector<1x16x16xf32>
    %322 = vector.shape_cast %321 : vector<1x16x16xf32> to vector<16x16xf32>
    %323 = vector.extract_strided_slice %320 {offsets = [0, 0], sizes = [16, 64], strides = [1, 1]} : vector<16x192xf32> to vector<16x64xf32>
    %cst_184 = arith.constant dense<0.000000e+00> : vector<16x64xf32>
    %324 = tpu.matmul %322, %323, %cst_184 {dimension_numbers = #tpu.dot_dimension_numbers<[1], [0], [0], [1], [0, 0, 1, 1], [], []>} : vector<16x16xf32>, vector<16x64xf32>, vector<16x64xf32> -> vector<16x64xf32>
    %325 = vector.extract_strided_slice %320 {offsets = [0, 64], sizes = [16, 64], strides = [1, 1]} : vector<16x192xf32> to vector<16x64xf32>
    %326 = arith.addf %324, %325 : vector<16x64xf32>
    %c0_185 = arith.constant 0 : index
    %c0_186 = arith.constant 0 : index
    %c0_187 = arith.constant 0 : index
    %327 = vector.load %arg20[%c0_185, %c0_186, %c0_187] : memref<4x16x16xf32, #tpu.memory_space<vmem>>, vector<1x16x16xf32>
    %328 = vector.shape_cast %327 : vector<1x16x16xf32> to vector<16x16xf32>
    %329 = vector.extract_strided_slice %320 {offsets = [0, 128], sizes = [16, 64], strides = [1, 1]} : vector<16x192xf32> to vector<16x64xf32>
    %cst_188 = arith.constant dense<0.000000e+00> : vector<16x64xf32>
    %330 = tpu.matmul %328, %329, %cst_188 {dimension_numbers = #tpu.dot_dimension_numbers<[1], [0], [0], [1], [0, 0, 1, 1], [], []>} : vector<16x16xf32>, vector<16x64xf32>, vector<16x64xf32> -> vector<16x64xf32>
    %331 = arith.addf %326, %330 : vector<16x64xf32>
    %c0_189 = arith.constant 0 : index
    %c0_190 = arith.constant 0 : index
    %c0_191 = arith.constant 0 : index
    %c0_192 = arith.constant 0 : index
    %332 = vector.load %arg25[%c0_189, %c0_190, %c0_191, %c0_192] : memref<2x10x1x64xf32, #tpu.memory_space<vmem>>, vector<1x1x1x64xf32>
    %333 = vector.shape_cast %332 : vector<1x1x1x64xf32> to vector<1x64xf32>
    %334 = vector.broadcast %333 : vector<1x64xf32> to vector<16x64xf32>
    %335 = arith.addf %331, %334 : vector<16x64xf32>
    %cst_193 = arith.constant 0.000000e+00 : f32
    %336 = vector.broadcast %cst_193 : f32 to vector<16x64xf32>
    %337 = arith.maximumf %335, %336 : vector<16x64xf32>
    %c0_194 = arith.constant 0 : index
    %c0_195 = arith.constant 0 : index
    %c0_196 = arith.constant 0 : index
    %c0_197 = arith.constant 0 : index
    %338 = vector.load %arg26[%c0_194, %c0_195, %c0_196, %c0_197] : memref<2x10x64x64xf32, #tpu.memory_space<vmem>>, vector<1x1x64x64xf32>
    %339 = vector.shape_cast %338 : vector<1x1x64x64xf32> to vector<64x64xf32>
    %cst_198 = arith.constant dense<0.000000e+00> : vector<16x64xf32>
    %340 = tpu.matmul %337, %339, %cst_198 {dimension_numbers = #tpu.dot_dimension_numbers<[1], [0], [0], [1], [0, 0, 1, 1], [], []>} : vector<16x64xf32>, vector<64x64xf32>, vector<16x64xf32> -> vector<16x64xf32>
    %341 = arith.addf %317, %340 : vector<16x64xf32>
    %c0_199 = arith.constant 0 : index
    %c0_200 = arith.constant 0 : index
    %c0_201 = arith.constant 0 : index
    %c0_202 = arith.constant 0 : index
    %342 = vector.load %arg27[%c0_199, %c0_200, %c0_201, %c0_202] : memref<2x10x1x64xf32, #tpu.memory_space<vmem>>, vector<1x1x1x64xf32>
    %343 = vector.shape_cast %342 : vector<1x1x1x64xf32> to vector<1x64xf32>
    %344 = vector.broadcast %343 : vector<1x64xf32> to vector<16x64xf32>
    %345 = arith.addf %341, %344 : vector<16x64xf32>
    %c0_203 = arith.constant 0 : index
    %c1_204 = arith.constant 1 : index
    %c0_205 = arith.constant 0 : index
    %c0_206 = arith.constant 0 : index
    %346 = vector.load %arg23[%c0_203, %c1_204, %c0_205, %c0_206] : memref<2x4x64x192xf32, #tpu.memory_space<vmem>>, vector<1x1x64x192xf32>
    %347 = vector.shape_cast %346 : vector<1x1x64x192xf32> to vector<64x192xf32>
    %cst_207 = arith.constant dense<0.000000e+00> : vector<16x192xf32>
    %348 = tpu.matmul %345, %347, %cst_207 {dimension_numbers = #tpu.dot_dimension_numbers<[1], [0], [0], [1], [0, 0, 1, 1], [], []>} : vector<16x64xf32>, vector<64x192xf32>, vector<16x192xf32> -> vector<16x192xf32>
    %c1_208 = arith.constant 1 : index
    %c0_209 = arith.constant 0 : index
    %c0_210 = arith.constant 0 : index
    %349 = vector.load %arg19[%c1_208, %c0_209, %c0_210] : memref<4x16x16xf32, #tpu.memory_space<vmem>>, vector<1x16x16xf32>
    %350 = vector.shape_cast %349 : vector<1x16x16xf32> to vector<16x16xf32>
    %351 = vector.extract_strided_slice %348 {offsets = [0, 0], sizes = [16, 64], strides = [1, 1]} : vector<16x192xf32> to vector<16x64xf32>
    %cst_211 = arith.constant dense<0.000000e+00> : vector<16x64xf32>
    %352 = tpu.matmul %350, %351, %cst_211 {dimension_numbers = #tpu.dot_dimension_numbers<[1], [0], [0], [1], [0, 0, 1, 1], [], []>} : vector<16x16xf32>, vector<16x64xf32>, vector<16x64xf32> -> vector<16x64xf32>
    %353 = vector.extract_strided_slice %348 {offsets = [0, 64], sizes = [16, 64], strides = [1, 1]} : vector<16x192xf32> to vector<16x64xf32>
    %354 = arith.addf %352, %353 : vector<16x64xf32>
    %c1_212 = arith.constant 1 : index
    %c0_213 = arith.constant 0 : index
    %c0_214 = arith.constant 0 : index
    %355 = vector.load %arg20[%c1_212, %c0_213, %c0_214] : memref<4x16x16xf32, #tpu.memory_space<vmem>>, vector<1x16x16xf32>
    %356 = vector.shape_cast %355 : vector<1x16x16xf32> to vector<16x16xf32>
    %357 = vector.extract_strided_slice %348 {offsets = [0, 128], sizes = [16, 64], strides = [1, 1]} : vector<16x192xf32> to vector<16x64xf32>
    %cst_215 = arith.constant dense<0.000000e+00> : vector<16x64xf32>
    %358 = tpu.matmul %356, %357, %cst_215 {dimension_numbers = #tpu.dot_dimension_numbers<[1], [0], [0], [1], [0, 0, 1, 1], [], []>} : vector<16x16xf32>, vector<16x64xf32>, vector<16x64xf32> -> vector<16x64xf32>
    %359 = arith.addf %354, %358 : vector<16x64xf32>
    %c0_216 = arith.constant 0 : index
    %c1_217 = arith.constant 1 : index
    %c0_218 = arith.constant 0 : index
    %c0_219 = arith.constant 0 : index
    %360 = vector.load %arg25[%c0_216, %c1_217, %c0_218, %c0_219] : memref<2x10x1x64xf32, #tpu.memory_space<vmem>>, vector<1x1x1x64xf32>
    %361 = vector.shape_cast %360 : vector<1x1x1x64xf32> to vector<1x64xf32>
    %362 = vector.broadcast %361 : vector<1x64xf32> to vector<16x64xf32>
    %363 = arith.addf %359, %362 : vector<16x64xf32>
    %cst_220 = arith.constant 0.000000e+00 : f32
    %364 = vector.broadcast %cst_220 : f32 to vector<16x64xf32>
    %365 = arith.maximumf %363, %364 : vector<16x64xf32>
    %c0_221 = arith.constant 0 : index
    %c1_222 = arith.constant 1 : index
    %c0_223 = arith.constant 0 : index
    %c0_224 = arith.constant 0 : index
    %366 = vector.load %arg26[%c0_221, %c1_222, %c0_223, %c0_224] : memref<2x10x64x64xf32, #tpu.memory_space<vmem>>, vector<1x1x64x64xf32>
    %367 = vector.shape_cast %366 : vector<1x1x64x64xf32> to vector<64x64xf32>
    %cst_225 = arith.constant dense<0.000000e+00> : vector<16x64xf32>
    %368 = tpu.matmul %365, %367, %cst_225 {dimension_numbers = #tpu.dot_dimension_numbers<[1], [0], [0], [1], [0, 0, 1, 1], [], []>} : vector<16x64xf32>, vector<64x64xf32>, vector<16x64xf32> -> vector<16x64xf32>
    %369 = arith.addf %345, %368 : vector<16x64xf32>
    %c0_226 = arith.constant 0 : index
    %c1_227 = arith.constant 1 : index
    %c0_228 = arith.constant 0 : index
    %c0_229 = arith.constant 0 : index
    %370 = vector.load %arg27[%c0_226, %c1_227, %c0_228, %c0_229] : memref<2x10x1x64xf32, #tpu.memory_space<vmem>>, vector<1x1x1x64xf32>
    %371 = vector.shape_cast %370 : vector<1x1x1x64xf32> to vector<1x64xf32>
    %372 = vector.broadcast %371 : vector<1x64xf32> to vector<16x64xf32>
    %373 = arith.addf %369, %372 : vector<16x64xf32>
    %c0_230 = arith.constant 0 : index
    %c2_231 = arith.constant 2 : index
    %c0_232 = arith.constant 0 : index
    %c0_233 = arith.constant 0 : index
    %374 = vector.load %arg23[%c0_230, %c2_231, %c0_232, %c0_233] : memref<2x4x64x192xf32, #tpu.memory_space<vmem>>, vector<1x1x64x192xf32>
    %375 = vector.shape_cast %374 : vector<1x1x64x192xf32> to vector<64x192xf32>
    %cst_234 = arith.constant dense<0.000000e+00> : vector<16x192xf32>
    %376 = tpu.matmul %373, %375, %cst_234 {dimension_numbers = #tpu.dot_dimension_numbers<[1], [0], [0], [1], [0, 0, 1, 1], [], []>} : vector<16x64xf32>, vector<64x192xf32>, vector<16x192xf32> -> vector<16x192xf32>
    %c2_235 = arith.constant 2 : index
    %c0_236 = arith.constant 0 : index
    %c0_237 = arith.constant 0 : index
    %377 = vector.load %arg19[%c2_235, %c0_236, %c0_237] : memref<4x16x16xf32, #tpu.memory_space<vmem>>, vector<1x16x16xf32>
    %378 = vector.shape_cast %377 : vector<1x16x16xf32> to vector<16x16xf32>
    %379 = vector.extract_strided_slice %376 {offsets = [0, 0], sizes = [16, 64], strides = [1, 1]} : vector<16x192xf32> to vector<16x64xf32>
    %cst_238 = arith.constant dense<0.000000e+00> : vector<16x64xf32>
    %380 = tpu.matmul %378, %379, %cst_238 {dimension_numbers = #tpu.dot_dimension_numbers<[1], [0], [0], [1], [0, 0, 1, 1], [], []>} : vector<16x16xf32>, vector<16x64xf32>, vector<16x64xf32> -> vector<16x64xf32>
    %381 = vector.extract_strided_slice %376 {offsets = [0, 64], sizes = [16, 64], strides = [1, 1]} : vector<16x192xf32> to vector<16x64xf32>
    %382 = arith.addf %380, %381 : vector<16x64xf32>
    %c2_239 = arith.constant 2 : index
    %c0_240 = arith.constant 0 : index
    %c0_241 = arith.constant 0 : index
    %383 = vector.load %arg20[%c2_239, %c0_240, %c0_241] : memref<4x16x16xf32, #tpu.memory_space<vmem>>, vector<1x16x16xf32>
    %384 = vector.shape_cast %383 : vector<1x16x16xf32> to vector<16x16xf32>
    %385 = vector.extract_strided_slice %376 {offsets = [0, 128], sizes = [16, 64], strides = [1, 1]} : vector<16x192xf32> to vector<16x64xf32>
    %cst_242 = arith.constant dense<0.000000e+00> : vector<16x64xf32>
    %386 = tpu.matmul %384, %385, %cst_242 {dimension_numbers = #tpu.dot_dimension_numbers<[1], [0], [0], [1], [0, 0, 1, 1], [], []>} : vector<16x16xf32>, vector<16x64xf32>, vector<16x64xf32> -> vector<16x64xf32>
    %387 = arith.addf %382, %386 : vector<16x64xf32>
    %c0_243 = arith.constant 0 : index
    %c2_244 = arith.constant 2 : index
    %c0_245 = arith.constant 0 : index
    %c0_246 = arith.constant 0 : index
    %388 = vector.load %arg25[%c0_243, %c2_244, %c0_245, %c0_246] : memref<2x10x1x64xf32, #tpu.memory_space<vmem>>, vector<1x1x1x64xf32>
    %389 = vector.shape_cast %388 : vector<1x1x1x64xf32> to vector<1x64xf32>
    %390 = vector.broadcast %389 : vector<1x64xf32> to vector<16x64xf32>
    %391 = arith.addf %387, %390 : vector<16x64xf32>
    %cst_247 = arith.constant 0.000000e+00 : f32
    %392 = vector.broadcast %cst_247 : f32 to vector<16x64xf32>
    %393 = arith.maximumf %391, %392 : vector<16x64xf32>
    %c0_248 = arith.constant 0 : index
    %c2_249 = arith.constant 2 : index
    %c0_250 = arith.constant 0 : index
    %c0_251 = arith.constant 0 : index
    %394 = vector.load %arg26[%c0_248, %c2_249, %c0_250, %c0_251] : memref<2x10x64x64xf32, #tpu.memory_space<vmem>>, vector<1x1x64x64xf32>
    %395 = vector.shape_cast %394 : vector<1x1x64x64xf32> to vector<64x64xf32>
    %cst_252 = arith.constant dense<0.000000e+00> : vector<16x64xf32>
    %396 = tpu.matmul %393, %395, %cst_252 {dimension_numbers = #tpu.dot_dimension_numbers<[1], [0], [0], [1], [0, 0, 1, 1], [], []>} : vector<16x64xf32>, vector<64x64xf32>, vector<16x64xf32> -> vector<16x64xf32>
    %397 = arith.addf %373, %396 : vector<16x64xf32>
    %c0_253 = arith.constant 0 : index
    %c2_254 = arith.constant 2 : index
    %c0_255 = arith.constant 0 : index
    %c0_256 = arith.constant 0 : index
    %398 = vector.load %arg27[%c0_253, %c2_254, %c0_255, %c0_256] : memref<2x10x1x64xf32, #tpu.memory_space<vmem>>, vector<1x1x1x64xf32>
    %399 = vector.shape_cast %398 : vector<1x1x1x64xf32> to vector<1x64xf32>
    %400 = vector.broadcast %399 : vector<1x64xf32> to vector<16x64xf32>
    %401 = arith.addf %397, %400 : vector<16x64xf32>
    %c0_257 = arith.constant 0 : index
    %c3_258 = arith.constant 3 : index
    %c0_259 = arith.constant 0 : index
    %c0_260 = arith.constant 0 : index
    %402 = vector.load %arg23[%c0_257, %c3_258, %c0_259, %c0_260] : memref<2x4x64x192xf32, #tpu.memory_space<vmem>>, vector<1x1x64x192xf32>
    %403 = vector.shape_cast %402 : vector<1x1x64x192xf32> to vector<64x192xf32>
    %cst_261 = arith.constant dense<0.000000e+00> : vector<16x192xf32>
    %404 = tpu.matmul %401, %403, %cst_261 {dimension_numbers = #tpu.dot_dimension_numbers<[1], [0], [0], [1], [0, 0, 1, 1], [], []>} : vector<16x64xf32>, vector<64x192xf32>, vector<16x192xf32> -> vector<16x192xf32>
    %c3_262 = arith.constant 3 : index
    %c0_263 = arith.constant 0 : index
    %c0_264 = arith.constant 0 : index
    %405 = vector.load %arg19[%c3_262, %c0_263, %c0_264] : memref<4x16x16xf32, #tpu.memory_space<vmem>>, vector<1x16x16xf32>
    %406 = vector.shape_cast %405 : vector<1x16x16xf32> to vector<16x16xf32>
    %407 = vector.extract_strided_slice %404 {offsets = [0, 0], sizes = [16, 64], strides = [1, 1]} : vector<16x192xf32> to vector<16x64xf32>
    %cst_265 = arith.constant dense<0.000000e+00> : vector<16x64xf32>
    %408 = tpu.matmul %406, %407, %cst_265 {dimension_numbers = #tpu.dot_dimension_numbers<[1], [0], [0], [1], [0, 0, 1, 1], [], []>} : vector<16x16xf32>, vector<16x64xf32>, vector<16x64xf32> -> vector<16x64xf32>
    %409 = vector.extract_strided_slice %404 {offsets = [0, 64], sizes = [16, 64], strides = [1, 1]} : vector<16x192xf32> to vector<16x64xf32>
    %410 = arith.addf %408, %409 : vector<16x64xf32>
    %c3_266 = arith.constant 3 : index
    %c0_267 = arith.constant 0 : index
    %c0_268 = arith.constant 0 : index
    %411 = vector.load %arg20[%c3_266, %c0_267, %c0_268] : memref<4x16x16xf32, #tpu.memory_space<vmem>>, vector<1x16x16xf32>
    %412 = vector.shape_cast %411 : vector<1x16x16xf32> to vector<16x16xf32>
    %413 = vector.extract_strided_slice %404 {offsets = [0, 128], sizes = [16, 64], strides = [1, 1]} : vector<16x192xf32> to vector<16x64xf32>
    %cst_269 = arith.constant dense<0.000000e+00> : vector<16x64xf32>
    %414 = tpu.matmul %412, %413, %cst_269 {dimension_numbers = #tpu.dot_dimension_numbers<[1], [0], [0], [1], [0, 0, 1, 1], [], []>} : vector<16x16xf32>, vector<16x64xf32>, vector<16x64xf32> -> vector<16x64xf32>
    %415 = arith.addf %410, %414 : vector<16x64xf32>
    %c0_270 = arith.constant 0 : index
    %c3_271 = arith.constant 3 : index
    %c0_272 = arith.constant 0 : index
    %c0_273 = arith.constant 0 : index
    %416 = vector.load %arg25[%c0_270, %c3_271, %c0_272, %c0_273] : memref<2x10x1x64xf32, #tpu.memory_space<vmem>>, vector<1x1x1x64xf32>
    %417 = vector.shape_cast %416 : vector<1x1x1x64xf32> to vector<1x64xf32>
    %418 = vector.broadcast %417 : vector<1x64xf32> to vector<16x64xf32>
    %419 = arith.addf %415, %418 : vector<16x64xf32>
    %cst_274 = arith.constant 0.000000e+00 : f32
    %420 = vector.broadcast %cst_274 : f32 to vector<16x64xf32>
    %421 = arith.maximumf %419, %420 : vector<16x64xf32>
    %c0_275 = arith.constant 0 : index
    %c3_276 = arith.constant 3 : index
    %c0_277 = arith.constant 0 : index
    %c0_278 = arith.constant 0 : index
    %422 = vector.load %arg26[%c0_275, %c3_276, %c0_277, %c0_278] : memref<2x10x64x64xf32, #tpu.memory_space<vmem>>, vector<1x1x64x64xf32>
    %423 = vector.shape_cast %422 : vector<1x1x64x64xf32> to vector<64x64xf32>
    %cst_279 = arith.constant dense<0.000000e+00> : vector<16x64xf32>
    %424 = tpu.matmul %421, %423, %cst_279 {dimension_numbers = #tpu.dot_dimension_numbers<[1], [0], [0], [1], [0, 0, 1, 1], [], []>} : vector<16x64xf32>, vector<64x64xf32>, vector<16x64xf32> -> vector<16x64xf32>
    %425 = arith.addf %401, %424 : vector<16x64xf32>
    %c0_280 = arith.constant 0 : index
    %c3_281 = arith.constant 3 : index
    %c0_282 = arith.constant 0 : index
    %c0_283 = arith.constant 0 : index
    %426 = vector.load %arg27[%c0_280, %c3_281, %c0_282, %c0_283] : memref<2x10x1x64xf32, #tpu.memory_space<vmem>>, vector<1x1x1x64xf32>
    %427 = vector.shape_cast %426 : vector<1x1x1x64xf32> to vector<1x64xf32>
    %428 = vector.broadcast %427 : vector<1x64xf32> to vector<16x64xf32>
    %429 = arith.addf %425, %428 : vector<16x64xf32>
    %c0_284 = arith.constant 0 : index
    %c0_285 = arith.constant 0 : index
    %c0_286 = arith.constant 0 : index
    %c0_287 = arith.constant 0 : index
    %430 = vector.load %arg24[%c0_284, %c0_285, %c0_286, %c0_287] : memref<2x6x64x64xf32, #tpu.memory_space<vmem>>, vector<1x1x64x64xf32>
    %431 = vector.shape_cast %430 : vector<1x1x64x64xf32> to vector<64x64xf32>
    %cst_288 = arith.constant dense<0.000000e+00> : vector<16x64xf32>
    %432 = tpu.matmul %429, %431, %cst_288 {dimension_numbers = #tpu.dot_dimension_numbers<[1], [0], [0], [1], [0, 0, 1, 1], [], []>} : vector<16x64xf32>, vector<64x64xf32>, vector<16x64xf32> -> vector<16x64xf32>
    %c0_289 = arith.constant 0 : index
    %c4_290 = arith.constant 4 : index
    %c0_291 = arith.constant 0 : index
    %c0_292 = arith.constant 0 : index
    %433 = vector.load %arg25[%c0_289, %c4_290, %c0_291, %c0_292] : memref<2x10x1x64xf32, #tpu.memory_space<vmem>>, vector<1x1x1x64xf32>
    %434 = vector.shape_cast %433 : vector<1x1x1x64xf32> to vector<1x64xf32>
    %435 = vector.broadcast %434 : vector<1x64xf32> to vector<16x64xf32>
    %436 = arith.addf %432, %435 : vector<16x64xf32>
    %cst_293 = arith.constant 0.000000e+00 : f32
    %437 = vector.broadcast %cst_293 : f32 to vector<16x64xf32>
    %438 = arith.maximumf %436, %437 : vector<16x64xf32>
    %c0_294 = arith.constant 0 : index
    %c4_295 = arith.constant 4 : index
    %c0_296 = arith.constant 0 : index
    %c0_297 = arith.constant 0 : index
    %439 = vector.load %arg26[%c0_294, %c4_295, %c0_296, %c0_297] : memref<2x10x64x64xf32, #tpu.memory_space<vmem>>, vector<1x1x64x64xf32>
    %440 = vector.shape_cast %439 : vector<1x1x64x64xf32> to vector<64x64xf32>
    %cst_298 = arith.constant dense<0.000000e+00> : vector<16x64xf32>
    %441 = tpu.matmul %438, %440, %cst_298 {dimension_numbers = #tpu.dot_dimension_numbers<[1], [0], [0], [1], [0, 0, 1, 1], [], []>} : vector<16x64xf32>, vector<64x64xf32>, vector<16x64xf32> -> vector<16x64xf32>
    %442 = arith.addf %429, %441 : vector<16x64xf32>
    %c0_299 = arith.constant 0 : index
    %c4_300 = arith.constant 4 : index
    %c0_301 = arith.constant 0 : index
    %c0_302 = arith.constant 0 : index
    %443 = vector.load %arg27[%c0_299, %c4_300, %c0_301, %c0_302] : memref<2x10x1x64xf32, #tpu.memory_space<vmem>>, vector<1x1x1x64xf32>
    %444 = vector.shape_cast %443 : vector<1x1x1x64xf32> to vector<1x64xf32>
    %445 = vector.broadcast %444 : vector<1x64xf32> to vector<16x64xf32>
    %446 = arith.addf %442, %445 : vector<16x64xf32>
    %c0_303 = arith.constant 0 : index
    %c1_304 = arith.constant 1 : index
    %c0_305 = arith.constant 0 : index
    %c0_306 = arith.constant 0 : index
    %447 = vector.load %arg24[%c0_303, %c1_304, %c0_305, %c0_306] : memref<2x6x64x64xf32, #tpu.memory_space<vmem>>, vector<1x1x64x64xf32>
    %448 = vector.shape_cast %447 : vector<1x1x64x64xf32> to vector<64x64xf32>
    %cst_307 = arith.constant dense<0.000000e+00> : vector<16x64xf32>
    %449 = tpu.matmul %446, %448, %cst_307 {dimension_numbers = #tpu.dot_dimension_numbers<[1], [0], [0], [1], [0, 0, 1, 1], [], []>} : vector<16x64xf32>, vector<64x64xf32>, vector<16x64xf32> -> vector<16x64xf32>
    %c0_308 = arith.constant 0 : index
    %c5_309 = arith.constant 5 : index
    %c0_310 = arith.constant 0 : index
    %c0_311 = arith.constant 0 : index
    %450 = vector.load %arg25[%c0_308, %c5_309, %c0_310, %c0_311] : memref<2x10x1x64xf32, #tpu.memory_space<vmem>>, vector<1x1x1x64xf32>
    %451 = vector.shape_cast %450 : vector<1x1x1x64xf32> to vector<1x64xf32>
    %452 = vector.broadcast %451 : vector<1x64xf32> to vector<16x64xf32>
    %453 = arith.addf %449, %452 : vector<16x64xf32>
    %cst_312 = arith.constant 0.000000e+00 : f32
    %454 = vector.broadcast %cst_312 : f32 to vector<16x64xf32>
    %455 = arith.maximumf %453, %454 : vector<16x64xf32>
    %c0_313 = arith.constant 0 : index
    %c5_314 = arith.constant 5 : index
    %c0_315 = arith.constant 0 : index
    %c0_316 = arith.constant 0 : index
    %456 = vector.load %arg26[%c0_313, %c5_314, %c0_315, %c0_316] : memref<2x10x64x64xf32, #tpu.memory_space<vmem>>, vector<1x1x64x64xf32>
    %457 = vector.shape_cast %456 : vector<1x1x64x64xf32> to vector<64x64xf32>
    %cst_317 = arith.constant dense<0.000000e+00> : vector<16x64xf32>
    %458 = tpu.matmul %455, %457, %cst_317 {dimension_numbers = #tpu.dot_dimension_numbers<[1], [0], [0], [1], [0, 0, 1, 1], [], []>} : vector<16x64xf32>, vector<64x64xf32>, vector<16x64xf32> -> vector<16x64xf32>
    %459 = arith.addf %446, %458 : vector<16x64xf32>
    %c0_318 = arith.constant 0 : index
    %c5_319 = arith.constant 5 : index
    %c0_320 = arith.constant 0 : index
    %c0_321 = arith.constant 0 : index
    %460 = vector.load %arg27[%c0_318, %c5_319, %c0_320, %c0_321] : memref<2x10x1x64xf32, #tpu.memory_space<vmem>>, vector<1x1x1x64xf32>
    %461 = vector.shape_cast %460 : vector<1x1x1x64xf32> to vector<1x64xf32>
    %462 = vector.broadcast %461 : vector<1x64xf32> to vector<16x64xf32>
    %463 = arith.addf %459, %462 : vector<16x64xf32>
    %c0_322 = arith.constant 0 : index
    %c2_323 = arith.constant 2 : index
    %c0_324 = arith.constant 0 : index
    %c0_325 = arith.constant 0 : index
    %464 = vector.load %arg24[%c0_322, %c2_323, %c0_324, %c0_325] : memref<2x6x64x64xf32, #tpu.memory_space<vmem>>, vector<1x1x64x64xf32>
    %465 = vector.shape_cast %464 : vector<1x1x64x64xf32> to vector<64x64xf32>
    %cst_326 = arith.constant dense<0.000000e+00> : vector<16x64xf32>
    %466 = tpu.matmul %463, %465, %cst_326 {dimension_numbers = #tpu.dot_dimension_numbers<[1], [0], [0], [1], [0, 0, 1, 1], [], []>} : vector<16x64xf32>, vector<64x64xf32>, vector<16x64xf32> -> vector<16x64xf32>
    %c0_327 = arith.constant 0 : index
    %c6_328 = arith.constant 6 : index
    %c0_329 = arith.constant 0 : index
    %c0_330 = arith.constant 0 : index
    %467 = vector.load %arg25[%c0_327, %c6_328, %c0_329, %c0_330] : memref<2x10x1x64xf32, #tpu.memory_space<vmem>>, vector<1x1x1x64xf32>
    %468 = vector.shape_cast %467 : vector<1x1x1x64xf32> to vector<1x64xf32>
    %469 = vector.broadcast %468 : vector<1x64xf32> to vector<16x64xf32>
    %470 = arith.addf %466, %469 : vector<16x64xf32>
    %cst_331 = arith.constant 0.000000e+00 : f32
    %471 = vector.broadcast %cst_331 : f32 to vector<16x64xf32>
    %472 = arith.maximumf %470, %471 : vector<16x64xf32>
    %c0_332 = arith.constant 0 : index
    %c6_333 = arith.constant 6 : index
    %c0_334 = arith.constant 0 : index
    %c0_335 = arith.constant 0 : index
    %473 = vector.load %arg26[%c0_332, %c6_333, %c0_334, %c0_335] : memref<2x10x64x64xf32, #tpu.memory_space<vmem>>, vector<1x1x64x64xf32>
    %474 = vector.shape_cast %473 : vector<1x1x64x64xf32> to vector<64x64xf32>
    %cst_336 = arith.constant dense<0.000000e+00> : vector<16x64xf32>
    %475 = tpu.matmul %472, %474, %cst_336 {dimension_numbers = #tpu.dot_dimension_numbers<[1], [0], [0], [1], [0, 0, 1, 1], [], []>} : vector<16x64xf32>, vector<64x64xf32>, vector<16x64xf32> -> vector<16x64xf32>
    %476 = arith.addf %463, %475 : vector<16x64xf32>
    %c0_337 = arith.constant 0 : index
    %c6_338 = arith.constant 6 : index
    %c0_339 = arith.constant 0 : index
    %c0_340 = arith.constant 0 : index
    %477 = vector.load %arg27[%c0_337, %c6_338, %c0_339, %c0_340] : memref<2x10x1x64xf32, #tpu.memory_space<vmem>>, vector<1x1x1x64xf32>
    %478 = vector.shape_cast %477 : vector<1x1x1x64xf32> to vector<1x64xf32>
    %479 = vector.broadcast %478 : vector<1x64xf32> to vector<16x64xf32>
    %480 = arith.addf %476, %479 : vector<16x64xf32>
    %c0_341 = arith.constant 0 : index
    %c3_342 = arith.constant 3 : index
    %c0_343 = arith.constant 0 : index
    %c0_344 = arith.constant 0 : index
    %481 = vector.load %arg24[%c0_341, %c3_342, %c0_343, %c0_344] : memref<2x6x64x64xf32, #tpu.memory_space<vmem>>, vector<1x1x64x64xf32>
    %482 = vector.shape_cast %481 : vector<1x1x64x64xf32> to vector<64x64xf32>
    %cst_345 = arith.constant dense<0.000000e+00> : vector<16x64xf32>
    %483 = tpu.matmul %480, %482, %cst_345 {dimension_numbers = #tpu.dot_dimension_numbers<[1], [0], [0], [1], [0, 0, 1, 1], [], []>} : vector<16x64xf32>, vector<64x64xf32>, vector<16x64xf32> -> vector<16x64xf32>
    %c0_346 = arith.constant 0 : index
    %c7_347 = arith.constant 7 : index
    %c0_348 = arith.constant 0 : index
    %c0_349 = arith.constant 0 : index
    %484 = vector.load %arg25[%c0_346, %c7_347, %c0_348, %c0_349] : memref<2x10x1x64xf32, #tpu.memory_space<vmem>>, vector<1x1x1x64xf32>
    %485 = vector.shape_cast %484 : vector<1x1x1x64xf32> to vector<1x64xf32>
    %486 = vector.broadcast %485 : vector<1x64xf32> to vector<16x64xf32>
    %487 = arith.addf %483, %486 : vector<16x64xf32>
    %cst_350 = arith.constant 0.000000e+00 : f32
    %488 = vector.broadcast %cst_350 : f32 to vector<16x64xf32>
    %489 = arith.maximumf %487, %488 : vector<16x64xf32>
    %c0_351 = arith.constant 0 : index
    %c7_352 = arith.constant 7 : index
    %c0_353 = arith.constant 0 : index
    %c0_354 = arith.constant 0 : index
    %490 = vector.load %arg26[%c0_351, %c7_352, %c0_353, %c0_354] : memref<2x10x64x64xf32, #tpu.memory_space<vmem>>, vector<1x1x64x64xf32>
    %491 = vector.shape_cast %490 : vector<1x1x64x64xf32> to vector<64x64xf32>
    %cst_355 = arith.constant dense<0.000000e+00> : vector<16x64xf32>
    %492 = tpu.matmul %489, %491, %cst_355 {dimension_numbers = #tpu.dot_dimension_numbers<[1], [0], [0], [1], [0, 0, 1, 1], [], []>} : vector<16x64xf32>, vector<64x64xf32>, vector<16x64xf32> -> vector<16x64xf32>
    %493 = arith.addf %480, %492 : vector<16x64xf32>
    %c0_356 = arith.constant 0 : index
    %c7_357 = arith.constant 7 : index
    %c0_358 = arith.constant 0 : index
    %c0_359 = arith.constant 0 : index
    %494 = vector.load %arg27[%c0_356, %c7_357, %c0_358, %c0_359] : memref<2x10x1x64xf32, #tpu.memory_space<vmem>>, vector<1x1x1x64xf32>
    %495 = vector.shape_cast %494 : vector<1x1x1x64xf32> to vector<1x64xf32>
    %496 = vector.broadcast %495 : vector<1x64xf32> to vector<16x64xf32>
    %497 = arith.addf %493, %496 : vector<16x64xf32>
    %c0_360 = arith.constant 0 : index
    %c4_361 = arith.constant 4 : index
    %c0_362 = arith.constant 0 : index
    %c0_363 = arith.constant 0 : index
    %498 = vector.load %arg24[%c0_360, %c4_361, %c0_362, %c0_363] : memref<2x6x64x64xf32, #tpu.memory_space<vmem>>, vector<1x1x64x64xf32>
    %499 = vector.shape_cast %498 : vector<1x1x64x64xf32> to vector<64x64xf32>
    %cst_364 = arith.constant dense<0.000000e+00> : vector<16x64xf32>
    %500 = tpu.matmul %497, %499, %cst_364 {dimension_numbers = #tpu.dot_dimension_numbers<[1], [0], [0], [1], [0, 0, 1, 1], [], []>} : vector<16x64xf32>, vector<64x64xf32>, vector<16x64xf32> -> vector<16x64xf32>
    %c0_365 = arith.constant 0 : index
    %c8_366 = arith.constant 8 : index
    %c0_367 = arith.constant 0 : index
    %c0_368 = arith.constant 0 : index
    %501 = vector.load %arg25[%c0_365, %c8_366, %c0_367, %c0_368] : memref<2x10x1x64xf32, #tpu.memory_space<vmem>>, vector<1x1x1x64xf32>
    %502 = vector.shape_cast %501 : vector<1x1x1x64xf32> to vector<1x64xf32>
    %503 = vector.broadcast %502 : vector<1x64xf32> to vector<16x64xf32>
    %504 = arith.addf %500, %503 : vector<16x64xf32>
    %cst_369 = arith.constant 0.000000e+00 : f32
    %505 = vector.broadcast %cst_369 : f32 to vector<16x64xf32>
    %506 = arith.maximumf %504, %505 : vector<16x64xf32>
    %c0_370 = arith.constant 0 : index
    %c8_371 = arith.constant 8 : index
    %c0_372 = arith.constant 0 : index
    %c0_373 = arith.constant 0 : index
    %507 = vector.load %arg26[%c0_370, %c8_371, %c0_372, %c0_373] : memref<2x10x64x64xf32, #tpu.memory_space<vmem>>, vector<1x1x64x64xf32>
    %508 = vector.shape_cast %507 : vector<1x1x64x64xf32> to vector<64x64xf32>
    %cst_374 = arith.constant dense<0.000000e+00> : vector<16x64xf32>
    %509 = tpu.matmul %506, %508, %cst_374 {dimension_numbers = #tpu.dot_dimension_numbers<[1], [0], [0], [1], [0, 0, 1, 1], [], []>} : vector<16x64xf32>, vector<64x64xf32>, vector<16x64xf32> -> vector<16x64xf32>
    %510 = arith.addf %497, %509 : vector<16x64xf32>
    %c0_375 = arith.constant 0 : index
    %c8_376 = arith.constant 8 : index
    %c0_377 = arith.constant 0 : index
    %c0_378 = arith.constant 0 : index
    %511 = vector.load %arg27[%c0_375, %c8_376, %c0_377, %c0_378] : memref<2x10x1x64xf32, #tpu.memory_space<vmem>>, vector<1x1x1x64xf32>
    %512 = vector.shape_cast %511 : vector<1x1x1x64xf32> to vector<1x64xf32>
    %513 = vector.broadcast %512 : vector<1x64xf32> to vector<16x64xf32>
    %514 = arith.addf %510, %513 : vector<16x64xf32>
    %c0_379 = arith.constant 0 : index
    %c5_380 = arith.constant 5 : index
    %c0_381 = arith.constant 0 : index
    %c0_382 = arith.constant 0 : index
    %515 = vector.load %arg24[%c0_379, %c5_380, %c0_381, %c0_382] : memref<2x6x64x64xf32, #tpu.memory_space<vmem>>, vector<1x1x64x64xf32>
    %516 = vector.shape_cast %515 : vector<1x1x64x64xf32> to vector<64x64xf32>
    %cst_383 = arith.constant dense<0.000000e+00> : vector<16x64xf32>
    %517 = tpu.matmul %514, %516, %cst_383 {dimension_numbers = #tpu.dot_dimension_numbers<[1], [0], [0], [1], [0, 0, 1, 1], [], []>} : vector<16x64xf32>, vector<64x64xf32>, vector<16x64xf32> -> vector<16x64xf32>
    %c0_384 = arith.constant 0 : index
    %c9_385 = arith.constant 9 : index
    %c0_386 = arith.constant 0 : index
    %c0_387 = arith.constant 0 : index
    %518 = vector.load %arg25[%c0_384, %c9_385, %c0_386, %c0_387] : memref<2x10x1x64xf32, #tpu.memory_space<vmem>>, vector<1x1x1x64xf32>
    %519 = vector.shape_cast %518 : vector<1x1x1x64xf32> to vector<1x64xf32>
    %520 = vector.broadcast %519 : vector<1x64xf32> to vector<16x64xf32>
    %521 = arith.addf %517, %520 : vector<16x64xf32>
    %cst_388 = arith.constant 0.000000e+00 : f32
    %522 = vector.broadcast %cst_388 : f32 to vector<16x64xf32>
    %523 = arith.maximumf %521, %522 : vector<16x64xf32>
    %c0_389 = arith.constant 0 : index
    %c9_390 = arith.constant 9 : index
    %c0_391 = arith.constant 0 : index
    %c0_392 = arith.constant 0 : index
    %524 = vector.load %arg26[%c0_389, %c9_390, %c0_391, %c0_392] : memref<2x10x64x64xf32, #tpu.memory_space<vmem>>, vector<1x1x64x64xf32>
    %525 = vector.shape_cast %524 : vector<1x1x64x64xf32> to vector<64x64xf32>
    %cst_393 = arith.constant dense<0.000000e+00> : vector<16x64xf32>
    %526 = tpu.matmul %523, %525, %cst_393 {dimension_numbers = #tpu.dot_dimension_numbers<[1], [0], [0], [1], [0, 0, 1, 1], [], []>} : vector<16x64xf32>, vector<64x64xf32>, vector<16x64xf32> -> vector<16x64xf32>
    %527 = arith.addf %514, %526 : vector<16x64xf32>
    %c0_394 = arith.constant 0 : index
    %c9_395 = arith.constant 9 : index
    %c0_396 = arith.constant 0 : index
    %c0_397 = arith.constant 0 : index
    %528 = vector.load %arg27[%c0_394, %c9_395, %c0_396, %c0_397] : memref<2x10x1x64xf32, #tpu.memory_space<vmem>>, vector<1x1x1x64xf32>
    %529 = vector.shape_cast %528 : vector<1x1x1x64xf32> to vector<1x64xf32>
    %530 = vector.broadcast %529 : vector<1x64xf32> to vector<16x64xf32>
    %531 = arith.addf %527, %530 : vector<16x64xf32>
    %c0_398 = arith.constant 0 : index
    %c0_399 = arith.constant 0 : index
    %c0_400 = arith.constant 0 : index
    %532 = vector.load %arg28[%c0_398, %c0_399, %c0_400] : memref<2x64x8xf32, #tpu.memory_space<vmem>>, vector<1x64x8xf32>
    %533 = vector.shape_cast %532 : vector<1x64x8xf32> to vector<64x8xf32>
    %cst_401 = arith.constant dense<0.000000e+00> : vector<16x8xf32>
    %534 = tpu.matmul %531, %533, %cst_401 {dimension_numbers = #tpu.dot_dimension_numbers<[1], [0], [0], [1], [0, 0, 1, 1], [], []>} : vector<16x64xf32>, vector<64x8xf32>, vector<16x8xf32> -> vector<16x8xf32>
    %c0_402 = arith.constant 0 : index
    %c0_403 = arith.constant 0 : index
    %c0_404 = arith.constant 0 : index
    %535 = vector.load %arg29[%c0_402, %c0_403, %c0_404] : memref<2x1x8xf32, #tpu.memory_space<vmem>>, vector<1x1x8xf32>
    %536 = vector.shape_cast %535 : vector<1x1x8xf32> to vector<1x8xf32>
    %537 = vector.broadcast %536 : vector<1x8xf32> to vector<16x8xf32>
    %538 = arith.addf %534, %537 : vector<16x8xf32>
    %cst_405 = arith.constant dense<0xFF800000> : vector<16xf32>
    %539 = vector.multi_reduction <maximumf>, %538, %cst_405 [1] : vector<16x8xf32> to vector<16xf32>
    %540 = vector.shape_cast %539 : vector<16xf32> to vector<16x1xf32>
    %541 = vector.broadcast %540 : vector<16x1xf32> to vector<16x8xf32>
    %542 = arith.subf %538, %541 : vector<16x8xf32>
    %543 = math.exp %542 : vector<16x8xf32>
    %cst_406 = arith.constant dense<0.000000e+00> : vector<16xf32>
    %544 = vector.multi_reduction <add>, %543, %cst_406 [1] : vector<16x8xf32> to vector<16xf32>
    %545 = vector.shape_cast %544 : vector<16xf32> to vector<16x1xf32>
    %546 = vector.broadcast %545 : vector<16x1xf32> to vector<16x8xf32>
    %547 = arith.divf %543, %546 : vector<16x8xf32>
    %c1_407 = arith.constant 1 : index
    %c0_408 = arith.constant 0 : index
    %c0_409 = arith.constant 0 : index
    %548 = vector.load %arg21[%c1_407, %c0_408, %c0_409] : memref<2x8x64xf32, #tpu.memory_space<vmem>>, vector<1x8x64xf32>
    %549 = vector.shape_cast %548 : vector<1x8x64xf32> to vector<8x64xf32>
    %cst_410 = arith.constant dense<0.000000e+00> : vector<16x64xf32>
    %550 = tpu.matmul %547, %549, %cst_410 {dimension_numbers = #tpu.dot_dimension_numbers<[1], [0], [0], [1], [0, 0, 1, 1], [], []>} : vector<16x8xf32>, vector<8x64xf32>, vector<16x64xf32> -> vector<16x64xf32>
    %c1_411 = arith.constant 1 : index
    %c0_412 = arith.constant 0 : index
    %c0_413 = arith.constant 0 : index
    %551 = vector.load %arg22[%c1_411, %c0_412, %c0_413] : memref<2x1x64xf32, #tpu.memory_space<vmem>>, vector<1x1x64xf32>
    %552 = vector.shape_cast %551 : vector<1x1x64xf32> to vector<1x64xf32>
    %553 = vector.broadcast %552 : vector<1x64xf32> to vector<16x64xf32>
    %554 = arith.addf %550, %553 : vector<16x64xf32>
    %c1_414 = arith.constant 1 : index
    %c0_415 = arith.constant 0 : index
    %c0_416 = arith.constant 0 : index
    %c0_417 = arith.constant 0 : index
    %555 = vector.load %arg23[%c1_414, %c0_415, %c0_416, %c0_417] : memref<2x4x64x192xf32, #tpu.memory_space<vmem>>, vector<1x1x64x192xf32>
    %556 = vector.shape_cast %555 : vector<1x1x64x192xf32> to vector<64x192xf32>
    %cst_418 = arith.constant dense<0.000000e+00> : vector<16x192xf32>
    %557 = tpu.matmul %554, %556, %cst_418 {dimension_numbers = #tpu.dot_dimension_numbers<[1], [0], [0], [1], [0, 0, 1, 1], [], []>} : vector<16x64xf32>, vector<64x192xf32>, vector<16x192xf32> -> vector<16x192xf32>
    %c0_419 = arith.constant 0 : index
    %c0_420 = arith.constant 0 : index
    %c0_421 = arith.constant 0 : index
    %558 = vector.load %arg19[%c0_419, %c0_420, %c0_421] : memref<4x16x16xf32, #tpu.memory_space<vmem>>, vector<1x16x16xf32>
    %559 = vector.shape_cast %558 : vector<1x16x16xf32> to vector<16x16xf32>
    %560 = vector.extract_strided_slice %557 {offsets = [0, 0], sizes = [16, 64], strides = [1, 1]} : vector<16x192xf32> to vector<16x64xf32>
    %cst_422 = arith.constant dense<0.000000e+00> : vector<16x64xf32>
    %561 = tpu.matmul %559, %560, %cst_422 {dimension_numbers = #tpu.dot_dimension_numbers<[1], [0], [0], [1], [0, 0, 1, 1], [], []>} : vector<16x16xf32>, vector<16x64xf32>, vector<16x64xf32> -> vector<16x64xf32>
    %562 = vector.extract_strided_slice %557 {offsets = [0, 64], sizes = [16, 64], strides = [1, 1]} : vector<16x192xf32> to vector<16x64xf32>
    %563 = arith.addf %561, %562 : vector<16x64xf32>
    %c0_423 = arith.constant 0 : index
    %c0_424 = arith.constant 0 : index
    %c0_425 = arith.constant 0 : index
    %564 = vector.load %arg20[%c0_423, %c0_424, %c0_425] : memref<4x16x16xf32, #tpu.memory_space<vmem>>, vector<1x16x16xf32>
    %565 = vector.shape_cast %564 : vector<1x16x16xf32> to vector<16x16xf32>
    %566 = vector.extract_strided_slice %557 {offsets = [0, 128], sizes = [16, 64], strides = [1, 1]} : vector<16x192xf32> to vector<16x64xf32>
    %cst_426 = arith.constant dense<0.000000e+00> : vector<16x64xf32>
    %567 = tpu.matmul %565, %566, %cst_426 {dimension_numbers = #tpu.dot_dimension_numbers<[1], [0], [0], [1], [0, 0, 1, 1], [], []>} : vector<16x16xf32>, vector<16x64xf32>, vector<16x64xf32> -> vector<16x64xf32>
    %568 = arith.addf %563, %567 : vector<16x64xf32>
    %c1_427 = arith.constant 1 : index
    %c0_428 = arith.constant 0 : index
    %c0_429 = arith.constant 0 : index
    %c0_430 = arith.constant 0 : index
    %569 = vector.load %arg25[%c1_427, %c0_428, %c0_429, %c0_430] : memref<2x10x1x64xf32, #tpu.memory_space<vmem>>, vector<1x1x1x64xf32>
    %570 = vector.shape_cast %569 : vector<1x1x1x64xf32> to vector<1x64xf32>
    %571 = vector.broadcast %570 : vector<1x64xf32> to vector<16x64xf32>
    %572 = arith.addf %568, %571 : vector<16x64xf32>
    %cst_431 = arith.constant 0.000000e+00 : f32
    %573 = vector.broadcast %cst_431 : f32 to vector<16x64xf32>
    %574 = arith.maximumf %572, %573 : vector<16x64xf32>
    %c1_432 = arith.constant 1 : index
    %c0_433 = arith.constant 0 : index
    %c0_434 = arith.constant 0 : index
    %c0_435 = arith.constant 0 : index
    %575 = vector.load %arg26[%c1_432, %c0_433, %c0_434, %c0_435] : memref<2x10x64x64xf32, #tpu.memory_space<vmem>>, vector<1x1x64x64xf32>
    %576 = vector.shape_cast %575 : vector<1x1x64x64xf32> to vector<64x64xf32>
    %cst_436 = arith.constant dense<0.000000e+00> : vector<16x64xf32>
    %577 = tpu.matmul %574, %576, %cst_436 {dimension_numbers = #tpu.dot_dimension_numbers<[1], [0], [0], [1], [0, 0, 1, 1], [], []>} : vector<16x64xf32>, vector<64x64xf32>, vector<16x64xf32> -> vector<16x64xf32>
    %578 = arith.addf %554, %577 : vector<16x64xf32>
    %c1_437 = arith.constant 1 : index
    %c0_438 = arith.constant 0 : index
    %c0_439 = arith.constant 0 : index
    %c0_440 = arith.constant 0 : index
    %579 = vector.load %arg27[%c1_437, %c0_438, %c0_439, %c0_440] : memref<2x10x1x64xf32, #tpu.memory_space<vmem>>, vector<1x1x1x64xf32>
    %580 = vector.shape_cast %579 : vector<1x1x1x64xf32> to vector<1x64xf32>
    %581 = vector.broadcast %580 : vector<1x64xf32> to vector<16x64xf32>
    %582 = arith.addf %578, %581 : vector<16x64xf32>
    %c1_441 = arith.constant 1 : index
    %c1_442 = arith.constant 1 : index
    %c0_443 = arith.constant 0 : index
    %c0_444 = arith.constant 0 : index
    %583 = vector.load %arg23[%c1_441, %c1_442, %c0_443, %c0_444] : memref<2x4x64x192xf32, #tpu.memory_space<vmem>>, vector<1x1x64x192xf32>
    %584 = vector.shape_cast %583 : vector<1x1x64x192xf32> to vector<64x192xf32>
    %cst_445 = arith.constant dense<0.000000e+00> : vector<16x192xf32>
    %585 = tpu.matmul %582, %584, %cst_445 {dimension_numbers = #tpu.dot_dimension_numbers<[1], [0], [0], [1], [0, 0, 1, 1], [], []>} : vector<16x64xf32>, vector<64x192xf32>, vector<16x192xf32> -> vector<16x192xf32>
    %c1_446 = arith.constant 1 : index
    %c0_447 = arith.constant 0 : index
    %c0_448 = arith.constant 0 : index
    %586 = vector.load %arg19[%c1_446, %c0_447, %c0_448] : memref<4x16x16xf32, #tpu.memory_space<vmem>>, vector<1x16x16xf32>
    %587 = vector.shape_cast %586 : vector<1x16x16xf32> to vector<16x16xf32>
    %588 = vector.extract_strided_slice %585 {offsets = [0, 0], sizes = [16, 64], strides = [1, 1]} : vector<16x192xf32> to vector<16x64xf32>
    %cst_449 = arith.constant dense<0.000000e+00> : vector<16x64xf32>
    %589 = tpu.matmul %587, %588, %cst_449 {dimension_numbers = #tpu.dot_dimension_numbers<[1], [0], [0], [1], [0, 0, 1, 1], [], []>} : vector<16x16xf32>, vector<16x64xf32>, vector<16x64xf32> -> vector<16x64xf32>
    %590 = vector.extract_strided_slice %585 {offsets = [0, 64], sizes = [16, 64], strides = [1, 1]} : vector<16x192xf32> to vector<16x64xf32>
    %591 = arith.addf %589, %590 : vector<16x64xf32>
    %c1_450 = arith.constant 1 : index
    %c0_451 = arith.constant 0 : index
    %c0_452 = arith.constant 0 : index
    %592 = vector.load %arg20[%c1_450, %c0_451, %c0_452] : memref<4x16x16xf32, #tpu.memory_space<vmem>>, vector<1x16x16xf32>
    %593 = vector.shape_cast %592 : vector<1x16x16xf32> to vector<16x16xf32>
    %594 = vector.extract_strided_slice %585 {offsets = [0, 128], sizes = [16, 64], strides = [1, 1]} : vector<16x192xf32> to vector<16x64xf32>
    %cst_453 = arith.constant dense<0.000000e+00> : vector<16x64xf32>
    %595 = tpu.matmul %593, %594, %cst_453 {dimension_numbers = #tpu.dot_dimension_numbers<[1], [0], [0], [1], [0, 0, 1, 1], [], []>} : vector<16x16xf32>, vector<16x64xf32>, vector<16x64xf32> -> vector<16x64xf32>
    %596 = arith.addf %591, %595 : vector<16x64xf32>
    %c1_454 = arith.constant 1 : index
    %c1_455 = arith.constant 1 : index
    %c0_456 = arith.constant 0 : index
    %c0_457 = arith.constant 0 : index
    %597 = vector.load %arg25[%c1_454, %c1_455, %c0_456, %c0_457] : memref<2x10x1x64xf32, #tpu.memory_space<vmem>>, vector<1x1x1x64xf32>
    %598 = vector.shape_cast %597 : vector<1x1x1x64xf32> to vector<1x64xf32>
    %599 = vector.broadcast %598 : vector<1x64xf32> to vector<16x64xf32>
    %600 = arith.addf %596, %599 : vector<16x64xf32>
    %cst_458 = arith.constant 0.000000e+00 : f32
    %601 = vector.broadcast %cst_458 : f32 to vector<16x64xf32>
    %602 = arith.maximumf %600, %601 : vector<16x64xf32>
    %c1_459 = arith.constant 1 : index
    %c1_460 = arith.constant 1 : index
    %c0_461 = arith.constant 0 : index
    %c0_462 = arith.constant 0 : index
    %603 = vector.load %arg26[%c1_459, %c1_460, %c0_461, %c0_462] : memref<2x10x64x64xf32, #tpu.memory_space<vmem>>, vector<1x1x64x64xf32>
    %604 = vector.shape_cast %603 : vector<1x1x64x64xf32> to vector<64x64xf32>
    %cst_463 = arith.constant dense<0.000000e+00> : vector<16x64xf32>
    %605 = tpu.matmul %602, %604, %cst_463 {dimension_numbers = #tpu.dot_dimension_numbers<[1], [0], [0], [1], [0, 0, 1, 1], [], []>} : vector<16x64xf32>, vector<64x64xf32>, vector<16x64xf32> -> vector<16x64xf32>
    %606 = arith.addf %582, %605 : vector<16x64xf32>
    %c1_464 = arith.constant 1 : index
    %c1_465 = arith.constant 1 : index
    %c0_466 = arith.constant 0 : index
    %c0_467 = arith.constant 0 : index
    %607 = vector.load %arg27[%c1_464, %c1_465, %c0_466, %c0_467] : memref<2x10x1x64xf32, #tpu.memory_space<vmem>>, vector<1x1x1x64xf32>
    %608 = vector.shape_cast %607 : vector<1x1x1x64xf32> to vector<1x64xf32>
    %609 = vector.broadcast %608 : vector<1x64xf32> to vector<16x64xf32>
    %610 = arith.addf %606, %609 : vector<16x64xf32>
    %c1_468 = arith.constant 1 : index
    %c2_469 = arith.constant 2 : index
    %c0_470 = arith.constant 0 : index
    %c0_471 = arith.constant 0 : index
    %611 = vector.load %arg23[%c1_468, %c2_469, %c0_470, %c0_471] : memref<2x4x64x192xf32, #tpu.memory_space<vmem>>, vector<1x1x64x192xf32>
    %612 = vector.shape_cast %611 : vector<1x1x64x192xf32> to vector<64x192xf32>
    %cst_472 = arith.constant dense<0.000000e+00> : vector<16x192xf32>
    %613 = tpu.matmul %610, %612, %cst_472 {dimension_numbers = #tpu.dot_dimension_numbers<[1], [0], [0], [1], [0, 0, 1, 1], [], []>} : vector<16x64xf32>, vector<64x192xf32>, vector<16x192xf32> -> vector<16x192xf32>
    %c2_473 = arith.constant 2 : index
    %c0_474 = arith.constant 0 : index
    %c0_475 = arith.constant 0 : index
    %614 = vector.load %arg19[%c2_473, %c0_474, %c0_475] : memref<4x16x16xf32, #tpu.memory_space<vmem>>, vector<1x16x16xf32>
    %615 = vector.shape_cast %614 : vector<1x16x16xf32> to vector<16x16xf32>
    %616 = vector.extract_strided_slice %613 {offsets = [0, 0], sizes = [16, 64], strides = [1, 1]} : vector<16x192xf32> to vector<16x64xf32>
    %cst_476 = arith.constant dense<0.000000e+00> : vector<16x64xf32>
    %617 = tpu.matmul %615, %616, %cst_476 {dimension_numbers = #tpu.dot_dimension_numbers<[1], [0], [0], [1], [0, 0, 1, 1], [], []>} : vector<16x16xf32>, vector<16x64xf32>, vector<16x64xf32> -> vector<16x64xf32>
    %618 = vector.extract_strided_slice %613 {offsets = [0, 64], sizes = [16, 64], strides = [1, 1]} : vector<16x192xf32> to vector<16x64xf32>
    %619 = arith.addf %617, %618 : vector<16x64xf32>
    %c2_477 = arith.constant 2 : index
    %c0_478 = arith.constant 0 : index
    %c0_479 = arith.constant 0 : index
    %620 = vector.load %arg20[%c2_477, %c0_478, %c0_479] : memref<4x16x16xf32, #tpu.memory_space<vmem>>, vector<1x16x16xf32>
    %621 = vector.shape_cast %620 : vector<1x16x16xf32> to vector<16x16xf32>
    %622 = vector.extract_strided_slice %613 {offsets = [0, 128], sizes = [16, 64], strides = [1, 1]} : vector<16x192xf32> to vector<16x64xf32>
    %cst_480 = arith.constant dense<0.000000e+00> : vector<16x64xf32>
    %623 = tpu.matmul %621, %622, %cst_480 {dimension_numbers = #tpu.dot_dimension_numbers<[1], [0], [0], [1], [0, 0, 1, 1], [], []>} : vector<16x16xf32>, vector<16x64xf32>, vector<16x64xf32> -> vector<16x64xf32>
    %624 = arith.addf %619, %623 : vector<16x64xf32>
    %c1_481 = arith.constant 1 : index
    %c2_482 = arith.constant 2 : index
    %c0_483 = arith.constant 0 : index
    %c0_484 = arith.constant 0 : index
    %625 = vector.load %arg25[%c1_481, %c2_482, %c0_483, %c0_484] : memref<2x10x1x64xf32, #tpu.memory_space<vmem>>, vector<1x1x1x64xf32>
    %626 = vector.shape_cast %625 : vector<1x1x1x64xf32> to vector<1x64xf32>
    %627 = vector.broadcast %626 : vector<1x64xf32> to vector<16x64xf32>
    %628 = arith.addf %624, %627 : vector<16x64xf32>
    %cst_485 = arith.constant 0.000000e+00 : f32
    %629 = vector.broadcast %cst_485 : f32 to vector<16x64xf32>
    %630 = arith.maximumf %628, %629 : vector<16x64xf32>
    %c1_486 = arith.constant 1 : index
    %c2_487 = arith.constant 2 : index
    %c0_488 = arith.constant 0 : index
    %c0_489 = arith.constant 0 : index
    %631 = vector.load %arg26[%c1_486, %c2_487, %c0_488, %c0_489] : memref<2x10x64x64xf32, #tpu.memory_space<vmem>>, vector<1x1x64x64xf32>
    %632 = vector.shape_cast %631 : vector<1x1x64x64xf32> to vector<64x64xf32>
    %cst_490 = arith.constant dense<0.000000e+00> : vector<16x64xf32>
    %633 = tpu.matmul %630, %632, %cst_490 {dimension_numbers = #tpu.dot_dimension_numbers<[1], [0], [0], [1], [0, 0, 1, 1], [], []>} : vector<16x64xf32>, vector<64x64xf32>, vector<16x64xf32> -> vector<16x64xf32>
    %634 = arith.addf %610, %633 : vector<16x64xf32>
    %c1_491 = arith.constant 1 : index
    %c2_492 = arith.constant 2 : index
    %c0_493 = arith.constant 0 : index
    %c0_494 = arith.constant 0 : index
    %635 = vector.load %arg27[%c1_491, %c2_492, %c0_493, %c0_494] : memref<2x10x1x64xf32, #tpu.memory_space<vmem>>, vector<1x1x1x64xf32>
    %636 = vector.shape_cast %635 : vector<1x1x1x64xf32> to vector<1x64xf32>
    %637 = vector.broadcast %636 : vector<1x64xf32> to vector<16x64xf32>
    %638 = arith.addf %634, %637 : vector<16x64xf32>
    %c1_495 = arith.constant 1 : index
    %c3_496 = arith.constant 3 : index
    %c0_497 = arith.constant 0 : index
    %c0_498 = arith.constant 0 : index
    %639 = vector.load %arg23[%c1_495, %c3_496, %c0_497, %c0_498] : memref<2x4x64x192xf32, #tpu.memory_space<vmem>>, vector<1x1x64x192xf32>
    %640 = vector.shape_cast %639 : vector<1x1x64x192xf32> to vector<64x192xf32>
    %cst_499 = arith.constant dense<0.000000e+00> : vector<16x192xf32>
    %641 = tpu.matmul %638, %640, %cst_499 {dimension_numbers = #tpu.dot_dimension_numbers<[1], [0], [0], [1], [0, 0, 1, 1], [], []>} : vector<16x64xf32>, vector<64x192xf32>, vector<16x192xf32> -> vector<16x192xf32>
    %c3_500 = arith.constant 3 : index
    %c0_501 = arith.constant 0 : index
    %c0_502 = arith.constant 0 : index
    %642 = vector.load %arg19[%c3_500, %c0_501, %c0_502] : memref<4x16x16xf32, #tpu.memory_space<vmem>>, vector<1x16x16xf32>
    %643 = vector.shape_cast %642 : vector<1x16x16xf32> to vector<16x16xf32>
    %644 = vector.extract_strided_slice %641 {offsets = [0, 0], sizes = [16, 64], strides = [1, 1]} : vector<16x192xf32> to vector<16x64xf32>
    %cst_503 = arith.constant dense<0.000000e+00> : vector<16x64xf32>
    %645 = tpu.matmul %643, %644, %cst_503 {dimension_numbers = #tpu.dot_dimension_numbers<[1], [0], [0], [1], [0, 0, 1, 1], [], []>} : vector<16x16xf32>, vector<16x64xf32>, vector<16x64xf32> -> vector<16x64xf32>
    %646 = vector.extract_strided_slice %641 {offsets = [0, 64], sizes = [16, 64], strides = [1, 1]} : vector<16x192xf32> to vector<16x64xf32>
    %647 = arith.addf %645, %646 : vector<16x64xf32>
    %c3_504 = arith.constant 3 : index
    %c0_505 = arith.constant 0 : index
    %c0_506 = arith.constant 0 : index
    %648 = vector.load %arg20[%c3_504, %c0_505, %c0_506] : memref<4x16x16xf32, #tpu.memory_space<vmem>>, vector<1x16x16xf32>
    %649 = vector.shape_cast %648 : vector<1x16x16xf32> to vector<16x16xf32>
    %650 = vector.extract_strided_slice %641 {offsets = [0, 128], sizes = [16, 64], strides = [1, 1]} : vector<16x192xf32> to vector<16x64xf32>
    %cst_507 = arith.constant dense<0.000000e+00> : vector<16x64xf32>
    %651 = tpu.matmul %649, %650, %cst_507 {dimension_numbers = #tpu.dot_dimension_numbers<[1], [0], [0], [1], [0, 0, 1, 1], [], []>} : vector<16x16xf32>, vector<16x64xf32>, vector<16x64xf32> -> vector<16x64xf32>
    %652 = arith.addf %647, %651 : vector<16x64xf32>
    %c1_508 = arith.constant 1 : index
    %c3_509 = arith.constant 3 : index
    %c0_510 = arith.constant 0 : index
    %c0_511 = arith.constant 0 : index
    %653 = vector.load %arg25[%c1_508, %c3_509, %c0_510, %c0_511] : memref<2x10x1x64xf32, #tpu.memory_space<vmem>>, vector<1x1x1x64xf32>
    %654 = vector.shape_cast %653 : vector<1x1x1x64xf32> to vector<1x64xf32>
    %655 = vector.broadcast %654 : vector<1x64xf32> to vector<16x64xf32>
    %656 = arith.addf %652, %655 : vector<16x64xf32>
    %cst_512 = arith.constant 0.000000e+00 : f32
    %657 = vector.broadcast %cst_512 : f32 to vector<16x64xf32>
    %658 = arith.maximumf %656, %657 : vector<16x64xf32>
    %c1_513 = arith.constant 1 : index
    %c3_514 = arith.constant 3 : index
    %c0_515 = arith.constant 0 : index
    %c0_516 = arith.constant 0 : index
    %659 = vector.load %arg26[%c1_513, %c3_514, %c0_515, %c0_516] : memref<2x10x64x64xf32, #tpu.memory_space<vmem>>, vector<1x1x64x64xf32>
    %660 = vector.shape_cast %659 : vector<1x1x64x64xf32> to vector<64x64xf32>
    %cst_517 = arith.constant dense<0.000000e+00> : vector<16x64xf32>
    %661 = tpu.matmul %658, %660, %cst_517 {dimension_numbers = #tpu.dot_dimension_numbers<[1], [0], [0], [1], [0, 0, 1, 1], [], []>} : vector<16x64xf32>, vector<64x64xf32>, vector<16x64xf32> -> vector<16x64xf32>
    %662 = arith.addf %638, %661 : vector<16x64xf32>
    %c1_518 = arith.constant 1 : index
    %c3_519 = arith.constant 3 : index
    %c0_520 = arith.constant 0 : index
    %c0_521 = arith.constant 0 : index
    %663 = vector.load %arg27[%c1_518, %c3_519, %c0_520, %c0_521] : memref<2x10x1x64xf32, #tpu.memory_space<vmem>>, vector<1x1x1x64xf32>
    %664 = vector.shape_cast %663 : vector<1x1x1x64xf32> to vector<1x64xf32>
    %665 = vector.broadcast %664 : vector<1x64xf32> to vector<16x64xf32>
    %666 = arith.addf %662, %665 : vector<16x64xf32>
    %c1_522 = arith.constant 1 : index
    %c0_523 = arith.constant 0 : index
    %c0_524 = arith.constant 0 : index
    %c0_525 = arith.constant 0 : index
    %667 = vector.load %arg24[%c1_522, %c0_523, %c0_524, %c0_525] : memref<2x6x64x64xf32, #tpu.memory_space<vmem>>, vector<1x1x64x64xf32>
    %668 = vector.shape_cast %667 : vector<1x1x64x64xf32> to vector<64x64xf32>
    %cst_526 = arith.constant dense<0.000000e+00> : vector<16x64xf32>
    %669 = tpu.matmul %666, %668, %cst_526 {dimension_numbers = #tpu.dot_dimension_numbers<[1], [0], [0], [1], [0, 0, 1, 1], [], []>} : vector<16x64xf32>, vector<64x64xf32>, vector<16x64xf32> -> vector<16x64xf32>
    %c1_527 = arith.constant 1 : index
    %c4_528 = arith.constant 4 : index
    %c0_529 = arith.constant 0 : index
    %c0_530 = arith.constant 0 : index
    %670 = vector.load %arg25[%c1_527, %c4_528, %c0_529, %c0_530] : memref<2x10x1x64xf32, #tpu.memory_space<vmem>>, vector<1x1x1x64xf32>
    %671 = vector.shape_cast %670 : vector<1x1x1x64xf32> to vector<1x64xf32>
    %672 = vector.broadcast %671 : vector<1x64xf32> to vector<16x64xf32>
    %673 = arith.addf %669, %672 : vector<16x64xf32>
    %cst_531 = arith.constant 0.000000e+00 : f32
    %674 = vector.broadcast %cst_531 : f32 to vector<16x64xf32>
    %675 = arith.maximumf %673, %674 : vector<16x64xf32>
    %c1_532 = arith.constant 1 : index
    %c4_533 = arith.constant 4 : index
    %c0_534 = arith.constant 0 : index
    %c0_535 = arith.constant 0 : index
    %676 = vector.load %arg26[%c1_532, %c4_533, %c0_534, %c0_535] : memref<2x10x64x64xf32, #tpu.memory_space<vmem>>, vector<1x1x64x64xf32>
    %677 = vector.shape_cast %676 : vector<1x1x64x64xf32> to vector<64x64xf32>
    %cst_536 = arith.constant dense<0.000000e+00> : vector<16x64xf32>
    %678 = tpu.matmul %675, %677, %cst_536 {dimension_numbers = #tpu.dot_dimension_numbers<[1], [0], [0], [1], [0, 0, 1, 1], [], []>} : vector<16x64xf32>, vector<64x64xf32>, vector<16x64xf32> -> vector<16x64xf32>
    %679 = arith.addf %666, %678 : vector<16x64xf32>
    %c1_537 = arith.constant 1 : index
    %c4_538 = arith.constant 4 : index
    %c0_539 = arith.constant 0 : index
    %c0_540 = arith.constant 0 : index
    %680 = vector.load %arg27[%c1_537, %c4_538, %c0_539, %c0_540] : memref<2x10x1x64xf32, #tpu.memory_space<vmem>>, vector<1x1x1x64xf32>
    %681 = vector.shape_cast %680 : vector<1x1x1x64xf32> to vector<1x64xf32>
    %682 = vector.broadcast %681 : vector<1x64xf32> to vector<16x64xf32>
    %683 = arith.addf %679, %682 : vector<16x64xf32>
    %c1_541 = arith.constant 1 : index
    %c1_542 = arith.constant 1 : index
    %c0_543 = arith.constant 0 : index
    %c0_544 = arith.constant 0 : index
    %684 = vector.load %arg24[%c1_541, %c1_542, %c0_543, %c0_544] : memref<2x6x64x64xf32, #tpu.memory_space<vmem>>, vector<1x1x64x64xf32>
    %685 = vector.shape_cast %684 : vector<1x1x64x64xf32> to vector<64x64xf32>
    %cst_545 = arith.constant dense<0.000000e+00> : vector<16x64xf32>
    %686 = tpu.matmul %683, %685, %cst_545 {dimension_numbers = #tpu.dot_dimension_numbers<[1], [0], [0], [1], [0, 0, 1, 1], [], []>} : vector<16x64xf32>, vector<64x64xf32>, vector<16x64xf32> -> vector<16x64xf32>
    %c1_546 = arith.constant 1 : index
    %c5_547 = arith.constant 5 : index
    %c0_548 = arith.constant 0 : index
    %c0_549 = arith.constant 0 : index
    %687 = vector.load %arg25[%c1_546, %c5_547, %c0_548, %c0_549] : memref<2x10x1x64xf32, #tpu.memory_space<vmem>>, vector<1x1x1x64xf32>
    %688 = vector.shape_cast %687 : vector<1x1x1x64xf32> to vector<1x64xf32>
    %689 = vector.broadcast %688 : vector<1x64xf32> to vector<16x64xf32>
    %690 = arith.addf %686, %689 : vector<16x64xf32>
    %cst_550 = arith.constant 0.000000e+00 : f32
    %691 = vector.broadcast %cst_550 : f32 to vector<16x64xf32>
    %692 = arith.maximumf %690, %691 : vector<16x64xf32>
    %c1_551 = arith.constant 1 : index
    %c5_552 = arith.constant 5 : index
    %c0_553 = arith.constant 0 : index
    %c0_554 = arith.constant 0 : index
    %693 = vector.load %arg26[%c1_551, %c5_552, %c0_553, %c0_554] : memref<2x10x64x64xf32, #tpu.memory_space<vmem>>, vector<1x1x64x64xf32>
    %694 = vector.shape_cast %693 : vector<1x1x64x64xf32> to vector<64x64xf32>
    %cst_555 = arith.constant dense<0.000000e+00> : vector<16x64xf32>
    %695 = tpu.matmul %692, %694, %cst_555 {dimension_numbers = #tpu.dot_dimension_numbers<[1], [0], [0], [1], [0, 0, 1, 1], [], []>} : vector<16x64xf32>, vector<64x64xf32>, vector<16x64xf32> -> vector<16x64xf32>
    %696 = arith.addf %683, %695 : vector<16x64xf32>
    %c1_556 = arith.constant 1 : index
    %c5_557 = arith.constant 5 : index
    %c0_558 = arith.constant 0 : index
    %c0_559 = arith.constant 0 : index
    %697 = vector.load %arg27[%c1_556, %c5_557, %c0_558, %c0_559] : memref<2x10x1x64xf32, #tpu.memory_space<vmem>>, vector<1x1x1x64xf32>
    %698 = vector.shape_cast %697 : vector<1x1x1x64xf32> to vector<1x64xf32>
    %699 = vector.broadcast %698 : vector<1x64xf32> to vector<16x64xf32>
    %700 = arith.addf %696, %699 : vector<16x64xf32>
    %c1_560 = arith.constant 1 : index
    %c2_561 = arith.constant 2 : index
    %c0_562 = arith.constant 0 : index
    %c0_563 = arith.constant 0 : index
    %701 = vector.load %arg24[%c1_560, %c2_561, %c0_562, %c0_563] : memref<2x6x64x64xf32, #tpu.memory_space<vmem>>, vector<1x1x64x64xf32>
    %702 = vector.shape_cast %701 : vector<1x1x64x64xf32> to vector<64x64xf32>
    %cst_564 = arith.constant dense<0.000000e+00> : vector<16x64xf32>
    %703 = tpu.matmul %700, %702, %cst_564 {dimension_numbers = #tpu.dot_dimension_numbers<[1], [0], [0], [1], [0, 0, 1, 1], [], []>} : vector<16x64xf32>, vector<64x64xf32>, vector<16x64xf32> -> vector<16x64xf32>
    %c1_565 = arith.constant 1 : index
    %c6_566 = arith.constant 6 : index
    %c0_567 = arith.constant 0 : index
    %c0_568 = arith.constant 0 : index
    %704 = vector.load %arg25[%c1_565, %c6_566, %c0_567, %c0_568] : memref<2x10x1x64xf32, #tpu.memory_space<vmem>>, vector<1x1x1x64xf32>
    %705 = vector.shape_cast %704 : vector<1x1x1x64xf32> to vector<1x64xf32>
    %706 = vector.broadcast %705 : vector<1x64xf32> to vector<16x64xf32>
    %707 = arith.addf %703, %706 : vector<16x64xf32>
    %cst_569 = arith.constant 0.000000e+00 : f32
    %708 = vector.broadcast %cst_569 : f32 to vector<16x64xf32>
    %709 = arith.maximumf %707, %708 : vector<16x64xf32>
    %c1_570 = arith.constant 1 : index
    %c6_571 = arith.constant 6 : index
    %c0_572 = arith.constant 0 : index
    %c0_573 = arith.constant 0 : index
    %710 = vector.load %arg26[%c1_570, %c6_571, %c0_572, %c0_573] : memref<2x10x64x64xf32, #tpu.memory_space<vmem>>, vector<1x1x64x64xf32>
    %711 = vector.shape_cast %710 : vector<1x1x64x64xf32> to vector<64x64xf32>
    %cst_574 = arith.constant dense<0.000000e+00> : vector<16x64xf32>
    %712 = tpu.matmul %709, %711, %cst_574 {dimension_numbers = #tpu.dot_dimension_numbers<[1], [0], [0], [1], [0, 0, 1, 1], [], []>} : vector<16x64xf32>, vector<64x64xf32>, vector<16x64xf32> -> vector<16x64xf32>
    %713 = arith.addf %700, %712 : vector<16x64xf32>
    %c1_575 = arith.constant 1 : index
    %c6_576 = arith.constant 6 : index
    %c0_577 = arith.constant 0 : index
    %c0_578 = arith.constant 0 : index
    %714 = vector.load %arg27[%c1_575, %c6_576, %c0_577, %c0_578] : memref<2x10x1x64xf32, #tpu.memory_space<vmem>>, vector<1x1x1x64xf32>
    %715 = vector.shape_cast %714 : vector<1x1x1x64xf32> to vector<1x64xf32>
    %716 = vector.broadcast %715 : vector<1x64xf32> to vector<16x64xf32>
    %717 = arith.addf %713, %716 : vector<16x64xf32>
    %c1_579 = arith.constant 1 : index
    %c3_580 = arith.constant 3 : index
    %c0_581 = arith.constant 0 : index
    %c0_582 = arith.constant 0 : index
    %718 = vector.load %arg24[%c1_579, %c3_580, %c0_581, %c0_582] : memref<2x6x64x64xf32, #tpu.memory_space<vmem>>, vector<1x1x64x64xf32>
    %719 = vector.shape_cast %718 : vector<1x1x64x64xf32> to vector<64x64xf32>
    %cst_583 = arith.constant dense<0.000000e+00> : vector<16x64xf32>
    %720 = tpu.matmul %717, %719, %cst_583 {dimension_numbers = #tpu.dot_dimension_numbers<[1], [0], [0], [1], [0, 0, 1, 1], [], []>} : vector<16x64xf32>, vector<64x64xf32>, vector<16x64xf32> -> vector<16x64xf32>
    %c1_584 = arith.constant 1 : index
    %c7_585 = arith.constant 7 : index
    %c0_586 = arith.constant 0 : index
    %c0_587 = arith.constant 0 : index
    %721 = vector.load %arg25[%c1_584, %c7_585, %c0_586, %c0_587] : memref<2x10x1x64xf32, #tpu.memory_space<vmem>>, vector<1x1x1x64xf32>
    %722 = vector.shape_cast %721 : vector<1x1x1x64xf32> to vector<1x64xf32>
    %723 = vector.broadcast %722 : vector<1x64xf32> to vector<16x64xf32>
    %724 = arith.addf %720, %723 : vector<16x64xf32>
    %cst_588 = arith.constant 0.000000e+00 : f32
    %725 = vector.broadcast %cst_588 : f32 to vector<16x64xf32>
    %726 = arith.maximumf %724, %725 : vector<16x64xf32>
    %c1_589 = arith.constant 1 : index
    %c7_590 = arith.constant 7 : index
    %c0_591 = arith.constant 0 : index
    %c0_592 = arith.constant 0 : index
    %727 = vector.load %arg26[%c1_589, %c7_590, %c0_591, %c0_592] : memref<2x10x64x64xf32, #tpu.memory_space<vmem>>, vector<1x1x64x64xf32>
    %728 = vector.shape_cast %727 : vector<1x1x64x64xf32> to vector<64x64xf32>
    %cst_593 = arith.constant dense<0.000000e+00> : vector<16x64xf32>
    %729 = tpu.matmul %726, %728, %cst_593 {dimension_numbers = #tpu.dot_dimension_numbers<[1], [0], [0], [1], [0, 0, 1, 1], [], []>} : vector<16x64xf32>, vector<64x64xf32>, vector<16x64xf32> -> vector<16x64xf32>
    %730 = arith.addf %717, %729 : vector<16x64xf32>
    %c1_594 = arith.constant 1 : index
    %c7_595 = arith.constant 7 : index
    %c0_596 = arith.constant 0 : index
    %c0_597 = arith.constant 0 : index
    %731 = vector.load %arg27[%c1_594, %c7_595, %c0_596, %c0_597] : memref<2x10x1x64xf32, #tpu.memory_space<vmem>>, vector<1x1x1x64xf32>
    %732 = vector.shape_cast %731 : vector<1x1x1x64xf32> to vector<1x64xf32>
    %733 = vector.broadcast %732 : vector<1x64xf32> to vector<16x64xf32>
    %734 = arith.addf %730, %733 : vector<16x64xf32>
    %c1_598 = arith.constant 1 : index
    %c4_599 = arith.constant 4 : index
    %c0_600 = arith.constant 0 : index
    %c0_601 = arith.constant 0 : index
    %735 = vector.load %arg24[%c1_598, %c4_599, %c0_600, %c0_601] : memref<2x6x64x64xf32, #tpu.memory_space<vmem>>, vector<1x1x64x64xf32>
    %736 = vector.shape_cast %735 : vector<1x1x64x64xf32> to vector<64x64xf32>
    %cst_602 = arith.constant dense<0.000000e+00> : vector<16x64xf32>
    %737 = tpu.matmul %734, %736, %cst_602 {dimension_numbers = #tpu.dot_dimension_numbers<[1], [0], [0], [1], [0, 0, 1, 1], [], []>} : vector<16x64xf32>, vector<64x64xf32>, vector<16x64xf32> -> vector<16x64xf32>
    %c1_603 = arith.constant 1 : index
    %c8_604 = arith.constant 8 : index
    %c0_605 = arith.constant 0 : index
    %c0_606 = arith.constant 0 : index
    %738 = vector.load %arg25[%c1_603, %c8_604, %c0_605, %c0_606] : memref<2x10x1x64xf32, #tpu.memory_space<vmem>>, vector<1x1x1x64xf32>
    %739 = vector.shape_cast %738 : vector<1x1x1x64xf32> to vector<1x64xf32>
    %740 = vector.broadcast %739 : vector<1x64xf32> to vector<16x64xf32>
    %741 = arith.addf %737, %740 : vector<16x64xf32>
    %cst_607 = arith.constant 0.000000e+00 : f32
    %742 = vector.broadcast %cst_607 : f32 to vector<16x64xf32>
    %743 = arith.maximumf %741, %742 : vector<16x64xf32>
    %c1_608 = arith.constant 1 : index
    %c8_609 = arith.constant 8 : index
    %c0_610 = arith.constant 0 : index
    %c0_611 = arith.constant 0 : index
    %744 = vector.load %arg26[%c1_608, %c8_609, %c0_610, %c0_611] : memref<2x10x64x64xf32, #tpu.memory_space<vmem>>, vector<1x1x64x64xf32>
    %745 = vector.shape_cast %744 : vector<1x1x64x64xf32> to vector<64x64xf32>
    %cst_612 = arith.constant dense<0.000000e+00> : vector<16x64xf32>
    %746 = tpu.matmul %743, %745, %cst_612 {dimension_numbers = #tpu.dot_dimension_numbers<[1], [0], [0], [1], [0, 0, 1, 1], [], []>} : vector<16x64xf32>, vector<64x64xf32>, vector<16x64xf32> -> vector<16x64xf32>
    %747 = arith.addf %734, %746 : vector<16x64xf32>
    %c1_613 = arith.constant 1 : index
    %c8_614 = arith.constant 8 : index
    %c0_615 = arith.constant 0 : index
    %c0_616 = arith.constant 0 : index
    %748 = vector.load %arg27[%c1_613, %c8_614, %c0_615, %c0_616] : memref<2x10x1x64xf32, #tpu.memory_space<vmem>>, vector<1x1x1x64xf32>
    %749 = vector.shape_cast %748 : vector<1x1x1x64xf32> to vector<1x64xf32>
    %750 = vector.broadcast %749 : vector<1x64xf32> to vector<16x64xf32>
    %751 = arith.addf %747, %750 : vector<16x64xf32>
    %c1_617 = arith.constant 1 : index
    %c5_618 = arith.constant 5 : index
    %c0_619 = arith.constant 0 : index
    %c0_620 = arith.constant 0 : index
    %752 = vector.load %arg24[%c1_617, %c5_618, %c0_619, %c0_620] : memref<2x6x64x64xf32, #tpu.memory_space<vmem>>, vector<1x1x64x64xf32>
    %753 = vector.shape_cast %752 : vector<1x1x64x64xf32> to vector<64x64xf32>
    %cst_621 = arith.constant dense<0.000000e+00> : vector<16x64xf32>
    %754 = tpu.matmul %751, %753, %cst_621 {dimension_numbers = #tpu.dot_dimension_numbers<[1], [0], [0], [1], [0, 0, 1, 1], [], []>} : vector<16x64xf32>, vector<64x64xf32>, vector<16x64xf32> -> vector<16x64xf32>
    %c1_622 = arith.constant 1 : index
    %c9_623 = arith.constant 9 : index
    %c0_624 = arith.constant 0 : index
    %c0_625 = arith.constant 0 : index
    %755 = vector.load %arg25[%c1_622, %c9_623, %c0_624, %c0_625] : memref<2x10x1x64xf32, #tpu.memory_space<vmem>>, vector<1x1x1x64xf32>
    %756 = vector.shape_cast %755 : vector<1x1x1x64xf32> to vector<1x64xf32>
    %757 = vector.broadcast %756 : vector<1x64xf32> to vector<16x64xf32>
    %758 = arith.addf %754, %757 : vector<16x64xf32>
    %cst_626 = arith.constant 0.000000e+00 : f32
    %759 = vector.broadcast %cst_626 : f32 to vector<16x64xf32>
    %760 = arith.maximumf %758, %759 : vector<16x64xf32>
    %c1_627 = arith.constant 1 : index
    %c9_628 = arith.constant 9 : index
    %c0_629 = arith.constant 0 : index
    %c0_630 = arith.constant 0 : index
    %761 = vector.load %arg26[%c1_627, %c9_628, %c0_629, %c0_630] : memref<2x10x64x64xf32, #tpu.memory_space<vmem>>, vector<1x1x64x64xf32>
    %762 = vector.shape_cast %761 : vector<1x1x64x64xf32> to vector<64x64xf32>
    %cst_631 = arith.constant dense<0.000000e+00> : vector<16x64xf32>
    %763 = tpu.matmul %760, %762, %cst_631 {dimension_numbers = #tpu.dot_dimension_numbers<[1], [0], [0], [1], [0, 0, 1, 1], [], []>} : vector<16x64xf32>, vector<64x64xf32>, vector<16x64xf32> -> vector<16x64xf32>
    %764 = arith.addf %751, %763 : vector<16x64xf32>
    %c1_632 = arith.constant 1 : index
    %c9_633 = arith.constant 9 : index
    %c0_634 = arith.constant 0 : index
    %c0_635 = arith.constant 0 : index
    %765 = vector.load %arg27[%c1_632, %c9_633, %c0_634, %c0_635] : memref<2x10x1x64xf32, #tpu.memory_space<vmem>>, vector<1x1x1x64xf32>
    %766 = vector.shape_cast %765 : vector<1x1x1x64xf32> to vector<1x64xf32>
    %767 = vector.broadcast %766 : vector<1x64xf32> to vector<16x64xf32>
    %768 = arith.addf %764, %767 : vector<16x64xf32>
    %c1_636 = arith.constant 1 : index
    %c0_637 = arith.constant 0 : index
    %c0_638 = arith.constant 0 : index
    %769 = vector.load %arg28[%c1_636, %c0_637, %c0_638] : memref<2x64x8xf32, #tpu.memory_space<vmem>>, vector<1x64x8xf32>
    %770 = vector.shape_cast %769 : vector<1x64x8xf32> to vector<64x8xf32>
    %cst_639 = arith.constant dense<0.000000e+00> : vector<16x8xf32>
    %771 = tpu.matmul %768, %770, %cst_639 {dimension_numbers = #tpu.dot_dimension_numbers<[1], [0], [0], [1], [0, 0, 1, 1], [], []>} : vector<16x64xf32>, vector<64x8xf32>, vector<16x8xf32> -> vector<16x8xf32>
    %c1_640 = arith.constant 1 : index
    %c0_641 = arith.constant 0 : index
    %c0_642 = arith.constant 0 : index
    %772 = vector.load %arg29[%c1_640, %c0_641, %c0_642] : memref<2x1x8xf32, #tpu.memory_space<vmem>>, vector<1x1x8xf32>
    %773 = vector.shape_cast %772 : vector<1x1x8xf32> to vector<1x8xf32>
    %774 = vector.broadcast %773 : vector<1x8xf32> to vector<16x8xf32>
    %775 = arith.addf %771, %774 : vector<16x8xf32>
    %c0_643 = arith.constant 0 : index
    %c0_644 = arith.constant 0 : index
    %c0_645 = arith.constant 0 : index
    %776 = vector.load %arg30[%c0_643, %c0_644, %c0_645] : memref<4x16x8xf32, #tpu.memory_space<vmem>>, vector<1x16x8xf32>
    %777 = vector.shape_cast %776 : vector<1x16x8xf32> to vector<16x8xf32>
    %778 = vector.shape_cast %301 : vector<16x8xf32> to vector<1x16x8xf32>
    tpu.vector_store %arg30[%c0_643, %c0_644, %c0_645], %778 {strides = array<i32>} : memref<4x16x8xf32, #tpu.memory_space<vmem>>, vector<1x16x8xf32>,
    %c1_646 = arith.constant 1 : index
    %c0_647 = arith.constant 0 : index
    %c0_648 = arith.constant 0 : index
    %779 = vector.load %arg30[%c1_646, %c0_647, %c0_648] : memref<4x16x8xf32, #tpu.memory_space<vmem>>, vector<1x16x8xf32>
    %780 = vector.shape_cast %779 : vector<1x16x8xf32> to vector<16x8xf32>
    %781 = vector.shape_cast %538 : vector<16x8xf32> to vector<1x16x8xf32>
    tpu.vector_store %arg30[%c1_646, %c0_647, %c0_648], %781 {strides = array<i32>} : memref<4x16x8xf32, #tpu.memory_space<vmem>>, vector<1x16x8xf32>,
    %c2_649 = arith.constant 2 : index
    %c0_650 = arith.constant 0 : index
    %c0_651 = arith.constant 0 : index
    %782 = vector.load %arg30[%c2_649, %c0_650, %c0_651] : memref<4x16x8xf32, #tpu.memory_space<vmem>>, vector<1x16x8xf32>
    %783 = vector.shape_cast %782 : vector<1x16x8xf32> to vector<16x8xf32>
    %784 = vector.shape_cast %775 : vector<16x8xf32> to vector<1x16x8xf32>
    tpu.vector_store %arg30[%c2_649, %c0_650, %c0_651], %784 {strides = array<i32>} : memref<4x16x8xf32, #tpu.memory_space<vmem>>, vector<1x16x8xf32>,
    %c3_652 = arith.constant 3 : index
    %c0_653 = arith.constant 0 : index
    %c0_654 = arith.constant 0 : index
    %785 = vector.load %arg30[%c3_652, %c0_653, %c0_654] : memref<4x16x8xf32, #tpu.memory_space<vmem>>, vector<1x16x8xf32>
    %786 = vector.shape_cast %785 : vector<1x16x8xf32> to vector<16x8xf32>
    %787 = vector.shape_cast %775 : vector<16x8xf32> to vector<1x16x8xf32>
    tpu.vector_store %arg30[%c3_652, %c0_653, %c0_654], %787 {strides = array<i32>} : memref<4x16x8xf32, #tpu.memory_space<vmem>>, vector<1x16x8xf32>,
    return
  }
}

</mosaic_0001>

<bundles_post_ra>
// kernel: spell_forward.1
= control target key start
LH: loop header
LB: loop body
LE: loop exit
PB: predicated region body
PF: predicated region fallthrough
CT: control target
= control target key end

     0   :  { %s13720_s3 = smov 4   ;;  %s13721_s10 = smov 6   ;;  %vm150_vm0 = vcmask 949248   ;;  %vm157_vm1 = vcmask 1043456   ;;  %vm249_vm2 = vcmask 261120   ;;  %v423_v61 = vlaneseq  ;;  %s15204_s0 = inlined_call_operand.smem [shape: u32[31], index: -1, kind: input, shape index: {}] }
   0x1   :  { %s13761_s6 = sld [smem:[%s15204_s0 + %s13720_s3]]   ;;  %s13722_s14 = smov 7   ;;  %vm437_vm3 = vcmask 785408   ;;  %vm1991_vm4 = vcmask 130048   ;;  %vm3526_vm5 = vcmask 64512   ;;  %vm3654_vm6 = vcmask 523264  }
   0x2   :  { %s13766_s9 = sld [smem:[%s15204_s0]]   ;;  %s13723_s18 = smov 9  }
   0x3   :  { %s13771_s13 = sld [smem:[%s15204_s0 + %s13721_s10]]   ;;  %s13724_s22 = smov 5  }
   0x4   :  { %s13797_s17 = sld [smem:[%s15204_s0 + %s13722_s14]]   ;;  %s13725_s26 = smov 8  }
   0x5   :  { %s13806_s21 = sld [smem:[%s15204_s0 + %s13723_s18]]   ;;  %s13726_s30 = smov 10  }
   0x6   :  { %s9446_s25 = sld [smem:[%s15204_s0 + %s13724_s22]]   ;;  %s13727_s4 = smov 2  }
   0x7   :  { %v128_v0 = vld [vmem:[%s13761_s6] sm:$0xff]  ;;  %v129_v1 = vld [vmem:[%s13761_s6 + $0x8] sm:$0xff]  ;;  %v130_v2 = vld [vmem:[%s13761_s6 + $0x10] sm:$0xff]  ;;  %s9449_s29 = sld [smem:[%s15204_s0 + %s13725_s26]]   ;;  %s13728_s8 = smov 1  }
   0x8   :  { %v12335_v3 = vpack.c.bf16 %v129_v1, %v128_v0  ;;  %v131_v4 = vld [vmem:[%s13761_s6 + $0x18] sm:$0xff]  ;;  %v132_v6 = vld [vmem:[%s13761_s6 + $0x20] sm:$0xff]  ;;  %v133_v7 = vld [vmem:[%s13761_s6 + $0x28] sm:$0xff]  ;;  %v13870_v0 = vshrl.u32 %v423_v61, 7  ;;  %s9451_s3 = sld [smem:[%s15204_s0 + %s13726_s30]]   ;;  %s13729_s12 = smov 3  }
   0x9   :  { %v12339_v5 = vpack.c.bf16 %v131_v4, %v130_v2  ;;  %v12343_v8 = vpack.c.bf16 %v133_v7, %v132_v6  ;;  %v126_v9 = vld [vmem:[%s13766_s9] sm:$0xff]  ;;  %v134_v11 = vld [vmem:[%s13761_s6 + $0x30] sm:$0xff]  ;;  %v135_v12 = vld [vmem:[%s13761_s6 + $0x38] sm:$0xff]  ;;  %s14214_s7 = sld [smem:[%s15204_s0 + %s13727_s4]]   ;;  %s13730_s16 = smov 11  }
   0xa   :  { %12336 = vmatprep.subr.bf16.mxu0 %v12335_v3  ;;  %v238_v10 = vld [vmem:[%s13771_s13] sm:$0xff]  ;;  %10960 = vmatprep.mubr.msk.f32.mxu0 %vm150_vm0, %v126_v9  ;;  %v239_v13 = vld [vmem:[%s13771_s13 + $0x8] sm:$0xff]  ;;  %v12347_v15 = vpack.c.bf16 %v135_v12, %v134_v11  ;;  %v138_v19 = vld [vmem:[%s13761_s6 + $0x50] sm:$0xff]  ;;  %v425_v2 = vsub.s32 0, %v13870_v0  ;;  %v623_v4 = vsub.s32 2, %v13870_v0  ;;  %v815_v6 = vsub.s32 4, %v13870_v0  ;;  %s14245_s11 = sld [smem:[%s15204_s0 + %s13728_s8]]  }
   0xb   :  { %12338 = vmatpush3.bf16.msra.mxu0 %v12335_v3  ;;  %v12363_v14 = vpack.c.bf16 %v239_v13, %v238_v10  ;;  %v136_v16 = vld [vmem:[%s13761_s6 + $0x40] sm:$0xff]  ;;  %v137_v17 = vld [vmem:[%s13761_s6 + $0x48] sm:$0xff]  ;;  %v139_v20 = vld [vmem:[%s13761_s6 + $0x58] sm:$0xff]  ;;  %v527_v3 = vsub.s32 1, %v13870_v0  ;;  %v911_v7 = vsub.s32 5, %v13870_v0  ;;  %v1103_v9 = vsub.s32 7, %v13870_v0  ;;  %s9444_s15 = sld [smem:[%s15204_s0 + %s13729_s12]]  }
   0xc   :  { %12340 = vmatprep.subr.bf16.mxu0 %v12339_v5  ;;  %v12351_v18 = vpack.c.bf16 %v137_v17, %v136_v16  ;;  %v12355_v21 = vpack.c.bf16 %v139_v20, %v138_v19  ;;  %v140_v22 = vld [vmem:[%s13761_s6 + $0x60] sm:$0xff]  ;;  %v141_v23 = vld [vmem:[%s13761_s6 + $0x68] sm:$0xff]  ;;  %v142_v25 = vld [vmem:[%s13761_s6 + $0x70] sm:$0xf]  ;;  %s9452_s19 = sld [smem:[%s15204_s0 + %s13730_s16]]   ;;  %s13731_s20 = smov 12  }
   0xd   :  { %12364 = vmatprep.subr.bf16.mxu1 %v12363_v14  ;;  %v12359_v24 = vpack.c.bf16 %v141_v23, %v140_v22  ;;  %v127_v26 = vld [vmem:[%s13766_s9 + $0x8] sm:$0xff]  ;;  %v240_v27 = vld [vmem:[%s13771_s13 + $0x10] sm:$0xff]  ;;  %v241_v28 = vld [vmem:[%s13771_s13 + $0x18] sm:$0xff]  ;;  %s9453_s23 = sld [smem:[%s15204_s0 + %s13731_s20]]   ;;  %s13732_s24 = smov 13  }
   0xe   :  { %12366 = vmatpush3.bf16.msra.mxu1 %v12363_v14  ;;  %v12367_v29 = vpack.c.bf16 %v241_v28, %v240_v27  ;;  %v331_v30 = vld [vmem:[%s13797_s17] sm:$0xff]  ;;  %v332_v31 = vld [vmem:[%s13797_s17 + $0x8] sm:$0xff]  ;;  %v412_v35 = vld [vmem:[%s13806_s21 + $0x10] sm:$0xff]  ;;  %s9454_s27 = sld [smem:[%s15204_s0 + %s13732_s24]]   ;;  %s13733_s28 = smov 64  }
   0xf   :  { %12342 = vmatpush3.bf16.msra.mxu0 %v12339_v5  ;;  %v12371_v32 = vpack.c.bf16 %v332_v31, %v331_v30  ;;  %v410_v33 = vld [vmem:[%s13806_s21] sm:$0xff]  ;;  %v411_v34 = vld [vmem:[%s13806_s21 + $0x8] sm:$0xff]  ;;  %v413_v37 = vld [vmem:[%s13806_s21 + $0x18] sm:$0xff]  ;;  %v719_v5 = vsub.s32 3, %v13870_v0  ;;  %s13735_s30 = smov 15   ;;  %s13736_s4 = smov 14  }
  0x10   :  { %12344 = vmatprep.subr.bf16.mxu0 %v12343_v8  ;;  %12368 = vmatprep.subr.bf16.mxu1 %v12367_v29  ;;  %v13811_v36 = vpack.c.bf16 %v411_v34, %v410_v33  ;;  %v13814_v38 = vpack.c.bf16 %v413_v37, %v412_v35  ;;  %v414_v39 = vld [vmem:[%s13806_s21 + $0x20] sm:$0xff]  ;;  %v415_v40 = vld [vmem:[%s13806_s21 + $0x28] sm:$0xff]  ;;  %v333_v47 = vld [vmem:[%s13797_s17 + $0x10] sm:$0xff]  ;;  %s13737_s8 = smov 16   ;;  %s13738_s13 = smov 18  }
  0x11   :  { %v13821_v41 = vpack.c.bf16 %v415_v40, %v414_v39  ;;  %v9472_v42 = vld [vmem:[%s9446_s25] ss:$0 sm:$0xff]  ;;  %v334_v48 = vld [vmem:[%s13797_s17 + $0x18] sm:$0xff]  ;;  %v416_v52 = vld [vmem:[%s13806_s21 + $0x30] sm:$0xff]  ;;  %s14353_s12 = sld [smem:[%s15204_s0 + %s13737_s8]]   ;;  %s13740_s20 = smov 30  }
  0x12   :  { %12370 = vmatpush3.bf16.msra.mxu1 %v12367_v29  ;;  %v12375_v51 = vpack.c.bf16 %v334_v48, %v333_v47  ;;  %v417_v53 = vld [vmem:[%s13806_s21 + $0x38] sm:$0xff]  ;;  %v418_v55 = vld [vmem:[%s13806_s21 + $0x40] sm:$0xff]  ;;  %v419_v56 = vld [vmem:[%s13806_s21 + $0x48] sm:$0xff]  ;;  %s14378_s16 = sld [smem:[%s15204_s0 + %s13738_s13]]   ;;  %s13741_s24 = smov 21  }
  0x13   :  { %12346 = vmatpush3.bf16.msra.mxu0 %v12343_v8  ;;  %12372 = vmatprep.subr.bf16.mxu1 %v12371_v32  ;;  %v13843_v54 = vpack.c.bf16 %v417_v53, %v416_v52  ;;  %v13851_v57 = vpack.c.bf16 %v419_v56, %v418_v55  ;;  %v420_v58 = vld [vmem:[%s13806_s21 + $0x50] sm:$0xff]  ;;  %v421_v59 = vld [vmem:[%s13806_s21 + $0x58] sm:$0xff]  ;;  %v9476_v1 = vld [vmem:[%s9449_s29] ss:$0 sm:$0xff]  ;;  %v1007_v8 = vsub.s32 6, %v13870_v0  ;;  %s13734_s29 = smov 96  }
  0x14   :  { %12348 = vmatprep.subr.bf16.mxu0 %v12347_v15  ;;  %v13859_v60 = vpack.c.bf16 %v421_v59, %v420_v58  ;;  %s13751_s5 = smov 28  }
  0x15   :  { %s14819_s9 = sld [smem:[%s15204_s0 + %s13751_s5]]  }
  0x17   :  { %12350 = vmatpush3.bf16.msra.mxu0 %v12347_v15 }
  0x18   :  { %12352 = vmatprep.subr.bf16.mxu0 %v12351_v18 }
  0x1b   :  { %12354 = vmatpush3.bf16.msra.mxu0 %v12351_v18 }
  0x1c   :  { %12356 = vmatprep.subr.bf16.mxu0 %v12355_v21 }
  0x1f   :  { %12358 = vmatpush3.bf16.msra.mxu0 %v12355_v21 }
  0x20   :  { %12360 = vmatprep.subr.bf16.mxu0 %v12359_v24 }
  0x23   :  { %12362 = vmatpush3.bf16.msra.mxu0 %v12359_v24 }
  0x24   :  { %10958 = vmatprep.subr.msk.mxu0 %vm157_vm1, %v142_v25 }
  0x27   :  { %10959 = vmatpush3.msk.msra.mxu0 %vm157_vm1, %v142_v25 }
  0x28   :  { %10961 = vmatmul.mubr.msk.f32.vlgmr.msra.gmra.mrb[0].mxu0 %vm150_vm0, %v127_v26  ;;  %12404 = vmatprep.subr.bf16.mxu0 %v13811_v36 }
  0x29   :  { %12406 = vmatpush3.bf16.msra.mxu0 %v13811_v36 }
  0x2a   :  { %12408 = vmatprep.subr.bf16.mxu0 %v13814_v38 }
  0x2d   :  { %12410 = vmatpush3.bf16.msra.mxu0 %v13814_v38 }
  0x2e   :  { %12412 = vmatprep.subr.bf16.mxu0 %v13821_v41 }
  0x31   :  { %12414 = vmatpush3.bf16.msra.mxu0 %v13821_v41 }
  0x32   :  { %12416 = vmatprep.subr.bf16.mxu0 %v13843_v54 }
  0x35   :  { %12418 = vmatpush3.bf16.msra.mxu0 %v13843_v54 }
  0x36   :  { %12420 = vmatprep.subr.bf16.mxu0 %v13851_v57 }
  0x39   :  { %12422 = vmatpush3.bf16.msra.mxu0 %v13851_v57 }
  0x3a   :  { %12424 = vmatprep.subr.bf16.mxu0 %v13859_v60 }
  0x3d   :  { %12426 = vmatpush3.bf16.msra.mxu0 %v13859_v60 }
  0x3e   :  { %12452 = vmatprep.subr.bf16.mxu0 %v13811_v36 }
  0xfb   :  { %v10962_v43 = vpop.f32.mrb[0].mxu0 }
  0xfc   :  { %v233_v44 = vadd.f32 %v10962_v43, %v9472_v42  ;;  %v227_v45 = vpop.f32.mrb[1].mxu0 }
  0xfd   :  { %v228_v46 = vadd.f32 %v9472_v42, %v227_v45 }
  0xfe   :  { %v237_v50 = vmax.f32 %v233_v44, 0.0 }
  0xff   :  { %v236_v49 = vmax.f32 %v228_v46, 0.0 }
 0x101   :  { %10971 = vmatprep.mubr.msk.f32.mxu1 %vm249_vm2, %v236_v49 }
 0x102   :  { %10972 = vmatmul.mubr.msk.f32.vlgmr.msra.gmra.mrb[0].mxu1 %vm249_vm2, %v237_v50 }
 0x103   :  { %12374 = vmatpush3.bf16.msra.mxu1 %v12371_v32  ;;  %10982 = vmatprep.mubr.msk.f32.mxu1 %vm249_vm2, %v236_v49 }
 0x104   :  { %12376 = vmatprep.subr.bf16.mxu1 %v12375_v51 }
 0x107   :  { %12378 = vmatpush3.bf16.msra.mxu1 %v12375_v51 }
 0x108   :  { %12380 = vmatprep.subr.bf16.mxu1 %v13811_v36 }
 0x10a   :  { %10983 = vmatmul.mubr.msk.f32.vlgmr.msra.gmra.mrb[2].mxu1 %vm249_vm2, %v237_v50 }
 0x10b   :  { %12382 = vmatpush3.bf16.msra.mxu1 %v13811_v36 }
 0x10c   :  { %12384 = vmatprep.subr.bf16.mxu1 %v13814_v38 }
 0x10f   :  { %12386 = vmatpush3.bf16.msra.mxu1 %v13814_v38 }
 0x110   :  { %12388 = vmatprep.subr.bf16.mxu1 %v13821_v41 }
 0x113   :  { %12390 = vmatpush3.bf16.msra.mxu1 %v13821_v41 }
 0x114   :  { %12392 = vmatprep.subr.bf16.mxu1 %v13843_v54 }
 0x117   :  { %12394 = vmatpush3.bf16.msra.mxu1 %v13843_v54 }
 0x118   :  { %12396 = vmatprep.subr.bf16.mxu1 %v13851_v57 }
 0x11b   :  { %12398 = vmatpush3.bf16.msra.mxu1 %v13851_v57 }
 0x11c   :  { %12400 = vmatprep.subr.bf16.mxu1 %v13859_v60 }
 0x11f   :  { %12402 = vmatpush3.bf16.msra.mxu1 %v13859_v60 }
 0x120   :  { %12428 = vmatprep.subr.bf16.mxu1 %v13811_v36 }
 0x1d5   :  { %v10973_v62 = vpop.f32.mrb[0].mxu1 }
 0x1d6   :  { %v322_v63 = vpop.f32.mrb[1].mxu1  ;;  %v13880_v10 = vadd.f32 %v10973_v62, %v9476_v1 }
 0x1d7   :  { %v13882_v11 = vadd.f32 %v9476_v1, %v322_v63 }
 0x1dd   :  { %v10984_v12 = vpop.f32.mrb[2].mxu1 }
 0x1de   :  { %v401_v13 = vpop.f32.mrb[3].mxu1  ;;  %v1200_v14 = vrot.slane %v10984_v12, %v425_v2  ;;  %v1296_v15 = vrot.slane %v10984_v12, %v527_v3  ;;  %v1392_v16 = vrot.slane %v10984_v12, %v623_v4  ;;  %v1488_v17 = vrot.slane %v10984_v12, %v719_v5 }
 0x1df   :  { %v426_v18 = vrot.slane %v401_v13, %v425_v2  ;;  %v528_v19 = vrot.slane %v401_v13, %v527_v3  ;;  %v624_v20 = vrot.slane %v401_v13, %v623_v4  ;;  %v720_v21 = vrot.slane %v401_v13, %v719_v5 }
 0x1e0   :  { %v816_v22 = vrot.slane %v401_v13, %v815_v6  ;;  %v912_v23 = vrot.slane %v401_v13, %v911_v7  ;;  %v1008_v24 = vrot.slane %v401_v13, %v1007_v8  ;;  %v1104_v25 = vrot.slane %v401_v13, %v1103_v9 }
 0x1e1   :  { %v427_v26 = vadd.f32 %v426_v18, %v13882_v11  ;;  %v428_v27 = vadd.f32 %v426_v18, %v13880_v10  ;;  %v529_v28 = vadd.f32 %v528_v19, %v13882_v11  ;;  %v530_v29 = vadd.f32 %v528_v19, %v13880_v10 }
 0x1e2   :  { %v625_v30 = vadd.f32 %v624_v20, %v13882_v11  ;;  %v13898_v31 = vadd.f32 %v624_v20, %v13880_v10  ;;  %v721_v32 = vadd.f32 %v720_v21, %v13882_v11  ;;  %v13902_v33 = vadd.f32 %v720_v21, %v13880_v10 }
 0x1e3   :  { %v429_v34 = vmax.f32 %v427_v26, 0.0  ;;  %v531_v35 = vmax.f32 %v529_v28, 0.0  ;;  %v430_v37 = vmax.f32 %v428_v27, 0.0  ;;  %v532_v39 = vmax.f32 %v530_v29, 0.0 }
 0x1e4   :  { %v627_v40 = vmax.f32 %v625_v30, 0.0  ;;  %v13907_v42 = vadd.f32 %v816_v22, %v13882_v11  ;;  %v13910_v43 = vadd.f32 %v816_v22, %v13880_v10  ;;  %v13913_v44 = vadd.f32 %v912_v23, %v13882_v11 }
 0x1e5   :  { %11009 = vmatprep.mubr.msk.f32.mxu1 %vm437_vm3, %v429_v34  ;;  %11036 = vmatprep.mubr.msk.f32.mxu0 %vm437_vm3, %v531_v35  ;;  %v723_v45 = vmax.f32 %v721_v32, 0.0  ;;  %v13918_v46 = vadd.f32 %v912_v23, %v13880_v10  ;;  %v13921_v47 = vadd.f32 %v1008_v24, %v13882_v11  ;;  %v13924_v48 = vadd.f32 %v1008_v24, %v13880_v10 }
 0x1e6   :  { %11010 = vmatmul.mubr.msk.f32.vlgmr.msra.gmra.mrb[4].mxu1 %vm437_vm3, %v430_v37  ;;  %11037 = vmatmul.mubr.msk.f32.vlgmr.msra.gmra.mrb[2].mxu0 %vm437_vm3, %v532_v39  ;;  %v13929_v49 = vadd.f32 %v1104_v25, %v13882_v11  ;;  %v13934_v50 = vadd.f32 %v1104_v25, %v13880_v10  ;;  %v13939_v51 = vadd.f32 %v1200_v14, %v13882_v11  ;;  %v915_v13 = vmax.f32 %v13913_v44, 0.0  ;;  %v519_v39 = vld [vmem:[%s14214_s7] sm:$0xff] }
 0x1e7   :  { %12430 = vmatpush3.bf16.msra.mxu1 %v13811_v36  ;;  %12454 = vmatpush3.bf16.msra.mxu0 %v13811_v36  ;;  %v13942_v52 = vadd.f32 %v1200_v14, %v13880_v10  ;;  %v13945_v53 = vadd.f32 %v1296_v15, %v13882_v11  ;;  %v13948_v55 = vadd.f32 %v1296_v15, %v13880_v10  ;;  %v820_v14 = vmax.f32 %v13910_v43, 0.0 }
 0x1e8   :  { %11063 = vmatprep.mubr.msk.f32.mxu1 %vm437_vm3, %v627_v40  ;;  %11090 = vmatprep.mubr.msk.f32.mxu0 %vm437_vm3, %v723_v45  ;;  %v13951_v56 = vadd.f32 %v1392_v16, %v13882_v11  ;;  %v13954_v58 = vadd.f32 %v1392_v16, %v13880_v10  ;;  %v13959_v59 = vadd.f32 %v1488_v17, %v13882_v11  ;;  %v916_v15 = vmax.f32 %v13918_v46, 0.0  ;;  %v9486_v46 = vld [vmem:[%s14214_s7 + $0x10] sm:$0xff] }
 0x1e9   :  { %12432 = vmatprep.subr.bf16.mxu1 %v13814_v38  ;;  %12456 = vmatprep.subr.bf16.mxu0 %v13814_v38  ;;  %v13964_v61 = vadd.f32 %v1488_v17, %v13880_v10  ;;  %v1584_v62 = vrot.slane %v10984_v12, %v815_v6  ;;  %v1680_v63 = vrot.slane %v10984_v12, %v911_v7  ;;  %v1011_v16 = vmax.f32 %v13921_v47, 0.0 }
 0x1ea   :  { %v1776_v1 = vrot.slane %v10984_v12, %v1007_v8  ;;  %v1872_v2 = vrot.slane %v10984_v12, %v1103_v9  ;;  %v819_v12 = vmax.f32 %v13907_v42, 0.0  ;;  %v1107_v17 = vmax.f32 %v13929_v49, 0.0  ;;  %v9487_v42 = vld [vmem:[%s14214_s7 + $0x18] sm:$0xff] }
 0x1eb   :  { %12434 = vmatpush3.bf16.msra.mxu1 %v13814_v38  ;;  %12458 = vmatpush3.bf16.msra.mxu0 %v13814_v38  ;;  %v13977_v3 = vadd.f32 %v1584_v62, %v13882_v11  ;;  %v13980_v4 = vadd.f32 %v1584_v62, %v13880_v10  ;;  %v13983_v5 = vadd.f32 %v1680_v63, %v13882_v11  ;;  %v1012_v18 = vmax.f32 %v13924_v48, 0.0 }
 0x1ec   :  { %12436 = vmatprep.subr.bf16.mxu1 %v13821_v41  ;;  %12460 = vmatprep.subr.bf16.mxu0 %v13821_v41  ;;  %v13988_v0 = vadd.f32 %v1680_v63, %v13880_v10  ;;  %v13991_v6 = vadd.f32 %v1776_v1, %v13882_v11  ;;  %v13994_v7 = vadd.f32 %v1776_v1, %v13880_v10  ;;  %v1108_v19 = vmax.f32 %v13934_v50, 0.0  ;;  %v9490_v63 = vld [vmem:[%s14214_s7 + $0x20] sm:$0xff] }
 0x1ed   :  { %v13997_v8 = vadd.f32 %v1872_v2, %v13882_v11  ;;  %v14000_v9 = vadd.f32 %v1872_v2, %v13880_v10  ;;  %v628_v10 = vmax.f32 %v13898_v31, 0.0  ;;  %v724_v11 = vmax.f32 %v13902_v33, 0.0  ;;  %v9495_v2 = vld [vmem:[%s14214_s7 + $0x38] sm:$0xff] }
 0x1ee   :  { %v1203_v20 = vmax.f32 %v13939_v51, 0.0  ;;  %v1299_v21 = vmax.f32 %v13945_v53, 0.0  ;;  %v1204_v22 = vmax.f32 %v13942_v52, 0.0  ;;  %v1300_v23 = vmax.f32 %v13948_v55, 0.0 }
 0x1ef   :  { %12438 = vmatpush3.bf16.msra.mxu1 %v13821_v41  ;;  %12462 = vmatpush3.bf16.msra.mxu0 %v13821_v41  ;;  %v1395_v24 = vmax.f32 %v13951_v56, 0.0  ;;  %v1491_v25 = vmax.f32 %v13959_v59, 0.0  ;;  %v1396_v26 = vmax.f32 %v13954_v58, 0.0  ;;  %v1492_v27 = vmax.f32 %v13964_v61, 0.0  ;;  %v9491_v56 = vld [vmem:[%s14214_s7 + $0x28] sm:$0xff] }
 0x1f0   :  { %12440 = vmatprep.subr.bf16.mxu1 %v13843_v54  ;;  %12464 = vmatprep.subr.bf16.mxu0 %v13843_v54  ;;  %v1587_v28 = vmax.f32 %v13977_v3, 0.0  ;;  %v1683_v29 = vmax.f32 %v13983_v5, 0.0  ;;  %v1588_v30 = vmax.f32 %v13980_v4, 0.0  ;;  %v1684_v31 = vmax.f32 %v13988_v0, 0.0  ;;  %v9494_v0 = vld [vmem:[%s14214_s7 + $0x30] sm:$0xff] }
 0x1f1   :  { %v1779_v32 = vmax.f32 %v13991_v6, 0.0  ;;  %v1875_v33 = vmax.f32 %v13997_v8, 0.0 }
 0x1f3   :  { %12442 = vmatpush3.bf16.msra.mxu1 %v13843_v54  ;;  %12466 = vmatpush3.bf16.msra.mxu0 %v13843_v54 }
 0x1f4   :  { %12444 = vmatprep.subr.bf16.mxu1 %v13851_v57  ;;  %12468 = vmatprep.subr.bf16.mxu0 %v13851_v57 }
 0x1f7   :  { %12446 = vmatpush3.bf16.msra.mxu1 %v13851_v57  ;;  %12470 = vmatpush3.bf16.msra.mxu0 %v13851_v57 }
 0x1f8   :  { %12448 = vmatprep.subr.bf16.mxu1 %v13859_v60  ;;  %12472 = vmatprep.subr.bf16.mxu0 %v13859_v60 }
 0x1fb   :  { %12450 = vmatpush3.bf16.msra.mxu1 %v13859_v60  ;;  %12474 = vmatpush3.bf16.msra.mxu0 %v13859_v60 }
 0x1fc   :  { %12476 = vmatprep.subr.bf16.mxu1 %v13811_v36  ;;  %12500 = vmatprep.subr.bf16.mxu0 %v13811_v36 }
 0x1fe   :  { %11064 = vmatmul.mubr.msk.f32.vlgmr.msra.gmra.mrb[6].mxu1 %vm437_vm3, %v628_v10  ;;  %11091 = vmatmul.mubr.msk.f32.vlgmr.msra.gmra.mrb[4].mxu0 %vm437_vm3, %v724_v11 }
 0x1ff   :  { %12478 = vmatpush3.bf16.msra.mxu1 %v13811_v36  ;;  %11117 = vmatprep.mubr.msk.f32.mxu1 %vm437_vm3, %v819_v12 }
 0x200   :  { %12502 = vmatpush3.bf16.msra.mxu0 %v13811_v36  ;;  %11144 = vmatprep.mubr.msk.f32.mxu0 %vm437_vm3, %v915_v13 }
 0x201   :  { %12480 = vmatprep.subr.bf16.mxu1 %v13814_v38  ;;  %12504 = vmatprep.subr.bf16.mxu0 %v13814_v38 }
 0x203   :  { %12482 = vmatpush3.bf16.msra.mxu1 %v13814_v38 }
 0x204   :  { %12506 = vmatpush3.bf16.msra.mxu0 %v13814_v38  ;;  %12484 = vmatprep.subr.bf16.mxu1 %v13821_v41 }
 0x205   :  { %12508 = vmatprep.subr.bf16.mxu0 %v13821_v41 }
 0x207   :  { %12486 = vmatpush3.bf16.msra.mxu1 %v13821_v41 }
 0x208   :  { %12510 = vmatpush3.bf16.msra.mxu0 %v13821_v41  ;;  %12488 = vmatprep.subr.bf16.mxu1 %v13843_v54 }
 0x209   :  { %12512 = vmatprep.subr.bf16.mxu0 %v13843_v54 }
 0x20b   :  { %12490 = vmatpush3.bf16.msra.mxu1 %v13843_v54 }
 0x20c   :  { %12514 = vmatpush3.bf16.msra.mxu0 %v13843_v54  ;;  %12492 = vmatprep.subr.bf16.mxu1 %v13851_v57 }
 0x20d   :  { %12516 = vmatprep.subr.bf16.mxu0 %v13851_v57 }
 0x20f   :  { %12494 = vmatpush3.bf16.msra.mxu1 %v13851_v57 }
 0x210   :  { %12518 = vmatpush3.bf16.msra.mxu0 %v13851_v57  ;;  %12496 = vmatprep.subr.bf16.mxu1 %v13859_v60 }
 0x211   :  { %12520 = vmatprep.subr.bf16.mxu0 %v13859_v60 }
 0x213   :  { %12498 = vmatpush3.bf16.msra.mxu1 %v13859_v60 }
 0x214   :  { %12522 = vmatpush3.bf16.msra.mxu0 %v13859_v60  ;;  %12524 = vmatprep.subr.bf16.mxu1 %v13811_v36 }
 0x215   :  { %12548 = vmatprep.subr.bf16.mxu0 %v13811_v36 }
 0x216   :  { %11118 = vmatmul.mubr.msk.f32.vlgmr.msra.gmra.mrb[8].mxu1 %vm437_vm3, %v820_v14  ;;  %v9499_v14 = vld [vmem:[%s14214_s7 + $0x48] sm:$0xff] }
 0x217   :  { %11145 = vmatmul.mubr.msk.f32.vlgmr.msra.gmra.mrb[6].mxu0 %vm437_vm3, %v916_v15  ;;  %12526 = vmatpush3.bf16.msra.mxu1 %v13811_v36 }
 0x218   :  { %11171 = vmatprep.mubr.msk.f32.mxu1 %vm437_vm3, %v1011_v16  ;;  %12550 = vmatpush3.bf16.msra.mxu0 %v13811_v36 }
 0x219   :  { %11198 = vmatprep.mubr.msk.f32.mxu0 %vm437_vm3, %v1107_v17  ;;  %12528 = vmatprep.subr.bf16.mxu1 %v13814_v38 }
 0x21a   :  { %12552 = vmatprep.subr.bf16.mxu0 %v13814_v38 }
 0x21b   :  { %12530 = vmatpush3.bf16.msra.mxu1 %v13814_v38 }
 0x21c   :  { %12554 = vmatpush3.bf16.msra.mxu0 %v13814_v38  ;;  %12532 = vmatprep.subr.bf16.mxu1 %v13821_v41 }
 0x21d   :  { %12556 = vmatprep.subr.bf16.mxu0 %v13821_v41 }
 0x21f   :  { %12534 = vmatpush3.bf16.msra.mxu1 %v13821_v41 }
 0x220   :  { %12558 = vmatpush3.bf16.msra.mxu0 %v13821_v41  ;;  %12536 = vmatprep.subr.bf16.mxu1 %v13843_v54 }
 0x221   :  { %12560 = vmatprep.subr.bf16.mxu0 %v13843_v54 }
 0x223   :  { %12538 = vmatpush3.bf16.msra.mxu1 %v13843_v54 }
 0x224   :  { %12562 = vmatpush3.bf16.msra.mxu0 %v13843_v54  ;;  %12540 = vmatprep.subr.bf16.mxu1 %v13851_v57 }
 0x225   :  { %12564 = vmatprep.subr.bf16.mxu0 %v13851_v57 }
 0x227   :  { %12542 = vmatpush3.bf16.msra.mxu1 %v13851_v57 }
 0x228   :  { %12566 = vmatpush3.bf16.msra.mxu0 %v13851_v57  ;;  %12544 = vmatprep.subr.bf16.mxu1 %v13859_v60 }
 0x229   :  { %12568 = vmatprep.subr.bf16.mxu0 %v13859_v60 }
 0x22b   :  { %12546 = vmatpush3.bf16.msra.mxu1 %v13859_v60 }
 0x22c   :  { %12570 = vmatpush3.bf16.msra.mxu0 %v13859_v60  ;;  %12572 = vmatprep.subr.bf16.mxu1 %v13811_v36 }
 0x22d   :  { %12596 = vmatprep.subr.bf16.mxu0 %v13811_v36 }
 0x22e   :  { %11172 = vmatmul.mubr.msk.f32.vlgmr.msra.gmra.mrb[10].mxu1 %vm437_vm3, %v1012_v18  ;;  %v9498_v18 = vld [vmem:[%s14214_s7 + $0x40] sm:$0xff] }
 0x22f   :  { %11199 = vmatmul.mubr.msk.f32.vlgmr.msra.gmra.mrb[8].mxu0 %vm437_vm3, %v1108_v19  ;;  %12574 = vmatpush3.bf16.msra.mxu1 %v13811_v36 }
 0x230   :  { %11225 = vmatprep.mubr.msk.f32.mxu1 %vm437_vm3, %v1203_v20  ;;  %12598 = vmatpush3.bf16.msra.mxu0 %v13811_v36  ;;  %v9503_v20 = vld [vmem:[%s14214_s7 + $0x58] sm:$0xff] }
 0x231   :  { %11252 = vmatprep.mubr.msk.f32.mxu0 %vm437_vm3, %v1299_v21  ;;  %12576 = vmatprep.subr.bf16.mxu1 %v13814_v38 }
 0x232   :  { %12600 = vmatprep.subr.bf16.mxu0 %v13814_v38 }
 0x233   :  { %12578 = vmatpush3.bf16.msra.mxu1 %v13814_v38 }
 0x234   :  { %12602 = vmatpush3.bf16.msra.mxu0 %v13814_v38  ;;  %12580 = vmatprep.subr.bf16.mxu1 %v13821_v41 }
 0x235   :  { %12604 = vmatprep.subr.bf16.mxu0 %v13821_v41 }
 0x237   :  { %12582 = vmatpush3.bf16.msra.mxu1 %v13821_v41 }
 0x238   :  { %12606 = vmatpush3.bf16.msra.mxu0 %v13821_v41  ;;  %12584 = vmatprep.subr.bf16.mxu1 %v13843_v54 }
 0x239   :  { %12608 = vmatprep.subr.bf16.mxu0 %v13843_v54 }
 0x23b   :  { %12586 = vmatpush3.bf16.msra.mxu1 %v13843_v54 }
 0x23c   :  { %12610 = vmatpush3.bf16.msra.mxu0 %v13843_v54  ;;  %12588 = vmatprep.subr.bf16.mxu1 %v13851_v57 }
 0x23d   :  { %12612 = vmatprep.subr.bf16.mxu0 %v13851_v57 }
 0x23f   :  { %12590 = vmatpush3.bf16.msra.mxu1 %v13851_v57 }
 0x240   :  { %12614 = vmatpush3.bf16.msra.mxu0 %v13851_v57  ;;  %12592 = vmatprep.subr.bf16.mxu1 %v13859_v60 }
 0x241   :  { %12616 = vmatprep.subr.bf16.mxu0 %v13859_v60 }
 0x243   :  { %12594 = vmatpush3.bf16.msra.mxu1 %v13859_v60 }
 0x244   :  { %12618 = vmatpush3.bf16.msra.mxu0 %v13859_v60  ;;  %12620 = vmatprep.subr.bf16.mxu1 %v13811_v36 }
 0x245   :  { %12644 = vmatprep.subr.bf16.mxu0 %v13811_v36 }
 0x246   :  { %11226 = vmatmul.mubr.msk.f32.vlgmr.msra.gmra.mrb[12].mxu1 %vm437_vm3, %v1204_v22 }
 0x247   :  { %11253 = vmatmul.mubr.msk.f32.vlgmr.msra.gmra.mrb[10].mxu0 %vm437_vm3, %v1300_v23  ;;  %12622 = vmatpush3.bf16.msra.mxu1 %v13811_v36 }
 0x248   :  { %11279 = vmatprep.mubr.msk.f32.mxu1 %vm437_vm3, %v1395_v24  ;;  %12646 = vmatpush3.bf16.msra.mxu0 %v13811_v36 }
 0x249   :  { %11306 = vmatprep.mubr.msk.f32.mxu0 %vm437_vm3, %v1491_v25  ;;  %12624 = vmatprep.subr.bf16.mxu1 %v13814_v38  ;;  %v9502_v25 = vld [vmem:[%s14214_s7 + $0x50] sm:$0xff] }
 0x24a   :  { %12648 = vmatprep.subr.bf16.mxu0 %v13814_v38 }
 0x24b   :  { %12626 = vmatpush3.bf16.msra.mxu1 %v13814_v38 }
 0x24c   :  { %12650 = vmatpush3.bf16.msra.mxu0 %v13814_v38  ;;  %12628 = vmatprep.subr.bf16.mxu1 %v13821_v41 }
 0x24d   :  { %12652 = vmatprep.subr.bf16.mxu0 %v13821_v41 }
 0x24f   :  { %12630 = vmatpush3.bf16.msra.mxu1 %v13821_v41 }
 0x250   :  { %12654 = vmatpush3.bf16.msra.mxu0 %v13821_v41  ;;  %12632 = vmatprep.subr.bf16.mxu1 %v13843_v54 }
 0x251   :  { %12656 = vmatprep.subr.bf16.mxu0 %v13843_v54 }
 0x253   :  { %12634 = vmatpush3.bf16.msra.mxu1 %v13843_v54 }
 0x254   :  { %12658 = vmatpush3.bf16.msra.mxu0 %v13843_v54  ;;  %12636 = vmatprep.subr.bf16.mxu1 %v13851_v57 }
 0x255   :  { %12660 = vmatprep.subr.bf16.mxu0 %v13851_v57 }
 0x257   :  { %12638 = vmatpush3.bf16.msra.mxu1 %v13851_v57 }
 0x258   :  { %12662 = vmatpush3.bf16.msra.mxu0 %v13851_v57  ;;  %12640 = vmatprep.subr.bf16.mxu1 %v13859_v60 }
 0x259   :  { %12664 = vmatprep.subr.bf16.mxu0 %v13859_v60 }
 0x25b   :  { %12642 = vmatpush3.bf16.msra.mxu1 %v13859_v60 }
 0x25c   :  { %12666 = vmatpush3.bf16.msra.mxu0 %v13859_v60  ;;  %12668 = vmatprep.subr.bf16.mxu1 %v13811_v36 }
 0x25d   :  { %12692 = vmatprep.subr.bf16.mxu0 %v13811_v36 }
 0x25e   :  { %11280 = vmatmul.mubr.msk.f32.vlgmr.msra.gmra.mrb[14].mxu1 %vm437_vm3, %v1396_v26 }
 0x25f   :  { %11307 = vmatmul.mubr.msk.f32.vlgmr.msra.gmra.mrb[12].mxu0 %vm437_vm3, %v1492_v27  ;;  %12670 = vmatpush3.bf16.msra.mxu1 %v13811_v36 }
 0x260   :  { %11333 = vmatprep.mubr.msk.f32.mxu1 %vm437_vm3, %v1587_v28  ;;  %12694 = vmatpush3.bf16.msra.mxu0 %v13811_v36 }
 0x261   :  { %11360 = vmatprep.mubr.msk.f32.mxu0 %vm437_vm3, %v1683_v29  ;;  %12672 = vmatprep.subr.bf16.mxu1 %v13814_v38 }
 0x262   :  { %12696 = vmatprep.subr.bf16.mxu0 %v13814_v38 }
 0x263   :  { %12674 = vmatpush3.bf16.msra.mxu1 %v13814_v38 }
 0x264   :  { %12698 = vmatpush3.bf16.msra.mxu0 %v13814_v38  ;;  %12676 = vmatprep.subr.bf16.mxu1 %v13821_v41 }
 0x265   :  { %12700 = vmatprep.subr.bf16.mxu0 %v13821_v41 }
 0x267   :  { %12678 = vmatpush3.bf16.msra.mxu1 %v13821_v41 }
 0x268   :  { %12702 = vmatpush3.bf16.msra.mxu0 %v13821_v41  ;;  %12680 = vmatprep.subr.bf16.mxu1 %v13843_v54 }
 0x269   :  { %12704 = vmatprep.subr.bf16.mxu0 %v13843_v54 }
 0x26b   :  { %12682 = vmatpush3.bf16.msra.mxu1 %v13843_v54 }
 0x26c   :  { %12706 = vmatpush3.bf16.msra.mxu0 %v13843_v54  ;;  %12684 = vmatprep.subr.bf16.mxu1 %v13851_v57 }
 0x26d   :  { %12708 = vmatprep.subr.bf16.mxu0 %v13851_v57 }
 0x26f   :  { %12686 = vmatpush3.bf16.msra.mxu1 %v13851_v57 }
 0x270   :  { %12710 = vmatpush3.bf16.msra.mxu0 %v13851_v57  ;;  %12688 = vmatprep.subr.bf16.mxu1 %v13859_v60 }
 0x271   :  { %12712 = vmatprep.subr.bf16.mxu0 %v13859_v60 }
 0x273   :  { %12690 = vmatpush3.bf16.msra.mxu1 %v13859_v60 }
 0x274   :  { %12714 = vmatpush3.bf16.msra.mxu0 %v13859_v60  ;;  %12716 = vmatprep.subr.bf16.mxu1 %v13811_v36 }
 0x275   :  { %12740 = vmatprep.subr.bf16.mxu0 %v13811_v36 }
 0x276   :  { %11334 = vmatmul.mubr.msk.f32.vlgmr.msra.gmra.mrb[16].mxu1 %vm437_vm3, %v1588_v30 }
 0x277   :  { %11361 = vmatmul.mubr.msk.f32.vlgmr.msra.gmra.mrb[14].mxu0 %vm437_vm3, %v1684_v31  ;;  %12718 = vmatpush3.bf16.msra.mxu1 %v13811_v36 }
 0x278   :  { %11387 = vmatprep.mubr.msk.f32.mxu1 %vm437_vm3, %v1779_v32  ;;  %12742 = vmatpush3.bf16.msra.mxu0 %v13811_v36  ;;  %v1780_v36 = vmax.f32 %v13994_v7, 0.0 }
 0x279   :  { %11414 = vmatprep.mubr.msk.f32.mxu0 %vm437_vm3, %v1875_v33  ;;  %12720 = vmatprep.subr.bf16.mxu1 %v13814_v38  ;;  %v1989_v33 = vld [vmem:[%s14245_s11] sm:$0xff] }
 0x27a   :  { %12744 = vmatprep.subr.bf16.mxu0 %v13814_v38 }
 0x27b   :  { %12722 = vmatpush3.bf16.msra.mxu1 %v13814_v38 }
 0x27c   :  { %12746 = vmatpush3.bf16.msra.mxu0 %v13814_v38  ;;  %12724 = vmatprep.subr.bf16.mxu1 %v13821_v41  ;;  %v1876_v38 = vmax.f32 %v14000_v9, 0.0 }
 0x27d   :  { %12748 = vmatprep.subr.bf16.mxu0 %v13821_v41 }
 0x27f   :  { %12726 = vmatpush3.bf16.msra.mxu1 %v13821_v41 }
 0x280   :  { %12750 = vmatpush3.bf16.msra.mxu0 %v13821_v41  ;;  %12728 = vmatprep.subr.bf16.mxu1 %v13843_v54  ;;  %v14216_v41 = vld [vmem:[%s9451_s3] ss:$0 sm:$0xff]  ;;  %s9456_s3 = sld [smem:[%s15204_s0 + %s13735_s30]]   ;;  %s13750_s30 = smov 24  }
 0x281   :  { %12752 = vmatprep.subr.bf16.mxu0 %v13843_v54 }
 0x283   :  { %12730 = vmatpush3.bf16.msra.mxu1 %v13843_v54 }
 0x284   :  { %12754 = vmatpush3.bf16.msra.mxu0 %v13843_v54  ;;  %12732 = vmatprep.subr.bf16.mxu1 %v13851_v57 }
 0x285   :  { %12756 = vmatprep.subr.bf16.mxu0 %v13851_v57 }
 0x287   :  { %12734 = vmatpush3.bf16.msra.mxu1 %v13851_v57 }
 0x288   :  { %12758 = vmatpush3.bf16.msra.mxu0 %v13851_v57  ;;  %12736 = vmatprep.subr.bf16.mxu1 %v13859_v60  ;;  %v520_v57 = vld [vmem:[%s14214_s7 + $0x8] sm:$0xff] }
 0x289   :  { %12760 = vmatprep.subr.bf16.mxu0 %v13859_v60 }
 0x28b   :  { %12738 = vmatpush3.bf16.msra.mxu1 %v13859_v60 }
 0x28c   :  { %12762 = vmatpush3.bf16.msra.mxu0 %v13859_v60 }
 0x28e   :  { %11388 = vmatmul.mubr.msk.f32.vlgmr.msra.gmra.mrb[18].mxu1 %vm437_vm3, %v1780_v36 }
 0x28f   :  { %11415 = vmatmul.mubr.msk.f32.vlgmr.msra.gmra.mrb[16].mxu0 %vm437_vm3, %v1876_v38  ;;  %11421 = vmatprep.mubr.msk.f32.mxu1 %vm1991_vm4, %v1989_v33  ;;  %v9507_v38 = vld [vmem:[%s14214_s7 + $0x68] sm:$0xff] }
 0x290   :  { %11450 = vmatprep.mubr.msk.f32.mxu0 %vm1991_vm4, %v1989_v33 }
 0x2b9   :  { %v11011_v54 = vpop.f32.mrb[4].mxu1  ;;  %v11038_v60 = vpop.f32.mrb[2].mxu0 }
 0x2ba   :  { %v516_v34 = vadd.f32 %v11011_v54, %v14216_v41  ;;  %v611_v35 = vadd.f32 %v11038_v60, %v14216_v41  ;;  %v510_v37 = vpop.f32.mrb[5].mxu1  ;;  %v605_v40 = vpop.f32.mrb[3].mxu0 }
 0x2bb   :  { %v511_v43 = vadd.f32 %v14216_v41, %v510_v37  ;;  %v606_v44 = vadd.f32 %v14216_v41, %v605_v40  ;;  %v9511_v37 = vld [vmem:[%s14214_s7 + $0x78] sm:$0xff] }
 0x2bc   :  { %v522_v45 = vadd.f32 %v520_v57, %v516_v34  ;;  %v618_v49 = vadd.f32 %v9487_v42, %v611_v35  ;;  %v9506_v34 = vld [vmem:[%s14214_s7 + $0x60] sm:$0xff] }
 0x2bd   :  { %v521_v47 = vadd.f32 %v519_v39, %v511_v43  ;;  %v617_v51 = vadd.f32 %v9486_v46, %v606_v44  ;;  %v9510_v44 = vld [vmem:[%s14214_s7 + $0x70] sm:$0xff] }
 0x2be   :  { %v524_v48 = vmax.f32 %v522_v45, -1e+30 }
 0x2bf   :  { %v523_v50 = vmax.f32 %v521_v47, -1e+30 }
 0x2c0   :  { %v620_v52 = vmax.f32 %v524_v48, %v618_v49 }
 0x2c1   :  { %v619_v53 = vmax.f32 %v523_v50, %v617_v51 }
 0x2d1   :  { %v11065_v55 = vpop.f32.mrb[6].mxu1  ;;  %v11092_v58 = vpop.f32.mrb[4].mxu0 }
 0x2d2   :  { %v707_v59 = vadd.f32 %v11065_v55, %v14216_v41  ;;  %v803_v61 = vadd.f32 %v11092_v58, %v14216_v41  ;;  %v701_v62 = vpop.f32.mrb[7].mxu1  ;;  %v797_v1 = vpop.f32.mrb[5].mxu0 }
 0x2d3   :  { %v702_v3 = vadd.f32 %v14216_v41, %v701_v62  ;;  %v798_v4 = vadd.f32 %v14216_v41, %v797_v1  ;;  %v9519_v62 = vld [vmem:[%s14214_s7 + $0x98] sm:$0xff] }
 0x2d4   :  { %v714_v5 = vadd.f32 %v9491_v56, %v707_v59  ;;  %v810_v8 = vadd.f32 %v9495_v2, %v803_v61  ;;  %v9514_v59 = vld [vmem:[%s14214_s7 + $0x80] sm:$0xff] }
 0x2d5   :  { %v713_v6 = vadd.f32 %v9490_v63, %v702_v3  ;;  %v809_v10 = vadd.f32 %v9494_v0, %v798_v4  ;;  %v9518_v4 = vld [vmem:[%s14214_s7 + $0x90] sm:$0xff] }
 0x2d6   :  { %v716_v7 = vmax.f32 %v620_v52, %v714_v5 }
 0x2d7   :  { %v715_v9 = vmax.f32 %v619_v53, %v713_v6  ;;  %v9515_v53 = vld [vmem:[%s14214_s7 + $0x88] sm:$0xff] }
 0x2d8   :  { %v812_v11 = vmax.f32 %v716_v7, %v810_v8 }
 0x2d9   :  { %v811_v12 = vmax.f32 %v715_v9, %v809_v10 }
 0x2e9   :  { %v11119_v13 = vpop.f32.mrb[8].mxu1 }
 0x2ea   :  { %v899_v15 = vadd.f32 %v11119_v13, %v14216_v41  ;;  %v11146_v16 = vpop.f32.mrb[6].mxu0  ;;  %v893_v17 = vpop.f32.mrb[9].mxu1 }
 0x2eb   :  { %v995_v19 = vadd.f32 %v11146_v16, %v14216_v41  ;;  %v894_v21 = vadd.f32 %v14216_v41, %v893_v17  ;;  %v989_v22 = vpop.f32.mrb[7].mxu0  ;;  %v9522_v16 = vld [vmem:[%s14214_s7 + $0xa0] sm:$0xff] }
 0x2ec   :  { %v906_v23 = vadd.f32 %v9499_v14, %v899_v15  ;;  %v990_v24 = vadd.f32 %v14216_v41, %v989_v22 }
 0x2ed   :  { %v905_v26 = vadd.f32 %v9498_v18, %v894_v21  ;;  %v1002_v28 = vadd.f32 %v9503_v20, %v995_v19  ;;  %v9527_v18 = vld [vmem:[%s14214_s7 + $0xb8] sm:$0xff] }
 0x2ee   :  { %v908_v27 = vmax.f32 %v812_v11, %v906_v23  ;;  %v1001_v30 = vadd.f32 %v9502_v25, %v990_v24  ;;  %v9526_v23 = vld [vmem:[%s14214_s7 + $0xb0] sm:$0xff] }
 0x2ef   :  { %v907_v29 = vmax.f32 %v811_v12, %v905_v26  ;;  %v9523_v12 = vld [vmem:[%s14214_s7 + $0xa8] sm:$0xff] }
 0x2f0   :  { %v1004_v31 = vmax.f32 %v908_v27, %v1002_v28 }
 0x2f1   :  { %v1003_v32 = vmax.f32 %v907_v29, %v1001_v30 }
 0x301   :  { %v11173_v36 = vpop.f32.mrb[10].mxu1 }
 0x302   :  { %v1091_v54 = vadd.f32 %v11173_v36, %v14216_v41  ;;  %v11200_v57 = vpop.f32.mrb[8].mxu0  ;;  %v1085_v60 = vpop.f32.mrb[11].mxu1 }
 0x303   :  { %v1187_v35 = vadd.f32 %v11200_v57, %v14216_v41  ;;  %v1086_v39 = vadd.f32 %v14216_v41, %v1085_v60  ;;  %v1181_v40 = vpop.f32.mrb[9].mxu0  ;;  %v9535_v60 = vld [vmem:[%s14214_s7 + $0xd8] sm:$0xff] }
 0x304   :  { %v1098_v42 = vadd.f32 %v9507_v38, %v1091_v54  ;;  %v1182_v43 = vadd.f32 %v14216_v41, %v1181_v40  ;;  %v9530_v54 = vld [vmem:[%s14214_s7 + $0xc0] sm:$0xff]  ;;  %v9534_v40 = vld [vmem:[%s14214_s7 + $0xd0] sm:$0xff] }
 0x305   :  { %v1097_v45 = vadd.f32 %v9506_v34, %v1086_v39  ;;  %v1194_v47 = vadd.f32 %v9511_v37, %v1187_v35 }
 0x306   :  { %v1100_v46 = vmax.f32 %v1004_v31, %v1098_v42  ;;  %v1193_v49 = vadd.f32 %v9510_v44, %v1182_v43 }
 0x307   :  { %v1099_v48 = vmax.f32 %v1003_v32, %v1097_v45  ;;  %v9531_v32 = vld [vmem:[%s14214_s7 + $0xc8] sm:$0xff] }
 0x308   :  { %v1196_v50 = vmax.f32 %v1100_v46, %v1194_v47 }
 0x309   :  { %v1195_v51 = vmax.f32 %v1099_v48, %v1193_v49 }
 0x319   :  { %v11227_v52 = vpop.f32.mrb[12].mxu1 }
 0x31a   :  { %v1283_v55 = vadd.f32 %v11227_v52, %v14216_v41  ;;  %v11254_v56 = vpop.f32.mrb[10].mxu0  ;;  %v1277_v58 = vpop.f32.mrb[13].mxu1 }
 0x31b   :  { %v1379_v61 = vadd.f32 %v11254_v56, %v14216_v41  ;;  %v1278_v63 = vadd.f32 %v14216_v41, %v1277_v58  ;;  %v1373_v1 = vpop.f32.mrb[11].mxu0  ;;  %v9543_v58 = vld [vmem:[%s14214_s7 + $0xf8] sm:$0xff] }
 0x31c   :  { %v1290_v2 = vadd.f32 %v9515_v53, %v1283_v55  ;;  %v1374_v3 = vadd.f32 %v14216_v41, %v1373_v1  ;;  %v9538_v55 = vld [vmem:[%s14214_s7 + $0xe0] sm:$0xff]  ;;  %v9542_v1 = vld [vmem:[%s14214_s7 + $0xf0] sm:$0xff] }
 0x31d   :  { %v1289_v5 = vadd.f32 %v9514_v59, %v1278_v63  ;;  %v1386_v6 = vadd.f32 %v9519_v62, %v1379_v61 }
 0x31e   :  { %v1292_v0 = vmax.f32 %v1196_v50, %v1290_v2  ;;  %v1385_v8 = vadd.f32 %v9518_v4, %v1374_v3  ;;  %v9539_v50 = vld [vmem:[%s14214_s7 + $0xe8] sm:$0xff]  ;;  %s9455_s7 = sld [smem:[%s15204_s0 + %s13736_s4]]  }
 0x31f   :  { %v1291_v7 = vmax.f32 %v1195_v51, %v1289_v5  ;;  %v1966_v5 = vld [vmem:[%s9444_s15 + $0x8] sm:$0xff]  ;;  %s14680_s4 = sld [smem:[%s15204_s0 + %s13750_s30]]  }
 0x320   :  { %v1388_v9 = vmax.f32 %v1292_v0, %v1386_v6 }
 0x321   :  { %v1387_v10 = vmax.f32 %v1291_v7, %v1385_v8  ;;  %v1965_v8 = vld [vmem:[%s9444_s15] sm:$0xff] }
 0x331   :  { %v11281_v11 = vpop.f32.mrb[14].mxu1 }
 0x332   :  { %v1475_v13 = vadd.f32 %v11281_v11, %v14216_v41  ;;  %v11308_v14 = vpop.f32.mrb[12].mxu0  ;;  %v1469_v15 = vpop.f32.mrb[15].mxu1 }
 0x333   :  { %v1571_v17 = vadd.f32 %v11308_v14, %v14216_v41  ;;  %v1470_v19 = vadd.f32 %v14216_v41, %v1469_v15  ;;  %v1565_v20 = vpop.f32.mrb[13].mxu0 }
 0x334   :  { %v1482_v21 = vadd.f32 %v9523_v12, %v1475_v13  ;;  %v1566_v22 = vadd.f32 %v14216_v41, %v1565_v20  ;;  %v9545_v13 = vld [vmem:[%s9453_s23] ss:$0 sm:$0xff]  ;;  %v2074_v20 = vld [vmem:[%s9454_s27 + $0x8] sm:$0xff]  ;;  %s14429_s23 = sld [smem:[%s15204_s0 + %s13740_s20]]  }
 0x335   :  { %v1481_v24 = vadd.f32 %v9522_v16, %v1470_v19  ;;  %v1578_v26 = vadd.f32 %v9527_v18, %v1571_v17  ;;  %v2073_v19 = vld [vmem:[%s9454_s27] sm:$0xff] }
 0x336   :  { %v1484_v25 = vmax.f32 %v1388_v9, %v1482_v21  ;;  %v1577_v28 = vadd.f32 %v9526_v23, %v1566_v22  ;;  %v9544_v9 = vld [vmem:[%s9452_s19] ss:$0 sm:$0xff]  ;;  %v14303_v22 = vpack.c.bf16 %v2074_v20, %v2073_v19  ;;  %v2075_v23 = vld [vmem:[%s9454_s27 + $0x10] sm:$0xff] }
 0x337   :  { %v1483_v27 = vmax.f32 %v1387_v10, %v1481_v24  ;;  %v2076_v24 = vld [vmem:[%s9454_s27 + $0x18] sm:$0xff]  ;;  %s14442_s27 = sld [smem:[%s15204_s0 + %s13741_s24]]   ;;  %s13749_s24 = smov 27  }
 0x338   :  { %v1580_v29 = vmax.f32 %v1484_v25, %v1578_v26  ;;  %v14306_v25 = vld [vmem:[%s14245_s11 + $0x8] sm:$0xff]  ;;  %v14309_v26 = vpack.c.bf16 %v2076_v24, %v2075_v23 }
 0x339   :  { %v1579_v30 = vmax.f32 %v1483_v27, %v1577_v28  ;;  %v2165_v27 = vld [vmem:[%s9456_s3] sm:$0xff]  ;;  %v2166_v28 = vld [vmem:[%s9456_s3 + $0x8] sm:$0xff] }
 0x349   :  { %v11335_v31 = vpop.f32.mrb[16].mxu1 }
 0x34a   :  { %v1667_v33 = vadd.f32 %v11335_v31, %v14216_v41  ;;  %v11362_v36 = vpop.f32.mrb[14].mxu0  ;;  %v1661_v38 = vpop.f32.mrb[17].mxu1  ;;  %v2167_v31 = vld [vmem:[%s9456_s3 + $0x10] sm:$0xff] }
 0x34b   :  { %v1763_v57 = vadd.f32 %v11362_v36, %v14216_v41  ;;  %v1662_v34 = vadd.f32 %v14216_v41, %v1661_v38  ;;  %v1757_v35 = vpop.f32.mrb[15].mxu0 }
 0x34c   :  { %v1674_v37 = vadd.f32 %v9531_v32, %v1667_v33  ;;  %v1758_v39 = vadd.f32 %v14216_v41, %v1757_v35  ;;  %v2168_v32 = vld [vmem:[%s9456_s3 + $0x18] sm:$0xff]  ;;  %v14355_v35 = vld [vmem:[%s9455_s7] ss:$0 sm:$0xff]  ;;  %s13744_s3 = smov 22   ;;  %s13745_s7 = smov 19  }
 0x34d   :  { %v1673_v42 = vadd.f32 %v9530_v54, %v1662_v34  ;;  %v1770_v44 = vadd.f32 %v9535_v60, %v1763_v57  ;;  %v14323_v38 = vpack.c.bf16 %v2168_v32, %v2167_v31  ;;  %v14332_v60 = vld [vmem:[%s14245_s11 + $0x10] sm:$0xff]  ;;  %v14338_v34 = vld [vmem:[%s14245_s11 + $0x18] sm:$0xff]  ;;  %s14472_s6 = sld [smem:[%s15204_s0 + %s13744_s3]]  }
 0x34e   :  { %v1676_v43 = vmax.f32 %v1580_v29, %v1674_v37  ;;  %v1769_v46 = vadd.f32 %v9534_v40, %v1758_v39  ;;  %v14320_v29 = vpack.c.bf16 %v2166_v28, %v2165_v27  ;;  %v9597_v27 = vld [vmem:[%s14378_s16 + $0x28] sm:$0xff]  ;;  %s14488_s10 = sld [smem:[%s15204_s0 + %s13745_s7]]  }
 0x34f   :  { %v1675_v45 = vmax.f32 %v1579_v30, %v1673_v42 }
 0x350   :  { %v1772_v47 = vmax.f32 %v1676_v43, %v1770_v44  ;;  %v2329_v44 = vld [vmem:[%s14353_s12] sm:$0xff] }
 0x351   :  { %v1771_v48 = vmax.f32 %v1675_v45, %v1769_v46  ;;  %v2330_v45 = vld [vmem:[%s14353_s12 + $0x8] sm:$0xff] }
 0x361   :  { %v11389_v49 = vpop.f32.mrb[18].mxu1 }
 0x362   :  { %v1859_v51 = vadd.f32 %v11389_v49, %v14216_v41  ;;  %v11416_v52 = vpop.f32.mrb[16].mxu0  ;;  %v1853_v53 = vpop.f32.mrb[19].mxu1 }
 0x363   :  { %v1955_v56 = vadd.f32 %v11416_v52, %v14216_v41  ;;  %v1854_v59 = vadd.f32 %v14216_v41, %v1853_v53  ;;  %v1949_v61 = vpop.f32.mrb[17].mxu0  ;;  %v2420_v52 = vld [vmem:[%s14378_s16 + $0x8] sm:$0xff] }
 0x364   :  { %v1866_v62 = vadd.f32 %v9539_v50, %v1859_v51  ;;  %v1950_v63 = vadd.f32 %v14216_v41, %v1949_v61  ;;  %v12787_v50 = vpack.c.bf16 %v2330_v45, %v2329_v44  ;;  %v2419_v51 = vld [vmem:[%s14378_s16] sm:$0xff] }
 0x365   :  { %v1865_v2 = vadd.f32 %v9538_v55, %v1854_v59  ;;  %v1962_v4 = vadd.f32 %v9543_v58, %v1955_v56  ;;  %v12791_v53 = vpack.c.bf16 %v2420_v52, %v2419_v51 }
 0x366   :  { %v1868_v3 = vmax.f32 %v1772_v47, %v1866_v62  ;;  %v1961_v6 = vadd.f32 %v9542_v1, %v1950_v63  ;;  %v9570_v1 = vld [vmem:[%s14353_s12 + $0x10] sm:$0xff] }
 0x367   :  { %v1867_v0 = vmax.f32 %v1771_v48, %v1865_v2  ;;  %v9571_v2 = vld [vmem:[%s14353_s12 + $0x18] sm:$0xff] }
 0x368   :  { %v1964_v7 = vmax.f32 %v1868_v3, %v1962_v4 }
 0x369   :  { %v1963_v10 = vmax.f32 %v1867_v0, %v1961_v6  ;;  %v9576_v0 = vld [vmem:[%s14378_s16 + $0x10] sm:$0xff]  ;;  %v9577_v6 = vld [vmem:[%s14378_s16 + $0x18] sm:$0xff] }
 0x36a   :  { %v1968_v11 = vmul.f32 %v1966_v5, %v1964_v7  ;;  %v12819_v5 = vpack.c.bf16 %v9571_v2, %v9570_v1  ;;  %v12823_v7 = vpack.c.bf16 %v9577_v6, %v9576_v0 }
 0x36b   :  { %v1967_v12 = vmul.f32 %v1965_v8, %v1963_v10 }
 0x36c   :  { %v1977_v41 = vmul.f32 %v9544_v9, %v1968_v11 }
 0x36d   :  { %v1976_v14 = vmul.f32 %v9544_v9, %v1967_v12 }
 0x36e   :  { %v1986_v15 = vadd.f32 %v9545_v13, %v1977_v41  ;;  %v9581_v41 = vld [vmem:[%s14245_s11 + $0x28] sm:$0xff] }
 0x36f   :  { %v1985_v16 = vadd.f32 %v9545_v13, %v1976_v14  ;;  %v9580_v13 = vld [vmem:[%s14245_s11 + $0x20] sm:$0xff]  ;;  %s13739_s11 = smov 17  }
 0x370   :  { %v1988_v17 = vmax.f32 %v1986_v15, 0.0  ;;  %s9458_s19 = sld [smem:[%s15204_s0 + %s13739_s11]]  }
 0x371   :  { %v1987_v18 = vmax.f32 %v1985_v16, 0.0 }
 0x373   :  { %3018 = vrot.lane.b32.xlu1 %v1987_v18, %s13733_s28  ;;  %2507 = vrot.lane.b32.xlu0 %v1987_v18, %s13734_s29  ;;  %v12763_v21 = vpack.c.bf16 %v1988_v17, %v1987_v18 }
 0x375   :  { %12764 = vmatprep.subr.bf16.mxu1 %v12763_v21 }
 0x376   :  { %12766 = vmatpush3.bf16.msra.mxu1 %v12763_v21  ;;  %v9590_v21 = vld [vmem:[%s14353_s12 + $0x20] sm:$0xff] }
 0x377   :  { %3020 = vrot.lane.b32.xlu1 %v1988_v17, %s13733_s28  ;;  %2509 = vrot.lane.b32.xlu0 %v1988_v17, %s13734_s29  ;;  %v9555_v31 = vld [vmem:[%s9458_s19] ss:$0 sm:$0xff]  ;;  %v9575_v32 = vld [vmem:[%s9458_s19 + $0x1] ss:$0 sm:$0xff]  ;;  %s13742_s29 = smov 23  }
 0x378   :  { %12768 = vmatprep.subr.bf16.mxu1 %v14303_v22  ;;  %s14447_s2 = sld [smem:[%s15204_s0 + %s13742_s29]]  }
 0x379   :  { %11422 = vmatmul.mubr.msk.f32.vlgmr.msra.gmra.mrb[20].mxu1 %vm1991_vm4, %v14306_v25  ;;  %s14545_s29 = sld [smem:[%s15204_s0 + %s13749_s24]]  }
 0x37a   :  { %12770 = vmatpush3.bf16.msra.mxu1 %v14303_v22 }
 0x37b   :  { %12772 = vmatprep.subr.bf16.mxu1 %v14309_v26 }
 0x37e   :  { %12774 = vmatpush3.bf16.msra.mxu1 %v14309_v26  ;;  %v3639_v51 = vld [vmem:[%s14447_s2 + $0x8] sm:$0xff]  ;;  %v3641_v52 = vld [vmem:[%s14447_s2 + $0x18] sm:$0xff]  ;;  %v3644_v1 = vld [vmem:[%s14447_s2 + $0x30] sm:$0xff] }
 0x37f   :  { %12776 = vmatprep.subr.bf16.mxu1 %v14320_v29  ;;  %v3647_v2 = vld [vmem:[%s14447_s2 + $0x48] sm:$0xff]  ;;  %v3646_v0 = vld [vmem:[%s14447_s2 + $0x40] sm:$0xff]  ;;  %v3648_v6 = vld [vmem:[%s14447_s2 + $0x50] sm:$0xff] }
 0x3e5   :  { %v2508_v30 = vpop.permute.xlu0 %2507  ;;  %v3019_v8 = vpop.permute.xlu1 %3018 }
 0x3e9   :  { %v2510_v54 = vpop.permute.xlu0 %2509  ;;  %v3021_v9 = vpop.permute.xlu1 %3020 }
 0x3ea   :  { %v12795_v57 = vpack.c.bf16 %v2510_v54, %v2508_v30  ;;  %v12827_v12 = vpack.c.bf16 %v3021_v9, %v3019_v8 }
 0x44c   :  { %v11423_v33 = vpop.f32.mrb[20].mxu1 }
 0x44d   :  { %v2064_v36 = vpop.f32.mrb[21].mxu1 }
 0x44e   :  { %11432 = vmatprep.mubr.msk.f32.mxu1 %vm249_vm2, %v2064_v36  ;;  %v9595_v36 = vld [vmem:[%s9458_s19 + $0x2] ss:$0 sm:$0xff]  ;;  %s13748_s19 = smov 25  }
 0x44f   :  { %11433 = vmatmul.mubr.msk.f32.vlgmr.msra.gmra.mrb[22].mxu1 %vm249_vm2, %v11423_v33  ;;  %v13600_v33 = vadd.f32 %v9575_v32, %v9555_v31  ;;  %s14533_s22 = sld [smem:[%s15204_s0 + %s13748_s19]]  }
 0x450   :  { %12778 = vmatpush3.bf16.msra.mxu1 %v14320_v29  ;;  %11443 = vmatprep.mubr.msk.f32.mxu1 %vm249_vm2, %v1987_v18 }
 0x451   :  { %12780 = vmatprep.subr.bf16.mxu1 %v14323_v38 }
 0x454   :  { %12782 = vmatpush3.bf16.msra.mxu1 %v14323_v38 }
 0x455   :  { %12796 = vmatprep.subr.bf16.mxu1 %v12795_v57 }
 0x457   :  { %11444 = vmatmul.mubr.msk.f32.vlgmr.msra.gmra.mrb[22].mxu1 %vm249_vm2, %v1988_v17 }
 0x458   :  { %12798 = vmatpush3.bf16.msra.mxu1 %v12795_v57  ;;  %11471 = vmatprep.mubr.msk.f32.mxu1 %vm1991_vm4, %v14332_v60 }
 0x459   :  { %12800 = vmatprep.subr.bf16.mxu1 %v14303_v22 }
 0x45b   :  { %11472 = vmatmul.mubr.msk.f32.vlgmr.msra.gmra.mrb[24].mxu1 %vm1991_vm4, %v14338_v34 }
 0x45c   :  { %12802 = vmatpush3.bf16.msra.mxu1 %v14303_v22 }
 0x45d   :  { %12804 = vmatprep.subr.bf16.mxu1 %v14309_v26 }
 0x460   :  { %12806 = vmatpush3.bf16.msra.mxu1 %v14309_v26 }
 0x461   :  { %12808 = vmatprep.subr.bf16.mxu1 %v14320_v29 }
 0x52a   :  { %v11445_v37 = vpop.f32.mrb[22].mxu1 }
 0x52b   :  { %v13595_v39 = vadd.f32 %v11445_v37, %v14355_v35  ;;  %v2241_v40 = vpop.f32.mrb[23].mxu1 }
 0x52c   :  { %v13596_v42 = vadd.f32 %v14355_v35, %v2241_v40 }
 0x52d   :  { %v2253_v43 = vmax.f32 %v13595_v39, 0.0 }
 0x52e   :  { %v2252_v46 = vmax.f32 %v13596_v42, 0.0  ;;  %v11473_v47 = vpop.f32.mrb[24].mxu1 }
 0x52f   :  { %v2585_v48 = vpop.f32.mrb[25].mxu1 }
 0x530   :  { %v12783_v49 = vpack.c.bf16 %v2253_v43, %v2252_v46  ;;  %11482 = vmatprep.mubr.msk.f32.mxu1 %vm249_vm2, %v2585_v48 }
 0x531   :  { %11483 = vmatmul.mubr.msk.f32.vlgmr.msra.gmra.mrb[26].mxu1 %vm249_vm2, %v11473_v47 }
 0x532   :  { %12784 = vmatprep.subr.bf16.mxu0 %v12783_v49  ;;  %12810 = vmatpush3.bf16.msra.mxu1 %v14320_v29 }
 0x533   :  { %11493 = vmatprep.mubr.msk.f32.mxu1 %vm249_vm2, %v2508_v30  ;;  %12786 = vmatpush3.bf16.msra.mxu0 %v12783_v49 }
 0x534   :  { %12812 = vmatprep.subr.bf16.mxu1 %v14323_v38  ;;  %12788 = vmatprep.subr.bf16.mxu0 %v12787_v50 }
 0x536   :  { %11451 = vmatmul.mubr.msk.f32.vlgmr.msra.gmra.mrb[18].mxu0 %vm1991_vm4, %v14306_v25  ;;  %12814 = vmatpush3.bf16.msra.mxu1 %v14323_v38 }
 0x537   :  { %12790 = vmatpush3.bf16.msra.mxu0 %v12787_v50  ;;  %12832 = vmatprep.subr.bf16.mxu1 %v14303_v22  ;;  %v3549_v50 = vld [vmem:[%s14442_s27] sm:$0xff] }
 0x538   :  { %12792 = vmatprep.subr.bf16.mxu0 %v12791_v53 }
 0x539   :  { %11494 = vmatmul.mubr.msk.f32.vlgmr.msra.gmra.mrb[26].mxu1 %vm249_vm2, %v2510_v54 }
 0x53a   :  { %12834 = vmatpush3.bf16.msra.mxu1 %v14303_v22  ;;  %v9591_v22 = vld [vmem:[%s14353_s12 + $0x28] sm:$0xff]  ;;  %s13746_s12 = smov 26  }
 0x53b   :  { %12836 = vmatprep.subr.bf16.mxu1 %v14309_v26  ;;  %v12851_v25 = vpack.c.bf16 %v9591_v22, %v9590_v21  ;;  %s14495_s15 = sld [smem:[%s15204_s0 + %s13746_s12]]   ;;  %s13752_s12 = smov 29  }
 0x53e   :  { %12838 = vmatpush3.bf16.msra.mxu1 %v14309_v26  ;;  %v9596_v26 = vld [vmem:[%s14378_s16 + $0x20] sm:$0xff]  ;;  %s13747_s16 = smov 20  }
 0x53f   :  { %12840 = vmatprep.subr.bf16.mxu1 %v14320_v29  ;;  %v12855_v28 = vpack.c.bf16 %v9597_v27, %v9596_v26  ;;  %s14501_s18 = sld [smem:[%s15204_s0 + %s13747_s16]]  }
 0x540   :  { %s14839_s16 = sld [smem:[%s15204_s0 + %s13752_s12]]  }
 0x541   :  { %v3925_v32 = vld [vmem:[%s14495_s15] sm:$0xff] }
 0x609   :  { %v11452_v55 = vpop.f32.mrb[18].mxu0 }
 0x60a   :  { %v2320_v56 = vpop.f32.mrb[19].mxu0 }
 0x60b   :  { %11457 = vmatprep.mubr.msk.f32.mxu0 %vm1991_vm4, %v2320_v56  ;;  %v3640_v56 = vld [vmem:[%s14447_s2 + $0x10] sm:$0xff] }
 0x60c   :  { %11458 = vmatmul.mubr.msk.f32.vlgmr.msra.gmra.mrb[20].mxu0 %vm1991_vm4, %v11452_v55  ;;  %v11495_v58 = vpop.f32.mrb[26].mxu1  ;;  %v12859_v55 = vpack.c.bf16 %v3641_v52, %v3639_v51  ;;  %v9620_v51 = vld [vmem:[%s14447_s2 + $0xb8] sm:$0xff] }
 0x60d   :  { %v13603_v59 = vadd.f32 %v11495_v58, %v14355_v35  ;;  %12794 = vmatpush3.bf16.msra.mxu0 %v12791_v53  ;;  %11464 = vmatprep.mubr.msk.f32.mxu0 %vm1991_vm4, %v2252_v46  ;;  %v2745_v61 = vpop.f32.mrb[27].mxu1  ;;  %v3638_v53 = vld [vmem:[%s14447_s2] sm:$0xff]  ;;  %v3643_v58 = vld [vmem:[%s14447_s2 + $0x28] sm:$0xff] }
 0x60e   :  { %v13604_v62 = vadd.f32 %v14355_v35, %v2745_v61  ;;  %v12861_v61 = vpack.c.bf16 %v3640_v56, %v3638_v53  ;;  %v9619_v56 = vld [vmem:[%s14447_s2 + $0xb0] sm:$0xff] }
 0x60f   :  { %v2757_v63 = vmax.f32 %v13603_v59, 0.0  ;;  %v3645_v59 = vld [vmem:[%s14447_s2 + $0x38] sm:$0xff] }
 0x610   :  { %v2756_v3 = vmax.f32 %v13604_v62, 0.0  ;;  %v12863_v62 = vpack.c.bf16 %v3645_v59, %v3643_v58  ;;  %v9622_v58 = vld [vmem:[%s14447_s2 + $0xc8] sm:$0xff]  ;;  %v9624_v59 = vld [vmem:[%s14447_s2 + $0xd8] sm:$0xff] }
 0x612   :  { %v12815_v4 = vpack.c.bf16 %v2757_v63, %v2756_v3 }
 0x614   :  { %11465 = vmatmul.mubr.msk.f32.vlgmr.msra.gmra.mrb[20].mxu0 %vm1991_vm4, %v2253_v43  ;;  %12816 = vmatprep.subr.bf16.mxu0 %v12815_v4 }
 0x615   :  { %12818 = vmatpush3.bf16.msra.mxu0 %v12815_v4  ;;  %11500 = vmatprep.mubr.msk.f32.mxu0 %vm1991_vm4, %v14332_v60 }
 0x616   :  { %12820 = vmatprep.subr.bf16.mxu0 %v12819_v5 }
 0x618   :  { %11501 = vmatmul.mubr.msk.f32.vlgmr.msra.gmra.mrb[22].mxu0 %vm1991_vm4, %v14338_v34 }
 0x619   :  { %12822 = vmatpush3.bf16.msra.mxu0 %v12819_v5 }
 0x61a   :  { %12824 = vmatprep.subr.bf16.mxu0 %v12823_v7 }
 0x6eb   :  { %v11502_v10 = vpop.f32.mrb[22].mxu0 }
 0x6ec   :  { %v2824_v11 = vpop.f32.mrb[23].mxu0 }
 0x6ed   :  { %11507 = vmatprep.mubr.msk.f32.mxu0 %vm1991_vm4, %v2824_v11 }
 0x6ee   :  { %11508 = vmatmul.mubr.msk.f32.vlgmr.msra.gmra.mrb[20].mxu0 %vm1991_vm4, %v11502_v10 }
 0x6ef   :  { %12826 = vmatpush3.bf16.msra.mxu0 %v12823_v7  ;;  %11514 = vmatprep.mubr.msk.f32.mxu0 %vm1991_vm4, %v2756_v3  ;;  %v3649_v3 = vld [vmem:[%s14447_s2 + $0x58] sm:$0xff]  ;;  %v12869_v7 = vpack.c.bf16 %v3648_v6, %v3646_v0 }
 0x6f0   :  { %12828 = vmatprep.subr.bf16.mxu0 %v12827_v12  ;;  %v12867_v5 = vpack.c.bf16 %v3649_v3, %v3647_v2 }
 0x6f6   :  { %11515 = vmatmul.mubr.msk.f32.vlgmr.msra.gmra.mrb[20].mxu0 %vm1991_vm4, %v2757_v63  ;;  %v3642_v63 = vld [vmem:[%s14447_s2 + $0x20] sm:$0xff] }
 0x6f7   :  { %12830 = vmatpush3.bf16.msra.mxu0 %v12827_v12  ;;  %11521 = vmatprep.mubr.msk.f32.mxu0 %vm1991_vm4, %v9580_v13  ;;  %v12865_v4 = vpack.c.bf16 %v3644_v1, %v3642_v63  ;;  %v9621_v63 = vld [vmem:[%s14447_s2 + $0xc0] sm:$0xff]  ;;  %v9623_v1 = vld [vmem:[%s14447_s2 + $0xd0] sm:$0xff] }
 0x6f8   :  { %v12909_v2 = vpack.c.bf16 %v9623_v1, %v9621_v63  ;;  %v9661_v1 = vld [vmem:[%s14447_s2 + $0x140] sm:$0xff] }
 0x6fa   :  { %11522 = vmatmul.mubr.msk.f32.vlgmr.msra.gmra.mrb[24].mxu0 %vm1991_vm4, %v9581_v41 }
 0x6fb   :  { %11550 = vmatprep.mubr.msk.f32.mxu0 %vm1991_vm4, %v9580_v13 }
 0x7cd   :  { %v11523_v14 = vpop.f32.mrb[24].mxu0 }
 0x7ce   :  { %v3096_v15 = vpop.f32.mrb[25].mxu0 }
 0x7cf   :  { %11532 = vmatprep.mubr.msk.f32.mxu1 %vm249_vm2, %v3096_v15 }
 0x7d0   :  { %11533 = vmatmul.mubr.msk.f32.vlgmr.msra.gmra.mrb[28].mxu1 %vm249_vm2, %v11523_v14  ;;  %v3653_v14 = vld [vmem:[%s14447_s2 + $0x78] sm:$0xff] }
 0x7d1   :  { %12842 = vmatpush3.bf16.msra.mxu1 %v14320_v29  ;;  %11543 = vmatprep.mubr.msk.f32.mxu1 %vm249_vm2, %v3019_v8 }
 0x7d2   :  { %12844 = vmatprep.subr.bf16.mxu1 %v14323_v38 }
 0x7d5   :  { %12846 = vmatpush3.bf16.msra.mxu1 %v14323_v38  ;;  %v13601_v38 = vadd.f32 %v13600_v33, %v9595_v36  ;;  %v3926_v33 = vld [vmem:[%s14495_s15 + $0x8] sm:$0xff] }
 0x7d6   :  { %12860 = vmatprep.subr.bf16.mxu1 %v12859_v55  ;;  %v3739_v36 = vld [vmem:[%s14488_s10 + $0x8] sm:$0xff]  ;;  %v9617_v55 = vld [vmem:[%s14447_s2 + $0xa0] sm:$0xff] }
 0x7d8   :  { %11544 = vmatmul.mubr.msk.f32.vlgmr.msra.gmra.mrb[28].mxu1 %vm249_vm2, %v3021_v9 }
 0x7d9   :  { %12862 = vmatpush1.bf16.msra.mxu1 %v12861_v61  ;;  %v12905_v61 = vpack.c.bf16 %v9619_v56, %v9617_v55  ;;  %v9657_v56 = vld [vmem:[%s14447_s2 + $0x120] sm:$0xff] }
 0x7da   :  { %12864 = vmatprep.subr.bf16.mxu1 %v12863_v62  ;;  %v12907_v62 = vpack.c.bf16 %v9624_v59, %v9622_v58  ;;  %v9659_v58 = vld [vmem:[%s14447_s2 + $0x130] sm:$0xff]  ;;  %v9662_v59 = vld [vmem:[%s14447_s2 + $0x148] sm:$0xff] }
 0x7dd   :  { %12866 = vmatpush1.bf16.msra.mxu1 %v12865_v4 }
 0x7de   :  { %12868 = vmatprep.subr.bf16.mxu1 %v12867_v5  ;;  %v9609_v5 = vld [vmem:[%s14533_s22] ss:$0 sm:$0xff] }
 0x7e1   :  { %12870 = vmatpush1.bf16.msra.mxu1 %v12869_v7 }
 0x8ab   :  { %v11545_v16 = vpop.f32.mrb[28].mxu1 }
 0x8ac   :  { %v13605_v17 = vadd.f32 %v11545_v16, %v14355_v35  ;;  %v3256_v18 = vpop.f32.mrb[29].mxu1  ;;  %v3650_v16 = vld [vmem:[%s14447_s2 + $0x60] sm:$0xff] }
 0x8ad   :  { %v13606_v19 = vadd.f32 %v14355_v35, %v3256_v18 }
 0x8ae   :  { %v3268_v20 = vmax.f32 %v13605_v17, 0.0  ;;  %v3652_v17 = vld [vmem:[%s14447_s2 + $0x70] sm:$0xff] }
 0x8af   :  { %v3267_v23 = vmax.f32 %v13606_v19, 0.0  ;;  %v12873_v18 = vpack.c.bf16 %v3652_v17, %v3650_v16  ;;  %v13743_v19 = vmov 0.0   ;;  %v9627_v16 = vld [vmem:[%s14447_s2 + $0xf0] sm:$0xff] }
 0x8b0   :  { %3725 = vmatprep.mubr.f32.mxu1 %v13743_v19 }
 0x8b1   :  { %v12847_v24 = vpack.c.bf16 %v3268_v20, %v3267_v23 }
 0x8b3   :  { %12848 = vmatprep.subr.bf16.mxu0 %v12847_v24 }
 0x8b4   :  { %12850 = vmatpush3.bf16.msra.mxu0 %v12847_v24 }
 0x8b5   :  { %12852 = vmatprep.subr.bf16.mxu0 %v12851_v25 }
 0x8b7   :  { %11551 = vmatmul.mubr.msk.f32.vlgmr.msra.gmra.mrb[26].mxu0 %vm1991_vm4, %v9581_v41  ;;  %v3651_v41 = vld [vmem:[%s14447_s2 + $0x68] sm:$0xff] }
 0x8b8   :  { %12854 = vmatpush3.bf16.msra.mxu0 %v12851_v25  ;;  %v12871_v15 = vpack.c.bf16 %v3653_v14, %v3651_v41  ;;  %v3738_v25 = vld [vmem:[%s14488_s10] sm:$0xff]  ;;  %v9628_v41 = vld [vmem:[%s14447_s2 + $0xf8] sm:$0xff] }
 0x8b9   :  { %12856 = vmatprep.subr.bf16.mxu0 %v12855_v28  ;;  %v9625_v14 = vld [vmem:[%s14447_s2 + $0xe0] sm:$0xff] }
 0x8ba   :  { %12872 = vmatprep.subr.bf16.mxu1 %v12871_v15  ;;  %v12913_v17 = vpack.c.bf16 %v9627_v16, %v9625_v14  ;;  %v9668_v14 = vld [vmem:[%s14447_s2 + $0x178] sm:$0xff] }
 0x8bb   :  { %12874 = vmatpush1.bf16.msra.mxu1 %v12873_v18 }
 0x98a   :  { %v11552_v29 = vpop.f32.mrb[26].mxu0 }
 0x98b   :  { %v3335_v30 = vpop.f32.mrb[27].mxu0 }
 0x98c   :  { %11557 = vmatprep.mubr.msk.f32.mxu0 %vm1991_vm4, %v3335_v30 }
 0x98d   :  { %11558 = vmatmul.mubr.msk.f32.vlgmr.msra.gmra.mrb[20].mxu0 %vm1991_vm4, %v11552_v29 }
 0x98e   :  { %12858 = vmatpush3.bf16.msra.mxu0 %v12855_v28  ;;  %11564 = vmatprep.mubr.msk.f32.mxu0 %vm1991_vm4, %v3267_v23 }
 0x98f   :  { %11567 = vmatprep.subr.mxu0 %v3549_v50 }
 0x995   :  { %11565 = vmatmul.mubr.msk.f32.vlgmr.msra.gmra.mrb[20].mxu0 %vm1991_vm4, %v3268_v20  ;;  %v9600_v20 = vld [vmem:[%s14472_s6] ss:$0 sm:$0xff] }
 0x996   :  { %11568 = vmatpush3.msra.mxu0 %v3549_v50  ;;  %v9618_v50 = vld [vmem:[%s14447_s2 + $0xa8] sm:$0xff] }
 0x997   :  { %v12903_v53 = vpack.c.bf16 %v9620_v51, %v9618_v50  ;;  %v9655_v50 = vld [vmem:[%s14447_s2 + $0x110] sm:$0xff]  ;;  %v9658_v51 = vld [vmem:[%s14447_s2 + $0x128] sm:$0xff] }
 0xa68   :  { %v11566_v54 = vpop.f32.mrb[20].mxu0 }
 0xa69   :  { %v13599_v57 = vadd.f32 %v13601_v38, %v11566_v54  ;;  %v3515_v60 = vpop.f32.mrb[21].mxu0  ;;  %v12883_v54 = vpack.c.bf16 %v3926_v33, %v3925_v32 }
 0xa6a   :  { %v13602_v34 = vadd.f32 %v13601_v38, %v3515_v60  ;;  %v3829_v38 = vld [vmem:[%s14501_s18] sm:$0xff]  ;;  %v3928_v60 = vld [vmem:[%s14495_s15 + $0x18] sm:$0xff] }
 0xa6b   :  { %9428 = vst.msk [vmem:[%s14429_s23 + $0x8] sm:$0xff] %vm3526_vm5, %v13599_v57  ;;  %v3530_v35 = vsel %vm3526_vm5, %v13599_v57, -inf }
 0xa6c   :  { %9427 = vst.msk [vmem:[%s14429_s23] sm:$0xff] %vm3526_vm5, %v13602_v34  ;;  %3531 = vmax.xlane.f32.xlu1 %v3530_v35  ;;  %v3527_v37 = vsel %vm3526_vm5, %v13602_v34, -inf }
 0xa6d   :  { %3528 = vmax.xlane.f32.xlu0 %v3527_v37  ;;  %v3929_v37 = vld [vmem:[%s14495_s15 + $0x20] sm:$0xff] }
 0xaf9   :  { %v3532_v39 = vpop.xlane.xlu1 %3531 }
 0xafa   :  { %v3534_v40 = vsub.f32 %v13599_v57, %v3532_v39  ;;  %v3529_v42 = vpop.xlane.xlu0 %3528  ;;  %v3927_v57 = vld [vmem:[%s14495_s15 + $0x10] sm:$0xff]  ;;  %v3930_v39 = vld [vmem:[%s14495_s15 + $0x28] sm:$0xff] }
 0xafb   :  { %v3533_v43 = vsub.f32 %v13602_v34, %v3529_v42  ;;  %v3830_v34 = vld [vmem:[%s14501_s18 + $0x8] sm:$0xff]  ;;  %v12887_v35 = vpack.c.bf16 %v3928_v60, %v3927_v57  ;;  %v12891_v42 = vpack.c.bf16 %v3930_v39, %v3929_v37  ;;  %v9636_v37 = vld [vmem:[%s14501_s18 + $0x18] sm:$0xff]  ;;  %v9645_v39 = vld [vmem:[%s14495_s15 + $0x60] sm:$0xff] }
 0xafc   :  { %v3537_v44 = vmul.f32 1.442695, %v3534_v40  ;;  %v3931_v40 = vld [vmem:[%s14495_s15 + $0x30] sm:$0xff] }
 0xafd   :  { %v3535_v45 = vmul.f32 1.442695, %v3533_v43  ;;  %v3932_v43 = vld [vmem:[%s14495_s15 + $0x38] sm:$0xff] }
 0xaff   :  { %13688 = vpow2.f32 %v3535_v45  ;;  %v9614_v45 = vld [vmem:[%s14447_s2 + $0x88] sm:$0xff] }
 0xb00   :  { %13690 = vpow2.f32 %v3537_v44  ;;  %v12895_v44 = vpack.c.bf16 %v3932_v43, %v3931_v40  ;;  %v9646_v40 = vld [vmem:[%s14495_s15 + $0x68] sm:$0xff] }
 0xb01   :  { %v12931_v43 = vpack.c.bf16 %v9646_v40, %v9645_v39  ;;  %v9676_v39 = vld [vmem:[%s14501_s18 + $0x28] sm:$0xff]  ;;  %v9685_v40 = vld [vmem:[%s14495_s15 + $0xa0] sm:$0xff] }
 0xb09   :  { %v13689_v46 = vpop.eup %13688 }
 0xb0a   :  { %v3539_v47 = vsel %vm3526_vm5, %v13689_v46, 0.0  ;;  %v13691_v48 = vpop.eup %13690 }
 0xb0b   :  { %3540 = vadd.xlane.f32.xlu0 %v3539_v47  ;;  %v3542_v49 = vsel %vm3526_vm5, %v13691_v48, 0.0  ;;  %v9613_v47 = vld [vmem:[%s14447_s2 + $0x80] sm:$0xff] }
 0xb0f   :  { %3543 = vadd.xlane.f32.xlu0 %v3542_v49  ;;  %v9615_v49 = vld [vmem:[%s14447_s2 + $0x90] sm:$0xff] }
 0xb10   :  { %v12901_v52 = vpack.c.bf16 %v9615_v49, %v9613_v47  ;;  %v9656_v47 = vld [vmem:[%s14447_s2 + $0x118] sm:$0xff] }
 0xb98   :  { %v3541_v8 = vpop.xlane.xlu0 %3540 }
 0xb99   :  { %13692 = vrcp.f32 %v3541_v8 }
 0xb9c   :  { %v3544_v9 = vpop.xlane.xlu0 %3543 }
 0xb9d   :  { %13694 = vrcp.f32 %v3544_v9 }
 0xba3   :  { %v13693_v10 = vpop.eup %13692 }
 0xba4   :  { %v3546_v11 = vmul.f32 %v13693_v10, %v13689_v46  ;;  %v9616_v46 = vld [vmem:[%s14447_s2 + $0x98] sm:$0xff] }
 0xba6   :  { %11569 = vmatprep.mubr.msk.f32.mxu0 %vm3526_vm5, %v3546_v11 }
 0xba7   :  { %v13695_v12 = vpop.eup %13694 }
 0xba8   :  { %v3548_v13 = vmul.f32 %v13695_v12, %v13691_v48  ;;  %v12899_v48 = vpack.c.bf16 %v9616_v46, %v9614_v45  ;;  %v9654_v46 = vld [vmem:[%s14447_s2 + $0x108] sm:$0xff] }
 0xba9   :  { %v12939_v49 = vpack.c.bf16 %v9656_v47, %v9654_v46  ;;  %v9694_v47 = vld [vmem:[%s14447_s2 + $0x188] sm:$0xff] }
 0xbaa   :  { %11570 = vmatmul.mubr.msk.f32.vlgmr.msra.gmra.mrb[28].mxu0 %vm3526_vm5, %v3548_v13  ;;  %12900 = vmatprep.subr.bf16.mxu1 %v12899_v48  ;;  %v9626_v13 = vld [vmem:[%s14447_s2 + $0xe8] sm:$0xff]  ;;  %v9653_v48 = vld [vmem:[%s14447_s2 + $0x100] sm:$0xff] }
 0xbab   :  { %11576 = vmatprep.mubr.msk.f32.mxu0 %vm1991_vm4, %v3738_v25  ;;  %v12911_v15 = vpack.c.bf16 %v9628_v41, %v9626_v13  ;;  %v9666_v41 = vld [vmem:[%s14447_s2 + $0x168] sm:$0xff] }
 0xbac   :  { %v12951_v16 = vpack.c.bf16 %v9668_v14, %v9666_v41  ;;  %v9706_v14 = vld [vmem:[%s14447_s2 + $0x1e8] sm:$0xff] }
 0xc7d   :  { %v11571_v21 = vpop.f32.mrb[28].mxu0 }
 0xc7e   :  { %v3629_v22 = vpop.f32.mrb[29].mxu0  ;;  %v14480_v24 = vadd.f32 %v11571_v21, %v9600_v20 }
 0xc7f   :  { %v14475_v23 = vadd.f32 %v9600_v20, %v3629_v22  ;;  %v9612_v20 = vld [vmem:[%s14545_s29] ss:$0 sm:$0xff] }
 0xc81   :  { %9603 = vmatmul.mubr.msk.f32.vlgmr.msra.gmra.mrb[30].mxu1 %vm3654_vm6, %v14475_v23 }
 0xc82   :  { %3731 = vmatprep.mubr.f32.mxu1 %v13743_v19  ;;  %12902 = vmatpush1.bf16.msra.mxu1 %v12901_v52  ;;  %v9660_v52 = vld [vmem:[%s14447_s2 + $0x138] sm:$0xff] }
 0xc83   :  { %12904 = vmatprep.subr.bf16.mxu1 %v12903_v53  ;;  %v12941_v53 = vpack.c.bf16 %v9655_v50, %v9653_v48  ;;  %v12943_v55 = vpack.c.bf16 %v9660_v52, %v9658_v51  ;;  %v9696_v48 = vld [vmem:[%s14447_s2 + $0x198] sm:$0xff]  ;;  %v9695_v51 = vld [vmem:[%s14447_s2 + $0x190] sm:$0xff]  ;;  %v9698_v52 = vld [vmem:[%s14447_s2 + $0x1a8] sm:$0xff] }
 0xc84   :  { %v12979_v50 = vpack.c.bf16 %v9696_v48, %v9694_v47  ;;  %v5201_v48 = vld [vmem:[%s14680_s4] sm:$0xff] }
 0xc85   :  { %9604 = vmatmul.mubr.msk.f32.gmra.mrb[32].mxu1 %vm3654_vm6, %v14480_v24 }
 0xc86   :  { %4112 = vmatprep.mubr.f32.mxu1 %v13743_v19  ;;  %12906 = vmatpush1.bf16.msra.mxu1 %v12905_v61  ;;  %v9664_v61 = vld [vmem:[%s14447_s2 + $0x158] sm:$0xff] }
 0xc87   :  { %12908 = vmatprep.subr.bf16.mxu1 %v12907_v62  ;;  %v12945_v62 = vpack.c.bf16 %v9659_v58, %v9657_v56  ;;  %v12947_v63 = vpack.c.bf16 %v9664_v61, %v9662_v59  ;;  %v9697_v58 = vld [vmem:[%s14447_s2 + $0x1a0] sm:$0xff]  ;;  %v9699_v59 = vld [vmem:[%s14447_s2 + $0x1b0] sm:$0xff]  ;;  %v9702_v61 = vld [vmem:[%s14447_s2 + $0x1c8] sm:$0xff] }
 0xc8a   :  { %12910 = vmatpush1.bf16.msra.mxu1 %v12909_v2  ;;  %v9663_v2 = vld [vmem:[%s14447_s2 + $0x150] sm:$0xff] }
 0xc8b   :  { %12912 = vmatprep.subr.bf16.mxu1 %v12911_v15  ;;  %v9665_v15 = vld [vmem:[%s14447_s2 + $0x160] sm:$0xff] }
 0xc8e   :  { %12914 = vmatpush1.bf16.msra.mxu1 %v12913_v17  ;;  %v9667_v17 = vld [vmem:[%s14447_s2 + $0x170] sm:$0xff] }
 0xd54   :  { %v3727_v26 = vpop.f32.mrb[30].mxu1 }
 0xd55   :  { %3742 = vrot.lane.b32.xlu1 %v3727_v26, %s13733_s28  ;;  %v3729_v27 = vpop.f32.mrb[31].mxu1 }
 0xd58   :  { %v3733_v28 = vpop.f32.mrb[32].mxu1 }
 0xd59   :  { %v12875_v29 = vpack.c.bf16 %v3733_v28, %v3727_v26  ;;  %3744 = vrot.lane.b32.xlu0 %v3733_v28, %s13733_s28  ;;  %v3735_v30 = vpop.f32.mrb[33].mxu1  ;;  %v9631_v28 = vld [vmem:[%s14488_s10 + $0x10] sm:$0xff] }
 0xd5a   :  { %v12879_v31 = vpack.c.bf16 %v3735_v30, %v3729_v27  ;;  %v9642_v30 = vld [vmem:[%s14495_s15 + $0x48] sm:$0xff] }
 0xd5b   :  { %12876 = vmatprep.subr.bf16.mxu0 %v12875_v29 }
 0xd5c   :  { %12878 = vmatpush3.bf16.msra.mxu0 %v12875_v29  ;;  %v9641_v29 = vld [vmem:[%s14495_s15 + $0x40] sm:$0xff] }
 0xd5d   :  { %12880 = vmatprep.subr.bf16.mxu0 %v12879_v31 }
 0xd5f   :  { %11577 = vmatmul.mubr.msk.f32.vlgmr.msra.gmra.mrb[30].mxu0 %vm1991_vm4, %v3739_v36 }
 0xd60   :  { %12882 = vmatpush3.bf16.msra.mxu0 %v12879_v31  ;;  %11583 = vmatprep.mubr.msk.f32.mxu0 %vm1991_vm4, %v3829_v38  ;;  %v12923_v31 = vpack.c.bf16 %v9642_v30, %v9641_v29 }
 0xd61   :  { %12884 = vmatprep.subr.bf16.mxu0 %v12883_v54 }
 0xd62   :  { %12924 = vmatprep.subr.bf16.mxu1 %v12923_v31 }
 0xd67   :  { %11584 = vmatmul.mubr.msk.f32.vlgmr.msra.gmra.mrb[30].mxu0 %vm1991_vm4, %v3830_v34  ;;  %v9632_v34 = vld [vmem:[%s14488_s10 + $0x18] sm:$0xff] }
 0xd68   :  { %12886 = vmatpush3.bf16.msra.mxu0 %v12883_v54 }
 0xd69   :  { %12888 = vmatprep.subr.bf16.mxu0 %v12887_v35 }
 0xd6c   :  { %12890 = vmatpush3.bf16.msra.mxu0 %v12887_v35  ;;  %v9635_v35 = vld [vmem:[%s14501_s18 + $0x10] sm:$0xff] }
 0xd6d   :  { %12892 = vmatprep.subr.bf16.mxu0 %v12891_v42 }
 0xd70   :  { %12894 = vmatpush3.bf16.msra.mxu0 %v12891_v42  ;;  %v9647_v42 = vld [vmem:[%s14495_s15 + $0x70] sm:$0xff] }
 0xd71   :  { %12896 = vmatprep.subr.bf16.mxu0 %v12895_v44 }
 0xd74   :  { %12898 = vmatpush3.bf16.msra.mxu0 %v12895_v44  ;;  %v9648_v44 = vld [vmem:[%s14495_s15 + $0x78] sm:$0xff] }
 0xd75   :  { %v12935_v45 = vpack.c.bf16 %v9648_v44, %v9647_v42  ;;  %v9686_v42 = vld [vmem:[%s14495_s15 + $0xa8] sm:$0xff] }
 0xd76   :  { %v12971_v44 = vpack.c.bf16 %v9686_v42, %v9685_v40  ;;  %v9716_v40 = vld [vmem:[%s14501_s18 + $0x38] sm:$0xff]  ;;  %v9725_v42 = vld [vmem:[%s14495_s15 + $0xe0] sm:$0xff] }
 0xdc7   :  { %v3743_v0 = vpop.permute.xlu1 %3742 }
 0xdcb   :  { %v3745_v3 = vpop.permute.xlu0 %3744 }
 0xe3a   :  { %v11585_v4 = vpop.f32.mrb[30].mxu0 }
 0xe3b   :  { %v13607_v6 = vadd.f32 %v11585_v4, %v3745_v3  ;;  %v3903_v7 = vpop.f32.mrb[31].mxu0  ;;  %v12949_v3 = vpack.c.bf16 %v9663_v2, %v9661_v1  ;;  %v9701_v2 = vld [vmem:[%s14447_s2 + $0x1c0] sm:$0xff] }
 0xe3c   :  { %v13608_v8 = vadd.f32 %v3903_v7, %v3743_v0 }
 0xe3d   :  { %v3922_v9 = vadd.f32 %v13607_v6, %v9609_v5  ;;  %v9640_v6 = vld [vmem:[%s14533_s22 + $0x1] ss:$0 sm:$0xff] }
 0xe3e   :  { %v3921_v10 = vadd.f32 %v13608_v8, %v9609_v5 }
 0xe3f   :  { %v3924_v12 = vmax.f32 %v3922_v9, 0.0 }
 0xe40   :  { %v3923_v11 = vmax.f32 %v3921_v10, 0.0 }
 0xe42   :  { %11602 = vmatprep.mubr.msk.f32.mxu0 %vm3654_vm6, %v3923_v11 }
 0xe43   :  { %11603 = vmatmul.mubr.msk.f32.vlgmr.msra.gmra.mrb[32].mxu0 %vm3654_vm6, %v3924_v12 }
 0xe44   :  { %11609 = vmatprep.mubr.msk.f32.mxu0 %vm1991_vm4, %v9631_v28 }
 0xf16   :  { %v11604_v18 = vpop.f32.mrb[32].mxu0 }
 0xf17   :  { %v4005_v21 = vpop.f32.mrb[33].mxu0  ;;  %v4015_v25 = vadd.f32 %v11604_v18, %v14480_v24  ;;  %v9644_v24 = vld [vmem:[%s14495_s15 + $0x58] sm:$0xff]  ;;  %v12953_v18 = vpack.c.bf16 %v9667_v17, %v9665_v15 }
 0xf18   :  { %v4014_v22 = vadd.f32 %v4005_v21, %v14475_v23  ;;  %v9643_v23 = vld [vmem:[%s14495_s15 + $0x50] sm:$0xff]  ;;  %v9652_v21 = vld [vmem:[%s14545_s29 + $0x1] ss:$0 sm:$0xff]  ;;  %v9708_v15 = vld [vmem:[%s14447_s2 + $0x1f8] sm:$0xff] }
 0xf19   :  { %v14555_v27 = vadd.f32 %v9612_v20, %v4015_v25  ;;  %v12927_v32 = vpack.c.bf16 %v9644_v24, %v9643_v23  ;;  %v9671_v23 = vld [vmem:[%s14488_s10 + $0x20] sm:$0xff]  ;;  %v9682_v24 = vld [vmem:[%s14495_s15 + $0x88] sm:$0xff]  ;;  %v12991_v17 = vpack.c.bf16 %v9708_v15, %v9706_v14 }
 0xf1a   :  { %v14550_v26 = vadd.f32 %v9612_v20, %v4014_v22  ;;  %v9741_v15 = vld [vmem:[%s14495_s15 + $0x120] sm:$0xff] }
 0xf1c   :  { %9629 = vmatmul.mubr.msk.f32.vlgmr.msra.gmra.mrb[34].mxu1 %vm3654_vm6, %v14550_v26 }
 0xf1d   :  { %4118 = vmatprep.mubr.f32.mxu1 %v13743_v19  ;;  %12926 = vmatpush3.bf16.msra.mxu1 %v12923_v31  ;;  %v9681_v31 = vld [vmem:[%s14495_s15 + $0x80] sm:$0xff] }
 0xf1e   :  { %12928 = vmatprep.subr.bf16.mxu1 %v12927_v32 }
 0xf20   :  { %9630 = vmatmul.mubr.msk.f32.gmra.mrb[36].mxu1 %vm3654_vm6, %v14555_v27 }
 0xf21   :  { %12930 = vmatpush3.bf16.msra.mxu1 %v12927_v32  ;;  %v12963_v32 = vpack.c.bf16 %v9682_v24, %v9681_v31 }
 0xf22   :  { %12932 = vmatprep.subr.bf16.mxu1 %v12931_v43 }
 0xf25   :  { %12934 = vmatpush3.bf16.msra.mxu1 %v12931_v43  ;;  %v9687_v43 = vld [vmem:[%s14495_s15 + $0xb0] sm:$0xff] }
 0xf26   :  { %12936 = vmatprep.subr.bf16.mxu1 %v12935_v45 }
 0xf29   :  { %12938 = vmatpush3.bf16.msra.mxu1 %v12935_v45  ;;  %v9688_v45 = vld [vmem:[%s14495_s15 + $0xb8] sm:$0xff] }
 0xf2a   :  { %v12975_v46 = vpack.c.bf16 %v9688_v45, %v9687_v43  ;;  %v9726_v43 = vld [vmem:[%s14495_s15 + $0xe8] sm:$0xff] }
 0xf2b   :  { %v13011_v45 = vpack.c.bf16 %v9726_v43, %v9725_v42  ;;  %v9755_v43 = vld [vmem:[%s14680_s4 + $0x70] sm:$0xff] }
 0xfef   :  { %v4114_v33 = vpop.f32.mrb[34].mxu1 }
 0xff0   :  { %4130 = vrot.lane.b32.xlu1 %v4114_v33, %s13733_s28  ;;  %v4116_v36 = vpop.f32.mrb[35].mxu1 }
 0xff3   :  { %v4120_v38 = vpop.f32.mrb[36].mxu1 }
 0xff4   :  { %v12915_v54 = vpack.c.bf16 %v4120_v38, %v4114_v33  ;;  %4132 = vrot.lane.b32.xlu1 %v4120_v38, %s13733_s28  ;;  %v4122_v57 = vpop.f32.mrb[37].mxu1 }
 0xff5   :  { %v12919_v60 = vpack.c.bf16 %v4122_v57, %v4116_v36 }
 0xff6   :  { %12916 = vmatprep.subr.bf16.mxu0 %v12915_v54 }
 0xff7   :  { %12918 = vmatpush3.bf16.msra.mxu0 %v12915_v54 }
 0xff8   :  { %12920 = vmatprep.subr.bf16.mxu0 %v12919_v60 }
 0xffa   :  { %11610 = vmatmul.mubr.msk.f32.vlgmr.msra.gmra.mrb[34].mxu0 %vm1991_vm4, %v9632_v34 }
 0xffb   :  { %12922 = vmatpush3.bf16.msra.mxu0 %v12919_v60  ;;  %11616 = vmatprep.mubr.msk.f32.mxu0 %vm1991_vm4, %v9635_v35  ;;  %v9672_v35 = vld [vmem:[%s14488_s10 + $0x28] sm:$0xff] }
 0xffc   :  { %12940 = vmatprep.subr.bf16.mxu0 %v12939_v49  ;;  %v9693_v49 = vld [vmem:[%s14447_s2 + $0x180] sm:$0xff] }
0x1002   :  { %11617 = vmatmul.mubr.msk.f32.vlgmr.msra.gmra.mrb[34].mxu0 %vm1991_vm4, %v9636_v37  ;;  %v9675_v37 = vld [vmem:[%s14501_s18 + $0x20] sm:$0xff] }
0x1003   :  { %4504 = vmatprep.mubr.f32.mxu0 %v13743_v19  ;;  %12942 = vmatpush1.bf16.msra.mxu0 %v12941_v53  ;;  %v9700_v53 = vld [vmem:[%s14447_s2 + $0x1b8] sm:$0xff] }
0x1004   :  { %12944 = vmatprep.subr.bf16.mxu0 %v12943_v55  ;;  %v12981_v55 = vpack.c.bf16 %v9695_v51, %v9693_v49  ;;  %v12983_v56 = vpack.c.bf16 %v9700_v53, %v9698_v52  ;;  %v5202_v49 = vld [vmem:[%s14680_s4 + $0x8] sm:$0xff]  ;;  %v5204_v52 = vld [vmem:[%s14680_s4 + $0x18] sm:$0xff] }
0x1005   :  { %v13019_v51 = vpack.c.bf16 %v5202_v49, %v5201_v48  ;;  %v9763_v48 = vld [vmem:[%s14495_s15 + $0x150] sm:$0xff] }
0x1007   :  { %12946 = vmatpush1.bf16.msra.mxu0 %v12945_v62  ;;  %v9704_v62 = vld [vmem:[%s14447_s2 + $0x1d8] sm:$0xff] }
0x1008   :  { %12948 = vmatprep.subr.bf16.mxu0 %v12947_v63  ;;  %v12985_v63 = vpack.c.bf16 %v9699_v59, %v9697_v58  ;;  %v12987_v1 = vpack.c.bf16 %v9704_v62, %v9702_v61  ;;  %v9720_v62 = vld [vmem:[%s14533_s22 + $0x3] ss:$0 sm:$0xff] }
0x100b   :  { %12950 = vmatpush1.bf16.msra.mxu0 %v12949_v3  ;;  %v9703_v3 = vld [vmem:[%s14447_s2 + $0x1d0] sm:$0xff] }
0x100c   :  { %12952 = vmatprep.subr.bf16.mxu0 %v12951_v16  ;;  %v9705_v16 = vld [vmem:[%s14447_s2 + $0x1e0] sm:$0xff] }
0x100f   :  { %12954 = vmatpush1.bf16.msra.mxu0 %v12953_v18  ;;  %v9707_v18 = vld [vmem:[%s14447_s2 + $0x1f0] sm:$0xff] }
0x1010   :  { %12964 = vmatprep.subr.bf16.mxu0 %v12963_v32 }
0x1062   :  { %v4131_v4 = vpop.permute.xlu1 %4130 }
0x1066   :  { %v4133_v5 = vpop.permute.xlu1 %4132 }
0x10d5   :  { %v11618_v0 = vpop.f32.mrb[34].mxu0 }
0x10d6   :  { %v13609_v7 = vadd.f32 %v11618_v0, %v4133_v5  ;;  %v4292_v8 = vpop.f32.mrb[35].mxu0 }
0x10d7   :  { %v13610_v9 = vadd.f32 %v4292_v8, %v4131_v4  ;;  %v12989_v4 = vpack.c.bf16 %v9703_v3, %v9701_v2 }
0x10d8   :  { %v4312_v10 = vadd.f32 %v13609_v7, %v9640_v6 }
0x10d9   :  { %v4311_v11 = vadd.f32 %v13610_v9, %v9640_v6  ;;  %v9680_v6 = vld [vmem:[%s14533_s22 + $0x2] ss:$0 sm:$0xff] }
0x10da   :  { %v4314_v13 = vmax.f32 %v4312_v10, 0.0 }
0x10db   :  { %v4313_v12 = vmax.f32 %v4311_v11, 0.0 }
0x10dd   :  { %11635 = vmatprep.mubr.msk.f32.mxu1 %vm3654_vm6, %v4313_v12 }
0x10de   :  { %11636 = vmatmul.mubr.msk.f32.vlgmr.msra.gmra.mrb[38].mxu1 %vm3654_vm6, %v4314_v13 }
0x10df   :  { %11642 = vmatprep.mubr.msk.f32.mxu1 %vm1991_vm4, %v9671_v23 }
0x11b1   :  { %v11637_v20 = vpop.f32.mrb[38].mxu1 }
0x11b2   :  { %v4396_v22 = vpop.f32.mrb[39].mxu1  ;;  %v4406_v28 = vadd.f32 %v11637_v20, %v14555_v27  ;;  %v9684_v27 = vld [vmem:[%s14495_s15 + $0x98] sm:$0xff]  ;;  %v12993_v20 = vpack.c.bf16 %v9707_v18, %v9705_v16  ;;  %v9742_v16 = vld [vmem:[%s14495_s15 + $0x128] sm:$0xff] }
0x11b3   :  { %v4405_v25 = vadd.f32 %v4396_v22, %v14550_v26  ;;  %v9683_v26 = vld [vmem:[%s14495_s15 + $0x90] sm:$0xff]  ;;  %v9692_v22 = vld [vmem:[%s14545_s29 + $0x2] ss:$0 sm:$0xff] }
0x11b4   :  { %v14605_v30 = vadd.f32 %v9652_v21, %v4406_v28  ;;  %v12967_v33 = vpack.c.bf16 %v9684_v27, %v9683_v26  ;;  %v9711_v26 = vld [vmem:[%s14488_s10 + $0x30] sm:$0xff]  ;;  %v9722_v27 = vld [vmem:[%s14495_s15 + $0xc8] sm:$0xff] }
0x11b5   :  { %v14600_v29 = vadd.f32 %v9652_v21, %v4405_v25 }
0x11b7   :  { %9669 = vmatmul.mubr.msk.f32.vlgmr.msra.gmra.mrb[36].mxu0 %vm3654_vm6, %v14600_v29 }
0x11b8   :  { %4510 = vmatprep.mubr.f32.mxu0 %v13743_v19  ;;  %12966 = vmatpush3.bf16.msra.mxu0 %v12963_v32  ;;  %v9721_v32 = vld [vmem:[%s14495_s15 + $0xc0] sm:$0xff] }
0x11b9   :  { %12968 = vmatprep.subr.bf16.mxu0 %v12967_v33 }
0x11bb   :  { %9670 = vmatmul.mubr.msk.f32.gmra.mrb[38].mxu0 %vm3654_vm6, %v14605_v30 }
0x11bc   :  { %12970 = vmatpush3.bf16.msra.mxu0 %v12967_v33  ;;  %v13003_v33 = vpack.c.bf16 %v9722_v27, %v9721_v32  ;;  %v9744_v32 = vld [vmem:[%s14495_s15 + $0x138] sm:$0xff] }
0x11bd   :  { %12972 = vmatprep.subr.bf16.mxu0 %v12971_v44 }
0x11c0   :  { %12974 = vmatpush3.bf16.msra.mxu0 %v12971_v44  ;;  %v9727_v44 = vld [vmem:[%s14495_s15 + $0xf0] sm:$0xff] }
0x11c1   :  { %12976 = vmatprep.subr.bf16.mxu0 %v12975_v46 }
0x11c4   :  { %12978 = vmatpush3.bf16.msra.mxu0 %v12975_v46  ;;  %v9728_v46 = vld [vmem:[%s14495_s15 + $0xf8] sm:$0xff] }
0x11c5   :  { %v13015_v47 = vpack.c.bf16 %v9728_v46, %v9727_v44  ;;  %v9756_v44 = vld [vmem:[%s14680_s4 + $0x78] sm:$0xff]  ;;  %v9761_v46 = vld [vmem:[%s14495_s15 + $0x140] sm:$0xff] }
0x128a   :  { %v4506_v36 = vpop.f32.mrb[36].mxu0 }
0x128b   :  { %4522 = vrot.lane.b32.xlu0 %v4506_v36, %s13733_s28  ;;  %v4508_v38 = vpop.f32.mrb[37].mxu0 }
0x128e   :  { %v4512_v54 = vpop.f32.mrb[38].mxu0 }
0x128f   :  { %v12955_v57 = vpack.c.bf16 %v4512_v54, %v4506_v36  ;;  %4524 = vrot.lane.b32.xlu1 %v4512_v54, %s13733_s28  ;;  %v4514_v60 = vpop.f32.mrb[39].mxu0 }
0x1290   :  { %v12959_v34 = vpack.c.bf16 %v4514_v60, %v4508_v38 }
0x1291   :  { %12956 = vmatprep.subr.bf16.mxu1 %v12955_v57 }
0x1292   :  { %12958 = vmatpush3.bf16.msra.mxu1 %v12955_v57 }
0x1293   :  { %12960 = vmatprep.subr.bf16.mxu1 %v12959_v34 }
0x1295   :  { %11643 = vmatmul.mubr.msk.f32.vlgmr.msra.gmra.mrb[40].mxu1 %vm1991_vm4, %v9672_v35 }
0x1296   :  { %12962 = vmatpush3.bf16.msra.mxu1 %v12959_v34  ;;  %11649 = vmatprep.mubr.msk.f32.mxu1 %vm1991_vm4, %v9675_v37  ;;  %v9712_v37 = vld [vmem:[%s14488_s10 + $0x38] sm:$0xff] }
0x1297   :  { %12980 = vmatprep.subr.bf16.mxu1 %v12979_v50  ;;  %v5203_v50 = vld [vmem:[%s14680_s4 + $0x10] sm:$0xff] }
0x1298   :  { %v13023_v53 = vpack.c.bf16 %v5204_v52, %v5203_v50  ;;  %v9764_v50 = vld [vmem:[%s14495_s15 + $0x158] sm:$0xff]  ;;  %v9765_v52 = vld [vmem:[%s14495_s15 + $0x160] sm:$0xff] }
0x129d   :  { %11650 = vmatmul.mubr.msk.f32.vlgmr.msra.gmra.mrb[40].mxu1 %vm1991_vm4, %v9676_v39  ;;  %v9715_v39 = vld [vmem:[%s14501_s18 + $0x30] sm:$0xff] }
0x129e   :  { %4896 = vmatprep.mubr.f32.mxu1 %v13743_v19  ;;  %12982 = vmatpush1.bf16.msra.mxu1 %v12981_v55  ;;  %v5205_v55 = vld [vmem:[%s14680_s4 + $0x20] sm:$0xff] }
0x129f   :  { %12984 = vmatprep.subr.bf16.mxu1 %v12983_v56  ;;  %v5206_v56 = vld [vmem:[%s14680_s4 + $0x28] sm:$0xff] }
0x12a0   :  { %v13027_v58 = vpack.c.bf16 %v5206_v56, %v5205_v55 }
0x12a2   :  { %12986 = vmatpush1.bf16.msra.mxu1 %v12985_v63 }
0x12a3   :  { %12988 = vmatprep.subr.bf16.mxu1 %v12987_v1 }
0x12a6   :  { %12990 = vmatpush1.bf16.msra.mxu1 %v12989_v4 }
0x12a7   :  { %12992 = vmatprep.subr.bf16.mxu1 %v12991_v17  ;;  %v13043_v17 = vpack.c.bf16 %v9742_v16, %v9741_v15 }
0x12aa   :  { %12994 = vmatpush1.bf16.msra.mxu1 %v12993_v20 }
0x12ab   :  { %13004 = vmatprep.subr.bf16.mxu1 %v13003_v33 }
0x12fd   :  { %v4523_v7 = vpop.permute.xlu0 %4522 }
0x1301   :  { %v4525_v5 = vpop.permute.xlu1 %4524 }
0x1370   :  { %v11651_v0 = vpop.f32.mrb[40].mxu1 }
0x1371   :  { %v13611_v8 = vadd.f32 %v11651_v0, %v4525_v5  ;;  %v4684_v9 = vpop.f32.mrb[41].mxu1 }
0x1372   :  { %v13612_v10 = vadd.f32 %v4684_v9, %v4523_v7  ;;  %v5207_v7 = vld [vmem:[%s14680_s4 + $0x30] sm:$0xff] }
0x1373   :  { %v4704_v11 = vadd.f32 %v13611_v8, %v9680_v6  ;;  %v5208_v8 = vld [vmem:[%s14680_s4 + $0x38] sm:$0xff] }
0x1374   :  { %v4703_v12 = vadd.f32 %v13612_v10, %v9680_v6  ;;  %v13031_v9 = vpack.c.bf16 %v5208_v8, %v5207_v7  ;;  %v9737_v10 = vld [vmem:[%s14495_s15 + $0x100] sm:$0xff]  ;;  %v9776_v8 = vld [vmem:[%s14680_s4 + $0x98] sm:$0xff] }
0x1375   :  { %v4706_v41 = vmax.f32 %v4704_v11, 0.0  ;;  %v9738_v11 = vld [vmem:[%s14495_s15 + $0x108] sm:$0xff] }
0x1376   :  { %v4705_v13 = vmax.f32 %v4703_v12, 0.0  ;;  %v9739_v12 = vld [vmem:[%s14495_s15 + $0x110] sm:$0xff] }
0x1378   :  { %11668 = vmatprep.mubr.msk.f32.mxu0 %vm3654_vm6, %v4705_v13  ;;  %v13035_v13 = vpack.c.bf16 %v9738_v11, %v9737_v10  ;;  %v9777_v10 = vld [vmem:[%s14680_s4 + $0xa0] sm:$0xff]  ;;  %v9778_v11 = vld [vmem:[%s14680_s4 + $0xa8] sm:$0xff] }
0x1379   :  { %11669 = vmatmul.mubr.msk.f32.vlgmr.msra.gmra.mrb[40].mxu0 %vm3654_vm6, %v4706_v41  ;;  %v9740_v41 = vld [vmem:[%s14495_s15 + $0x118] sm:$0xff] }
0x137a   :  { %11675 = vmatprep.mubr.msk.f32.mxu0 %vm1991_vm4, %v9711_v26  ;;  %v13039_v14 = vpack.c.bf16 %v9740_v41, %v9739_v12  ;;  %v9743_v26 = vld [vmem:[%s14495_s15 + $0x130] sm:$0xff]  ;;  %v13091_v12 = vpack.c.bf16 %v9778_v11, %v9777_v10 }
0x137b   :  { %v13047_v27 = vpack.c.bf16 %v9744_v32, %v9743_v26  ;;  %v9788_v32 = vld [vmem:[%s14495_s15 + $0x198] sm:$0xff] }
0x144c   :  { %v11670_v21 = vpop.f32.mrb[40].mxu0 }
0x144d   :  { %v4788_v25 = vpop.f32.mrb[41].mxu0  ;;  %v4798_v23 = vadd.f32 %v11670_v21, %v14605_v30  ;;  %v9724_v30 = vld [vmem:[%s14495_s15 + $0xd8] sm:$0xff]  ;;  %v9732_v21 = vld [vmem:[%s14545_s29 + $0x3] ss:$0 sm:$0xff] }
0x144e   :  { %v4797_v28 = vadd.f32 %v4788_v25, %v14600_v29  ;;  %v9723_v29 = vld [vmem:[%s14495_s15 + $0xd0] sm:$0xff] }
0x144f   :  { %v14655_v24 = vadd.f32 %v9692_v22, %v4798_v23  ;;  %v13007_v36 = vpack.c.bf16 %v9724_v30, %v9723_v29  ;;  %v9749_v29 = vld [vmem:[%s14680_s4 + $0x40] sm:$0xff] }
0x1450   :  { %v14650_v31 = vadd.f32 %v9692_v22, %v4797_v28 }
0x1452   :  { %9709 = vmatmul.mubr.msk.f32.vlgmr.msra.gmra.mrb[42].mxu1 %vm3654_vm6, %v14650_v31 }
0x1453   :  { %4902 = vmatprep.mubr.f32.mxu1 %v13743_v19  ;;  %13006 = vmatpush3.bf16.msra.mxu1 %v13003_v33  ;;  %v9751_v33 = vld [vmem:[%s14680_s4 + $0x50] sm:$0xff] }
0x1454   :  { %13008 = vmatprep.subr.bf16.mxu1 %v13007_v36 }
0x1456   :  { %9710 = vmatmul.mubr.msk.f32.gmra.mrb[44].mxu1 %vm3654_vm6, %v14655_v24 }
0x1457   :  { %13010 = vmatpush3.bf16.msra.mxu1 %v13007_v36  ;;  %v9752_v36 = vld [vmem:[%s14680_s4 + $0x58] sm:$0xff] }
0x1458   :  { %13012 = vmatprep.subr.bf16.mxu1 %v13011_v45 }
0x145b   :  { %13014 = vmatpush3.bf16.msra.mxu1 %v13011_v45  ;;  %v13063_v45 = vpack.c.bf16 %v9756_v44, %v9755_v43  ;;  %v9800_v44 = vld [vmem:[%s14680_s4 + $0xd8] sm:$0xff] }
0x145c   :  { %13016 = vmatprep.subr.bf16.mxu1 %v13015_v47 }
0x145f   :  { %13018 = vmatpush3.bf16.msra.mxu1 %v13015_v47  ;;  %v9762_v47 = vld [vmem:[%s14495_s15 + $0x148] sm:$0xff] }
0x1460   :  { %13036 = vmatprep.subr.bf16.mxu1 %v13035_v13  ;;  %v13067_v49 = vpack.c.bf16 %v9762_v47, %v9761_v46  ;;  %v9801_v46 = vld [vmem:[%s14680_s4 + $0xe0] sm:$0xff]  ;;  %v9802_v47 = vld [vmem:[%s14680_s4 + $0xe8] sm:$0xff] }
0x1525   :  { %v4898_v38 = vpop.f32.mrb[42].mxu1 }
0x1526   :  { %4914 = vrot.lane.b32.xlu0 %v4898_v38, %s13733_s28  ;;  %v4900_v54 = vpop.f32.mrb[43].mxu1 }
0x1529   :  { %v4904_v57 = vpop.f32.mrb[44].mxu1 }
0x152a   :  { %v12995_v60 = vpack.c.bf16 %v4904_v57, %v4898_v38  ;;  %4916 = vrot.lane.b32.xlu1 %v4904_v57, %s13733_s28  ;;  %v4906_v34 = vpop.f32.mrb[45].mxu1  ;;  %v9753_v38 = vld [vmem:[%s14680_s4 + $0x60] sm:$0xff] }
0x152b   :  { %v12999_v35 = vpack.c.bf16 %v4906_v34, %v4900_v54  ;;  %v9754_v54 = vld [vmem:[%s14680_s4 + $0x68] sm:$0xff] }
0x152c   :  { %12996 = vmatprep.subr.bf16.mxu0 %v12995_v60  ;;  %v13059_v57 = vpack.c.bf16 %v9754_v54, %v9753_v38 }
0x152d   :  { %12998 = vmatpush3.bf16.msra.mxu0 %v12995_v60  ;;  %v9734_v60 = vld [vmem:[%s14533_s22 + $0x4] ss:$0 sm:$0xff] }
0x152e   :  { %13000 = vmatprep.subr.bf16.mxu0 %v12999_v35 }
0x1530   :  { %11676 = vmatmul.mubr.msk.f32.vlgmr.msra.gmra.mrb[42].mxu0 %vm1991_vm4, %v9712_v37 }
0x1531   :  { %13002 = vmatpush3.bf16.msra.mxu0 %v12999_v35  ;;  %11682 = vmatprep.mubr.msk.f32.mxu0 %vm1991_vm4, %v9715_v39 }
0x1532   :  { %13020 = vmatprep.subr.bf16.mxu0 %v13019_v51 }
0x1538   :  { %11683 = vmatmul.mubr.msk.f32.vlgmr.msra.gmra.mrb[42].mxu0 %vm1991_vm4, %v9716_v40 }
0x1539   :  { %13022 = vmatpush3.bf16.msra.mxu0 %v13019_v51  ;;  %v13071_v51 = vpack.c.bf16 %v9764_v50, %v9763_v48  ;;  %v13123_v48 = vpack.c.bf16 %v9802_v47, %v9801_v46 }
0x153a   :  { %13024 = vmatprep.subr.bf16.mxu0 %v13023_v53 }
0x153d   :  { %13026 = vmatpush3.bf16.msra.mxu0 %v13023_v53  ;;  %v9766_v53 = vld [vmem:[%s14495_s15 + $0x168] sm:$0xff] }
0x153e   :  { %13028 = vmatprep.subr.bf16.mxu0 %v13027_v58  ;;  %v13075_v55 = vpack.c.bf16 %v9766_v53, %v9765_v52 }
0x1541   :  { %13030 = vmatpush3.bf16.msra.mxu0 %v13027_v58 }
0x1542   :  { %13032 = vmatprep.subr.bf16.mxu0 %v13031_v9 }
0x1545   :  { %13034 = vmatpush3.bf16.msra.mxu0 %v13031_v9 }
0x1598   :  { %v4915_v63 = vpop.permute.xlu0 %4914 }
0x159c   :  { %v4917_v59 = vpop.permute.xlu1 %4916 }
0x160b   :  { %v11684_v61 = vpop.f32.mrb[42].mxu0 }
0x160c   :  { %v13613_v1 = vadd.f32 %v11684_v61, %v4917_v59  ;;  %v5076_v2 = vpop.f32.mrb[43].mxu0  ;;  %v9748_v59 = vld [vmem:[%s14545_s29 + $0x4] ss:$0 sm:$0xff] }
0x160d   :  { %v13614_v3 = vadd.f32 %v5076_v2, %v4915_v63  ;;  %v9767_v2 = vld [vmem:[%s14495_s15 + $0x170] sm:$0xff] }
0x160e   :  { %v5096_v4 = vadd.f32 %v13613_v1, %v9720_v62 }
0x160f   :  { %v5095_v5 = vadd.f32 %v13614_v3, %v9720_v62  ;;  %v9768_v3 = vld [vmem:[%s14495_s15 + $0x178] sm:$0xff] }
0x1610   :  { %v5098_v6 = vmax.f32 %v5096_v4, 0.0  ;;  %v13079_v4 = vpack.c.bf16 %v9768_v3, %v9767_v2  ;;  %v9812_v3 = vld [vmem:[%s14495_s15 + $0x1d8] sm:$0xff] }
0x1611   :  { %v5097_v0 = vmax.f32 %v5095_v5, 0.0  ;;  %v9773_v5 = vld [vmem:[%s14680_s4 + $0x80] sm:$0xff] }
0x1613   :  { %11701 = vmatprep.mubr.msk.f32.mxu1 %vm3654_vm6, %v5097_v0  ;;  %v9774_v0 = vld [vmem:[%s14680_s4 + $0x88] sm:$0xff] }
0x1614   :  { %11702 = vmatmul.mubr.msk.f32.vlgmr.msra.gmra.mrb[46].mxu1 %vm3654_vm6, %v5098_v6  ;;  %v9775_v6 = vld [vmem:[%s14680_s4 + $0x90] sm:$0xff]  ;;  %v13083_v7 = vpack.c.bf16 %v9774_v0, %v9773_v5  ;;  %v9813_v5 = vld [vmem:[%s14495_s15 + $0x1e0] sm:$0xff]  ;;  %v9814_v0 = vld [vmem:[%s14495_s15 + $0x1e8] sm:$0xff] }
0x1615   :  { %13038 = vmatpush3.bf16.msra.mxu1 %v13035_v13  ;;  %v13087_v9 = vpack.c.bf16 %v9776_v8, %v9775_v6  ;;  %v9758_v13 = vld [vmem:[%s14533_s22 + $0x5] ss:$0 sm:$0xff]  ;;  %v13139_v6 = vpack.c.bf16 %v9814_v0, %v9813_v5 }
0x1616   :  { %13040 = vmatprep.subr.bf16.mxu1 %v13039_v14 }
0x1619   :  { %13042 = vmatpush3.bf16.msra.mxu1 %v13039_v14 }
0x161a   :  { %13044 = vmatprep.subr.bf16.mxu1 %v13043_v17 }
0x161d   :  { %13046 = vmatpush3.bf16.msra.mxu1 %v13043_v17 }
0x161e   :  { %13048 = vmatprep.subr.bf16.mxu1 %v13047_v27 }
0x1621   :  { %13050 = vmatpush3.bf16.msra.mxu1 %v13047_v27 }
0x1622   :  { %13068 = vmatprep.subr.bf16.mxu1 %v13067_v49 }
0x16e7   :  { %v11703_v18 = vpop.f32.mrb[46].mxu1 }
0x16e8   :  { %v5190_v20 = vadd.f32 %v11703_v18, %v14655_v24  ;;  %v5180_v22 = vpop.f32.mrb[47].mxu1  ;;  %v9750_v24 = vld [vmem:[%s14680_s4 + $0x48] sm:$0xff] }
0x16e9   :  { %v5189_v25 = vadd.f32 %v5180_v22, %v14650_v31  ;;  %v13051_v30 = vpack.c.bf16 %v9750_v24, %v9749_v29  ;;  %v13055_v31 = vpack.c.bf16 %v9752_v36, %v9751_v33  ;;  %v9789_v29 = vld [vmem:[%s14495_s15 + $0x1a0] sm:$0xff]  ;;  %v9790_v24 = vld [vmem:[%s14495_s15 + $0x1a8] sm:$0xff] }
0x16ea   :  { %v5200_v23 = vadd.f32 %v9732_v21, %v5190_v20  ;;  %v9779_v20 = vld [vmem:[%s14680_s4 + $0xb0] sm:$0xff]  ;;  %v13107_v33 = vpack.c.bf16 %v9790_v24, %v9789_v29 }
0x16eb   :  { %v5199_v28 = vadd.f32 %v9732_v21, %v5189_v25  ;;  %13052 = vmatprep.subr.bf16.mxu0 %v13051_v30  ;;  %v9780_v21 = vld [vmem:[%s14680_s4 + $0xb8] sm:$0xff]  ;;  %v9785_v25 = vld [vmem:[%s14495_s15 + $0x180] sm:$0xff] }
0x16ec   :  { %v13095_v22 = vpack.c.bf16 %v9780_v21, %v9779_v20  ;;  %v9824_v21 = vld [vmem:[%s14680_s4 + $0x118] sm:$0xff] }
0x16ed   :  { %11720 = vmatprep.mubr.msk.f32.mxu0 %vm3654_vm6, %v5199_v28 }
0x16ee   :  { %11721 = vmatmul.mubr.msk.f32.vlgmr.msra.gmra.mrb[44].mxu0 %vm3654_vm6, %v5200_v23 }
0x16ef   :  { %13054 = vmatpush3.bf16.msra.mxu0 %v13051_v30 }
0x16f0   :  { %13056 = vmatprep.subr.bf16.mxu0 %v13055_v31 }
0x16f3   :  { %13058 = vmatpush3.bf16.msra.mxu0 %v13055_v31  ;;  %v9772_v31 = vld [vmem:[%s14545_s29 + $0x5] ss:$0 sm:$0xff] }
0x16f4   :  { %13060 = vmatprep.subr.bf16.mxu0 %v13059_v57 }
0x16f7   :  { %13062 = vmatpush3.bf16.msra.mxu0 %v13059_v57 }
0x16f8   :  { %13064 = vmatprep.subr.bf16.mxu0 %v13063_v45 }
0x16fb   :  { %13066 = vmatpush3.bf16.msra.mxu0 %v13063_v45 }
0x16fc   :  { %13084 = vmatprep.subr.bf16.mxu0 %v13083_v7 }
0x17c1   :  { %v11722_v34 = vpop.f32.mrb[44].mxu0 }
0x17c2   :  { %v5295_v35 = vadd.f32 %v11722_v34, %v9734_v60  ;;  %v5289_v37 = vpop.f32.mrb[45].mxu0  ;;  %v9791_v34 = vld [vmem:[%s14495_s15 + $0x1b0] sm:$0xff] }
0x17c3   :  { %v5290_v39 = vadd.f32 %v9734_v60, %v5289_v37 }
0x17c4   :  { %v5299_v42 = vmax.f32 %v5295_v35, 0.0  ;;  %v9792_v35 = vld [vmem:[%s14495_s15 + $0x1b8] sm:$0xff] }
0x17c5   :  { %v5298_v40 = vmax.f32 %v5290_v39, 0.0  ;;  %v13111_v37 = vpack.c.bf16 %v9792_v35, %v9791_v34  ;;  %v9797_v39 = vld [vmem:[%s14680_s4 + $0xc0] sm:$0xff]  ;;  %v9836_v35 = vld [vmem:[%s14495_s15 + $0x218] sm:$0xff] }
0x17c7   :  { %11739 = vmatprep.mubr.msk.f32.mxu1 %vm3654_vm6, %v5298_v40  ;;  %v9798_v40 = vld [vmem:[%s14680_s4 + $0xc8] sm:$0xff] }
0x17c8   :  { %11740 = vmatmul.mubr.msk.f32.vlgmr.msra.gmra.mrb[48].mxu1 %vm3654_vm6, %v5299_v42  ;;  %v9799_v42 = vld [vmem:[%s14680_s4 + $0xd0] sm:$0xff]  ;;  %v13115_v43 = vpack.c.bf16 %v9798_v40, %v9797_v39  ;;  %v9837_v39 = vld [vmem:[%s14495_s15 + $0x220] sm:$0xff]  ;;  %v9838_v40 = vld [vmem:[%s14495_s15 + $0x228] sm:$0xff] }
0x17c9   :  { %13070 = vmatpush3.bf16.msra.mxu1 %v13067_v49  ;;  %v13119_v45 = vpack.c.bf16 %v9800_v44, %v9799_v42  ;;  %v9782_v49 = vld [vmem:[%s14533_s22 + $0x6] ss:$0 sm:$0xff]  ;;  %v13171_v42 = vpack.c.bf16 %v9838_v40, %v9837_v39 }
0x17ca   :  { %13072 = vmatprep.subr.bf16.mxu1 %v13071_v51 }
0x17cd   :  { %13074 = vmatpush3.bf16.msra.mxu1 %v13071_v51 }
0x17ce   :  { %13076 = vmatprep.subr.bf16.mxu1 %v13075_v55 }
0x17d1   :  { %13078 = vmatpush3.bf16.msra.mxu1 %v13075_v55 }
0x17d2   :  { %13080 = vmatprep.subr.bf16.mxu1 %v13079_v4 }
0x17d5   :  { %13082 = vmatpush3.bf16.msra.mxu1 %v13079_v4 }
0x189b   :  { %v11741_v56 = vpop.f32.mrb[48].mxu1 }
0x189c   :  { %v5391_v58 = vadd.f32 %v11741_v56, %v5200_v23  ;;  %v5381_v61 = vpop.f32.mrb[49].mxu1  ;;  %v9787_v23 = vld [vmem:[%s14495_s15 + $0x190] sm:$0xff] }
0x189d   :  { %v5390_v62 = vadd.f32 %v5381_v61, %v5199_v28  ;;  %v9786_v28 = vld [vmem:[%s14495_s15 + $0x188] sm:$0xff]  ;;  %v13103_v27 = vpack.c.bf16 %v9788_v32, %v9787_v23 }
0x189e   :  { %v5401_v1 = vadd.f32 %v9748_v59, %v5391_v58  ;;  %v13099_v26 = vpack.c.bf16 %v9786_v28, %v9785_v25  ;;  %v9803_v58 = vld [vmem:[%s14680_s4 + $0xf0] sm:$0xff]  ;;  %v9825_v25 = vld [vmem:[%s14680_s4 + $0x120] sm:$0xff]  ;;  %v9826_v28 = vld [vmem:[%s14680_s4 + $0x128] sm:$0xff] }
0x189f   :  { %v5400_v63 = vadd.f32 %v9748_v59, %v5390_v62  ;;  %v9804_v59 = vld [vmem:[%s14680_s4 + $0xf8] sm:$0xff]  ;;  %v9809_v62 = vld [vmem:[%s14495_s15 + $0x1c0] sm:$0xff]  ;;  %v13155_v23 = vpack.c.bf16 %v9826_v28, %v9825_v25 }
0x18a0   :  { %13100 = vmatprep.subr.bf16.mxu1 %v13099_v26  ;;  %v13127_v61 = vpack.c.bf16 %v9804_v59, %v9803_v58  ;;  %v9848_v59 = vld [vmem:[%s14680_s4 + $0x158] sm:$0xff] }
0x18a1   :  { %11758 = vmatprep.mubr.msk.f32.mxu0 %vm3654_vm6, %v5400_v63 }
0x18a2   :  { %11759 = vmatmul.mubr.msk.f32.vlgmr.msra.gmra.mrb[46].mxu0 %vm3654_vm6, %v5401_v1 }
0x18a3   :  { %13086 = vmatpush3.bf16.msra.mxu0 %v13083_v7 }
0x18a4   :  { %13088 = vmatprep.subr.bf16.mxu0 %v13087_v9 }
0x18a7   :  { %13090 = vmatpush3.bf16.msra.mxu0 %v13087_v9  ;;  %v9796_v9 = vld [vmem:[%s14545_s29 + $0x6] ss:$0 sm:$0xff] }
0x18a8   :  { %13092 = vmatprep.subr.bf16.mxu0 %v13091_v12 }
0x18ab   :  { %13094 = vmatpush3.bf16.msra.mxu0 %v13091_v12 }
0x18ac   :  { %13096 = vmatprep.subr.bf16.mxu0 %v13095_v22 }
0x18af   :  { %13098 = vmatpush3.bf16.msra.mxu0 %v13095_v22 }
0x18b0   :  { %13116 = vmatprep.subr.bf16.mxu0 %v13115_v43 }
0x1975   :  { %v11760_v41 = vpop.f32.mrb[46].mxu0 }
0x1976   :  { %v5497_v14 = vadd.f32 %v11760_v41, %v9758_v13  ;;  %v5491_v15 = vpop.f32.mrb[47].mxu0  ;;  %v9815_v41 = vld [vmem:[%s14495_s15 + $0x1f0] sm:$0xff] }
0x1977   :  { %v5492_v16 = vadd.f32 %v9758_v13, %v5491_v15 }
0x1978   :  { %v5501_v18 = vmax.f32 %v5497_v14, 0.0  ;;  %v9816_v14 = vld [vmem:[%s14495_s15 + $0x1f8] sm:$0xff] }
0x1979   :  { %v5500_v17 = vmax.f32 %v5492_v16, 0.0  ;;  %v13143_v15 = vpack.c.bf16 %v9816_v14, %v9815_v41  ;;  %v9821_v16 = vld [vmem:[%s14680_s4 + $0x100] sm:$0xff]  ;;  %v9860_v14 = vld [vmem:[%s14495_s15 + $0x258] sm:$0xff] }
0x197b   :  { %11777 = vmatprep.mubr.msk.f32.mxu1 %vm3654_vm6, %v5500_v17  ;;  %v9822_v17 = vld [vmem:[%s14680_s4 + $0x108] sm:$0xff] }
0x197c   :  { %11778 = vmatmul.mubr.msk.f32.vlgmr.msra.gmra.mrb[50].mxu1 %vm3654_vm6, %v5501_v18  ;;  %v9823_v18 = vld [vmem:[%s14680_s4 + $0x110] sm:$0xff]  ;;  %v13147_v20 = vpack.c.bf16 %v9822_v17, %v9821_v16  ;;  %v9861_v16 = vld [vmem:[%s14495_s15 + $0x260] sm:$0xff]  ;;  %v9862_v17 = vld [vmem:[%s14495_s15 + $0x268] sm:$0xff] }
0x197d   :  { %13102 = vmatpush3.bf16.msra.mxu1 %v13099_v26  ;;  %v13151_v22 = vpack.c.bf16 %v9824_v21, %v9823_v18  ;;  %v9806_v26 = vld [vmem:[%s14533_s22 + $0x7] ss:$0 sm:$0xff]  ;;  %v13203_v18 = vpack.c.bf16 %v9862_v17, %v9861_v16  ;;  %v9884_v16 = vld [vmem:[%s14447_s2 + $0x238] sm:$0xff] }
0x197e   :  { %13104 = vmatprep.subr.bf16.mxu1 %v13103_v27 }
0x1981   :  { %13106 = vmatpush3.bf16.msra.mxu1 %v13103_v27 }
0x1982   :  { %13108 = vmatprep.subr.bf16.mxu1 %v13107_v33 }
0x1985   :  { %13110 = vmatpush3.bf16.msra.mxu1 %v13107_v33 }
0x1986   :  { %13112 = vmatprep.subr.bf16.mxu1 %v13111_v37 }
0x1989   :  { %13114 = vmatpush3.bf16.msra.mxu1 %v13111_v37 }
0x1a4f   :  { %v11779_v30 = vpop.f32.mrb[50].mxu1 }
0x1a50   :  { %v5593_v36 = vadd.f32 %v11779_v30, %v5401_v1  ;;  %v5583_v38 = vpop.f32.mrb[51].mxu1  ;;  %v9811_v1 = vld [vmem:[%s14495_s15 + $0x1d0] sm:$0xff] }
0x1a51   :  { %v5592_v54 = vadd.f32 %v5583_v38, %v5400_v63  ;;  %v9810_v63 = vld [vmem:[%s14495_s15 + $0x1c8] sm:$0xff]  ;;  %v13135_v4 = vpack.c.bf16 %v9812_v3, %v9811_v1 }
0x1a52   :  { %v5603_v60 = vadd.f32 %v9772_v31, %v5593_v36  ;;  %v13131_v2 = vpack.c.bf16 %v9810_v63, %v9809_v62  ;;  %v9827_v36 = vld [vmem:[%s14680_s4 + $0x130] sm:$0xff]  ;;  %v9849_v62 = vld [vmem:[%s14680_s4 + $0x160] sm:$0xff]  ;;  %v9850_v63 = vld [vmem:[%s14680_s4 + $0x168] sm:$0xff] }
0x1a53   :  { %v5602_v57 = vadd.f32 %v9772_v31, %v5592_v54  ;;  %v9828_v31 = vld [vmem:[%s14680_s4 + $0x138] sm:$0xff]  ;;  %v9833_v54 = vld [vmem:[%s14495_s15 + $0x200] sm:$0xff]  ;;  %v13187_v1 = vpack.c.bf16 %v9850_v63, %v9849_v62 }
0x1a54   :  { %13132 = vmatprep.subr.bf16.mxu1 %v13131_v2  ;;  %v13159_v38 = vpack.c.bf16 %v9828_v31, %v9827_v36  ;;  %v6415_v31 = vld [vmem:[%s14819_s9 + $0x18] sm:$0xff] }
0x1a55   :  { %11796 = vmatprep.mubr.msk.f32.mxu0 %vm3654_vm6, %v5602_v57 }
0x1a56   :  { %11797 = vmatmul.mubr.msk.f32.vlgmr.msra.gmra.mrb[48].mxu0 %vm3654_vm6, %v5603_v60 }
0x1a57   :  { %13118 = vmatpush3.bf16.msra.mxu0 %v13115_v43 }
0x1a58   :  { %13120 = vmatprep.subr.bf16.mxu0 %v13119_v45 }
0x1a5b   :  { %13122 = vmatpush3.bf16.msra.mxu0 %v13119_v45  ;;  %v9820_v45 = vld [vmem:[%s14545_s29 + $0x7] ss:$0 sm:$0xff] }
0x1a5c   :  { %13124 = vmatprep.subr.bf16.mxu0 %v13123_v48 }
0x1a5f   :  { %13126 = vmatpush3.bf16.msra.mxu0 %v13123_v48 }
0x1a60   :  { %13128 = vmatprep.subr.bf16.mxu0 %v13127_v61 }
0x1a63   :  { %13130 = vmatpush3.bf16.msra.mxu0 %v13127_v61 }
0x1a64   :  { %13148 = vmatprep.subr.bf16.mxu0 %v13147_v20 }
0x1b29   :  { %v11798_v50 = vpop.f32.mrb[48].mxu0 }
0x1b2a   :  { %v5699_v51 = vadd.f32 %v11798_v50, %v9782_v49  ;;  %v5693_v52 = vpop.f32.mrb[49].mxu0  ;;  %v9839_v50 = vld [vmem:[%s14495_s15 + $0x230] sm:$0xff] }
0x1b2b   :  { %v5694_v53 = vadd.f32 %v9782_v49, %v5693_v52 }
0x1b2c   :  { %v5703_v56 = vmax.f32 %v5699_v51, 0.0  ;;  %v9840_v51 = vld [vmem:[%s14495_s15 + $0x238] sm:$0xff] }
0x1b2d   :  { %v5702_v55 = vmax.f32 %v5694_v53, 0.0  ;;  %v13175_v52 = vpack.c.bf16 %v9840_v51, %v9839_v50  ;;  %v9845_v53 = vld [vmem:[%s14680_s4 + $0x140] sm:$0xff] }
0x1b2f   :  { %11815 = vmatprep.mubr.msk.f32.mxu1 %vm3654_vm6, %v5702_v55  ;;  %v9846_v55 = vld [vmem:[%s14680_s4 + $0x148] sm:$0xff] }
0x1b30   :  { %11816 = vmatmul.mubr.msk.f32.vlgmr.msra.gmra.mrb[52].mxu1 %vm3654_vm6, %v5703_v56  ;;  %v9847_v56 = vld [vmem:[%s14680_s4 + $0x150] sm:$0xff]  ;;  %v13179_v58 = vpack.c.bf16 %v9846_v55, %v9845_v53  ;;  %v9869_v55 = vld [vmem:[%s14839_s16] ss:$0 sm:$0xff] }
0x1b31   :  { %13134 = vmatpush3.bf16.msra.mxu1 %v13131_v2  ;;  %v13183_v61 = vpack.c.bf16 %v9848_v59, %v9847_v56  ;;  %v9830_v2 = vld [vmem:[%s14533_s22 + $0x8] ss:$0 sm:$0xff] }
0x1b32   :  { %13136 = vmatprep.subr.bf16.mxu1 %v13135_v4 }
0x1b35   :  { %13138 = vmatpush3.bf16.msra.mxu1 %v13135_v4 }
0x1b36   :  { %13140 = vmatprep.subr.bf16.mxu1 %v13139_v6 }
0x1b39   :  { %13142 = vmatpush3.bf16.msra.mxu1 %v13139_v6 }
0x1b3a   :  { %13144 = vmatprep.subr.bf16.mxu1 %v13143_v15 }
0x1b3d   :  { %13146 = vmatpush3.bf16.msra.mxu1 %v13143_v15 }
0x1c03   :  { %v11817_v7 = vpop.f32.mrb[52].mxu1 }
0x1c04   :  { %v5795_v8 = vadd.f32 %v11817_v7, %v5603_v60  ;;  %v5785_v10 = vpop.f32.mrb[53].mxu1  ;;  %v9835_v60 = vld [vmem:[%s14495_s15 + $0x210] sm:$0xff] }
0x1c05   :  { %v5794_v11 = vadd.f32 %v5785_v10, %v5602_v57  ;;  %v9834_v57 = vld [vmem:[%s14495_s15 + $0x208] sm:$0xff]  ;;  %v13167_v37 = vpack.c.bf16 %v9836_v35, %v9835_v60 }
0x1c06   :  { %v5805_v13 = vadd.f32 %v9796_v9, %v5795_v8  ;;  %v13163_v34 = vpack.c.bf16 %v9834_v57, %v9833_v54  ;;  %v9851_v8 = vld [vmem:[%s14680_s4 + $0x170] sm:$0xff]  ;;  %v6416_v54 = vld [vmem:[%s14819_s9 + $0x20] sm:$0xff]  ;;  %v6417_v57 = vld [vmem:[%s14819_s9 + $0x28] sm:$0xff] }
0x1c07   :  { %v5804_v12 = vadd.f32 %v9796_v9, %v5794_v11  ;;  %v9852_v9 = vld [vmem:[%s14680_s4 + $0x178] sm:$0xff]  ;;  %v9857_v11 = vld [vmem:[%s14495_s15 + $0x240] sm:$0xff]  ;;  %v13219_v60 = vpack.c.bf16 %v6417_v57, %v6416_v54  ;;  %v9890_v54 = vld [vmem:[%s14447_s2 + $0x268] sm:$0xff] }
0x1c08   :  { %13164 = vmatprep.subr.bf16.mxu1 %v13163_v34  ;;  %v13191_v10 = vpack.c.bf16 %v9852_v9, %v9851_v8  ;;  %v9892_v57 = vld [vmem:[%s14447_s2 + $0x278] sm:$0xff] }
0x1c09   :  { %11834 = vmatprep.mubr.msk.f32.mxu0 %vm3654_vm6, %v5804_v12 }
0x1c0a   :  { %11835 = vmatmul.mubr.msk.f32.vlgmr.msra.gmra.mrb[50].mxu0 %vm3654_vm6, %v5805_v13 }
0x1c0b   :  { %13150 = vmatpush3.bf16.msra.mxu0 %v13147_v20 }
0x1c0c   :  { %13152 = vmatprep.subr.bf16.mxu0 %v13151_v22 }
0x1c0f   :  { %13154 = vmatpush3.bf16.msra.mxu0 %v13151_v22  ;;  %v9844_v22 = vld [vmem:[%s14545_s29 + $0x8] ss:$0 sm:$0xff] }
0x1c10   :  { %13156 = vmatprep.subr.bf16.mxu0 %v13155_v23 }
0x1c13   :  { %13158 = vmatpush3.bf16.msra.mxu0 %v13155_v23 }
0x1c14   :  { %13160 = vmatprep.subr.bf16.mxu0 %v13159_v38 }
0x1c17   :  { %13162 = vmatpush3.bf16.msra.mxu0 %v13159_v38 }
0x1c18   :  { %13180 = vmatprep.subr.bf16.mxu0 %v13179_v58 }
0x1cdd   :  { %v11836_v32 = vpop.f32.mrb[50].mxu0 }
0x1cde   :  { %v5901_v27 = vadd.f32 %v11836_v32, %v9806_v26  ;;  %v5895_v29 = vpop.f32.mrb[51].mxu0  ;;  %v9863_v32 = vld [vmem:[%s14495_s15 + $0x270] sm:$0xff] }
0x1cdf   :  { %v5896_v24 = vadd.f32 %v9806_v26, %v5895_v29 }
0x1ce0   :  { %v5905_v30 = vmax.f32 %v5901_v27, 0.0  ;;  %v9864_v27 = vld [vmem:[%s14495_s15 + $0x278] sm:$0xff] }
0x1ce1   :  { %v5904_v33 = vmax.f32 %v5896_v24, 0.0  ;;  %v13207_v29 = vpack.c.bf16 %v9864_v27, %v9863_v32  ;;  %v6412_v24 = vld [vmem:[%s14819_s9] sm:$0xff]  ;;  %v9887_v32 = vld [vmem:[%s14447_s2 + $0x250] sm:$0xff] }
0x1ce3   :  { %11853 = vmatprep.mubr.msk.f32.mxu1 %vm3654_vm6, %v5904_v33  ;;  %v6413_v33 = vld [vmem:[%s14819_s9 + $0x8] sm:$0xff] }
0x1ce4   :  { %11854 = vmatmul.mubr.msk.f32.vlgmr.msra.gmra.mrb[54].mxu1 %vm3654_vm6, %v5905_v30  ;;  %v6414_v30 = vld [vmem:[%s14819_s9 + $0x10] sm:$0xff]  ;;  %v13211_v36 = vpack.c.bf16 %v6413_v33, %v6412_v24 }
0x1ce5   :  { %13166 = vmatpush3.bf16.msra.mxu1 %v13163_v34  ;;  %v13215_v38 = vpack.c.bf16 %v6415_v31, %v6414_v30  ;;  %v9854_v34 = vld [vmem:[%s14533_s22 + $0x9] ss:$0 sm:$0xff] }
0x1ce6   :  { %13168 = vmatprep.subr.bf16.mxu1 %v13167_v37 }
0x1ce9   :  { %13170 = vmatpush3.bf16.msra.mxu1 %v13167_v37 }
0x1cea   :  { %13172 = vmatprep.subr.bf16.mxu1 %v13171_v42 }
0x1ced   :  { %13174 = vmatpush3.bf16.msra.mxu1 %v13171_v42 }
0x1cee   :  { %13176 = vmatprep.subr.bf16.mxu1 %v13175_v52 }
0x1cf1   :  { %13178 = vmatpush3.bf16.msra.mxu1 %v13175_v52 }
0x1db7   :  { %v11855_v43 = vpop.f32.mrb[54].mxu1 }
0x1db8   :  { %v5997_v44 = vadd.f32 %v11855_v43, %v5805_v13  ;;  %v5987_v46 = vpop.f32.mrb[55].mxu1  ;;  %v9859_v13 = vld [vmem:[%s14495_s15 + $0x250] sm:$0xff] }
0x1db9   :  { %v5996_v47 = vadd.f32 %v5987_v46, %v5804_v12  ;;  %v9858_v12 = vld [vmem:[%s14495_s15 + $0x248] sm:$0xff]  ;;  %v13199_v15 = vpack.c.bf16 %v9860_v14, %v9859_v13  ;;  %v9877_v13 = vld [vmem:[%s14447_s2 + $0x200] sm:$0xff]  ;;  %v9879_v14 = vld [vmem:[%s14447_s2 + $0x210] sm:$0xff] }
0x1dba   :  { %v6007_v49 = vadd.f32 %v9820_v45, %v5997_v44  ;;  %v13195_v41 = vpack.c.bf16 %v9858_v12, %v9857_v11  ;;  %v6418_v44 = vld [vmem:[%s14819_s9 + $0x30] sm:$0xff]  ;;  %v9878_v11 = vld [vmem:[%s14447_s2 + $0x208] sm:$0xff]  ;;  %v9880_v12 = vld [vmem:[%s14447_s2 + $0x218] sm:$0xff]  ;;  %v13229_v17 = vpack.c.bf16 %v9879_v14, %v9877_v13 }
0x1dbb   :  { %v6006_v48 = vadd.f32 %v9820_v45, %v5996_v47  ;;  %v6419_v45 = vld [vmem:[%s14819_s9 + $0x38] sm:$0xff]  ;;  %v9919_v14 = vld [vmem:[%s14447_s2 + $0x2b0] sm:$0xff] }
0x1dbc   :  { %13196 = vmatprep.subr.bf16.mxu1 %v13195_v41  ;;  %v13223_v46 = vpack.c.bf16 %v6419_v45, %v6418_v44 }
0x1dbd   :  { %11872 = vmatprep.mubr.msk.f32.mxu0 %vm3654_vm6, %v6006_v48 }
0x1dbe   :  { %11873 = vmatmul.mubr.msk.f32.vlgmr.msra.gmra.mrb[52].mxu0 %vm3654_vm6, %v6007_v49 }
0x1dbf   :  { %13182 = vmatpush3.bf16.msra.mxu0 %v13179_v58 }
0x1dc0   :  { %13184 = vmatprep.subr.bf16.mxu0 %v13183_v61 }
0x1dc3   :  { %13186 = vmatpush3.bf16.msra.mxu0 %v13183_v61 }
0x1dc4   :  { %13188 = vmatprep.subr.bf16.mxu0 %v13187_v1 }
0x1dc7   :  { %13190 = vmatpush3.bf16.msra.mxu0 %v13187_v1 }
0x1dc8   :  { %13192 = vmatprep.subr.bf16.mxu0 %v13191_v10 }
0x1dcb   :  { %13194 = vmatpush3.bf16.msra.mxu0 %v13191_v10  ;;  %v9872_v10 = vld [vmem:[%s14442_s27 + $0x8] sm:$0xff] }
0x1dcc   :  { %13212 = vmatprep.subr.bf16.mxu0 %v13211_v36 }
0x1e91   :  { %v11874_v3 = vpop.f32.mrb[52].mxu0 }
0x1e92   :  { %v6103_v4 = vadd.f32 %v11874_v3, %v9830_v2  ;;  %v6097_v5 = vpop.f32.mrb[53].mxu0 }
0x1e93   :  { %v6098_v0 = vadd.f32 %v9830_v2, %v6097_v5 }
0x1e94   :  { %v6107_v7 = vmax.f32 %v6103_v4, 0.0 }
0x1e95   :  { %v6106_v6 = vmax.f32 %v6098_v0, 0.0 }
0x1e97   :  { %11891 = vmatprep.mubr.msk.f32.mxu1 %vm3654_vm6, %v6106_v6 }
0x1e98   :  { %11892 = vmatmul.mubr.msk.f32.vlgmr.msra.gmra.mrb[56].mxu1 %vm3654_vm6, %v6107_v7 }
0x1e99   :  { %13198 = vmatpush3.bf16.msra.mxu1 %v13195_v41  ;;  %v13227_v41 = vpack.c.bf16 %v9880_v12, %v9878_v11  ;;  %v9920_v11 = vld [vmem:[%s14447_s2 + $0x2b8] sm:$0xff] }
0x1e9a   :  { %13200 = vmatprep.subr.bf16.mxu1 %v13199_v15 }
0x1e9d   :  { %13202 = vmatpush3.bf16.msra.mxu1 %v13199_v15  ;;  %v9882_v15 = vld [vmem:[%s14447_s2 + $0x228] sm:$0xff] }
0x1e9e   :  { %13204 = vmatprep.subr.bf16.mxu1 %v13203_v18 }
0x1ea1   :  { %13206 = vmatpush3.bf16.msra.mxu1 %v13203_v18  ;;  %v13231_v18 = vpack.c.bf16 %v9884_v16, %v9882_v15  ;;  %v9922_v15 = vld [vmem:[%s14447_s2 + $0x2c8] sm:$0xff]  ;;  %v9924_v16 = vld [vmem:[%s14447_s2 + $0x2d8] sm:$0xff] }
0x1ea2   :  { %13208 = vmatprep.subr.bf16.mxu1 %v13207_v29 }
0x1ea5   :  { %13210 = vmatpush3.bf16.msra.mxu1 %v13207_v29 }
0x1ea6   :  { %11951 = vmatprep.subr.mxu1 %v9872_v10 }
0x1f6b   :  { %v11893_v20 = vpop.f32.mrb[56].mxu1 }
0x1f6c   :  { %v6199_v21 = vadd.f32 %v11893_v20, %v6007_v49  ;;  %v6189_v25 = vpop.f32.mrb[57].mxu1  ;;  %v9868_v49 = vld [vmem:[%s14545_s29 + $0x9] ss:$0 sm:$0xff]  ;;  %v9881_v20 = vld [vmem:[%s14447_s2 + $0x220] sm:$0xff] }
0x1f6d   :  { %v6198_v28 = vadd.f32 %v6189_v25, %v6006_v48  ;;  %v9888_v25 = vld [vmem:[%s14447_s2 + $0x258] sm:$0xff] }
0x1f6e   :  { %v6209_v26 = vadd.f32 %v9844_v22, %v6199_v21  ;;  %v9883_v21 = vld [vmem:[%s14447_s2 + $0x230] sm:$0xff] }
0x1f6f   :  { %v6208_v23 = vadd.f32 %v9844_v22, %v6198_v28  ;;  %v9886_v22 = vld [vmem:[%s14447_s2 + $0x248] sm:$0xff]  ;;  %v13233_v28 = vpack.c.bf16 %v9883_v21, %v9881_v20  ;;  %v9921_v20 = vld [vmem:[%s14447_s2 + $0x2c0] sm:$0xff]  ;;  %v9923_v21 = vld [vmem:[%s14447_s2 + $0x2d0] sm:$0xff] }
0x1f71   :  { %11910 = vmatprep.mubr.msk.f32.mxu0 %vm3654_vm6, %v6208_v23 }
0x1f72   :  { %11911 = vmatmul.mubr.msk.f32.vlgmr.msra.gmra.mrb[54].mxu0 %vm3654_vm6, %v6209_v26 }
0x1f73   :  { %13214 = vmatpush3.bf16.msra.mxu0 %v13211_v36 }
0x1f74   :  { %13216 = vmatprep.subr.bf16.mxu0 %v13215_v38 }
0x1f77   :  { %13218 = vmatpush3.bf16.msra.mxu0 %v13215_v38  ;;  %v13704_v38 = vld [vmem:[%s14488_s10] sm:$0xff] }
0x1f78   :  { %13220 = vmatprep.subr.bf16.mxu0 %v13219_v60 }
0x1f7b   :  { %13222 = vmatpush3.bf16.msra.mxu0 %v13219_v60  ;;  %v13239_v60 = vpack.c.bf16 %v9892_v57, %v9890_v54  ;;  %v9928_v54 = vld [vmem:[%s14447_s2 + $0x2f8] sm:$0xff]  ;;  %v9925_v57 = vld [vmem:[%s14447_s2 + $0x2e0] sm:$0xff] }
0x1f7c   :  { %13224 = vmatprep.subr.bf16.mxu0 %v13223_v46 }
0x1f7f   :  { %13226 = vmatpush3.bf16.msra.mxu0 %v13223_v46 }
0x1f80   :  { %13228 = vmatprep.subr.bf16.mxu0 %v13227_v41  ;;  %v9917_v41 = vld [vmem:[%s14447_s2 + $0x2a0] sm:$0xff] }
0x2045   :  { %v11912_v35 = vpop.f32.mrb[54].mxu0 }
0x2046   :  { %v6305_v37 = vadd.f32 %v11912_v35, %v9854_v34  ;;  %v6299_v39 = vpop.f32.mrb[55].mxu0  ;;  %v9891_v35 = vld [vmem:[%s14447_s2 + $0x270] sm:$0xff] }
0x2047   :  { %v6300_v40 = vadd.f32 %v9854_v34, %v6299_v39  ;;  %v9889_v34 = vld [vmem:[%s14447_s2 + $0x260] sm:$0xff] }
0x2048   :  { %v6309_v43 = vmax.f32 %v6305_v37, 0.0  ;;  %v13241_v37 = vpack.c.bf16 %v9891_v35, %v9889_v34  ;;  %v9874_v39 = vld [vmem:[%s14472_s6 + $0x1] ss:$0 sm:$0xff]  ;;  %v9927_v34 = vld [vmem:[%s14447_s2 + $0x2f0] sm:$0xff] }
0x2049   :  { %v6308_v42 = vmax.f32 %v6300_v40, 0.0  ;;  %v13281_v35 = vpack.c.bf16 %v9927_v34, %v9925_v57  ;;  %v9964_v57 = vld [vmem:[%s14447_s2 + $0x378] sm:$0xff] }
0x204b   :  { %11929 = vmatprep.mubr.msk.f32.mxu1 %vm3654_vm6, %v6308_v42 }
0x204c   :  { %11930 = vmatmul.mubr.msk.f32.vlgmr.msra.gmra.mrb[58].mxu1 %vm3654_vm6, %v6309_v43 }
0x204d   :  { %11952 = vmatpush3.msra.mxu1 %v9872_v10  ;;  %v9918_v10 = vld [vmem:[%s14447_s2 + $0x2a8] sm:$0xff] }
0x204e   :  { %v13271_v13 = vpack.c.bf16 %v9920_v11, %v9918_v10  ;;  %v9951_v10 = vld [vmem:[%s14447_s2 + $0x310] sm:$0xff]  ;;  %v9954_v11 = vld [vmem:[%s14447_s2 + $0x328] sm:$0xff] }
0x211f   :  { %v11931_v47 = vpop.f32.mrb[58].mxu1 }
0x2120   :  { %v6401_v48 = vadd.f32 %v11931_v47, %v6209_v26  ;;  %v6391_v50 = vpop.f32.mrb[59].mxu1  ;;  %v9885_v26 = vld [vmem:[%s14447_s2 + $0x240] sm:$0xff] }
0x2121   :  { %v6400_v51 = vadd.f32 %v6391_v50, %v6208_v23  ;;  %v13235_v23 = vpack.c.bf16 %v9888_v25, %v9886_v22  ;;  %v13237_v27 = vpack.c.bf16 %v9887_v32, %v9885_v26  ;;  %v13277_v22 = vpack.c.bf16 %v9923_v21, %v9921_v20  ;;  %v9957_v21 = vld [vmem:[%s14447_s2 + $0x340] sm:$0xff] }
0x2122   :  { %v6411_v53 = vadd.f32 %v9868_v49, %v6401_v48 }
0x2123   :  { %v6410_v52 = vadd.f32 %v9868_v49, %v6400_v51  ;;  %v9901_v51 = vld [vmem:[%s14495_s15 + $0x280] sm:$0xff] }
0x2125   :  { %11948 = vmatprep.mubr.msk.f32.mxu0 %vm3654_vm6, %v6410_v52  ;;  %v9902_v52 = vld [vmem:[%s14495_s15 + $0x288] sm:$0xff] }
0x2126   :  { %11949 = vmatmul.mubr.msk.f32.vlgmr.msra.gmra.mrb[56].mxu0 %vm3654_vm6, %v6411_v53  ;;  %v13251_v53 = vpack.c.bf16 %v9902_v52, %v9901_v51  ;;  %v9940_v52 = vld [vmem:[%s14495_s15 + $0x2d8] sm:$0xff] }
0x2127   :  { %6708 = vmatprep.mubr.f32.mxu0 %v13743_v19  ;;  %13230 = vmatpush1.bf16.msra.mxu0 %v13229_v17  ;;  %v13273_v17 = vpack.c.bf16 %v9919_v14, %v9917_v41  ;;  %v9953_v14 = vld [vmem:[%s14447_s2 + $0x320] sm:$0xff] }
0x2128   :  { %13232 = vmatprep.subr.bf16.mxu0 %v13231_v18  ;;  %v13275_v18 = vpack.c.bf16 %v9924_v16, %v9922_v15  ;;  %v9955_v15 = vld [vmem:[%s14447_s2 + $0x330] sm:$0xff]  ;;  %v9958_v16 = vld [vmem:[%s14447_s2 + $0x348] sm:$0xff] }
0x212b   :  { %13234 = vmatpush1.bf16.msra.mxu0 %v13233_v28 }
0x212c   :  { %13236 = vmatprep.subr.bf16.mxu0 %v13235_v23  ;;  %v9900_v23 = vld [vmem:[%s14533_s22 + $0xa] ss:$0 sm:$0xff] }
0x212f   :  { %13238 = vmatpush1.bf16.msra.mxu0 %v13237_v27 }
0x2130   :  { %13240 = vmatprep.subr.bf16.mxu0 %v13239_v60 }
0x2133   :  { %13242 = vmatpush1.bf16.msra.mxu0 %v13241_v37 }
0x21f9   :  { %v11950_v56 = vpop.f32.mrb[56].mxu0 }
0x21fa   :  { %v6505_v58 = vadd.f32 %v11950_v56, %v9869_v55  ;;  %v6499_v59 = vpop.f32.mrb[57].mxu0  ;;  %v13706_v56 = vld [vmem:[%s14501_s18] sm:$0xff] }
0x21fb   :  { %v6500_v61 = vadd.f32 %v9869_v55, %v6499_v59  ;;  %v13705_v55 = vld [vmem:[%s14488_s10 + $0x8] sm:$0xff]  ;;  %v9904_v59 = vld [vmem:[%s14495_s15 + $0x298] sm:$0xff] }
0x21fc   :  { %10178 = vst.msk [vmem:[%s14429_s23 + $0x18] sm:$0xff] %vm3526_vm5, %v6505_v58  ;;  %v6511_v62 = vsel %vm3526_vm5, %v6505_v58, -inf }
0x21fd   :  { %10177 = vst.msk [vmem:[%s14429_s23 + $0x10] sm:$0xff] %vm3526_vm5, %v6500_v61  ;;  %6512 = vmax.xlane.f32.xlu1 %v6511_v62  ;;  %v6508_v63 = vsel %vm3526_vm5, %v6500_v61, -inf  ;;  %v13707_v62 = vld [vmem:[%s14501_s18 + $0x8] sm:$0xff] }
0x21fe   :  { %6509 = vmax.xlane.f32.xlu0 %v6508_v63  ;;  %v9905_v63 = vld [vmem:[%s14495_s15 + $0x2a0] sm:$0xff] }
0x228a   :  { %v6513_v1 = vpop.xlane.xlu1 %6512 }
0x228b   :  { %v6515_v2 = vsub.f32 %v6505_v58, %v6513_v1  ;;  %v6510_v3 = vpop.xlane.xlu0 %6509  ;;  %v9903_v58 = vld [vmem:[%s14495_s15 + $0x290] sm:$0xff]  ;;  %v9906_v1 = vld [vmem:[%s14495_s15 + $0x2a8] sm:$0xff] }
0x228c   :  { %v6514_v4 = vsub.f32 %v6500_v61, %v6510_v3  ;;  %v13255_v61 = vpack.c.bf16 %v9904_v59, %v9903_v58  ;;  %v13259_v3 = vpack.c.bf16 %v9906_v1, %v9905_v63  ;;  %v13711_v63 = vld [vmem:[%s14501_s18 + $0x18] sm:$0xff]  ;;  %v9941_v1 = vld [vmem:[%s14495_s15 + $0x2e0] sm:$0xff] }
0x228d   :  { %v6518_v5 = vmul.f32 1.442695, %v6515_v2  ;;  %v9907_v2 = vld [vmem:[%s14495_s15 + $0x2b0] sm:$0xff] }
0x228e   :  { %v6516_v0 = vmul.f32 1.442695, %v6514_v4  ;;  %v9908_v4 = vld [vmem:[%s14495_s15 + $0x2b8] sm:$0xff] }
0x2290   :  { %13696 = vpow2.f32 %v6516_v0  ;;  %v9914_v0 = vld [vmem:[%s14447_s2 + $0x288] sm:$0xff] }
0x2291   :  { %13698 = vpow2.f32 %v6518_v5  ;;  %v13263_v5 = vpack.c.bf16 %v9908_v4, %v9907_v2  ;;  %v9942_v2 = vld [vmem:[%s14495_s15 + $0x2e8] sm:$0xff] }
0x2292   :  { %v13299_v4 = vpack.c.bf16 %v9942_v2, %v9941_v1  ;;  %v13715_v1 = vld [vmem:[%s14501_s18 + $0x28] sm:$0xff]  ;;  %v9977_v2 = vld [vmem:[%s14495_s15 + $0x320] sm:$0xff] }
0x229a   :  { %v13697_v6 = vpop.eup %13696 }
0x229b   :  { %v6520_v7 = vsel %vm3526_vm5, %v13697_v6, 0.0  ;;  %v13699_v8 = vpop.eup %13698 }
0x229c   :  { %6521 = vadd.xlane.f32.xlu0 %v6520_v7  ;;  %v6523_v9 = vsel %vm3526_vm5, %v13699_v8, 0.0  ;;  %v9913_v7 = vld [vmem:[%s14447_s2 + $0x280] sm:$0xff] }
0x22a0   :  { %6524 = vadd.xlane.f32.xlu0 %v6523_v9  ;;  %v9915_v9 = vld [vmem:[%s14447_s2 + $0x290] sm:$0xff] }
0x22a1   :  { %v13269_v12 = vpack.c.bf16 %v9915_v9, %v9913_v7  ;;  %v9952_v7 = vld [vmem:[%s14447_s2 + $0x318] sm:$0xff] }
0x2329   :  { %v6522_v29 = vpop.xlane.xlu0 %6521 }
0x232a   :  { %13700 = vrcp.f32 %v6522_v29 }
0x232d   :  { %v6525_v24 = vpop.xlane.xlu0 %6524 }
0x232e   :  { %13702 = vrcp.f32 %v6525_v24 }
0x2334   :  { %v13701_v33 = vpop.eup %13700 }
0x2335   :  { %v6527_v30 = vmul.f32 %v13701_v33, %v13697_v6  ;;  %v9916_v6 = vld [vmem:[%s14447_s2 + $0x298] sm:$0xff] }
0x2337   :  { %11953 = vmatprep.mubr.msk.f32.mxu1 %vm3526_vm5, %v6527_v30 }
0x2338   :  { %v13703_v36 = vpop.eup %13702 }
0x2339   :  { %v6529_v31 = vmul.f32 %v13703_v36, %v13699_v8  ;;  %v13267_v8 = vpack.c.bf16 %v9916_v6, %v9914_v0  ;;  %v9950_v6 = vld [vmem:[%s14447_s2 + $0x308] sm:$0xff] }
0x233a   :  { %v13307_v9 = vpack.c.bf16 %v9952_v7, %v9950_v6  ;;  %v9986_v7 = vld [vmem:[%s14447_s2 + $0x388] sm:$0xff] }
0x233b   :  { %11954 = vmatmul.mubr.msk.f32.vlgmr.msra.gmra.mrb[60].mxu1 %vm3526_vm5, %v6529_v31  ;;  %13268 = vmatprep.subr.bf16.mxu0 %v13267_v8  ;;  %v13708_v31 = vld [vmem:[%s14488_s10 + $0x10] sm:$0xff]  ;;  %v9949_v8 = vld [vmem:[%s14447_s2 + $0x300] sm:$0xff] }
0x233c   :  { %11960 = vmatprep.mubr.msk.f32.mxu1 %vm1991_vm4, %v13704_v38  ;;  %v9926_v38 = vld [vmem:[%s14447_s2 + $0x2e8] sm:$0xff] }
0x233d   :  { %v13279_v60 = vpack.c.bf16 %v9928_v54, %v9926_v38  ;;  %v13712_v38 = vld [vmem:[%s14488_s10 + $0x20] sm:$0xff]  ;;  %v9962_v54 = vld [vmem:[%s14447_s2 + $0x368] sm:$0xff] }
0x233e   :  { %v13319_v34 = vpack.c.bf16 %v9964_v57, %v9962_v54  ;;  %v13716_v54 = vld [vmem:[%s14488_s10 + $0x30] sm:$0xff]  ;;  %v9998_v57 = vld [vmem:[%s14447_s2 + $0x3e8] sm:$0xff] }
0x240e   :  { %v11955_v40 = vpop.f32.mrb[60].mxu1 }
0x240f   :  { %v6612_v42 = vpop.f32.mrb[61].mxu1  ;;  %v14877_v44 = vadd.f32 %v11955_v40, %v9874_v39 }
0x2410   :  { %v14872_v43 = vadd.f32 %v9874_v39, %v6612_v42  ;;  %v9912_v39 = vld [vmem:[%s14545_s29 + $0xa] ss:$0 sm:$0xff] }
0x2412   :  { %9893 = vmatmul.mubr.msk.f32.vlgmr.msra.gmra.mrb[58].mxu0 %vm3654_vm6, %v14872_v43 }
0x2413   :  { %6714 = vmatprep.mubr.f32.mxu0 %v13743_v19  ;;  %13270 = vmatpush1.bf16.msra.mxu0 %v13269_v12  ;;  %v9956_v12 = vld [vmem:[%s14447_s2 + $0x338] sm:$0xff] }
0x2414   :  { %13272 = vmatprep.subr.bf16.mxu0 %v13271_v13  ;;  %v13309_v13 = vpack.c.bf16 %v9951_v10, %v9949_v8  ;;  %v13311_v41 = vpack.c.bf16 %v9956_v12, %v9954_v11  ;;  %v9988_v8 = vld [vmem:[%s14447_s2 + $0x398] sm:$0xff]  ;;  %v9987_v11 = vld [vmem:[%s14447_s2 + $0x390] sm:$0xff]  ;;  %v9990_v12 = vld [vmem:[%s14447_s2 + $0x3a8] sm:$0xff] }
0x2415   :  { %v13347_v10 = vpack.c.bf16 %v9988_v8, %v9986_v7  ;;  %v10021_v7 = vld [vmem:[%s14680_s4 + $0x180] sm:$0xff]  ;;  %v10022_v8 = vld [vmem:[%s14680_s4 + $0x188] sm:$0xff] }
0x2416   :  { %9894 = vmatmul.mubr.msk.f32.gmra.mrb[60].mxu0 %vm3654_vm6, %v14877_v44 }
0x2417   :  { %7082 = vmatprep.mubr.f32.mxu0 %v13743_v19  ;;  %13274 = vmatpush1.bf16.msra.mxu0 %v13273_v17  ;;  %v9960_v17 = vld [vmem:[%s14447_s2 + $0x358] sm:$0xff] }
0x2418   :  { %13276 = vmatprep.subr.bf16.mxu0 %v13275_v18  ;;  %v13313_v18 = vpack.c.bf16 %v9955_v15, %v9953_v14  ;;  %v13315_v20 = vpack.c.bf16 %v9960_v17, %v9958_v16  ;;  %v9989_v15 = vld [vmem:[%s14447_s2 + $0x3a0] sm:$0xff]  ;;  %v9991_v16 = vld [vmem:[%s14447_s2 + $0x3b0] sm:$0xff]  ;;  %v9994_v17 = vld [vmem:[%s14447_s2 + $0x3c8] sm:$0xff] }
0x241b   :  { %13278 = vmatpush1.bf16.msra.mxu0 %v13277_v22  ;;  %v9959_v22 = vld [vmem:[%s14447_s2 + $0x350] sm:$0xff] }
0x241c   :  { %13280 = vmatprep.subr.bf16.mxu0 %v13279_v60  ;;  %v9961_v60 = vld [vmem:[%s14447_s2 + $0x360] sm:$0xff] }
0x241f   :  { %13282 = vmatpush1.bf16.msra.mxu0 %v13281_v35  ;;  %v9963_v35 = vld [vmem:[%s14447_s2 + $0x370] sm:$0xff] }
0x24e5   :  { %v6710_v45 = vpop.f32.mrb[58].mxu0 }
0x24e6   :  { %6723 = vrot.lane.b32.xlu1 %v6710_v45, %s13733_s28  ;;  %v6712_v46 = vpop.f32.mrb[59].mxu0 }
0x24e9   :  { %v6716_v47 = vpop.f32.mrb[60].mxu0 }
0x24ea   :  { %v13243_v48 = vpack.c.bf16 %v6716_v47, %v6710_v45  ;;  %6725 = vrot.lane.b32.xlu0 %v6716_v47, %s13733_s28  ;;  %v6718_v49 = vpop.f32.mrb[61].mxu0 }
0x24eb   :  { %v13247_v50 = vpack.c.bf16 %v6718_v49, %v6712_v46  ;;  %v9938_v49 = vld [vmem:[%s14495_s15 + $0x2c8] sm:$0xff] }
0x24ec   :  { %13244 = vmatprep.subr.bf16.mxu1 %v13243_v48 }
0x24ed   :  { %13246 = vmatpush3.bf16.msra.mxu1 %v13243_v48  ;;  %v9937_v48 = vld [vmem:[%s14495_s15 + $0x2c0] sm:$0xff] }
0x24ee   :  { %13248 = vmatprep.subr.bf16.mxu1 %v13247_v50  ;;  %v13291_v51 = vpack.c.bf16 %v9938_v49, %v9937_v48 }
0x24f0   :  { %11961 = vmatmul.mubr.msk.f32.vlgmr.msra.gmra.mrb[62].mxu1 %vm1991_vm4, %v13705_v55  ;;  %13292 = vmatprep.subr.bf16.mxu0 %v13291_v51 }
0x24f1   :  { %13250 = vmatpush3.bf16.msra.mxu1 %v13247_v50  ;;  %11967 = vmatprep.mubr.msk.f32.mxu1 %vm1991_vm4, %v13706_v56  ;;  %v9939_v50 = vld [vmem:[%s14495_s15 + $0x2d0] sm:$0xff] }
0x24f2   :  { %13252 = vmatprep.subr.bf16.mxu1 %v13251_v53 }
0x24f8   :  { %11968 = vmatmul.mubr.msk.f32.vlgmr.msra.gmra.mrb[62].mxu1 %vm1991_vm4, %v13707_v62  ;;  %v13710_v62 = vld [vmem:[%s14501_s18 + $0x10] sm:$0xff] }
0x24f9   :  { %13254 = vmatpush3.bf16.msra.mxu1 %v13251_v53 }
0x24fa   :  { %13256 = vmatprep.subr.bf16.mxu1 %v13255_v61 }
0x24fd   :  { %13258 = vmatpush3.bf16.msra.mxu1 %v13255_v61  ;;  %v13709_v61 = vld [vmem:[%s14488_s10 + $0x18] sm:$0xff] }
0x24fe   :  { %13260 = vmatprep.subr.bf16.mxu1 %v13259_v3 }
0x2501   :  { %13262 = vmatpush3.bf16.msra.mxu1 %v13259_v3  ;;  %v9943_v3 = vld [vmem:[%s14495_s15 + $0x2f0] sm:$0xff] }
0x2502   :  { %13264 = vmatprep.subr.bf16.mxu1 %v13263_v5 }
0x2505   :  { %13266 = vmatpush3.bf16.msra.mxu1 %v13263_v5  ;;  %v9944_v5 = vld [vmem:[%s14495_s15 + $0x2f8] sm:$0xff] }
0x2506   :  { %v13303_v0 = vpack.c.bf16 %v9944_v5, %v9943_v3  ;;  %v9978_v3 = vld [vmem:[%s14495_s15 + $0x328] sm:$0xff] }
0x2507   :  { %v13339_v5 = vpack.c.bf16 %v9978_v3, %v9977_v2  ;;  %v10013_v2 = vld [vmem:[%s14495_s15 + $0x360] sm:$0xff]  ;;  %v10014_v3 = vld [vmem:[%s14495_s15 + $0x368] sm:$0xff] }
0x2558   :  { %v6724_v26 = vpop.permute.xlu1 %6723 }
0x255c   :  { %v6726_v25 = vpop.permute.xlu0 %6725 }
0x25cb   :  { %v11969_v28 = vpop.f32.mrb[62].mxu1 }
0x25cc   :  { %v13615_v32 = vadd.f32 %v11969_v28, %v6726_v25  ;;  %v6870_v27 = vpop.f32.mrb[63].mxu1  ;;  %v13317_v25 = vpack.c.bf16 %v9959_v22, %v9957_v21  ;;  %v9993_v22 = vld [vmem:[%s14447_s2 + $0x3c0] sm:$0xff] }
0x25cd   :  { %v13616_v29 = vadd.f32 %v6870_v27, %v6724_v26 }
0x25ce   :  { %v6890_v24 = vadd.f32 %v13615_v32, %v9900_v23  ;;  %v9936_v32 = vld [vmem:[%s14533_s22 + $0xb] ss:$0 sm:$0xff] }
0x25cf   :  { %v6889_v33 = vadd.f32 %v13616_v29, %v9900_v23 }
0x25d0   :  { %v6892_v36 = vmax.f32 %v6890_v24, 0.0 }
0x25d1   :  { %v6891_v30 = vmax.f32 %v6889_v33, 0.0 }
0x25d3   :  { %11986 = vmatprep.mubr.msk.f32.mxu1 %vm3654_vm6, %v6891_v30 }
0x25d4   :  { %11987 = vmatmul.mubr.msk.f32.vlgmr.msra.gmra.mrb[64].mxu1 %vm3654_vm6, %v6892_v36 }
0x25d5   :  { %11993 = vmatprep.mubr.msk.f32.mxu1 %vm1991_vm4, %v13708_v31 }
0x26a7   :  { %v11988_v37 = vpop.f32.mrb[64].mxu1 }
0x26a8   :  { %v6974_v40 = vpop.f32.mrb[65].mxu1  ;;  %v6984_v45 = vadd.f32 %v11988_v37, %v14877_v44  ;;  %v13321_v37 = vpack.c.bf16 %v9963_v35, %v9961_v60  ;;  %v10000_v60 = vld [vmem:[%s14447_s2 + $0x3f8] sm:$0xff] }
0x26a9   :  { %v6983_v42 = vadd.f32 %v6974_v40, %v14872_v43  ;;  %v13295_v43 = vpack.c.bf16 %v9940_v52, %v9939_v50  ;;  %v9948_v40 = vld [vmem:[%s14545_s29 + $0xb] ss:$0 sm:$0xff]  ;;  %v13359_v35 = vpack.c.bf16 %v10000_v60, %v9998_v57 }
0x26aa   :  { %v14927_v47 = vadd.f32 %v9912_v39, %v6984_v45  ;;  %v9974_v52 = vld [vmem:[%s14495_s15 + $0x308] sm:$0xff] }
0x26ab   :  { %v14922_v46 = vadd.f32 %v9912_v39, %v6983_v42  ;;  %v10038_v57 = vld [vmem:[%s14495_s15 + $0x3a8] sm:$0xff] }
0x26ad   :  { %9929 = vmatmul.mubr.msk.f32.vlgmr.msra.gmra.mrb[62].mxu0 %vm3654_vm6, %v14922_v46 }
0x26ae   :  { %7088 = vmatprep.mubr.f32.mxu0 %v13743_v19  ;;  %13294 = vmatpush3.bf16.msra.mxu0 %v13291_v51  ;;  %v9973_v51 = vld [vmem:[%s14495_s15 + $0x300] sm:$0xff] }
0x26af   :  { %13296 = vmatprep.subr.bf16.mxu0 %v13295_v43 }
0x26b1   :  { %9930 = vmatmul.mubr.msk.f32.gmra.mrb[64].mxu0 %vm3654_vm6, %v14927_v47 }
0x26b2   :  { %13298 = vmatpush3.bf16.msra.mxu0 %v13295_v43  ;;  %v9975_v43 = vld [vmem:[%s14495_s15 + $0x310] sm:$0xff] }
0x26b3   :  { %13300 = vmatprep.subr.bf16.mxu0 %v13299_v4 }
0x26b6   :  { %13302 = vmatpush3.bf16.msra.mxu0 %v13299_v4  ;;  %v9979_v4 = vld [vmem:[%s14495_s15 + $0x330] sm:$0xff] }
0x26b7   :  { %13304 = vmatprep.subr.bf16.mxu0 %v13303_v0 }
0x26ba   :  { %13306 = vmatpush3.bf16.msra.mxu0 %v13303_v0  ;;  %v9980_v0 = vld [vmem:[%s14495_s15 + $0x338] sm:$0xff] }
0x26bb   :  { %v13343_v6 = vpack.c.bf16 %v9980_v0, %v9979_v4  ;;  %v10015_v4 = vld [vmem:[%s14495_s15 + $0x370] sm:$0xff]  ;;  %v10016_v0 = vld [vmem:[%s14495_s15 + $0x378] sm:$0xff] }
0x2780   :  { %v7084_v44 = vpop.f32.mrb[62].mxu0 }
0x2781   :  { %7097 = vrot.lane.b32.xlu1 %v7084_v44, %s13733_s28  ;;  %v7086_v53 = vpop.f32.mrb[63].mxu0 }
0x2784   :  { %v7090_v55 = vpop.f32.mrb[64].mxu0 }
0x2785   :  { %v13283_v56 = vpack.c.bf16 %v7090_v55, %v7084_v44  ;;  %7099 = vrot.lane.b32.xlu1 %v7090_v55, %s13733_s28  ;;  %v7092_v58 = vpop.f32.mrb[65].mxu0  ;;  %v13331_v44 = vpack.c.bf16 %v9974_v52, %v9973_v51 }
0x2786   :  { %v13287_v59 = vpack.c.bf16 %v7092_v58, %v7086_v53  ;;  %v9976_v53 = vld [vmem:[%s14495_s15 + $0x318] sm:$0xff] }
0x2787   :  { %13284 = vmatprep.subr.bf16.mxu1 %v13283_v56 }
0x2788   :  { %13286 = vmatpush3.bf16.msra.mxu1 %v13283_v56 }
0x2789   :  { %13288 = vmatprep.subr.bf16.mxu1 %v13287_v59 }
0x278b   :  { %11994 = vmatmul.mubr.msk.f32.vlgmr.msra.gmra.mrb[66].mxu1 %vm1991_vm4, %v13709_v61 }
0x278c   :  { %13290 = vmatpush3.bf16.msra.mxu1 %v13287_v59  ;;  %12000 = vmatprep.mubr.msk.f32.mxu1 %vm1991_vm4, %v13710_v62  ;;  %v13713_v62 = vld [vmem:[%s14488_s10 + $0x28] sm:$0xff] }
0x278d   :  { %13308 = vmatprep.subr.bf16.mxu1 %v13307_v9  ;;  %v9985_v9 = vld [vmem:[%s14447_s2 + $0x380] sm:$0xff] }
0x2793   :  { %12001 = vmatmul.mubr.msk.f32.vlgmr.msra.gmra.mrb[66].mxu1 %vm1991_vm4, %v13711_v63  ;;  %v13714_v63 = vld [vmem:[%s14501_s18 + $0x20] sm:$0xff] }
0x2794   :  { %7456 = vmatprep.mubr.f32.mxu1 %v13743_v19  ;;  %13310 = vmatpush1.bf16.msra.mxu1 %v13309_v13  ;;  %v9992_v13 = vld [vmem:[%s14447_s2 + $0x3b8] sm:$0xff] }
0x2795   :  { %13312 = vmatprep.subr.bf16.mxu1 %v13311_v41  ;;  %v13349_v41 = vpack.c.bf16 %v9987_v11, %v9985_v9  ;;  %v13351_v14 = vpack.c.bf16 %v9992_v13, %v9990_v12  ;;  %v10023_v9 = vld [vmem:[%s14680_s4 + $0x190] sm:$0xff]  ;;  %v10024_v11 = vld [vmem:[%s14680_s4 + $0x198] sm:$0xff]  ;;  %v10025_v13 = vld [vmem:[%s14680_s4 + $0x1a0] sm:$0xff] }
0x2796   :  { %v13391_v12 = vpack.c.bf16 %v10024_v11, %v10023_v9  ;;  %v10062_v11 = vld [vmem:[%s14495_s15 + $0x3e8] sm:$0xff] }
0x2798   :  { %13314 = vmatpush1.bf16.msra.mxu1 %v13313_v18  ;;  %v9996_v18 = vld [vmem:[%s14447_s2 + $0x3d8] sm:$0xff] }
0x2799   :  { %13316 = vmatprep.subr.bf16.mxu1 %v13315_v20  ;;  %v13353_v20 = vpack.c.bf16 %v9991_v16, %v9989_v15  ;;  %v13355_v21 = vpack.c.bf16 %v9996_v18, %v9994_v17  ;;  %v10008_v17 = vld [vmem:[%s14533_s22 + $0xd] ss:$0 sm:$0xff] }
0x279c   :  { %13318 = vmatpush1.bf16.msra.mxu1 %v13317_v25  ;;  %v9995_v25 = vld [vmem:[%s14447_s2 + $0x3d0] sm:$0xff] }
0x279d   :  { %13320 = vmatprep.subr.bf16.mxu1 %v13319_v34  ;;  %v9997_v34 = vld [vmem:[%s14447_s2 + $0x3e0] sm:$0xff] }
0x27a0   :  { %13322 = vmatpush1.bf16.msra.mxu1 %v13321_v37  ;;  %v9999_v37 = vld [vmem:[%s14447_s2 + $0x3f0] sm:$0xff] }
0x27a1   :  { %13332 = vmatprep.subr.bf16.mxu1 %v13331_v44 }
0x27f3   :  { %v7098_v28 = vpop.permute.xlu1 %7097 }
0x27f7   :  { %v7100_v23 = vpop.permute.xlu1 %7099 }
0x2866   :  { %v12002_v26 = vpop.f32.mrb[66].mxu1 }
0x2867   :  { %v13617_v27 = vadd.f32 %v12002_v26, %v7100_v23  ;;  %v7244_v29 = vpop.f32.mrb[67].mxu1 }
0x2868   :  { %v13618_v24 = vadd.f32 %v7244_v29, %v7098_v28  ;;  %v13357_v28 = vpack.c.bf16 %v9995_v25, %v9993_v22 }
0x2869   :  { %v7264_v33 = vadd.f32 %v13617_v27, %v9936_v32 }
0x286a   :  { %v7263_v30 = vadd.f32 %v13618_v24, %v9936_v32  ;;  %v9972_v32 = vld [vmem:[%s14533_s22 + $0xc] ss:$0 sm:$0xff] }
0x286b   :  { %v7266_v31 = vmax.f32 %v7264_v33, 0.0 }
0x286c   :  { %v7265_v36 = vmax.f32 %v7263_v30, 0.0 }
0x286e   :  { %12019 = vmatprep.mubr.msk.f32.mxu0 %vm3654_vm6, %v7265_v36 }
0x286f   :  { %12020 = vmatmul.mubr.msk.f32.vlgmr.msra.gmra.mrb[66].mxu0 %vm3654_vm6, %v7266_v31 }
0x2870   :  { %12026 = vmatprep.mubr.msk.f32.mxu0 %vm1991_vm4, %v13712_v38 }
0x2942   :  { %v12021_v39 = vpop.f32.mrb[66].mxu0 }
0x2943   :  { %v7348_v42 = vpop.f32.mrb[67].mxu0  ;;  %v7358_v48 = vadd.f32 %v12021_v39, %v14927_v47  ;;  %v13361_v39 = vpack.c.bf16 %v9999_v37, %v9997_v34  ;;  %v10020_v37 = vld [vmem:[%s14545_s29 + $0xd] ss:$0 sm:$0xff] }
0x2944   :  { %v7357_v45 = vadd.f32 %v7348_v42, %v14922_v46  ;;  %v13335_v46 = vpack.c.bf16 %v9976_v53, %v9975_v43  ;;  %v9984_v42 = vld [vmem:[%s14545_s29 + $0xc] ss:$0 sm:$0xff] }
0x2945   :  { %v14977_v50 = vadd.f32 %v9948_v40, %v7358_v48  ;;  %v10010_v53 = vld [vmem:[%s14495_s15 + $0x348] sm:$0xff] }
0x2946   :  { %v14972_v49 = vadd.f32 %v9948_v40, %v7357_v45 }
0x2948   :  { %9965 = vmatmul.mubr.msk.f32.vlgmr.msra.gmra.mrb[68].mxu1 %vm3654_vm6, %v14972_v49 }
0x2949   :  { %7462 = vmatprep.mubr.f32.mxu1 %v13743_v19  ;;  %13334 = vmatpush3.bf16.msra.mxu1 %v13331_v44  ;;  %v10009_v44 = vld [vmem:[%s14495_s15 + $0x340] sm:$0xff] }
0x294a   :  { %13336 = vmatprep.subr.bf16.mxu1 %v13335_v46 }
0x294c   :  { %9966 = vmatmul.mubr.msk.f32.gmra.mrb[70].mxu1 %vm3654_vm6, %v14977_v50 }
0x294d   :  { %13338 = vmatpush3.bf16.msra.mxu1 %v13335_v46  ;;  %v10011_v46 = vld [vmem:[%s14495_s15 + $0x350] sm:$0xff] }
0x294e   :  { %13340 = vmatprep.subr.bf16.mxu1 %v13339_v5 }
0x2951   :  { %13342 = vmatpush3.bf16.msra.mxu1 %v13339_v5  ;;  %v13379_v5 = vpack.c.bf16 %v10014_v3, %v10013_v2  ;;  %v10051_v2 = vld [vmem:[%s14680_s4 + $0x1f0] sm:$0xff]  ;;  %v10052_v3 = vld [vmem:[%s14680_s4 + $0x1f8] sm:$0xff] }
0x2952   :  { %13344 = vmatprep.subr.bf16.mxu1 %v13343_v6 }
0x2955   :  { %13346 = vmatpush3.bf16.msra.mxu1 %v13343_v6  ;;  %v13383_v6 = vpack.c.bf16 %v10016_v0, %v10015_v4  ;;  %v13431_v4 = vpack.c.bf16 %v10052_v3, %v10051_v2  ;;  %v10058_v0 = vld [vmem:[%s14495_s15 + $0x3c8] sm:$0xff]  ;;  %v10096_v2 = vld [vmem:[%s14680_s4 + $0x258] sm:$0xff] }
0x2a1b   :  { %v7458_v47 = vpop.f32.mrb[68].mxu1 }
0x2a1c   :  { %7471 = vrot.lane.b32.xlu0 %v7458_v47, %s13733_s28  ;;  %v7460_v55 = vpop.f32.mrb[69].mxu1 }
0x2a1f   :  { %v7464_v56 = vpop.f32.mrb[70].mxu1 }
0x2a20   :  { %v13323_v58 = vpack.c.bf16 %v7464_v56, %v7458_v47  ;;  %7473 = vrot.lane.b32.xlu1 %v7464_v56, %s13733_s28  ;;  %v7466_v59 = vpop.f32.mrb[71].mxu1  ;;  %v13371_v47 = vpack.c.bf16 %v10010_v53, %v10009_v44  ;;  %v10045_v53 = vld [vmem:[%s14680_s4 + $0x1c0] sm:$0xff] }
0x2a21   :  { %v13327_v61 = vpack.c.bf16 %v7466_v59, %v7460_v55  ;;  %v10012_v55 = vld [vmem:[%s14495_s15 + $0x358] sm:$0xff] }
0x2a22   :  { %13324 = vmatprep.subr.bf16.mxu0 %v13323_v58 }
0x2a23   :  { %13326 = vmatpush3.bf16.msra.mxu0 %v13323_v58 }
0x2a24   :  { %13328 = vmatprep.subr.bf16.mxu0 %v13327_v61 }
0x2a26   :  { %12027 = vmatmul.mubr.msk.f32.vlgmr.msra.gmra.mrb[68].mxu0 %vm1991_vm4, %v13713_v62  ;;  %v13717_v62 = vld [vmem:[%s14488_s10 + $0x38] sm:$0xff] }
0x2a27   :  { %13330 = vmatpush3.bf16.msra.mxu0 %v13327_v61  ;;  %12033 = vmatprep.mubr.msk.f32.mxu0 %vm1991_vm4, %v13714_v63  ;;  %v13718_v63 = vld [vmem:[%s14501_s18 + $0x30] sm:$0xff] }
0x2a28   :  { %13348 = vmatprep.subr.bf16.mxu0 %v13347_v10  ;;  %v13387_v10 = vpack.c.bf16 %v10022_v8, %v10021_v7  ;;  %v10060_v8 = vld [vmem:[%s14495_s15 + $0x3d8] sm:$0xff] }
0x2a2e   :  { %12034 = vmatmul.mubr.msk.f32.vlgmr.msra.gmra.mrb[68].mxu0 %vm1991_vm4, %v13715_v1  ;;  %v13719_v1 = vld [vmem:[%s14501_s18 + $0x38] sm:$0xff] }
0x2a2f   :  { %7830 = vmatprep.mubr.f32.mxu0 %v13743_v19  ;;  %13350 = vmatpush1.bf16.msra.mxu0 %v13349_v41  ;;  %v10026_v41 = vld [vmem:[%s14680_s4 + $0x1a8] sm:$0xff] }
0x2a30   :  { %13352 = vmatprep.subr.bf16.mxu0 %v13351_v14  ;;  %v13395_v14 = vpack.c.bf16 %v10026_v41, %v10025_v13 }
0x2a33   :  { %13354 = vmatpush1.bf16.msra.mxu0 %v13353_v20 }
0x2a34   :  { %13356 = vmatprep.subr.bf16.mxu0 %v13355_v21 }
0x2a37   :  { %13358 = vmatpush1.bf16.msra.mxu0 %v13357_v28 }
0x2a38   :  { %13360 = vmatprep.subr.bf16.mxu0 %v13359_v35 }
0x2a3b   :  { %13362 = vmatpush1.bf16.msra.mxu0 %v13361_v39 }
0x2a3c   :  { %13372 = vmatprep.subr.bf16.mxu0 %v13371_v47 }
0x2a8e   :  { %v7472_v27 = vpop.permute.xlu0 %7471 }
0x2a92   :  { %v7474_v23 = vpop.permute.xlu1 %7473 }
0x2b01   :  { %v12035_v26 = vpop.f32.mrb[68].mxu0 }
0x2b02   :  { %v13619_v29 = vadd.f32 %v12035_v26, %v7474_v23  ;;  %v7618_v24 = vpop.f32.mrb[69].mxu0 }
0x2b03   :  { %v13620_v33 = vadd.f32 %v7618_v24, %v7472_v27  ;;  %v10028_v27 = vld [vmem:[%s14680_s4 + $0x1b8] sm:$0xff]  ;;  %v10033_v24 = vld [vmem:[%s14495_s15 + $0x380] sm:$0xff] }
0x2b04   :  { %v7638_v30 = vadd.f32 %v13619_v29, %v9972_v32 }
0x2b05   :  { %v7637_v36 = vadd.f32 %v13620_v33, %v9972_v32  ;;  %v10027_v32 = vld [vmem:[%s14680_s4 + $0x1b0] sm:$0xff]  ;;  %v10034_v33 = vld [vmem:[%s14495_s15 + $0x388] sm:$0xff] }
0x2b06   :  { %v7640_v38 = vmax.f32 %v7638_v30, 0.0  ;;  %v13399_v29 = vpack.c.bf16 %v10028_v27, %v10027_v32  ;;  %v10035_v30 = vld [vmem:[%s14495_s15 + $0x390] sm:$0xff]  ;;  %v10072_v32 = vld [vmem:[%s14680_s4 + $0x218] sm:$0xff] }
0x2b07   :  { %v7639_v31 = vmax.f32 %v7637_v36, 0.0  ;;  %v13403_v36 = vpack.c.bf16 %v10034_v33, %v10033_v24  ;;  %v10074_v24 = vld [vmem:[%s14680_s4 + $0x228] sm:$0xff] }
0x2b09   :  { %12052 = vmatprep.mubr.msk.f32.mxu1 %vm3654_vm6, %v7639_v31  ;;  %v10036_v31 = vld [vmem:[%s14495_s15 + $0x398] sm:$0xff] }
0x2b0a   :  { %12053 = vmatmul.mubr.msk.f32.vlgmr.msra.gmra.mrb[72].mxu1 %vm3654_vm6, %v7640_v38  ;;  %v13407_v38 = vpack.c.bf16 %v10036_v31, %v10035_v30  ;;  %v10054_v30 = vld [vmem:[%s14533_s22 + $0xf] ss:$0 sm:$0xff] }
0x2b0b   :  { %12059 = vmatprep.mubr.msk.f32.mxu1 %vm1991_vm4, %v13716_v54  ;;  %v10037_v54 = vld [vmem:[%s14495_s15 + $0x3a0] sm:$0xff] }
0x2b0c   :  { %v13411_v60 = vpack.c.bf16 %v10038_v57, %v10037_v54 }
0x2bdd   :  { %v12054_v40 = vpop.f32.mrb[72].mxu1 }
0x2bde   :  { %v7722_v45 = vpop.f32.mrb[73].mxu1  ;;  %v7732_v51 = vadd.f32 %v12054_v40, %v14977_v50 }
0x2bdf   :  { %v7731_v48 = vadd.f32 %v7722_v45, %v14972_v49  ;;  %v13375_v49 = vpack.c.bf16 %v10012_v55, %v10011_v46  ;;  %v10047_v46 = vld [vmem:[%s14680_s4 + $0x1d0] sm:$0xff]  ;;  %v10048_v55 = vld [vmem:[%s14680_s4 + $0x1d8] sm:$0xff] }
0x2be0   :  { %v15027_v43 = vadd.f32 %v9984_v42, %v7732_v51  ;;  %v10040_v51 = vld [vmem:[%s14495_s15 + $0x3b8] sm:$0xff] }
0x2be1   :  { %v15022_v52 = vadd.f32 %v9984_v42, %v7731_v48  ;;  %v10039_v48 = vld [vmem:[%s14495_s15 + $0x3b0] sm:$0xff] }
0x2be2   :  { %v13415_v44 = vpack.c.bf16 %v10040_v51, %v10039_v48  ;;  %v10084_v48 = vld [vmem:[%s14495_s15 + $0x418] sm:$0xff] }
0x2be3   :  { %10001 = vmatmul.mubr.msk.f32.vlgmr.msra.gmra.mrb[70].mxu0 %vm3654_vm6, %v15022_v52 }
0x2be4   :  { %7836 = vmatprep.mubr.f32.mxu0 %v13743_v19  ;;  %13374 = vmatpush3.bf16.msra.mxu0 %v13371_v47 }
0x2be5   :  { %13376 = vmatprep.subr.bf16.mxu0 %v13375_v49 }
0x2be7   :  { %10002 = vmatmul.mubr.msk.f32.gmra.mrb[72].mxu0 %vm3654_vm6, %v15027_v43 }
0x2be8   :  { %13378 = vmatpush3.bf16.msra.mxu0 %v13375_v49  ;;  %v10049_v49 = vld [vmem:[%s14680_s4 + $0x1e0] sm:$0xff] }
0x2be9   :  { %13380 = vmatprep.subr.bf16.mxu0 %v13379_v5 }
0x2bec   :  { %13382 = vmatpush3.bf16.msra.mxu0 %v13379_v5  ;;  %v10057_v5 = vld [vmem:[%s14495_s15 + $0x3c0] sm:$0xff] }
0x2bed   :  { %13384 = vmatprep.subr.bf16.mxu0 %v13383_v6  ;;  %v13435_v7 = vpack.c.bf16 %v10058_v0, %v10057_v5  ;;  %v10098_v5 = vld [vmem:[%s14680_s4 + $0x268] sm:$0xff] }
0x2bf0   :  { %13386 = vmatpush3.bf16.msra.mxu0 %v13383_v6  ;;  %v10059_v6 = vld [vmem:[%s14495_s15 + $0x3d0] sm:$0xff] }
0x2bf1   :  { %13404 = vmatprep.subr.bf16.mxu0 %v13403_v36  ;;  %v13439_v9 = vpack.c.bf16 %v10060_v8, %v10059_v6  ;;  %v10078_v6 = vld [vmem:[%s14533_s22 + $0x10] ss:$0 sm:$0xff] }
0x2cb6   :  { %v7832_v50 = vpop.f32.mrb[70].mxu0 }
0x2cb7   :  { %7845 = vrot.lane.b32.xlu0 %v7832_v50, %s13733_s28  ;;  %v7834_v19 = vpop.f32.mrb[71].mxu0 }
0x2cba   :  { %v7838_v56 = vpop.f32.mrb[72].mxu0 }
0x2cbb   :  { %v13363_v58 = vpack.c.bf16 %v7838_v56, %v7832_v50  ;;  %7847 = vrot.lane.b32.xlu1 %v7838_v56, %s13733_s28  ;;  %v7840_v59 = vpop.f32.mrb[73].mxu0  ;;  %v10050_v50 = vld [vmem:[%s14680_s4 + $0x1e8] sm:$0xff] }
0x2cbc   :  { %v13367_v61 = vpack.c.bf16 %v7840_v59, %v7834_v19  ;;  %v13427_v19 = vpack.c.bf16 %v10050_v50, %v10049_v49  ;;  %v10030_v56 = vld [vmem:[%s14533_s22 + $0xe] ss:$0 sm:$0xff] }
0x2cbd   :  { %13364 = vmatprep.subr.bf16.mxu1 %v13363_v58 }
0x2cbe   :  { %13366 = vmatpush3.bf16.msra.mxu1 %v13363_v58 }
0x2cbf   :  { %13368 = vmatprep.subr.bf16.mxu1 %v13367_v61 }
0x2cc1   :  { %12060 = vmatmul.mubr.msk.f32.vlgmr.msra.gmra.mrb[74].mxu1 %vm1991_vm4, %v13717_v62 }
0x2cc2   :  { %13370 = vmatpush3.bf16.msra.mxu1 %v13367_v61  ;;  %12066 = vmatprep.mubr.msk.f32.mxu1 %vm1991_vm4, %v13718_v63 }
0x2cc3   :  { %13388 = vmatprep.subr.bf16.mxu1 %v13387_v10 }
0x2cc9   :  { %12067 = vmatmul.mubr.msk.f32.vlgmr.msra.gmra.mrb[74].mxu1 %vm1991_vm4, %v13719_v1 }
0x2cca   :  { %13390 = vmatpush3.bf16.msra.mxu1 %v13387_v10  ;;  %v10061_v10 = vld [vmem:[%s14495_s15 + $0x3e0] sm:$0xff] }
0x2ccb   :  { %13392 = vmatprep.subr.bf16.mxu1 %v13391_v12 }
0x2cce   :  { %13394 = vmatpush3.bf16.msra.mxu1 %v13391_v12  ;;  %v13443_v12 = vpack.c.bf16 %v10062_v11, %v10061_v10 }
0x2ccf   :  { %13396 = vmatprep.subr.bf16.mxu1 %v13395_v14 }
0x2cd2   :  { %13398 = vmatpush3.bf16.msra.mxu1 %v13395_v14  ;;  %v10044_v14 = vld [vmem:[%s14545_s29 + $0xe] ss:$0 sm:$0xff] }
0x2cd3   :  { %13400 = vmatprep.subr.bf16.mxu1 %v13399_v29 }
0x2cd6   :  { %13402 = vmatpush3.bf16.msra.mxu1 %v13399_v29  ;;  %v10073_v29 = vld [vmem:[%s14680_s4 + $0x220] sm:$0xff] }
0x2cd7   :  { %v13459_v33 = vpack.c.bf16 %v10074_v24, %v10073_v29 }
0x2d29   :  { %v7846_v18 = vpop.permute.xlu0 %7845 }
0x2d2d   :  { %v7848_v15 = vpop.permute.xlu1 %7847 }
0x2d9c   :  { %v12068_v16 = vpop.f32.mrb[74].mxu1 }
0x2d9d   :  { %v13621_v20 = vadd.f32 %v12068_v16, %v7848_v15  ;;  %v7992_v21 = vpop.f32.mrb[75].mxu1 }
0x2d9e   :  { %v13622_v22 = vadd.f32 %v7992_v21, %v7846_v18  ;;  %v10064_v21 = vld [vmem:[%s14495_s15 + $0x3f8] sm:$0xff] }
0x2d9f   :  { %v8012_v25 = vadd.f32 %v13621_v20, %v10008_v17  ;;  %v10063_v20 = vld [vmem:[%s14495_s15 + $0x3f0] sm:$0xff] }
0x2da0   :  { %v8011_v28 = vadd.f32 %v13622_v22, %v10008_v17  ;;  %v13447_v22 = vpack.c.bf16 %v10064_v21, %v10063_v20  ;;  %v10108_v20 = vld [vmem:[%s14495_s15 + $0x458] sm:$0xff] }
0x2da1   :  { %v8014_v26 = vmax.f32 %v8012_v25, 0.0  ;;  %v10069_v25 = vld [vmem:[%s14680_s4 + $0x200] sm:$0xff] }
0x2da2   :  { %v8013_v23 = vmax.f32 %v8011_v28, 0.0  ;;  %v10070_v28 = vld [vmem:[%s14680_s4 + $0x208] sm:$0xff] }
0x2da4   :  { %12085 = vmatprep.mubr.msk.f32.mxu0 %vm3654_vm6, %v8013_v23  ;;  %v10071_v23 = vld [vmem:[%s14680_s4 + $0x210] sm:$0xff] }
0x2da5   :  { %12086 = vmatmul.mubr.msk.f32.vlgmr.msra.gmra.mrb[74].mxu0 %vm3654_vm6, %v8014_v26  ;;  %v13451_v26 = vpack.c.bf16 %v10070_v28, %v10069_v25  ;;  %v13455_v27 = vpack.c.bf16 %v10072_v32, %v10071_v23  ;;  %v10110_v25 = vld [vmem:[%s14495_s15 + $0x468] sm:$0xff]  ;;  %v10092_v32 = vld [vmem:[%s14545_s29 + $0x10] ss:$0 sm:$0xff] }
0x2da6   :  { %13406 = vmatpush3.bf16.msra.mxu0 %v13403_v36 }
0x2da7   :  { %13408 = vmatprep.subr.bf16.mxu0 %v13407_v38 }
0x2daa   :  { %13410 = vmatpush3.bf16.msra.mxu0 %v13407_v38 }
0x2dab   :  { %13412 = vmatprep.subr.bf16.mxu0 %v13411_v60 }
0x2dae   :  { %13414 = vmatpush3.bf16.msra.mxu0 %v13411_v60 }
0x2daf   :  { %13416 = vmatprep.subr.bf16.mxu0 %v13415_v44 }
0x2db2   :  { %13418 = vmatpush3.bf16.msra.mxu0 %v13415_v44  ;;  %v10085_v44 = vld [vmem:[%s14495_s15 + $0x420] sm:$0xff] }
0x2db3   :  { %13436 = vmatprep.subr.bf16.mxu0 %v13435_v7 }
0x2e78   :  { %v12087_v34 = vpop.f32.mrb[74].mxu0 }
0x2e79   :  { %v8106_v35 = vadd.f32 %v12087_v34, %v15027_v43  ;;  %v8096_v39 = vpop.f32.mrb[75].mxu0  ;;  %v10046_v43 = vld [vmem:[%s14680_s4 + $0x1c8] sm:$0xff]  ;;  %v10075_v34 = vld [vmem:[%s14680_s4 + $0x230] sm:$0xff] }
0x2e7a   :  { %v8105_v40 = vadd.f32 %v8096_v39, %v15022_v52  ;;  %v13419_v47 = vpack.c.bf16 %v10046_v43, %v10045_v53  ;;  %v13423_v52 = vpack.c.bf16 %v10048_v55, %v10047_v46  ;;  %v10081_v39 = vld [vmem:[%s14495_s15 + $0x400] sm:$0xff]  ;;  %v10086_v53 = vld [vmem:[%s14495_s15 + $0x428] sm:$0xff] }
0x2e7b   :  { %v8116_v45 = vadd.f32 %v10020_v37, %v8106_v35  ;;  %v10076_v35 = vld [vmem:[%s14680_s4 + $0x238] sm:$0xff]  ;;  %v13475_v43 = vpack.c.bf16 %v10086_v53, %v10085_v44  ;;  %v10068_v55 = vld [vmem:[%s14545_s29 + $0xf] ss:$0 sm:$0xff] }
0x2e7c   :  { %v8115_v42 = vadd.f32 %v10020_v37, %v8105_v40  ;;  %13420 = vmatprep.subr.bf16.mxu1 %v13419_v47  ;;  %v13463_v37 = vpack.c.bf16 %v10076_v35, %v10075_v34  ;;  %v10082_v40 = vld [vmem:[%s14495_s15 + $0x408] sm:$0xff]  ;;  %v10120_v34 = vld [vmem:[%s14680_s4 + $0x298] sm:$0xff] }
0x2e7e   :  { %12104 = vmatprep.mubr.msk.f32.mxu1 %vm3654_vm6, %v8115_v42 }
0x2e7f   :  { %12105 = vmatmul.mubr.msk.f32.vlgmr.msra.gmra.mrb[76].mxu1 %vm3654_vm6, %v8116_v45 }
0x2e80   :  { %13422 = vmatpush3.bf16.msra.mxu1 %v13419_v47 }
0x2e81   :  { %13424 = vmatprep.subr.bf16.mxu1 %v13423_v52 }
0x2e84   :  { %13426 = vmatpush3.bf16.msra.mxu1 %v13423_v52 }
0x2e85   :  { %13428 = vmatprep.subr.bf16.mxu1 %v13427_v19 }
0x2e88   :  { %13430 = vmatpush3.bf16.msra.mxu1 %v13427_v19 }
0x2e89   :  { %13432 = vmatprep.subr.bf16.mxu1 %v13431_v4 }
0x2e8c   :  { %13434 = vmatpush3.bf16.msra.mxu1 %v13431_v4  ;;  %v10097_v4 = vld [vmem:[%s14680_s4 + $0x260] sm:$0xff] }
0x2e8d   :  { %13452 = vmatprep.subr.bf16.mxu1 %v13451_v26  ;;  %v13491_v0 = vpack.c.bf16 %v10098_v5, %v10097_v4 }
0x2f52   :  { %v12106_v58 = vpop.f32.mrb[76].mxu1 }
0x2f53   :  { %v8212_v59 = vadd.f32 %v12106_v58, %v10030_v56  ;;  %v8206_v61 = vpop.f32.mrb[77].mxu1  ;;  %v10088_v58 = vld [vmem:[%s14495_s15 + $0x438] sm:$0xff] }
0x2f54   :  { %v8207_v62 = vadd.f32 %v10030_v56, %v8206_v61  ;;  %v10087_v56 = vld [vmem:[%s14495_s15 + $0x430] sm:$0xff]  ;;  %v10093_v61 = vld [vmem:[%s14680_s4 + $0x240] sm:$0xff] }
0x2f55   :  { %v8216_v1 = vmax.f32 %v8212_v59, 0.0  ;;  %v13479_v59 = vpack.c.bf16 %v10088_v58, %v10087_v56  ;;  %v10132_v56 = vld [vmem:[%s14495_s15 + $0x498] sm:$0xff] }
0x2f56   :  { %v8215_v63 = vmax.f32 %v8207_v62, 0.0  ;;  %v10094_v62 = vld [vmem:[%s14680_s4 + $0x248] sm:$0xff] }
0x2f58   :  { %12123 = vmatprep.mubr.msk.f32.mxu0 %vm3654_vm6, %v8215_v63  ;;  %v10095_v63 = vld [vmem:[%s14680_s4 + $0x250] sm:$0xff] }
0x2f59   :  { %12124 = vmatmul.mubr.msk.f32.vlgmr.msra.gmra.mrb[76].mxu0 %vm3654_vm6, %v8216_v1  ;;  %v13483_v1 = vpack.c.bf16 %v10094_v62, %v10093_v61  ;;  %v13487_v3 = vpack.c.bf16 %v10096_v2, %v10095_v63  ;;  %v10134_v61 = vld [vmem:[%s14495_s15 + $0x4a8] sm:$0xff]  ;;  %v10116_v2 = vld [vmem:[%s14545_s29 + $0x11] ss:$0 sm:$0xff] }
0x2f5a   :  { %13438 = vmatpush3.bf16.msra.mxu0 %v13435_v7 }
0x2f5b   :  { %13440 = vmatprep.subr.bf16.mxu0 %v13439_v9 }
0x2f5e   :  { %13442 = vmatpush3.bf16.msra.mxu0 %v13439_v9 }
0x2f5f   :  { %13444 = vmatprep.subr.bf16.mxu0 %v13443_v12 }
0x2f62   :  { %13446 = vmatpush3.bf16.msra.mxu0 %v13443_v12 }
0x2f63   :  { %13448 = vmatprep.subr.bf16.mxu0 %v13447_v22 }
0x2f66   :  { %13450 = vmatpush3.bf16.msra.mxu0 %v13447_v22  ;;  %v10109_v22 = vld [vmem:[%s14495_s15 + $0x460] sm:$0xff] }
0x2f67   :  { %v13507_v28 = vpack.c.bf16 %v10110_v25, %v10109_v22 }
0x302c   :  { %v12125_v13 = vpop.f32.mrb[76].mxu0 }
0x302d   :  { %v8308_v41 = vadd.f32 %v12125_v13, %v8116_v45  ;;  %v8298_v15 = vpop.f32.mrb[77].mxu0  ;;  %v13467_v45 = vpack.c.bf16 %v10082_v40, %v10081_v39  ;;  %v10099_v13 = vld [vmem:[%s14680_s4 + $0x270] sm:$0xff]  ;;  %v10122_v39 = vld [vmem:[%s14680_s4 + $0x2a8] sm:$0xff] }
0x302e   :  { %v8307_v16 = vadd.f32 %v8298_v15, %v8115_v42  ;;  %v10083_v42 = vld [vmem:[%s14495_s15 + $0x410] sm:$0xff]  ;;  %v10105_v15 = vld [vmem:[%s14495_s15 + $0x440] sm:$0xff] }
0x302f   :  { %v8318_v18 = vadd.f32 %v10044_v14, %v8308_v41  ;;  %v13471_v51 = vpack.c.bf16 %v10084_v48, %v10083_v42  ;;  %13468 = vmatprep.subr.bf16.mxu0 %v13467_v45  ;;  %v10100_v41 = vld [vmem:[%s14680_s4 + $0x278] sm:$0xff]  ;;  %v10102_v42 = vld [vmem:[%s14533_s22 + $0x11] ss:$0 sm:$0xff] }
0x3030   :  { %v8317_v17 = vadd.f32 %v10044_v14, %v8307_v16  ;;  %v13495_v14 = vpack.c.bf16 %v10100_v41, %v10099_v13  ;;  %v10106_v16 = vld [vmem:[%s14495_s15 + $0x448] sm:$0xff]  ;;  %v10144_v13 = vld [vmem:[%s14680_s4 + $0x2d8] sm:$0xff] }
0x3032   :  { %12142 = vmatprep.mubr.msk.f32.mxu1 %vm3654_vm6, %v8317_v17 }
0x3033   :  { %12143 = vmatmul.mubr.msk.f32.vlgmr.msra.gmra.mrb[78].mxu1 %vm3654_vm6, %v8318_v18 }
0x3034   :  { %13454 = vmatpush3.bf16.msra.mxu1 %v13451_v26 }
0x3035   :  { %13456 = vmatprep.subr.bf16.mxu1 %v13455_v27 }
0x3038   :  { %13458 = vmatpush3.bf16.msra.mxu1 %v13455_v27 }
0x3039   :  { %13460 = vmatprep.subr.bf16.mxu1 %v13459_v33 }
0x303c   :  { %13462 = vmatpush3.bf16.msra.mxu1 %v13459_v33 }
0x303d   :  { %13464 = vmatprep.subr.bf16.mxu1 %v13463_v37 }
0x3040   :  { %13466 = vmatpush3.bf16.msra.mxu1 %v13463_v37  ;;  %v10121_v37 = vld [vmem:[%s14680_s4 + $0x2a0] sm:$0xff] }
0x3041   :  { %13484 = vmatprep.subr.bf16.mxu1 %v13483_v1  ;;  %v13523_v40 = vpack.c.bf16 %v10122_v39, %v10121_v37 }
0x3106   :  { %v12144_v36 = vpop.f32.mrb[78].mxu1 }
0x3107   :  { %v8414_v31 = vadd.f32 %v12144_v36, %v10054_v30  ;;  %v8408_v38 = vpop.f32.mrb[79].mxu1  ;;  %v10112_v36 = vld [vmem:[%s14495_s15 + $0x478] sm:$0xff] }
0x3108   :  { %v8409_v54 = vadd.f32 %v10054_v30, %v8408_v38  ;;  %v10111_v30 = vld [vmem:[%s14495_s15 + $0x470] sm:$0xff]  ;;  %v10117_v38 = vld [vmem:[%s14680_s4 + $0x280] sm:$0xff] }
0x3109   :  { %v8418_v60 = vmax.f32 %v8414_v31, 0.0  ;;  %v13511_v31 = vpack.c.bf16 %v10112_v36, %v10111_v30  ;;  %v10156_v30 = vld [vmem:[%s14495_s15 + $0x4d8] sm:$0xff] }
0x310a   :  { %v8417_v57 = vmax.f32 %v8409_v54, 0.0  ;;  %v10118_v54 = vld [vmem:[%s14680_s4 + $0x288] sm:$0xff] }
0x310c   :  { %12161 = vmatprep.mubr.msk.f32.mxu0 %vm3654_vm6, %v8417_v57  ;;  %v10119_v57 = vld [vmem:[%s14680_s4 + $0x290] sm:$0xff] }
0x310d   :  { %12162 = vmatmul.mubr.msk.f32.vlgmr.msra.gmra.mrb[78].mxu0 %vm3654_vm6, %v8418_v60  ;;  %v13515_v60 = vpack.c.bf16 %v10118_v54, %v10117_v38  ;;  %v13519_v35 = vpack.c.bf16 %v10120_v34, %v10119_v57  ;;  %v10158_v38 = vld [vmem:[%s14495_s15 + $0x4e8] sm:$0xff]  ;;  %v10140_v34 = vld [vmem:[%s14545_s29 + $0x12] ss:$0 sm:$0xff] }
0x310e   :  { %13470 = vmatpush3.bf16.msra.mxu0 %v13467_v45 }
0x310f   :  { %13472 = vmatprep.subr.bf16.mxu0 %v13471_v51 }
0x3112   :  { %13474 = vmatpush3.bf16.msra.mxu0 %v13471_v51 }
0x3113   :  { %13476 = vmatprep.subr.bf16.mxu0 %v13475_v43 }
0x3116   :  { %13478 = vmatpush3.bf16.msra.mxu0 %v13475_v43 }
0x3117   :  { %13480 = vmatprep.subr.bf16.mxu0 %v13479_v59 }
0x311a   :  { %13482 = vmatpush3.bf16.msra.mxu0 %v13479_v59  ;;  %v10133_v59 = vld [vmem:[%s14495_s15 + $0x4a0] sm:$0xff] }
0x311b   :  { %v13539_v62 = vpack.c.bf16 %v10134_v61, %v10133_v59 }
0x31e0   :  { %v12163_v46 = vpop.f32.mrb[78].mxu0 }
0x31e1   :  { %v8510_v47 = vadd.f32 %v12163_v46, %v8318_v18  ;;  %v8500_v52 = vpop.f32.mrb[79].mxu0  ;;  %v13499_v18 = vpack.c.bf16 %v10106_v16, %v10105_v15  ;;  %v10123_v46 = vld [vmem:[%s14680_s4 + $0x2b0] sm:$0xff]  ;;  %v10146_v15 = vld [vmem:[%s14680_s4 + $0x2e8] sm:$0xff] }
0x31e2   :  { %v8509_v49 = vadd.f32 %v8500_v52, %v8317_v17  ;;  %v10107_v17 = vld [vmem:[%s14495_s15 + $0x450] sm:$0xff]  ;;  %v10129_v52 = vld [vmem:[%s14495_s15 + $0x480] sm:$0xff] }
0x31e3   :  { %v8520_v19 = vadd.f32 %v10068_v55, %v8510_v47  ;;  %v13503_v21 = vpack.c.bf16 %v10108_v20, %v10107_v17  ;;  %13500 = vmatprep.subr.bf16.mxu0 %v13499_v18  ;;  %v10124_v47 = vld [vmem:[%s14680_s4 + $0x2b8] sm:$0xff]  ;;  %v10126_v17 = vld [vmem:[%s14533_s22 + $0x12] ss:$0 sm:$0xff] }
0x31e4   :  { %v8519_v50 = vadd.f32 %v10068_v55, %v8509_v49  ;;  %v13527_v55 = vpack.c.bf16 %v10124_v47, %v10123_v46  ;;  %v10130_v49 = vld [vmem:[%s14495_s15 + $0x488] sm:$0xff]  ;;  %v10168_v46 = vld [vmem:[%s14819_s9 + $0x58] sm:$0xff] }
0x31e6   :  { %12180 = vmatprep.mubr.msk.f32.mxu1 %vm3654_vm6, %v8519_v50 }
0x31e7   :  { %12181 = vmatmul.mubr.msk.f32.vlgmr.msra.gmra.mrb[80].mxu1 %vm3654_vm6, %v8520_v19 }
0x31e8   :  { %13486 = vmatpush3.bf16.msra.mxu1 %v13483_v1 }
0x31e9   :  { %13488 = vmatprep.subr.bf16.mxu1 %v13487_v3 }
0x31ec   :  { %13490 = vmatpush3.bf16.msra.mxu1 %v13487_v3 }
0x31ed   :  { %13492 = vmatprep.subr.bf16.mxu1 %v13491_v0 }
0x31f0   :  { %13494 = vmatpush3.bf16.msra.mxu1 %v13491_v0 }
0x31f1   :  { %13496 = vmatprep.subr.bf16.mxu1 %v13495_v14 }
0x31f4   :  { %13498 = vmatpush3.bf16.msra.mxu1 %v13495_v14  ;;  %v10145_v14 = vld [vmem:[%s14680_s4 + $0x2e0] sm:$0xff] }
0x31f5   :  { %13516 = vmatprep.subr.bf16.mxu1 %v13515_v60  ;;  %v13555_v16 = vpack.c.bf16 %v10146_v15, %v10145_v14 }
0x32ba   :  { %v12182_v7 = vpop.f32.mrb[80].mxu1 }
0x32bb   :  { %v8616_v8 = vadd.f32 %v12182_v7, %v10078_v6  ;;  %v8610_v9 = vpop.f32.mrb[81].mxu1  ;;  %v10136_v7 = vld [vmem:[%s14495_s15 + $0x4b8] sm:$0xff] }
0x32bc   :  { %v8611_v10 = vadd.f32 %v10078_v6, %v8610_v9  ;;  %v10135_v6 = vld [vmem:[%s14495_s15 + $0x4b0] sm:$0xff]  ;;  %v10141_v9 = vld [vmem:[%s14680_s4 + $0x2c0] sm:$0xff] }
0x32bd   :  { %v8620_v12 = vmax.f32 %v8616_v8, 0.0  ;;  %v13543_v8 = vpack.c.bf16 %v10136_v7, %v10135_v6 }
0x32be   :  { %v8619_v11 = vmax.f32 %v8611_v10, 0.0  ;;  %v10142_v10 = vld [vmem:[%s14680_s4 + $0x2c8] sm:$0xff] }
0x32c0   :  { %12199 = vmatprep.mubr.msk.f32.mxu0 %vm3654_vm6, %v8619_v11  ;;  %v10143_v11 = vld [vmem:[%s14680_s4 + $0x2d0] sm:$0xff] }
0x32c1   :  { %12200 = vmatmul.mubr.msk.f32.vlgmr.msra.gmra.mrb[80].mxu0 %vm3654_vm6, %v8620_v12  ;;  %v13547_v12 = vpack.c.bf16 %v10142_v10, %v10141_v9  ;;  %v13551_v41 = vpack.c.bf16 %v10144_v13, %v10143_v11  ;;  %v10174_v9 = vld [vmem:[%s14839_s16 + $0x1] ss:$0 sm:$0xff] }
0x32c2   :  { %13502 = vmatpush3.bf16.msra.mxu0 %v13499_v18 }
0x32c3   :  { %13504 = vmatprep.subr.bf16.mxu0 %v13503_v21 }
0x32c6   :  { %13506 = vmatpush3.bf16.msra.mxu0 %v13503_v21 }
0x32c7   :  { %13508 = vmatprep.subr.bf16.mxu0 %v13507_v28 }
0x32ca   :  { %13510 = vmatpush3.bf16.msra.mxu0 %v13507_v28 }
0x32cb   :  { %13512 = vmatprep.subr.bf16.mxu0 %v13511_v31 }
0x32ce   :  { %13514 = vmatpush3.bf16.msra.mxu0 %v13511_v31  ;;  %v10157_v31 = vld [vmem:[%s14495_s15 + $0x4e0] sm:$0xff] }
0x32cf   :  { %v13571_v54 = vpack.c.bf16 %v10158_v38, %v10157_v31 }
0x3394   :  { %v12201_v23 = vpop.f32.mrb[80].mxu0 }
0x3395   :  { %v8712_v26 = vadd.f32 %v12201_v23, %v8520_v19  ;;  %v8702_v27 = vpop.f32.mrb[81].mxu0  ;;  %v13531_v19 = vpack.c.bf16 %v10130_v49, %v10129_v52  ;;  %v10147_v23 = vld [vmem:[%s14680_s4 + $0x2f0] sm:$0xff]  ;;  %v10170_v52 = vld [vmem:[%s14819_s9 + $0x68] sm:$0xff] }
0x3396   :  { %v8711_v29 = vadd.f32 %v8702_v27, %v8519_v50  ;;  %v10131_v50 = vld [vmem:[%s14495_s15 + $0x490] sm:$0xff]  ;;  %v10153_v27 = vld [vmem:[%s14495_s15 + $0x4c0] sm:$0xff] }
0x3397   :  { %v8722_v33 = vadd.f32 %v10092_v32, %v8712_v26  ;;  %v13535_v58 = vpack.c.bf16 %v10132_v56, %v10131_v50  ;;  %13532 = vmatprep.subr.bf16.mxu0 %v13531_v19  ;;  %v10148_v26 = vld [vmem:[%s14680_s4 + $0x2f8] sm:$0xff]  ;;  %v10150_v50 = vld [vmem:[%s14533_s22 + $0x13] ss:$0 sm:$0xff] }
0x3398   :  { %v8721_v24 = vadd.f32 %v10092_v32, %v8711_v29  ;;  %v13559_v32 = vpack.c.bf16 %v10148_v26, %v10147_v23  ;;  %v10154_v29 = vld [vmem:[%s14495_s15 + $0x4c8] sm:$0xff] }
0x339a   :  { %12218 = vmatprep.mubr.msk.f32.mxu1 %vm3654_vm6, %v8721_v24 }
0x339b   :  { %12219 = vmatmul.mubr.msk.f32.vlgmr.msra.gmra.mrb[82].mxu1 %vm3654_vm6, %v8722_v33 }
0x339c   :  { %13518 = vmatpush3.bf16.msra.mxu1 %v13515_v60 }
0x339d   :  { %13520 = vmatprep.subr.bf16.mxu1 %v13519_v35 }
0x33a0   :  { %13522 = vmatpush3.bf16.msra.mxu1 %v13519_v35 }
0x33a1   :  { %13524 = vmatprep.subr.bf16.mxu1 %v13523_v40 }
0x33a4   :  { %13526 = vmatpush3.bf16.msra.mxu1 %v13523_v40 }
0x33a5   :  { %13528 = vmatprep.subr.bf16.mxu1 %v13527_v55 }
0x33a8   :  { %13530 = vmatpush3.bf16.msra.mxu1 %v13527_v55  ;;  %v10169_v55 = vld [vmem:[%s14819_s9 + $0x60] sm:$0xff] }
0x33a9   :  { %13548 = vmatprep.subr.bf16.mxu1 %v13547_v12  ;;  %v13587_v49 = vpack.c.bf16 %v10170_v52, %v10169_v55 }
0x346e   :  { %v12220_v45 = vpop.f32.mrb[82].mxu1 }
0x346f   :  { %v8818_v48 = vadd.f32 %v12220_v45, %v10102_v42  ;;  %v8812_v51 = vpop.f32.mrb[83].mxu1  ;;  %v10160_v45 = vld [vmem:[%s14495_s15 + $0x4f8] sm:$0xff] }
0x3470   :  { %v8813_v44 = vadd.f32 %v10102_v42, %v8812_v51  ;;  %v10159_v42 = vld [vmem:[%s14495_s15 + $0x4f0] sm:$0xff]  ;;  %v10165_v51 = vld [vmem:[%s14819_s9 + $0x40] sm:$0xff] }
0x3471   :  { %v8822_v43 = vmax.f32 %v8818_v48, 0.0  ;;  %v13575_v48 = vpack.c.bf16 %v10160_v45, %v10159_v42 }
0x3472   :  { %v8821_v53 = vmax.f32 %v8813_v44, 0.0  ;;  %v10166_v44 = vld [vmem:[%s14819_s9 + $0x48] sm:$0xff] }
0x3474   :  { %12237 = vmatprep.mubr.msk.f32.mxu0 %vm3654_vm6, %v8821_v53  ;;  %v10167_v53 = vld [vmem:[%s14819_s9 + $0x50] sm:$0xff] }
0x3475   :  { %12238 = vmatmul.mubr.msk.f32.vlgmr.msra.gmra.mrb[82].mxu0 %vm3654_vm6, %v8822_v43  ;;  %v13579_v43 = vpack.c.bf16 %v10166_v44, %v10165_v51  ;;  %v13583_v47 = vpack.c.bf16 %v10168_v46, %v10167_v53 }
0x3476   :  { %13534 = vmatpush3.bf16.msra.mxu0 %v13531_v19 }
0x3477   :  { %13536 = vmatprep.subr.bf16.mxu0 %v13535_v58 }
0x347a   :  { %13538 = vmatpush3.bf16.msra.mxu0 %v13535_v58 }
0x347b   :  { %13540 = vmatprep.subr.bf16.mxu0 %v13539_v62 }
0x347e   :  { %13542 = vmatpush3.bf16.msra.mxu0 %v13539_v62 }
0x347f   :  { %13544 = vmatprep.subr.bf16.mxu0 %v13543_v8 }
0x3482   :  { %13546 = vmatpush3.bf16.msra.mxu0 %v13543_v8 }
0x3548   :  { %v12239_v63 = vpop.f32.mrb[82].mxu0 }
0x3549   :  { %v8914_v1 = vadd.f32 %v12239_v63, %v8722_v33  ;;  %v8904_v3 = vpop.f32.mrb[83].mxu0  ;;  %v13563_v33 = vpack.c.bf16 %v10154_v29, %v10153_v27  ;;  %v10171_v63 = vld [vmem:[%s14819_s9 + $0x70] sm:$0xff] }
0x354a   :  { %v8913_v4 = vadd.f32 %v8904_v3, %v8721_v24  ;;  %v10155_v24 = vld [vmem:[%s14495_s15 + $0x4d0] sm:$0xff] }
0x354b   :  { %v8924_v0 = vadd.f32 %v10116_v2, %v8914_v1  ;;  %v13567_v36 = vpack.c.bf16 %v10156_v30, %v10155_v24  ;;  %13564 = vmatprep.subr.bf16.mxu0 %v13563_v33  ;;  %v10172_v1 = vld [vmem:[%s14819_s9 + $0x78] sm:$0xff] }
0x354c   :  { %v8923_v5 = vadd.f32 %v10116_v2, %v8913_v4  ;;  %v13591_v2 = vpack.c.bf16 %v10172_v1, %v10171_v63 }
0x354e   :  { %12256 = vmatprep.mubr.msk.f32.mxu1 %vm3654_vm6, %v8923_v5 }
0x354f   :  { %12257 = vmatmul.mubr.msk.f32.vlgmr.msra.gmra.mrb[84].mxu1 %vm3654_vm6, %v8924_v0 }
0x3550   :  { %13550 = vmatpush3.bf16.msra.mxu1 %v13547_v12 }
0x3551   :  { %13552 = vmatprep.subr.bf16.mxu1 %v13551_v41 }
0x3554   :  { %13554 = vmatpush3.bf16.msra.mxu1 %v13551_v41 }
0x3555   :  { %13556 = vmatprep.subr.bf16.mxu1 %v13555_v16 }
0x3558   :  { %13558 = vmatpush3.bf16.msra.mxu1 %v13555_v16 }
0x3559   :  { %13560 = vmatprep.subr.bf16.mxu1 %v13559_v32 }
0x355c   :  { %13562 = vmatpush3.bf16.msra.mxu1 %v13559_v32 }
0x355d   :  { %13580 = vmatprep.subr.bf16.mxu1 %v13579_v43 }
0x3622   :  { %v12258_v18 = vpop.f32.mrb[84].mxu1 }
0x3623   :  { %v9020_v20 = vadd.f32 %v12258_v18, %v10126_v17  ;;  %v9014_v21 = vpop.f32.mrb[85].mxu1 }
0x3624   :  { %v9015_v22 = vadd.f32 %v10126_v17, %v9014_v21 }
0x3625   :  { %v9024_v28 = vmax.f32 %v9020_v20, 0.0 }
0x3626   :  { %v9023_v25 = vmax.f32 %v9015_v22, 0.0 }
0x3628   :  { %12275 = vmatprep.mubr.msk.f32.mxu0 %vm3654_vm6, %v9023_v25 }
0x3629   :  { %12276 = vmatmul.mubr.msk.f32.vlgmr.msra.gmra.mrb[84].mxu0 %vm3654_vm6, %v9024_v28 }
0x362a   :  { %13566 = vmatpush3.bf16.msra.mxu0 %v13563_v33 }
0x362b   :  { %13568 = vmatprep.subr.bf16.mxu0 %v13567_v36 }
0x362e   :  { %13570 = vmatpush3.bf16.msra.mxu0 %v13567_v36 }
0x362f   :  { %13572 = vmatprep.subr.bf16.mxu0 %v13571_v54 }
0x3632   :  { %13574 = vmatpush3.bf16.msra.mxu0 %v13571_v54 }
0x3633   :  { %13576 = vmatprep.subr.bf16.mxu0 %v13575_v48 }
0x3636   :  { %13578 = vmatpush3.bf16.msra.mxu0 %v13575_v48 }
0x36fc   :  { %v12277_v57 = vpop.f32.mrb[84].mxu0 }
0x36fd   :  { %v9116_v60 = vadd.f32 %v12277_v57, %v8924_v0  ;;  %v9106_v35 = vpop.f32.mrb[85].mxu0 }
0x36fe   :  { %v9115_v37 = vadd.f32 %v9106_v35, %v8923_v5  ;;  %v10164_v5 = vld [vmem:[%s14545_s29 + $0x13] ss:$0 sm:$0xff] }
0x36ff   :  { %v9126_v40 = vadd.f32 %v10140_v34, %v9116_v60 }
0x3700   :  { %v9125_v39 = vadd.f32 %v10140_v34, %v9115_v37 }
0x3702   :  { %12294 = vmatprep.mubr.msk.f32.mxu1 %vm3654_vm6, %v9125_v39 }
0x3703   :  { %12295 = vmatmul.mubr.msk.f32.vlgmr.msra.gmra.mrb[86].mxu1 %vm3654_vm6, %v9126_v40 }
0x3704   :  { %13582 = vmatpush3.bf16.msra.mxu1 %v13579_v43 }
0x3705   :  { %13584 = vmatprep.subr.bf16.mxu1 %v13583_v47 }
0x3708   :  { %13586 = vmatpush3.bf16.msra.mxu1 %v13583_v47 }
0x3709   :  { %13588 = vmatprep.subr.bf16.mxu1 %v13587_v49 }
0x370c   :  { %13590 = vmatpush3.bf16.msra.mxu1 %v13587_v49 }
0x370d   :  { %13592 = vmatprep.subr.bf16.mxu1 %v13591_v2 }
0x3710   :  { %13594 = vmatpush3.bf16.msra.mxu1 %v13591_v2 }
0x37d6   :  { %v12296_v19 = vpop.f32.mrb[86].mxu1 }
0x37d7   :  { %v9222_v56 = vadd.f32 %v12296_v19, %v10150_v50  ;;  %v9216_v58 = vpop.f32.mrb[87].mxu1 }
0x37d8   :  { %v9217_v59 = vadd.f32 %v10150_v50, %v9216_v58 }
0x37d9   :  { %v9226_v62 = vmax.f32 %v9222_v56, 0.0 }
0x37da   :  { %v9225_v61 = vmax.f32 %v9217_v59, 0.0 }
0x37dc   :  { %12313 = vmatprep.mubr.msk.f32.mxu0 %vm3654_vm6, %v9225_v61 }
0x37dd   :  { %12314 = vmatmul.mubr.msk.f32.vlgmr.msra.gmra.mrb[86].mxu0 %vm3654_vm6, %v9226_v62 }
0x38b0   :  { %v12315_v3 = vpop.f32.mrb[86].mxu0 }
0x38b1   :  { %v9318_v4 = vadd.f32 %v12315_v3, %v9126_v40  ;;  %v9308_v0 = vpop.f32.mrb[87].mxu0 }
0x38b2   :  { %v9317_v6 = vadd.f32 %v9308_v0, %v9125_v39 }
0x38b3   :  { %v9328_v8 = vadd.f32 %v10164_v5, %v9318_v4 }
0x38b4   :  { %v9327_v7 = vadd.f32 %v10164_v5, %v9317_v6 }
0x38b6   :  { %12332 = vmatprep.mubr.msk.f32.mxu1 %vm3654_vm6, %v9327_v7 }
0x38b7   :  { %12333 = vmatmul.mubr.msk.f32.vlgmr.msra.gmra.mrb[88].mxu1 %vm3654_vm6, %v9328_v8 }
0x398a   :  { %v12334_v10 = vpop.f32.mrb[88].mxu1 }
0x398b   :  { %v9424_v11 = vadd.f32 %v12334_v10, %v10174_v9  ;;  %v9418_v12 = vpop.f32.mrb[89].mxu1 }
0x398c   :  { %v9419_v13 = vadd.f32 %v10174_v9, %v9418_v12 }
0x398d   :  { %10180 = vst.msk [vmem:[%s14429_s23 + $0x28] sm:$0xff] %vm3526_vm5, %v9424_v11  ;;  %10182 = vst.msk [vmem:[%s14429_s23 + $0x38] sm:$0xff] %vm3526_vm5, %v9424_v11 }
0x398e   :  { %10179 = vst.msk [vmem:[%s14429_s23 + $0x20] sm:$0xff] %vm3526_vm5, %v9419_v13  ;;  %10181 = vst.msk [vmem:[%s14429_s23 + $0x30] sm:$0xff] %vm3526_vm5, %v9419_v13 }

</bundles_post_ra>
